<compile_context>
chip_gen: v5e
topology: v5e:2x2
jax: 0.10.0
libtpu: 0.0.40
codegen_flags: <defaults>
</compile_context>

<pallas_src>
import functools

import jax
import jax.numpy as jnp
import numpy as np
from jax.experimental import pallas as pl
from jax.experimental.pallas import tpu as pltpu

R = 4             # window radius, fixed inside the torch module
WIN = 2 * R + 1   # 9


def _relu1(d):
    # bilinear weight of an in-range integer grid index at signed distance d
    # (zero padding falls out automatically: out-of-range indices are never enumerated).
    return jnp.maximum(0.0, 1.0 - jnp.abs(d))


def _reverse_cost_kernel(cm_ref, c1_ref, c0_ref, out_ref, *, H1, W1, H2, W2, heads):
    P = H2 * W2
    TQ = out_ref.shape[-1]          # lane tile of target pixels
    f32 = jnp.float32

    cx1 = c1_ref[0, 0:1, :]         # (1, TQ) sampling x per target pixel
    cy1 = c1_ref[0, 1:2, :]         # (1, TQ) sampling y
    cx0 = c0_ref[0, 0:1, :]         # (1, TQ) window centroid x
    cy0 = c0_ref[0, 1:2, :]         # (1, TQ) window centroid y

    # ---- stage-1 weights: separable build (no (P,TQ) iota / divide / floor passes) -------
    iy2 = jax.lax.broadcasted_iota(jnp.int32, (H2, TQ), 0).astype(f32)
    ix2 = jax.lax.broadcasted_iota(jnp.int32, (W2, TQ), 0).astype(f32)
    wy1 = _relu1(iy2 - cy1)                                        # (H2, TQ)
    wx1 = _relu1(ix2 - cx1)                                        # (W2, TQ)
    s1 = (wy1[:, None, :] * wx1[None, :, :]).reshape(P, TQ)        # (P, TQ), <=4 nz / column

    # ---- stage-2 weights (shared across heads) --------------------------------------------
    # window-ROW index a offsets the x coordinate, window-COL index b offsets y
    # (the torch meshgrid(dy, dx) quirk, identical to the reference).
    ixw = jax.lax.broadcasted_iota(jnp.int32, (W1, TQ), 0).astype(f32)
    wx_win = [_relu1(ixw - (cx0 + float(a - R))) for a in range(WIN)]    # 9 x (W1, TQ)
    # y weights only appear as single rows relu1((hh - (b - R)) - cy0); the integer offset
    # t = hh - (b - R) takes only H1 + 2R distinct values -> build each once.
    ywt = {t: _relu1(float(t) - cy0) for t in range(-R, H1 + R)}         # (1, TQ) each

    for h in range(heads):
        cm_h = cm_ref[0, :, h * P:(h + 1) * P]                     # (Q, P) static lane slice

        # ---- stage 1: bilinear gather expressed as a one-hot-weight MXU matmul ------------
        # NOTE: cast cm_h / s1 to bf16 (keeping f32 accumulation) for full-rate MXU on
        # v6e/v7x if the accuracy budget allows; HIGHEST keeps full f32 accuracy here.
        # TODO(synk): for production-size P, add a P-reduction grid axis with a VMEM f32
        # accumulator (+ scalar-prefetched coord bounds to skip all-zero weight tiles).
        corr = jnp.dot(cm_h, s1, preferred_element_type=f32,
                       precision=jax.lax.Precision.HIGHEST)        # (Q, TQ) = (H1*W1, TQ)

        # ---- stage 2a: contract y = h1 (leading axis of corr) by accumulation (pure VPU) --
        v = [jnp.zeros((W1, TQ), f32) for _ in range(WIN)]         # v[b] : (W1, TQ)
        for hh in range(H1):
            row = corr[hh * W1:(hh + 1) * W1, :]                   # (W1, TQ) contiguous rows
            for b in range(WIN):
                v[b] = v[b] + row * ywt[hh - (b - R)]

        # ---- stage 2b: contract x = w1: small muls + sublane sums, assemble (81, TQ) ------
        rows = []
        for a in range(WIN):
            wxa = wx_win[a]
            for b in range(WIN):
                rows.append(jnp.sum(v[b] * wxa, axis=0, keepdims=True))   # (1, TQ)
        out_ref[0, h] = jnp.concatenate(rows, axis=0)              # (81, TQ), channel a*9+b


def _pick_q_tile(Q, q_tile):
    if Q <= q_tile:
        return Q
    best, t = None, 128
    while t <= q_tile:
        if Q % t == 0:
            best = t
        t += 128
    return best if best is not None else Q


def reverse_cost_extractor(cost_maps, coords0, coords1, *, q_tile=512):
    """cost_maps: (B*H1*W1, heads, H2, W2); coords0/coords1: (B, 2, H1, W1) pixel coords."""
    BH1W1, heads, H2, W2 = cost_maps.shape
    B, two, H1, W1 = coords1.shape
    assert two == 2 and H1 == H2 and W1 == W2 and BH1W1 == B * H1 * W1
    Q = H1 * W1
    P = H2 * W2
    TQ = _pick_q_tile(Q, q_tile)

    # Pure reshapes (no HBM transpose/copy): cost volume stays (q0, head, p)-ordered; the
    # head is selected inside the kernel with a static lane slice.
    cm = cost_maps.reshape(B, Q, heads * P)
    c1 = coords1.reshape(B, 2, Q)
    c0 = coords0.reshape(B, 2, Q)

    kernel = functools.partial(_reverse_cost_kernel,
                               H1=H1, W1=W1, H2=H2, W2=W2, heads=heads)
    out = pl.pallas_call(
        kernel,
        grid=(B, Q // TQ),
        in_specs=[
            # Block index independent of the q axis -> Pallas skips re-DMA of the cost-map
            # slab across consecutive q steps of the same batch.
            pl.BlockSpec((1, Q, heads * P), lambda b, qt: (b, 0, 0)),
            pl.BlockSpec((1, 2, TQ), lambda b, qt: (b, 0, qt)),
            pl.BlockSpec((1, 2, TQ), lambda b, qt: (b, 0, qt)),
        ],
        out_specs=pl.BlockSpec((1, heads, WIN * WIN, TQ), lambda b, qt: (b, 0, 0, qt)),
        out_shape=jax.ShapeDtypeStruct((B, heads, WIN * WIN, Q), jnp.float32),
        compiler_params=pltpu.CompilerParams(
            dimension_semantics=("parallel", "parallel"),
            # Per-step VMEM: cost-map slab (Q*heads*P*4, double-buffered) + O((P+Q+81h)*TQ*4)
            # intermediates; explicit limit keeps us inside the v7x 64-MiB budget.
            vmem_limit_bytes=32 * 1024 * 1024,
        ),
    )(cm, c1, c0)

    # channel = head*81 + a*9 + b; spatial grid comes from the q lane axis.
    return out.reshape(B, heads * WIN * WIN, H1, W1)


# ----------------------------- pure-JAX reference --------------------------------------
def _bilinear_sampler_ref(img, xg, yg):
    """torch grid_sample (bilinear, align_corners=True, zero padding) at pixel coords."""
    N, C, H, W = img.shape
    x0 = jnp.floor(xg)
    y0 = jnp.floor(yg)

    def gather(ix, iy):
        valid = ((ix >= 0) & (ix <= W - 1) & (iy >= 0) & (iy <= H - 1)).astype(img.dtype)
        ixc = jnp.clip(ix, 0, W - 1).astype(jnp.int32)
        iyc = jnp.clip(iy, 0, H - 1).astype(jnp.int32)
        vals = jax.vmap(lambda im, yy, xx: im[:, yy, xx])(img, iyc, ixc)  # (N, C, ...)
        return vals * valid[:, None]

    wx1 = xg - x0
    wy1 = yg - y0
    wx0 = 1.0 - wx1
    wy0 = 1.0 - wy1
    return (gather(x0, y0) * (wx0 * wy0)[:, None]
            + gather(x0 + 1.0, y0) * (wx1 * wy0)[:, None]
            + gather(x0, y0 + 1.0) * (wx0 * wy1)[:, None]
            + gather(x0 + 1.0, y0 + 1.0) * (wx1 * wy1)[:, None])


def reverse_cost_extractor_reference(cost_maps, coords0, coords1):
    BH1W1, heads, H2, W2 = cost_maps.shape
    B, _, H1, W1 = coords1.shape
    win = 2 * R + 1

    cm = cost_maps.reshape(B, H1 * W1 * heads, H2, W2)
    corr = _bilinear_sampler_ref(cm, coords1[:, 0], coords1[:, 1])      # (B, H1*W1*heads, H1, W1)
    # rearrange 'b (h1 w1 heads) h2 w2 -> (b h2 w2) heads h1 w1'
    corr = corr.reshape(B, H1, W1, heads, H1, W1).transpose(0, 4, 5, 3, 1, 2)
    corr = corr.reshape(B * H1 * W1, heads, H1, W1)

    dyv = jnp.linspace(-R, R, win)
    dxv = jnp.linspace(-R, R, win)
    dyg, dxg = jnp.meshgrid(dyv, dxv, indexing="ij")                    # torch.meshgrid(dy, dx)
    delta = jnp.stack([dyg, dxg], axis=-1)                              # (9, 9, 2)
    centroid = coords0.transpose(0, 2, 3, 1).reshape(B * H1 * W1, 1, 1, 2)
    coords = centroid + delta[None]                                     # [...,0]=x+dy, [...,1]=y+dx
    corr = _bilinear_sampler_ref(corr, coords[..., 0], coords[..., 1])  # (BH1W1, heads, 9, 9)
    return corr.reshape(B, H1, W1, heads * win * win).transpose(0, 3, 1, 2)


if __name__ == "__main__":
    def _run_case(case, B, heads, H1, W1, q_tile):
        H2, W2 = H1, W1
        key = jax.random.fold_in(jax.random.PRNGKey(0), case)
        k_cost, kx0, ky0, kx1, ky1 = jax.random.split(key, 5)
        cost_maps = jax.random.normal(k_cost, (B * H1 * W1, heads, H2, W2), jnp.float32)
        # pixel coordinates (x, y); slightly out of range to exercise the zero-padding path
        coords0 = jnp.stack(
            [jax.random.uniform(kx0, (B, H1, W1), jnp.float32, -2.0, W1 + 1.0),
             jax.random.uniform(ky0, (B, H1, W1), jnp.float32, -2.0, H1 + 1.0)], axis=1)
        coords1 = jnp.stack(
            [jax.random.uniform(kx1, (B, H1, W1), jnp.float32, -2.0, W1 + 1.0),
             jax.random.uniform(ky1, (B, H1, W1), jnp.float32, -2.0, H1 + 1.0)], axis=1)

        out = reverse_cost_extractor(cost_maps, coords0, coords1, q_tile=q_tile)
        out = jax.block_until_ready(out)
        assert out.shape == (B, heads * WIN * WIN, H1, W1)
        ref = reverse_cost_extractor_reference(cost_maps, coords0, coords1)
        np.testing.assert_allclose(np.asarray(out), np.asarray(ref), atol=2e-3, rtol=2e-3)

    # q-tiled path: Q=256 -> two 128-lane tiles, 4 "parallel" grid steps.
    _run_case(0, B=2, heads=1, H1=16, W1=16, q_tile=128)
    # single-tile path + heads>1 (no HBM transpose) + non-square spatial size.
    _run_case(1, B=1, heads=2, H1=16, W1=8, q_tile=512)
    print("KERNEL_OK")
</pallas_src>

<mosaic_0001>
module attributes {stable_mosaic.version = 11 : i64} {
  func.func @_reverse_cost_kernel(%arg0: i32, %arg1: i32, %arg2: memref<1x256x256xf32, #tpu.memory_space<vmem>>, %arg3: memref<1x2x128xf32, #tpu.memory_space<vmem>>, %arg4: memref<1x2x128xf32, #tpu.memory_space<vmem>>, %arg5: memref<1x1x81x128xf32, #tpu.memory_space<vmem>>) attributes {dimension_semantics = [#tpu.dimension_semantics<parallel>, #tpu.dimension_semantics<parallel>], iteration_bounds = array<i64: 2, 2>, scalar_prefetch = 0 : i64, scratch_operands = 0 : i64, tpu.core_type = #tpu.core_type<tc>, window_params = [{transform_indices = @transform_0, window_bounds = array<i64: 1, 256, 256>}, {transform_indices = @transform_1, window_bounds = array<i64: 1, 2, 128>}, {transform_indices = @transform_2, window_bounds = array<i64: 1, 2, 128>}, {transform_indices = @transform_3, window_bounds = array<i64: 1, 1, 81, 128>}]} {
    %c0 = arith.constant 0 : index
    %c0_0 = arith.constant 0 : index
    %c0_1 = arith.constant 0 : index
    %0 = vector.load %arg3[%c0, %c0_0, %c0_1] : memref<1x2x128xf32, #tpu.memory_space<vmem>>, vector<1x1x128xf32>
    %1 = vector.shape_cast %0 : vector<1x1x128xf32> to vector<1x128xf32>
    %c0_2 = arith.constant 0 : index
    %c1 = arith.constant 1 : index
    %c0_3 = arith.constant 0 : index
    %2 = vector.load %arg3[%c0_2, %c1, %c0_3] : memref<1x2x128xf32, #tpu.memory_space<vmem>>, vector<1x1x128xf32>
    %3 = vector.shape_cast %2 : vector<1x1x128xf32> to vector<1x128xf32>
    %c0_4 = arith.constant 0 : index
    %c0_5 = arith.constant 0 : index
    %c0_6 = arith.constant 0 : index
    %4 = vector.load %arg4[%c0_4, %c0_5, %c0_6] : memref<1x2x128xf32, #tpu.memory_space<vmem>>, vector<1x1x128xf32>
    %5 = vector.shape_cast %4 : vector<1x1x128xf32> to vector<1x128xf32>
    %c0_7 = arith.constant 0 : index
    %c1_8 = arith.constant 1 : index
    %c0_9 = arith.constant 0 : index
    %6 = vector.load %arg4[%c0_7, %c1_8, %c0_9] : memref<1x2x128xf32, #tpu.memory_space<vmem>>, vector<1x1x128xf32>
    %7 = vector.shape_cast %6 : vector<1x1x128xf32> to vector<1x128xf32>
    %8 = tpu.iota {dimensions = array<i32: 0>} : vector<16x128xi32>
    %9 = arith.sitofp %8 : vector<16x128xi32> to vector<16x128xf32>
    %10 = tpu.iota {dimensions = array<i32: 0>} : vector<16x128xi32>
    %11 = arith.sitofp %10 : vector<16x128xi32> to vector<16x128xf32>
    %12 = vector.broadcast %3 : vector<1x128xf32> to vector<16x128xf32>
    %13 = arith.subf %9, %12 : vector<16x128xf32>
    %14 = math.absf %13 : vector<16x128xf32>
    %cst = arith.constant 1.000000e+00 : f32
    %15 = vector.broadcast %cst : f32 to vector<16x128xf32>
    %16 = arith.subf %15, %14 : vector<16x128xf32>
    %cst_10 = arith.constant 0.000000e+00 : f32
    %17 = vector.broadcast %cst_10 : f32 to vector<16x128xf32>
    %18 = arith.maximumf %17, %16 : vector<16x128xf32>
    %19 = vector.broadcast %1 : vector<1x128xf32> to vector<16x128xf32>
    %20 = arith.subf %11, %19 : vector<16x128xf32>
    %21 = math.absf %20 : vector<16x128xf32>
    %cst_11 = arith.constant 1.000000e+00 : f32
    %22 = vector.broadcast %cst_11 : f32 to vector<16x128xf32>
    %23 = arith.subf %22, %21 : vector<16x128xf32>
    %cst_12 = arith.constant 0.000000e+00 : f32
    %24 = vector.broadcast %cst_12 : f32 to vector<16x128xf32>
    %25 = arith.maximumf %24, %23 : vector<16x128xf32>
    %26 = vector.shape_cast %18 : vector<16x128xf32> to vector<16x1x128xf32>
    %27 = vector.shape_cast %25 : vector<16x128xf32> to vector<1x16x128xf32>
    %28 = vector.broadcast %26 : vector<16x1x128xf32> to vector<16x16x128xf32>
    %29 = vector.broadcast %27 : vector<1x16x128xf32> to vector<16x16x128xf32>
    %30 = arith.mulf %28, %29 : vector<16x16x128xf32>
    %31 = vector.shape_cast %30 : vector<16x16x128xf32> to vector<256x128xf32>
    %32 = tpu.iota {dimensions = array<i32: 0>} : vector<16x128xi32>
    %33 = arith.sitofp %32 : vector<16x128xi32> to vector<16x128xf32>
    %cst_13 = arith.constant -4.000000e+00 : f32
    %34 = vector.broadcast %cst_13 : f32 to vector<1x128xf32>
    %35 = arith.addf %5, %34 : vector<1x128xf32>
    %36 = vector.broadcast %35 : vector<1x128xf32> to vector<16x128xf32>
    %37 = arith.subf %33, %36 : vector<16x128xf32>
    %38 = math.absf %37 : vector<16x128xf32>
    %cst_14 = arith.constant 1.000000e+00 : f32
    %39 = vector.broadcast %cst_14 : f32 to vector<16x128xf32>
    %40 = arith.subf %39, %38 : vector<16x128xf32>
    %cst_15 = arith.constant 0.000000e+00 : f32
    %41 = vector.broadcast %cst_15 : f32 to vector<16x128xf32>
    %42 = arith.maximumf %41, %40 : vector<16x128xf32>
    %cst_16 = arith.constant -3.000000e+00 : f32
    %43 = vector.broadcast %cst_16 : f32 to vector<1x128xf32>
    %44 = arith.addf %5, %43 : vector<1x128xf32>
    %45 = vector.broadcast %44 : vector<1x128xf32> to vector<16x128xf32>
    %46 = arith.subf %33, %45 : vector<16x128xf32>
    %47 = math.absf %46 : vector<16x128xf32>
    %cst_17 = arith.constant 1.000000e+00 : f32
    %48 = vector.broadcast %cst_17 : f32 to vector<16x128xf32>
    %49 = arith.subf %48, %47 : vector<16x128xf32>
    %cst_18 = arith.constant 0.000000e+00 : f32
    %50 = vector.broadcast %cst_18 : f32 to vector<16x128xf32>
    %51 = arith.maximumf %50, %49 : vector<16x128xf32>
    %cst_19 = arith.constant -2.000000e+00 : f32
    %52 = vector.broadcast %cst_19 : f32 to vector<1x128xf32>
    %53 = arith.addf %5, %52 : vector<1x128xf32>
    %54 = vector.broadcast %53 : vector<1x128xf32> to vector<16x128xf32>
    %55 = arith.subf %33, %54 : vector<16x128xf32>
    %56 = math.absf %55 : vector<16x128xf32>
    %cst_20 = arith.constant 1.000000e+00 : f32
    %57 = vector.broadcast %cst_20 : f32 to vector<16x128xf32>
    %58 = arith.subf %57, %56 : vector<16x128xf32>
    %cst_21 = arith.constant 0.000000e+00 : f32
    %59 = vector.broadcast %cst_21 : f32 to vector<16x128xf32>
    %60 = arith.maximumf %59, %58 : vector<16x128xf32>
    %cst_22 = arith.constant -1.000000e+00 : f32
    %61 = vector.broadcast %cst_22 : f32 to vector<1x128xf32>
    %62 = arith.addf %5, %61 : vector<1x128xf32>
    %63 = vector.broadcast %62 : vector<1x128xf32> to vector<16x128xf32>
    %64 = arith.subf %33, %63 : vector<16x128xf32>
    %65 = math.absf %64 : vector<16x128xf32>
    %cst_23 = arith.constant 1.000000e+00 : f32
    %66 = vector.broadcast %cst_23 : f32 to vector<16x128xf32>
    %67 = arith.subf %66, %65 : vector<16x128xf32>
    %cst_24 = arith.constant 0.000000e+00 : f32
    %68 = vector.broadcast %cst_24 : f32 to vector<16x128xf32>
    %69 = arith.maximumf %68, %67 : vector<16x128xf32>
    %cst_25 = arith.constant 0.000000e+00 : f32
    %70 = vector.broadcast %cst_25 : f32 to vector<1x128xf32>
    %71 = arith.addf %5, %70 : vector<1x128xf32>
    %72 = vector.broadcast %71 : vector<1x128xf32> to vector<16x128xf32>
    %73 = arith.subf %33, %72 : vector<16x128xf32>
    %74 = math.absf %73 : vector<16x128xf32>
    %cst_26 = arith.constant 1.000000e+00 : f32
    %75 = vector.broadcast %cst_26 : f32 to vector<16x128xf32>
    %76 = arith.subf %75, %74 : vector<16x128xf32>
    %cst_27 = arith.constant 0.000000e+00 : f32
    %77 = vector.broadcast %cst_27 : f32 to vector<16x128xf32>
    %78 = arith.maximumf %77, %76 : vector<16x128xf32>
    %cst_28 = arith.constant 1.000000e+00 : f32
    %79 = vector.broadcast %cst_28 : f32 to vector<1x128xf32>
    %80 = arith.addf %5, %79 : vector<1x128xf32>
    %81 = vector.broadcast %80 : vector<1x128xf32> to vector<16x128xf32>
    %82 = arith.subf %33, %81 : vector<16x128xf32>
    %83 = math.absf %82 : vector<16x128xf32>
    %cst_29 = arith.constant 1.000000e+00 : f32
    %84 = vector.broadcast %cst_29 : f32 to vector<16x128xf32>
    %85 = arith.subf %84, %83 : vector<16x128xf32>
    %cst_30 = arith.constant 0.000000e+00 : f32
    %86 = vector.broadcast %cst_30 : f32 to vector<16x128xf32>
    %87 = arith.maximumf %86, %85 : vector<16x128xf32>
    %cst_31 = arith.constant 2.000000e+00 : f32
    %88 = vector.broadcast %cst_31 : f32 to vector<1x128xf32>
    %89 = arith.addf %5, %88 : vector<1x128xf32>
    %90 = vector.broadcast %89 : vector<1x128xf32> to vector<16x128xf32>
    %91 = arith.subf %33, %90 : vector<16x128xf32>
    %92 = math.absf %91 : vector<16x128xf32>
    %cst_32 = arith.constant 1.000000e+00 : f32
    %93 = vector.broadcast %cst_32 : f32 to vector<16x128xf32>
    %94 = arith.subf %93, %92 : vector<16x128xf32>
    %cst_33 = arith.constant 0.000000e+00 : f32
    %95 = vector.broadcast %cst_33 : f32 to vector<16x128xf32>
    %96 = arith.maximumf %95, %94 : vector<16x128xf32>
    %cst_34 = arith.constant 3.000000e+00 : f32
    %97 = vector.broadcast %cst_34 : f32 to vector<1x128xf32>
    %98 = arith.addf %5, %97 : vector<1x128xf32>
    %99 = vector.broadcast %98 : vector<1x128xf32> to vector<16x128xf32>
    %100 = arith.subf %33, %99 : vector<16x128xf32>
    %101 = math.absf %100 : vector<16x128xf32>
    %cst_35 = arith.constant 1.000000e+00 : f32
    %102 = vector.broadcast %cst_35 : f32 to vector<16x128xf32>
    %103 = arith.subf %102, %101 : vector<16x128xf32>
    %cst_36 = arith.constant 0.000000e+00 : f32
    %104 = vector.broadcast %cst_36 : f32 to vector<16x128xf32>
    %105 = arith.maximumf %104, %103 : vector<16x128xf32>
    %cst_37 = arith.constant 4.000000e+00 : f32
    %106 = vector.broadcast %cst_37 : f32 to vector<1x128xf32>
    %107 = arith.addf %5, %106 : vector<1x128xf32>
    %108 = vector.broadcast %107 : vector<1x128xf32> to vector<16x128xf32>
    %109 = arith.subf %33, %108 : vector<16x128xf32>
    %110 = math.absf %109 : vector<16x128xf32>
    %cst_38 = arith.constant 1.000000e+00 : f32
    %111 = vector.broadcast %cst_38 : f32 to vector<16x128xf32>
    %112 = arith.subf %111, %110 : vector<16x128xf32>
    %cst_39 = arith.constant 0.000000e+00 : f32
    %113 = vector.broadcast %cst_39 : f32 to vector<16x128xf32>
    %114 = arith.maximumf %113, %112 : vector<16x128xf32>
    %cst_40 = arith.constant -4.000000e+00 : f32
    %115 = vector.broadcast %cst_40 : f32 to vector<1x128xf32>
    %116 = arith.subf %115, %7 : vector<1x128xf32>
    %117 = math.absf %116 : vector<1x128xf32>
    %cst_41 = arith.constant 1.000000e+00 : f32
    %118 = vector.broadcast %cst_41 : f32 to vector<1x128xf32>
    %119 = arith.subf %118, %117 : vector<1x128xf32>
    %cst_42 = arith.constant 0.000000e+00 : f32
    %120 = vector.broadcast %cst_42 : f32 to vector<1x128xf32>
    %121 = arith.maximumf %120, %119 : vector<1x128xf32>
    %cst_43 = arith.constant -3.000000e+00 : f32
    %122 = vector.broadcast %cst_43 : f32 to vector<1x128xf32>
    %123 = arith.subf %122, %7 : vector<1x128xf32>
    %124 = math.absf %123 : vector<1x128xf32>
    %cst_44 = arith.constant 1.000000e+00 : f32
    %125 = vector.broadcast %cst_44 : f32 to vector<1x128xf32>
    %126 = arith.subf %125, %124 : vector<1x128xf32>
    %cst_45 = arith.constant 0.000000e+00 : f32
    %127 = vector.broadcast %cst_45 : f32 to vector<1x128xf32>
    %128 = arith.maximumf %127, %126 : vector<1x128xf32>
    %cst_46 = arith.constant -2.000000e+00 : f32
    %129 = vector.broadcast %cst_46 : f32 to vector<1x128xf32>
    %130 = arith.subf %129, %7 : vector<1x128xf32>
    %131 = math.absf %130 : vector<1x128xf32>
    %cst_47 = arith.constant 1.000000e+00 : f32
    %132 = vector.broadcast %cst_47 : f32 to vector<1x128xf32>
    %133 = arith.subf %132, %131 : vector<1x128xf32>
    %cst_48 = arith.constant 0.000000e+00 : f32
    %134 = vector.broadcast %cst_48 : f32 to vector<1x128xf32>
    %135 = arith.maximumf %134, %133 : vector<1x128xf32>
    %cst_49 = arith.constant -1.000000e+00 : f32
    %136 = vector.broadcast %cst_49 : f32 to vector<1x128xf32>
    %137 = arith.subf %136, %7 : vector<1x128xf32>
    %138 = math.absf %137 : vector<1x128xf32>
    %cst_50 = arith.constant 1.000000e+00 : f32
    %139 = vector.broadcast %cst_50 : f32 to vector<1x128xf32>
    %140 = arith.subf %139, %138 : vector<1x128xf32>
    %cst_51 = arith.constant 0.000000e+00 : f32
    %141 = vector.broadcast %cst_51 : f32 to vector<1x128xf32>
    %142 = arith.maximumf %141, %140 : vector<1x128xf32>
    %cst_52 = arith.constant 0.000000e+00 : f32
    %143 = vector.broadcast %cst_52 : f32 to vector<1x128xf32>
    %144 = arith.subf %143, %7 : vector<1x128xf32>
    %145 = math.absf %144 : vector<1x128xf32>
    %cst_53 = arith.constant 1.000000e+00 : f32
    %146 = vector.broadcast %cst_53 : f32 to vector<1x128xf32>
    %147 = arith.subf %146, %145 : vector<1x128xf32>
    %cst_54 = arith.constant 0.000000e+00 : f32
    %148 = vector.broadcast %cst_54 : f32 to vector<1x128xf32>
    %149 = arith.maximumf %148, %147 : vector<1x128xf32>
    %cst_55 = arith.constant 1.000000e+00 : f32
    %150 = vector.broadcast %cst_55 : f32 to vector<1x128xf32>
    %151 = arith.subf %150, %7 : vector<1x128xf32>
    %152 = math.absf %151 : vector<1x128xf32>
    %cst_56 = arith.constant 1.000000e+00 : f32
    %153 = vector.broadcast %cst_56 : f32 to vector<1x128xf32>
    %154 = arith.subf %153, %152 : vector<1x128xf32>
    %cst_57 = arith.constant 0.000000e+00 : f32
    %155 = vector.broadcast %cst_57 : f32 to vector<1x128xf32>
    %156 = arith.maximumf %155, %154 : vector<1x128xf32>
    %cst_58 = arith.constant 2.000000e+00 : f32
    %157 = vector.broadcast %cst_58 : f32 to vector<1x128xf32>
    %158 = arith.subf %157, %7 : vector<1x128xf32>
    %159 = math.absf %158 : vector<1x128xf32>
    %cst_59 = arith.constant 1.000000e+00 : f32
    %160 = vector.broadcast %cst_59 : f32 to vector<1x128xf32>
    %161 = arith.subf %160, %159 : vector<1x128xf32>
    %cst_60 = arith.constant 0.000000e+00 : f32
    %162 = vector.broadcast %cst_60 : f32 to vector<1x128xf32>
    %163 = arith.maximumf %162, %161 : vector<1x128xf32>
    %cst_61 = arith.constant 3.000000e+00 : f32
    %164 = vector.broadcast %cst_61 : f32 to vector<1x128xf32>
    %165 = arith.subf %164, %7 : vector<1x128xf32>
    %166 = math.absf %165 : vector<1x128xf32>
    %cst_62 = arith.constant 1.000000e+00 : f32
    %167 = vector.broadcast %cst_62 : f32 to vector<1x128xf32>
    %168 = arith.subf %167, %166 : vector<1x128xf32>
    %cst_63 = arith.constant 0.000000e+00 : f32
    %169 = vector.broadcast %cst_63 : f32 to vector<1x128xf32>
    %170 = arith.maximumf %169, %168 : vector<1x128xf32>
    %cst_64 = arith.constant 4.000000e+00 : f32
    %171 = vector.broadcast %cst_64 : f32 to vector<1x128xf32>
    %172 = arith.subf %171, %7 : vector<1x128xf32>
    %173 = math.absf %172 : vector<1x128xf32>
    %cst_65 = arith.constant 1.000000e+00 : f32
    %174 = vector.broadcast %cst_65 : f32 to vector<1x128xf32>
    %175 = arith.subf %174, %173 : vector<1x128xf32>
    %cst_66 = arith.constant 0.000000e+00 : f32
    %176 = vector.broadcast %cst_66 : f32 to vector<1x128xf32>
    %177 = arith.maximumf %176, %175 : vector<1x128xf32>
    %cst_67 = arith.constant 5.000000e+00 : f32
    %178 = vector.broadcast %cst_67 : f32 to vector<1x128xf32>
    %179 = arith.subf %178, %7 : vector<1x128xf32>
    %180 = math.absf %179 : vector<1x128xf32>
    %cst_68 = arith.constant 1.000000e+00 : f32
    %181 = vector.broadcast %cst_68 : f32 to vector<1x128xf32>
    %182 = arith.subf %181, %180 : vector<1x128xf32>
    %cst_69 = arith.constant 0.000000e+00 : f32
    %183 = vector.broadcast %cst_69 : f32 to vector<1x128xf32>
    %184 = arith.maximumf %183, %182 : vector<1x128xf32>
    %cst_70 = arith.constant 6.000000e+00 : f32
    %185 = vector.broadcast %cst_70 : f32 to vector<1x128xf32>
    %186 = arith.subf %185, %7 : vector<1x128xf32>
    %187 = math.absf %186 : vector<1x128xf32>
    %cst_71 = arith.constant 1.000000e+00 : f32
    %188 = vector.broadcast %cst_71 : f32 to vector<1x128xf32>
    %189 = arith.subf %188, %187 : vector<1x128xf32>
    %cst_72 = arith.constant 0.000000e+00 : f32
    %190 = vector.broadcast %cst_72 : f32 to vector<1x128xf32>
    %191 = arith.maximumf %190, %189 : vector<1x128xf32>
    %cst_73 = arith.constant 7.000000e+00 : f32
    %192 = vector.broadcast %cst_73 : f32 to vector<1x128xf32>
    %193 = arith.subf %192, %7 : vector<1x128xf32>
    %194 = math.absf %193 : vector<1x128xf32>
    %cst_74 = arith.constant 1.000000e+00 : f32
    %195 = vector.broadcast %cst_74 : f32 to vector<1x128xf32>
    %196 = arith.subf %195, %194 : vector<1x128xf32>
    %cst_75 = arith.constant 0.000000e+00 : f32
    %197 = vector.broadcast %cst_75 : f32 to vector<1x128xf32>
    %198 = arith.maximumf %197, %196 : vector<1x128xf32>
    %cst_76 = arith.constant 8.000000e+00 : f32
    %199 = vector.broadcast %cst_76 : f32 to vector<1x128xf32>
    %200 = arith.subf %199, %7 : vector<1x128xf32>
    %201 = math.absf %200 : vector<1x128xf32>
    %cst_77 = arith.constant 1.000000e+00 : f32
    %202 = vector.broadcast %cst_77 : f32 to vector<1x128xf32>
    %203 = arith.subf %202, %201 : vector<1x128xf32>
    %cst_78 = arith.constant 0.000000e+00 : f32
    %204 = vector.broadcast %cst_78 : f32 to vector<1x128xf32>
    %205 = arith.maximumf %204, %203 : vector<1x128xf32>
    %cst_79 = arith.constant 9.000000e+00 : f32
    %206 = vector.broadcast %cst_79 : f32 to vector<1x128xf32>
    %207 = arith.subf %206, %7 : vector<1x128xf32>
    %208 = math.absf %207 : vector<1x128xf32>
    %cst_80 = arith.constant 1.000000e+00 : f32
    %209 = vector.broadcast %cst_80 : f32 to vector<1x128xf32>
    %210 = arith.subf %209, %208 : vector<1x128xf32>
    %cst_81 = arith.constant 0.000000e+00 : f32
    %211 = vector.broadcast %cst_81 : f32 to vector<1x128xf32>
    %212 = arith.maximumf %211, %210 : vector<1x128xf32>
    %cst_82 = arith.constant 1.000000e+01 : f32
    %213 = vector.broadcast %cst_82 : f32 to vector<1x128xf32>
    %214 = arith.subf %213, %7 : vector<1x128xf32>
    %215 = math.absf %214 : vector<1x128xf32>
    %cst_83 = arith.constant 1.000000e+00 : f32
    %216 = vector.broadcast %cst_83 : f32 to vector<1x128xf32>
    %217 = arith.subf %216, %215 : vector<1x128xf32>
    %cst_84 = arith.constant 0.000000e+00 : f32
    %218 = vector.broadcast %cst_84 : f32 to vector<1x128xf32>
    %219 = arith.maximumf %218, %217 : vector<1x128xf32>
    %cst_85 = arith.constant 1.100000e+01 : f32
    %220 = vector.broadcast %cst_85 : f32 to vector<1x128xf32>
    %221 = arith.subf %220, %7 : vector<1x128xf32>
    %222 = math.absf %221 : vector<1x128xf32>
    %cst_86 = arith.constant 1.000000e+00 : f32
    %223 = vector.broadcast %cst_86 : f32 to vector<1x128xf32>
    %224 = arith.subf %223, %222 : vector<1x128xf32>
    %cst_87 = arith.constant 0.000000e+00 : f32
    %225 = vector.broadcast %cst_87 : f32 to vector<1x128xf32>
    %226 = arith.maximumf %225, %224 : vector<1x128xf32>
    %cst_88 = arith.constant 1.200000e+01 : f32
    %227 = vector.broadcast %cst_88 : f32 to vector<1x128xf32>
    %228 = arith.subf %227, %7 : vector<1x128xf32>
    %229 = math.absf %228 : vector<1x128xf32>
    %cst_89 = arith.constant 1.000000e+00 : f32
    %230 = vector.broadcast %cst_89 : f32 to vector<1x128xf32>
    %231 = arith.subf %230, %229 : vector<1x128xf32>
    %cst_90 = arith.constant 0.000000e+00 : f32
    %232 = vector.broadcast %cst_90 : f32 to vector<1x128xf32>
    %233 = arith.maximumf %232, %231 : vector<1x128xf32>
    %cst_91 = arith.constant 1.300000e+01 : f32
    %234 = vector.broadcast %cst_91 : f32 to vector<1x128xf32>
    %235 = arith.subf %234, %7 : vector<1x128xf32>
    %236 = math.absf %235 : vector<1x128xf32>
    %cst_92 = arith.constant 1.000000e+00 : f32
    %237 = vector.broadcast %cst_92 : f32 to vector<1x128xf32>
    %238 = arith.subf %237, %236 : vector<1x128xf32>
    %cst_93 = arith.constant 0.000000e+00 : f32
    %239 = vector.broadcast %cst_93 : f32 to vector<1x128xf32>
    %240 = arith.maximumf %239, %238 : vector<1x128xf32>
    %cst_94 = arith.constant 1.400000e+01 : f32
    %241 = vector.broadcast %cst_94 : f32 to vector<1x128xf32>
    %242 = arith.subf %241, %7 : vector<1x128xf32>
    %243 = math.absf %242 : vector<1x128xf32>
    %cst_95 = arith.constant 1.000000e+00 : f32
    %244 = vector.broadcast %cst_95 : f32 to vector<1x128xf32>
    %245 = arith.subf %244, %243 : vector<1x128xf32>
    %cst_96 = arith.constant 0.000000e+00 : f32
    %246 = vector.broadcast %cst_96 : f32 to vector<1x128xf32>
    %247 = arith.maximumf %246, %245 : vector<1x128xf32>
    %cst_97 = arith.constant 1.500000e+01 : f32
    %248 = vector.broadcast %cst_97 : f32 to vector<1x128xf32>
    %249 = arith.subf %248, %7 : vector<1x128xf32>
    %250 = math.absf %249 : vector<1x128xf32>
    %cst_98 = arith.constant 1.000000e+00 : f32
    %251 = vector.broadcast %cst_98 : f32 to vector<1x128xf32>
    %252 = arith.subf %251, %250 : vector<1x128xf32>
    %cst_99 = arith.constant 0.000000e+00 : f32
    %253 = vector.broadcast %cst_99 : f32 to vector<1x128xf32>
    %254 = arith.maximumf %253, %252 : vector<1x128xf32>
    %cst_100 = arith.constant 1.600000e+01 : f32
    %255 = vector.broadcast %cst_100 : f32 to vector<1x128xf32>
    %256 = arith.subf %255, %7 : vector<1x128xf32>
    %257 = math.absf %256 : vector<1x128xf32>
    %cst_101 = arith.constant 1.000000e+00 : f32
    %258 = vector.broadcast %cst_101 : f32 to vector<1x128xf32>
    %259 = arith.subf %258, %257 : vector<1x128xf32>
    %cst_102 = arith.constant 0.000000e+00 : f32
    %260 = vector.broadcast %cst_102 : f32 to vector<1x128xf32>
    %261 = arith.maximumf %260, %259 : vector<1x128xf32>
    %cst_103 = arith.constant 1.700000e+01 : f32
    %262 = vector.broadcast %cst_103 : f32 to vector<1x128xf32>
    %263 = arith.subf %262, %7 : vector<1x128xf32>
    %264 = math.absf %263 : vector<1x128xf32>
    %cst_104 = arith.constant 1.000000e+00 : f32
    %265 = vector.broadcast %cst_104 : f32 to vector<1x128xf32>
    %266 = arith.subf %265, %264 : vector<1x128xf32>
    %cst_105 = arith.constant 0.000000e+00 : f32
    %267 = vector.broadcast %cst_105 : f32 to vector<1x128xf32>
    %268 = arith.maximumf %267, %266 : vector<1x128xf32>
    %cst_106 = arith.constant 1.800000e+01 : f32
    %269 = vector.broadcast %cst_106 : f32 to vector<1x128xf32>
    %270 = arith.subf %269, %7 : vector<1x128xf32>
    %271 = math.absf %270 : vector<1x128xf32>
    %cst_107 = arith.constant 1.000000e+00 : f32
    %272 = vector.broadcast %cst_107 : f32 to vector<1x128xf32>
    %273 = arith.subf %272, %271 : vector<1x128xf32>
    %cst_108 = arith.constant 0.000000e+00 : f32
    %274 = vector.broadcast %cst_108 : f32 to vector<1x128xf32>
    %275 = arith.maximumf %274, %273 : vector<1x128xf32>
    %cst_109 = arith.constant 1.900000e+01 : f32
    %276 = vector.broadcast %cst_109 : f32 to vector<1x128xf32>
    %277 = arith.subf %276, %7 : vector<1x128xf32>
    %278 = math.absf %277 : vector<1x128xf32>
    %cst_110 = arith.constant 1.000000e+00 : f32
    %279 = vector.broadcast %cst_110 : f32 to vector<1x128xf32>
    %280 = arith.subf %279, %278 : vector<1x128xf32>
    %cst_111 = arith.constant 0.000000e+00 : f32
    %281 = vector.broadcast %cst_111 : f32 to vector<1x128xf32>
    %282 = arith.maximumf %281, %280 : vector<1x128xf32>
    %c0_112 = arith.constant 0 : index
    %c0_113 = arith.constant 0 : index
    %c0_114 = arith.constant 0 : index
    %283 = vector.load %arg2[%c0_112, %c0_113, %c0_114] : memref<1x256x256xf32, #tpu.memory_space<vmem>>, vector<1x256x256xf32>
    %284 = vector.shape_cast %283 : vector<1x256x256xf32> to vector<256x256xf32>
    %cst_115 = arith.constant dense<0.000000e+00> : vector<256x128xf32>
    %285 = tpu.matmul %284, %31, %cst_115 {dimension_numbers = #tpu.dot_dimension_numbers<[1], [0], [0], [1], [0, 0, 1, 1], [], []>, precision = #tpu.contract_precision<fp32>} : vector<256x256xf32>, vector<256x128xf32>, vector<256x128xf32> -> vector<256x128xf32>
    %cst_116 = arith.constant 0.000000e+00 : f32
    %286 = vector.broadcast %cst_116 : f32 to vector<16x128xf32>
    %cst_117 = arith.constant 0.000000e+00 : f32
    %287 = vector.broadcast %cst_117 : f32 to vector<16x128xf32>
    %cst_118 = arith.constant 0.000000e+00 : f32
    %288 = vector.broadcast %cst_118 : f32 to vector<16x128xf32>
    %cst_119 = arith.constant 0.000000e+00 : f32
    %289 = vector.broadcast %cst_119 : f32 to vector<16x128xf32>
    %cst_120 = arith.constant 0.000000e+00 : f32
    %290 = vector.broadcast %cst_120 : f32 to vector<16x128xf32>
    %cst_121 = arith.constant 0.000000e+00 : f32
    %291 = vector.broadcast %cst_121 : f32 to vector<16x128xf32>
    %cst_122 = arith.constant 0.000000e+00 : f32
    %292 = vector.broadcast %cst_122 : f32 to vector<16x128xf32>
    %cst_123 = arith.constant 0.000000e+00 : f32
    %293 = vector.broadcast %cst_123 : f32 to vector<16x128xf32>
    %cst_124 = arith.constant 0.000000e+00 : f32
    %294 = vector.broadcast %cst_124 : f32 to vector<16x128xf32>
    %295 = vector.extract_strided_slice %285 {offsets = [0, 0], sizes = [16, 128], strides = [1, 1]} : vector<256x128xf32> to vector<16x128xf32>
    %296 = vector.broadcast %177 : vector<1x128xf32> to vector<16x128xf32>
    %297 = arith.mulf %295, %296 : vector<16x128xf32>
    %298 = arith.addf %286, %297 : vector<16x128xf32>
    %299 = vector.broadcast %170 : vector<1x128xf32> to vector<16x128xf32>
    %300 = arith.mulf %295, %299 : vector<16x128xf32>
    %301 = arith.addf %287, %300 : vector<16x128xf32>
    %302 = vector.broadcast %163 : vector<1x128xf32> to vector<16x128xf32>
    %303 = arith.mulf %295, %302 : vector<16x128xf32>
    %304 = arith.addf %288, %303 : vector<16x128xf32>
    %305 = vector.broadcast %156 : vector<1x128xf32> to vector<16x128xf32>
    %306 = arith.mulf %295, %305 : vector<16x128xf32>
    %307 = arith.addf %289, %306 : vector<16x128xf32>
    %308 = vector.broadcast %149 : vector<1x128xf32> to vector<16x128xf32>
    %309 = arith.mulf %295, %308 : vector<16x128xf32>
    %310 = arith.addf %290, %309 : vector<16x128xf32>
    %311 = vector.broadcast %142 : vector<1x128xf32> to vector<16x128xf32>
    %312 = arith.mulf %295, %311 : vector<16x128xf32>
    %313 = arith.addf %291, %312 : vector<16x128xf32>
    %314 = vector.broadcast %135 : vector<1x128xf32> to vector<16x128xf32>
    %315 = arith.mulf %295, %314 : vector<16x128xf32>
    %316 = arith.addf %292, %315 : vector<16x128xf32>
    %317 = vector.broadcast %128 : vector<1x128xf32> to vector<16x128xf32>
    %318 = arith.mulf %295, %317 : vector<16x128xf32>
    %319 = arith.addf %293, %318 : vector<16x128xf32>
    %320 = vector.broadcast %121 : vector<1x128xf32> to vector<16x128xf32>
    %321 = arith.mulf %295, %320 : vector<16x128xf32>
    %322 = arith.addf %294, %321 : vector<16x128xf32>
    %323 = vector.extract_strided_slice %285 {offsets = [16, 0], sizes = [16, 128], strides = [1, 1]} : vector<256x128xf32> to vector<16x128xf32>
    %324 = vector.broadcast %184 : vector<1x128xf32> to vector<16x128xf32>
    %325 = arith.mulf %323, %324 : vector<16x128xf32>
    %326 = arith.addf %298, %325 : vector<16x128xf32>
    %327 = vector.broadcast %177 : vector<1x128xf32> to vector<16x128xf32>
    %328 = arith.mulf %323, %327 : vector<16x128xf32>
    %329 = arith.addf %301, %328 : vector<16x128xf32>
    %330 = vector.broadcast %170 : vector<1x128xf32> to vector<16x128xf32>
    %331 = arith.mulf %323, %330 : vector<16x128xf32>
    %332 = arith.addf %304, %331 : vector<16x128xf32>
    %333 = vector.broadcast %163 : vector<1x128xf32> to vector<16x128xf32>
    %334 = arith.mulf %323, %333 : vector<16x128xf32>
    %335 = arith.addf %307, %334 : vector<16x128xf32>
    %336 = vector.broadcast %156 : vector<1x128xf32> to vector<16x128xf32>
    %337 = arith.mulf %323, %336 : vector<16x128xf32>
    %338 = arith.addf %310, %337 : vector<16x128xf32>
    %339 = vector.broadcast %149 : vector<1x128xf32> to vector<16x128xf32>
    %340 = arith.mulf %323, %339 : vector<16x128xf32>
    %341 = arith.addf %313, %340 : vector<16x128xf32>
    %342 = vector.broadcast %142 : vector<1x128xf32> to vector<16x128xf32>
    %343 = arith.mulf %323, %342 : vector<16x128xf32>
    %344 = arith.addf %316, %343 : vector<16x128xf32>
    %345 = vector.broadcast %135 : vector<1x128xf32> to vector<16x128xf32>
    %346 = arith.mulf %323, %345 : vector<16x128xf32>
    %347 = arith.addf %319, %346 : vector<16x128xf32>
    %348 = vector.broadcast %128 : vector<1x128xf32> to vector<16x128xf32>
    %349 = arith.mulf %323, %348 : vector<16x128xf32>
    %350 = arith.addf %322, %349 : vector<16x128xf32>
    %351 = vector.extract_strided_slice %285 {offsets = [32, 0], sizes = [16, 128], strides = [1, 1]} : vector<256x128xf32> to vector<16x128xf32>
    %352 = vector.broadcast %191 : vector<1x128xf32> to vector<16x128xf32>
    %353 = arith.mulf %351, %352 : vector<16x128xf32>
    %354 = arith.addf %326, %353 : vector<16x128xf32>
    %355 = vector.broadcast %184 : vector<1x128xf32> to vector<16x128xf32>
    %356 = arith.mulf %351, %355 : vector<16x128xf32>
    %357 = arith.addf %329, %356 : vector<16x128xf32>
    %358 = vector.broadcast %177 : vector<1x128xf32> to vector<16x128xf32>
    %359 = arith.mulf %351, %358 : vector<16x128xf32>
    %360 = arith.addf %332, %359 : vector<16x128xf32>
    %361 = vector.broadcast %170 : vector<1x128xf32> to vector<16x128xf32>
    %362 = arith.mulf %351, %361 : vector<16x128xf32>
    %363 = arith.addf %335, %362 : vector<16x128xf32>
    %364 = vector.broadcast %163 : vector<1x128xf32> to vector<16x128xf32>
    %365 = arith.mulf %351, %364 : vector<16x128xf32>
    %366 = arith.addf %338, %365 : vector<16x128xf32>
    %367 = vector.broadcast %156 : vector<1x128xf32> to vector<16x128xf32>
    %368 = arith.mulf %351, %367 : vector<16x128xf32>
    %369 = arith.addf %341, %368 : vector<16x128xf32>
    %370 = vector.broadcast %149 : vector<1x128xf32> to vector<16x128xf32>
    %371 = arith.mulf %351, %370 : vector<16x128xf32>
    %372 = arith.addf %344, %371 : vector<16x128xf32>
    %373 = vector.broadcast %142 : vector<1x128xf32> to vector<16x128xf32>
    %374 = arith.mulf %351, %373 : vector<16x128xf32>
    %375 = arith.addf %347, %374 : vector<16x128xf32>
    %376 = vector.broadcast %135 : vector<1x128xf32> to vector<16x128xf32>
    %377 = arith.mulf %351, %376 : vector<16x128xf32>
    %378 = arith.addf %350, %377 : vector<16x128xf32>
    %379 = vector.extract_strided_slice %285 {offsets = [48, 0], sizes = [16, 128], strides = [1, 1]} : vector<256x128xf32> to vector<16x128xf32>
    %380 = vector.broadcast %198 : vector<1x128xf32> to vector<16x128xf32>
    %381 = arith.mulf %379, %380 : vector<16x128xf32>
    %382 = arith.addf %354, %381 : vector<16x128xf32>
    %383 = vector.broadcast %191 : vector<1x128xf32> to vector<16x128xf32>
    %384 = arith.mulf %379, %383 : vector<16x128xf32>
    %385 = arith.addf %357, %384 : vector<16x128xf32>
    %386 = vector.broadcast %184 : vector<1x128xf32> to vector<16x128xf32>
    %387 = arith.mulf %379, %386 : vector<16x128xf32>
    %388 = arith.addf %360, %387 : vector<16x128xf32>
    %389 = vector.broadcast %177 : vector<1x128xf32> to vector<16x128xf32>
    %390 = arith.mulf %379, %389 : vector<16x128xf32>
    %391 = arith.addf %363, %390 : vector<16x128xf32>
    %392 = vector.broadcast %170 : vector<1x128xf32> to vector<16x128xf32>
    %393 = arith.mulf %379, %392 : vector<16x128xf32>
    %394 = arith.addf %366, %393 : vector<16x128xf32>
    %395 = vector.broadcast %163 : vector<1x128xf32> to vector<16x128xf32>
    %396 = arith.mulf %379, %395 : vector<16x128xf32>
    %397 = arith.addf %369, %396 : vector<16x128xf32>
    %398 = vector.broadcast %156 : vector<1x128xf32> to vector<16x128xf32>
    %399 = arith.mulf %379, %398 : vector<16x128xf32>
    %400 = arith.addf %372, %399 : vector<16x128xf32>
    %401 = vector.broadcast %149 : vector<1x128xf32> to vector<16x128xf32>
    %402 = arith.mulf %379, %401 : vector<16x128xf32>
    %403 = arith.addf %375, %402 : vector<16x128xf32>
    %404 = vector.broadcast %142 : vector<1x128xf32> to vector<16x128xf32>
    %405 = arith.mulf %379, %404 : vector<16x128xf32>
    %406 = arith.addf %378, %405 : vector<16x128xf32>
    %407 = vector.extract_strided_slice %285 {offsets = [64, 0], sizes = [16, 128], strides = [1, 1]} : vector<256x128xf32> to vector<16x128xf32>
    %408 = vector.broadcast %205 : vector<1x128xf32> to vector<16x128xf32>
    %409 = arith.mulf %407, %408 : vector<16x128xf32>
    %410 = arith.addf %382, %409 : vector<16x128xf32>
    %411 = vector.broadcast %198 : vector<1x128xf32> to vector<16x128xf32>
    %412 = arith.mulf %407, %411 : vector<16x128xf32>
    %413 = arith.addf %385, %412 : vector<16x128xf32>
    %414 = vector.broadcast %191 : vector<1x128xf32> to vector<16x128xf32>
    %415 = arith.mulf %407, %414 : vector<16x128xf32>
    %416 = arith.addf %388, %415 : vector<16x128xf32>
    %417 = vector.broadcast %184 : vector<1x128xf32> to vector<16x128xf32>
    %418 = arith.mulf %407, %417 : vector<16x128xf32>
    %419 = arith.addf %391, %418 : vector<16x128xf32>
    %420 = vector.broadcast %177 : vector<1x128xf32> to vector<16x128xf32>
    %421 = arith.mulf %407, %420 : vector<16x128xf32>
    %422 = arith.addf %394, %421 : vector<16x128xf32>
    %423 = vector.broadcast %170 : vector<1x128xf32> to vector<16x128xf32>
    %424 = arith.mulf %407, %423 : vector<16x128xf32>
    %425 = arith.addf %397, %424 : vector<16x128xf32>
    %426 = vector.broadcast %163 : vector<1x128xf32> to vector<16x128xf32>
    %427 = arith.mulf %407, %426 : vector<16x128xf32>
    %428 = arith.addf %400, %427 : vector<16x128xf32>
    %429 = vector.broadcast %156 : vector<1x128xf32> to vector<16x128xf32>
    %430 = arith.mulf %407, %429 : vector<16x128xf32>
    %431 = arith.addf %403, %430 : vector<16x128xf32>
    %432 = vector.broadcast %149 : vector<1x128xf32> to vector<16x128xf32>
    %433 = arith.mulf %407, %432 : vector<16x128xf32>
    %434 = arith.addf %406, %433 : vector<16x128xf32>
    %435 = vector.extract_strided_slice %285 {offsets = [80, 0], sizes = [16, 128], strides = [1, 1]} : vector<256x128xf32> to vector<16x128xf32>
    %436 = vector.broadcast %212 : vector<1x128xf32> to vector<16x128xf32>
    %437 = arith.mulf %435, %436 : vector<16x128xf32>
    %438 = arith.addf %410, %437 : vector<16x128xf32>
    %439 = vector.broadcast %205 : vector<1x128xf32> to vector<16x128xf32>
    %440 = arith.mulf %435, %439 : vector<16x128xf32>
    %441 = arith.addf %413, %440 : vector<16x128xf32>
    %442 = vector.broadcast %198 : vector<1x128xf32> to vector<16x128xf32>
    %443 = arith.mulf %435, %442 : vector<16x128xf32>
    %444 = arith.addf %416, %443 : vector<16x128xf32>
    %445 = vector.broadcast %191 : vector<1x128xf32> to vector<16x128xf32>
    %446 = arith.mulf %435, %445 : vector<16x128xf32>
    %447 = arith.addf %419, %446 : vector<16x128xf32>
    %448 = vector.broadcast %184 : vector<1x128xf32> to vector<16x128xf32>
    %449 = arith.mulf %435, %448 : vector<16x128xf32>
    %450 = arith.addf %422, %449 : vector<16x128xf32>
    %451 = vector.broadcast %177 : vector<1x128xf32> to vector<16x128xf32>
    %452 = arith.mulf %435, %451 : vector<16x128xf32>
    %453 = arith.addf %425, %452 : vector<16x128xf32>
    %454 = vector.broadcast %170 : vector<1x128xf32> to vector<16x128xf32>
    %455 = arith.mulf %435, %454 : vector<16x128xf32>
    %456 = arith.addf %428, %455 : vector<16x128xf32>
    %457 = vector.broadcast %163 : vector<1x128xf32> to vector<16x128xf32>
    %458 = arith.mulf %435, %457 : vector<16x128xf32>
    %459 = arith.addf %431, %458 : vector<16x128xf32>
    %460 = vector.broadcast %156 : vector<1x128xf32> to vector<16x128xf32>
    %461 = arith.mulf %435, %460 : vector<16x128xf32>
    %462 = arith.addf %434, %461 : vector<16x128xf32>
    %463 = vector.extract_strided_slice %285 {offsets = [96, 0], sizes = [16, 128], strides = [1, 1]} : vector<256x128xf32> to vector<16x128xf32>
    %464 = vector.broadcast %219 : vector<1x128xf32> to vector<16x128xf32>
    %465 = arith.mulf %463, %464 : vector<16x128xf32>
    %466 = arith.addf %438, %465 : vector<16x128xf32>
    %467 = vector.broadcast %212 : vector<1x128xf32> to vector<16x128xf32>
    %468 = arith.mulf %463, %467 : vector<16x128xf32>
    %469 = arith.addf %441, %468 : vector<16x128xf32>
    %470 = vector.broadcast %205 : vector<1x128xf32> to vector<16x128xf32>
    %471 = arith.mulf %463, %470 : vector<16x128xf32>
    %472 = arith.addf %444, %471 : vector<16x128xf32>
    %473 = vector.broadcast %198 : vector<1x128xf32> to vector<16x128xf32>
    %474 = arith.mulf %463, %473 : vector<16x128xf32>
    %475 = arith.addf %447, %474 : vector<16x128xf32>
    %476 = vector.broadcast %191 : vector<1x128xf32> to vector<16x128xf32>
    %477 = arith.mulf %463, %476 : vector<16x128xf32>
    %478 = arith.addf %450, %477 : vector<16x128xf32>
    %479 = vector.broadcast %184 : vector<1x128xf32> to vector<16x128xf32>
    %480 = arith.mulf %463, %479 : vector<16x128xf32>
    %481 = arith.addf %453, %480 : vector<16x128xf32>
    %482 = vector.broadcast %177 : vector<1x128xf32> to vector<16x128xf32>
    %483 = arith.mulf %463, %482 : vector<16x128xf32>
    %484 = arith.addf %456, %483 : vector<16x128xf32>
    %485 = vector.broadcast %170 : vector<1x128xf32> to vector<16x128xf32>
    %486 = arith.mulf %463, %485 : vector<16x128xf32>
    %487 = arith.addf %459, %486 : vector<16x128xf32>
    %488 = vector.broadcast %163 : vector<1x128xf32> to vector<16x128xf32>
    %489 = arith.mulf %463, %488 : vector<16x128xf32>
    %490 = arith.addf %462, %489 : vector<16x128xf32>
    %491 = vector.extract_strided_slice %285 {offsets = [112, 0], sizes = [16, 128], strides = [1, 1]} : vector<256x128xf32> to vector<16x128xf32>
    %492 = vector.broadcast %226 : vector<1x128xf32> to vector<16x128xf32>
    %493 = arith.mulf %491, %492 : vector<16x128xf32>
    %494 = arith.addf %466, %493 : vector<16x128xf32>
    %495 = vector.broadcast %219 : vector<1x128xf32> to vector<16x128xf32>
    %496 = arith.mulf %491, %495 : vector<16x128xf32>
    %497 = arith.addf %469, %496 : vector<16x128xf32>
    %498 = vector.broadcast %212 : vector<1x128xf32> to vector<16x128xf32>
    %499 = arith.mulf %491, %498 : vector<16x128xf32>
    %500 = arith.addf %472, %499 : vector<16x128xf32>
    %501 = vector.broadcast %205 : vector<1x128xf32> to vector<16x128xf32>
    %502 = arith.mulf %491, %501 : vector<16x128xf32>
    %503 = arith.addf %475, %502 : vector<16x128xf32>
    %504 = vector.broadcast %198 : vector<1x128xf32> to vector<16x128xf32>
    %505 = arith.mulf %491, %504 : vector<16x128xf32>
    %506 = arith.addf %478, %505 : vector<16x128xf32>
    %507 = vector.broadcast %191 : vector<1x128xf32> to vector<16x128xf32>
    %508 = arith.mulf %491, %507 : vector<16x128xf32>
    %509 = arith.addf %481, %508 : vector<16x128xf32>
    %510 = vector.broadcast %184 : vector<1x128xf32> to vector<16x128xf32>
    %511 = arith.mulf %491, %510 : vector<16x128xf32>
    %512 = arith.addf %484, %511 : vector<16x128xf32>
    %513 = vector.broadcast %177 : vector<1x128xf32> to vector<16x128xf32>
    %514 = arith.mulf %491, %513 : vector<16x128xf32>
    %515 = arith.addf %487, %514 : vector<16x128xf32>
    %516 = vector.broadcast %170 : vector<1x128xf32> to vector<16x128xf32>
    %517 = arith.mulf %491, %516 : vector<16x128xf32>
    %518 = arith.addf %490, %517 : vector<16x128xf32>
    %519 = vector.extract_strided_slice %285 {offsets = [128, 0], sizes = [16, 128], strides = [1, 1]} : vector<256x128xf32> to vector<16x128xf32>
    %520 = vector.broadcast %233 : vector<1x128xf32> to vector<16x128xf32>
    %521 = arith.mulf %519, %520 : vector<16x128xf32>
    %522 = arith.addf %494, %521 : vector<16x128xf32>
    %523 = vector.broadcast %226 : vector<1x128xf32> to vector<16x128xf32>
    %524 = arith.mulf %519, %523 : vector<16x128xf32>
    %525 = arith.addf %497, %524 : vector<16x128xf32>
    %526 = vector.broadcast %219 : vector<1x128xf32> to vector<16x128xf32>
    %527 = arith.mulf %519, %526 : vector<16x128xf32>
    %528 = arith.addf %500, %527 : vector<16x128xf32>
    %529 = vector.broadcast %212 : vector<1x128xf32> to vector<16x128xf32>
    %530 = arith.mulf %519, %529 : vector<16x128xf32>
    %531 = arith.addf %503, %530 : vector<16x128xf32>
    %532 = vector.broadcast %205 : vector<1x128xf32> to vector<16x128xf32>
    %533 = arith.mulf %519, %532 : vector<16x128xf32>
    %534 = arith.addf %506, %533 : vector<16x128xf32>
    %535 = vector.broadcast %198 : vector<1x128xf32> to vector<16x128xf32>
    %536 = arith.mulf %519, %535 : vector<16x128xf32>
    %537 = arith.addf %509, %536 : vector<16x128xf32>
    %538 = vector.broadcast %191 : vector<1x128xf32> to vector<16x128xf32>
    %539 = arith.mulf %519, %538 : vector<16x128xf32>
    %540 = arith.addf %512, %539 : vector<16x128xf32>
    %541 = vector.broadcast %184 : vector<1x128xf32> to vector<16x128xf32>
    %542 = arith.mulf %519, %541 : vector<16x128xf32>
    %543 = arith.addf %515, %542 : vector<16x128xf32>
    %544 = vector.broadcast %177 : vector<1x128xf32> to vector<16x128xf32>
    %545 = arith.mulf %519, %544 : vector<16x128xf32>
    %546 = arith.addf %518, %545 : vector<16x128xf32>
    %547 = vector.extract_strided_slice %285 {offsets = [144, 0], sizes = [16, 128], strides = [1, 1]} : vector<256x128xf32> to vector<16x128xf32>
    %548 = vector.broadcast %240 : vector<1x128xf32> to vector<16x128xf32>
    %549 = arith.mulf %547, %548 : vector<16x128xf32>
    %550 = arith.addf %522, %549 : vector<16x128xf32>
    %551 = vector.broadcast %233 : vector<1x128xf32> to vector<16x128xf32>
    %552 = arith.mulf %547, %551 : vector<16x128xf32>
    %553 = arith.addf %525, %552 : vector<16x128xf32>
    %554 = vector.broadcast %226 : vector<1x128xf32> to vector<16x128xf32>
    %555 = arith.mulf %547, %554 : vector<16x128xf32>
    %556 = arith.addf %528, %555 : vector<16x128xf32>
    %557 = vector.broadcast %219 : vector<1x128xf32> to vector<16x128xf32>
    %558 = arith.mulf %547, %557 : vector<16x128xf32>
    %559 = arith.addf %531, %558 : vector<16x128xf32>
    %560 = vector.broadcast %212 : vector<1x128xf32> to vector<16x128xf32>
    %561 = arith.mulf %547, %560 : vector<16x128xf32>
    %562 = arith.addf %534, %561 : vector<16x128xf32>
    %563 = vector.broadcast %205 : vector<1x128xf32> to vector<16x128xf32>
    %564 = arith.mulf %547, %563 : vector<16x128xf32>
    %565 = arith.addf %537, %564 : vector<16x128xf32>
    %566 = vector.broadcast %198 : vector<1x128xf32> to vector<16x128xf32>
    %567 = arith.mulf %547, %566 : vector<16x128xf32>
    %568 = arith.addf %540, %567 : vector<16x128xf32>
    %569 = vector.broadcast %191 : vector<1x128xf32> to vector<16x128xf32>
    %570 = arith.mulf %547, %569 : vector<16x128xf32>
    %571 = arith.addf %543, %570 : vector<16x128xf32>
    %572 = vector.broadcast %184 : vector<1x128xf32> to vector<16x128xf32>
    %573 = arith.mulf %547, %572 : vector<16x128xf32>
    %574 = arith.addf %546, %573 : vector<16x128xf32>
    %575 = vector.extract_strided_slice %285 {offsets = [160, 0], sizes = [16, 128], strides = [1, 1]} : vector<256x128xf32> to vector<16x128xf32>
    %576 = vector.broadcast %247 : vector<1x128xf32> to vector<16x128xf32>
    %577 = arith.mulf %575, %576 : vector<16x128xf32>
    %578 = arith.addf %550, %577 : vector<16x128xf32>
    %579 = vector.broadcast %240 : vector<1x128xf32> to vector<16x128xf32>
    %580 = arith.mulf %575, %579 : vector<16x128xf32>
    %581 = arith.addf %553, %580 : vector<16x128xf32>
    %582 = vector.broadcast %233 : vector<1x128xf32> to vector<16x128xf32>
    %583 = arith.mulf %575, %582 : vector<16x128xf32>
    %584 = arith.addf %556, %583 : vector<16x128xf32>
    %585 = vector.broadcast %226 : vector<1x128xf32> to vector<16x128xf32>
    %586 = arith.mulf %575, %585 : vector<16x128xf32>
    %587 = arith.addf %559, %586 : vector<16x128xf32>
    %588 = vector.broadcast %219 : vector<1x128xf32> to vector<16x128xf32>
    %589 = arith.mulf %575, %588 : vector<16x128xf32>
    %590 = arith.addf %562, %589 : vector<16x128xf32>
    %591 = vector.broadcast %212 : vector<1x128xf32> to vector<16x128xf32>
    %592 = arith.mulf %575, %591 : vector<16x128xf32>
    %593 = arith.addf %565, %592 : vector<16x128xf32>
    %594 = vector.broadcast %205 : vector<1x128xf32> to vector<16x128xf32>
    %595 = arith.mulf %575, %594 : vector<16x128xf32>
    %596 = arith.addf %568, %595 : vector<16x128xf32>
    %597 = vector.broadcast %198 : vector<1x128xf32> to vector<16x128xf32>
    %598 = arith.mulf %575, %597 : vector<16x128xf32>
    %599 = arith.addf %571, %598 : vector<16x128xf32>
    %600 = vector.broadcast %191 : vector<1x128xf32> to vector<16x128xf32>
    %601 = arith.mulf %575, %600 : vector<16x128xf32>
    %602 = arith.addf %574, %601 : vector<16x128xf32>
    %603 = vector.extract_strided_slice %285 {offsets = [176, 0], sizes = [16, 128], strides = [1, 1]} : vector<256x128xf32> to vector<16x128xf32>
    %604 = vector.broadcast %254 : vector<1x128xf32> to vector<16x128xf32>
    %605 = arith.mulf %603, %604 : vector<16x128xf32>
    %606 = arith.addf %578, %605 : vector<16x128xf32>
    %607 = vector.broadcast %247 : vector<1x128xf32> to vector<16x128xf32>
    %608 = arith.mulf %603, %607 : vector<16x128xf32>
    %609 = arith.addf %581, %608 : vector<16x128xf32>
    %610 = vector.broadcast %240 : vector<1x128xf32> to vector<16x128xf32>
    %611 = arith.mulf %603, %610 : vector<16x128xf32>
    %612 = arith.addf %584, %611 : vector<16x128xf32>
    %613 = vector.broadcast %233 : vector<1x128xf32> to vector<16x128xf32>
    %614 = arith.mulf %603, %613 : vector<16x128xf32>
    %615 = arith.addf %587, %614 : vector<16x128xf32>
    %616 = vector.broadcast %226 : vector<1x128xf32> to vector<16x128xf32>
    %617 = arith.mulf %603, %616 : vector<16x128xf32>
    %618 = arith.addf %590, %617 : vector<16x128xf32>
    %619 = vector.broadcast %219 : vector<1x128xf32> to vector<16x128xf32>
    %620 = arith.mulf %603, %619 : vector<16x128xf32>
    %621 = arith.addf %593, %620 : vector<16x128xf32>
    %622 = vector.broadcast %212 : vector<1x128xf32> to vector<16x128xf32>
    %623 = arith.mulf %603, %622 : vector<16x128xf32>
    %624 = arith.addf %596, %623 : vector<16x128xf32>
    %625 = vector.broadcast %205 : vector<1x128xf32> to vector<16x128xf32>
    %626 = arith.mulf %603, %625 : vector<16x128xf32>
    %627 = arith.addf %599, %626 : vector<16x128xf32>
    %628 = vector.broadcast %198 : vector<1x128xf32> to vector<16x128xf32>
    %629 = arith.mulf %603, %628 : vector<16x128xf32>
    %630 = arith.addf %602, %629 : vector<16x128xf32>
    %631 = vector.extract_strided_slice %285 {offsets = [192, 0], sizes = [16, 128], strides = [1, 1]} : vector<256x128xf32> to vector<16x128xf32>
    %632 = vector.broadcast %261 : vector<1x128xf32> to vector<16x128xf32>
    %633 = arith.mulf %631, %632 : vector<16x128xf32>
    %634 = arith.addf %606, %633 : vector<16x128xf32>
    %635 = vector.broadcast %254 : vector<1x128xf32> to vector<16x128xf32>
    %636 = arith.mulf %631, %635 : vector<16x128xf32>
    %637 = arith.addf %609, %636 : vector<16x128xf32>
    %638 = vector.broadcast %247 : vector<1x128xf32> to vector<16x128xf32>
    %639 = arith.mulf %631, %638 : vector<16x128xf32>
    %640 = arith.addf %612, %639 : vector<16x128xf32>
    %641 = vector.broadcast %240 : vector<1x128xf32> to vector<16x128xf32>
    %642 = arith.mulf %631, %641 : vector<16x128xf32>
    %643 = arith.addf %615, %642 : vector<16x128xf32>
    %644 = vector.broadcast %233 : vector<1x128xf32> to vector<16x128xf32>
    %645 = arith.mulf %631, %644 : vector<16x128xf32>
    %646 = arith.addf %618, %645 : vector<16x128xf32>
    %647 = vector.broadcast %226 : vector<1x128xf32> to vector<16x128xf32>
    %648 = arith.mulf %631, %647 : vector<16x128xf32>
    %649 = arith.addf %621, %648 : vector<16x128xf32>
    %650 = vector.broadcast %219 : vector<1x128xf32> to vector<16x128xf32>
    %651 = arith.mulf %631, %650 : vector<16x128xf32>
    %652 = arith.addf %624, %651 : vector<16x128xf32>
    %653 = vector.broadcast %212 : vector<1x128xf32> to vector<16x128xf32>
    %654 = arith.mulf %631, %653 : vector<16x128xf32>
    %655 = arith.addf %627, %654 : vector<16x128xf32>
    %656 = vector.broadcast %205 : vector<1x128xf32> to vector<16x128xf32>
    %657 = arith.mulf %631, %656 : vector<16x128xf32>
    %658 = arith.addf %630, %657 : vector<16x128xf32>
    %659 = vector.extract_strided_slice %285 {offsets = [208, 0], sizes = [16, 128], strides = [1, 1]} : vector<256x128xf32> to vector<16x128xf32>
    %660 = vector.broadcast %268 : vector<1x128xf32> to vector<16x128xf32>
    %661 = arith.mulf %659, %660 : vector<16x128xf32>
    %662 = arith.addf %634, %661 : vector<16x128xf32>
    %663 = vector.broadcast %261 : vector<1x128xf32> to vector<16x128xf32>
    %664 = arith.mulf %659, %663 : vector<16x128xf32>
    %665 = arith.addf %637, %664 : vector<16x128xf32>
    %666 = vector.broadcast %254 : vector<1x128xf32> to vector<16x128xf32>
    %667 = arith.mulf %659, %666 : vector<16x128xf32>
    %668 = arith.addf %640, %667 : vector<16x128xf32>
    %669 = vector.broadcast %247 : vector<1x128xf32> to vector<16x128xf32>
    %670 = arith.mulf %659, %669 : vector<16x128xf32>
    %671 = arith.addf %643, %670 : vector<16x128xf32>
    %672 = vector.broadcast %240 : vector<1x128xf32> to vector<16x128xf32>
    %673 = arith.mulf %659, %672 : vector<16x128xf32>
    %674 = arith.addf %646, %673 : vector<16x128xf32>
    %675 = vector.broadcast %233 : vector<1x128xf32> to vector<16x128xf32>
    %676 = arith.mulf %659, %675 : vector<16x128xf32>
    %677 = arith.addf %649, %676 : vector<16x128xf32>
    %678 = vector.broadcast %226 : vector<1x128xf32> to vector<16x128xf32>
    %679 = arith.mulf %659, %678 : vector<16x128xf32>
    %680 = arith.addf %652, %679 : vector<16x128xf32>
    %681 = vector.broadcast %219 : vector<1x128xf32> to vector<16x128xf32>
    %682 = arith.mulf %659, %681 : vector<16x128xf32>
    %683 = arith.addf %655, %682 : vector<16x128xf32>
    %684 = vector.broadcast %212 : vector<1x128xf32> to vector<16x128xf32>
    %685 = arith.mulf %659, %684 : vector<16x128xf32>
    %686 = arith.addf %658, %685 : vector<16x128xf32>
    %687 = vector.extract_strided_slice %285 {offsets = [224, 0], sizes = [16, 128], strides = [1, 1]} : vector<256x128xf32> to vector<16x128xf32>
    %688 = vector.broadcast %275 : vector<1x128xf32> to vector<16x128xf32>
    %689 = arith.mulf %687, %688 : vector<16x128xf32>
    %690 = arith.addf %662, %689 : vector<16x128xf32>
    %691 = vector.broadcast %268 : vector<1x128xf32> to vector<16x128xf32>
    %692 = arith.mulf %687, %691 : vector<16x128xf32>
    %693 = arith.addf %665, %692 : vector<16x128xf32>
    %694 = vector.broadcast %261 : vector<1x128xf32> to vector<16x128xf32>
    %695 = arith.mulf %687, %694 : vector<16x128xf32>
    %696 = arith.addf %668, %695 : vector<16x128xf32>
    %697 = vector.broadcast %254 : vector<1x128xf32> to vector<16x128xf32>
    %698 = arith.mulf %687, %697 : vector<16x128xf32>
    %699 = arith.addf %671, %698 : vector<16x128xf32>
    %700 = vector.broadcast %247 : vector<1x128xf32> to vector<16x128xf32>
    %701 = arith.mulf %687, %700 : vector<16x128xf32>
    %702 = arith.addf %674, %701 : vector<16x128xf32>
    %703 = vector.broadcast %240 : vector<1x128xf32> to vector<16x128xf32>
    %704 = arith.mulf %687, %703 : vector<16x128xf32>
    %705 = arith.addf %677, %704 : vector<16x128xf32>
    %706 = vector.broadcast %233 : vector<1x128xf32> to vector<16x128xf32>
    %707 = arith.mulf %687, %706 : vector<16x128xf32>
    %708 = arith.addf %680, %707 : vector<16x128xf32>
    %709 = vector.broadcast %226 : vector<1x128xf32> to vector<16x128xf32>
    %710 = arith.mulf %687, %709 : vector<16x128xf32>
    %711 = arith.addf %683, %710 : vector<16x128xf32>
    %712 = vector.broadcast %219 : vector<1x128xf32> to vector<16x128xf32>
    %713 = arith.mulf %687, %712 : vector<16x128xf32>
    %714 = arith.addf %686, %713 : vector<16x128xf32>
    %715 = vector.extract_strided_slice %285 {offsets = [240, 0], sizes = [16, 128], strides = [1, 1]} : vector<256x128xf32> to vector<16x128xf32>
    %716 = vector.broadcast %282 : vector<1x128xf32> to vector<16x128xf32>
    %717 = arith.mulf %715, %716 : vector<16x128xf32>
    %718 = arith.addf %690, %717 : vector<16x128xf32>
    %719 = vector.broadcast %275 : vector<1x128xf32> to vector<16x128xf32>
    %720 = arith.mulf %715, %719 : vector<16x128xf32>
    %721 = arith.addf %693, %720 : vector<16x128xf32>
    %722 = vector.broadcast %268 : vector<1x128xf32> to vector<16x128xf32>
    %723 = arith.mulf %715, %722 : vector<16x128xf32>
    %724 = arith.addf %696, %723 : vector<16x128xf32>
    %725 = vector.broadcast %261 : vector<1x128xf32> to vector<16x128xf32>
    %726 = arith.mulf %715, %725 : vector<16x128xf32>
    %727 = arith.addf %699, %726 : vector<16x128xf32>
    %728 = vector.broadcast %254 : vector<1x128xf32> to vector<16x128xf32>
    %729 = arith.mulf %715, %728 : vector<16x128xf32>
    %730 = arith.addf %702, %729 : vector<16x128xf32>
    %731 = vector.broadcast %247 : vector<1x128xf32> to vector<16x128xf32>
    %732 = arith.mulf %715, %731 : vector<16x128xf32>
    %733 = arith.addf %705, %732 : vector<16x128xf32>
    %734 = vector.broadcast %240 : vector<1x128xf32> to vector<16x128xf32>
    %735 = arith.mulf %715, %734 : vector<16x128xf32>
    %736 = arith.addf %708, %735 : vector<16x128xf32>
    %737 = vector.broadcast %233 : vector<1x128xf32> to vector<16x128xf32>
    %738 = arith.mulf %715, %737 : vector<16x128xf32>
    %739 = arith.addf %711, %738 : vector<16x128xf32>
    %740 = vector.broadcast %226 : vector<1x128xf32> to vector<16x128xf32>
    %741 = arith.mulf %715, %740 : vector<16x128xf32>
    %742 = arith.addf %714, %741 : vector<16x128xf32>
    %743 = arith.mulf %718, %42 : vector<16x128xf32>
    %cst_125 = arith.constant dense<0.000000e+00> : vector<128xf32>
    %744 = vector.multi_reduction <add>, %743, %cst_125 [0] : vector<16x128xf32> to vector<128xf32>
    %745 = vector.shape_cast %744 : vector<128xf32> to vector<1x128xf32>
    %746 = arith.mulf %721, %42 : vector<16x128xf32>
    %cst_126 = arith.constant dense<0.000000e+00> : vector<128xf32>
    %747 = vector.multi_reduction <add>, %746, %cst_126 [0] : vector<16x128xf32> to vector<128xf32>
    %748 = vector.shape_cast %747 : vector<128xf32> to vector<1x128xf32>
    %749 = arith.mulf %724, %42 : vector<16x128xf32>
    %cst_127 = arith.constant dense<0.000000e+00> : vector<128xf32>
    %750 = vector.multi_reduction <add>, %749, %cst_127 [0] : vector<16x128xf32> to vector<128xf32>
    %751 = vector.shape_cast %750 : vector<128xf32> to vector<1x128xf32>
    %752 = arith.mulf %727, %42 : vector<16x128xf32>
    %cst_128 = arith.constant dense<0.000000e+00> : vector<128xf32>
    %753 = vector.multi_reduction <add>, %752, %cst_128 [0] : vector<16x128xf32> to vector<128xf32>
    %754 = vector.shape_cast %753 : vector<128xf32> to vector<1x128xf32>
    %755 = arith.mulf %730, %42 : vector<16x128xf32>
    %cst_129 = arith.constant dense<0.000000e+00> : vector<128xf32>
    %756 = vector.multi_reduction <add>, %755, %cst_129 [0] : vector<16x128xf32> to vector<128xf32>
    %757 = vector.shape_cast %756 : vector<128xf32> to vector<1x128xf32>
    %758 = arith.mulf %733, %42 : vector<16x128xf32>
    %cst_130 = arith.constant dense<0.000000e+00> : vector<128xf32>
    %759 = vector.multi_reduction <add>, %758, %cst_130 [0] : vector<16x128xf32> to vector<128xf32>
    %760 = vector.shape_cast %759 : vector<128xf32> to vector<1x128xf32>
    %761 = arith.mulf %736, %42 : vector<16x128xf32>
    %cst_131 = arith.constant dense<0.000000e+00> : vector<128xf32>
    %762 = vector.multi_reduction <add>, %761, %cst_131 [0] : vector<16x128xf32> to vector<128xf32>
    %763 = vector.shape_cast %762 : vector<128xf32> to vector<1x128xf32>
    %764 = arith.mulf %739, %42 : vector<16x128xf32>
    %cst_132 = arith.constant dense<0.000000e+00> : vector<128xf32>
    %765 = vector.multi_reduction <add>, %764, %cst_132 [0] : vector<16x128xf32> to vector<128xf32>
    %766 = vector.shape_cast %765 : vector<128xf32> to vector<1x128xf32>
    %767 = arith.mulf %742, %42 : vector<16x128xf32>
    %cst_133 = arith.constant dense<0.000000e+00> : vector<128xf32>
    %768 = vector.multi_reduction <add>, %767, %cst_133 [0] : vector<16x128xf32> to vector<128xf32>
    %769 = vector.shape_cast %768 : vector<128xf32> to vector<1x128xf32>
    %770 = arith.mulf %718, %51 : vector<16x128xf32>
    %cst_134 = arith.constant dense<0.000000e+00> : vector<128xf32>
    %771 = vector.multi_reduction <add>, %770, %cst_134 [0] : vector<16x128xf32> to vector<128xf32>
    %772 = vector.shape_cast %771 : vector<128xf32> to vector<1x128xf32>
    %773 = arith.mulf %721, %51 : vector<16x128xf32>
    %cst_135 = arith.constant dense<0.000000e+00> : vector<128xf32>
    %774 = vector.multi_reduction <add>, %773, %cst_135 [0] : vector<16x128xf32> to vector<128xf32>
    %775 = vector.shape_cast %774 : vector<128xf32> to vector<1x128xf32>
    %776 = arith.mulf %724, %51 : vector<16x128xf32>
    %cst_136 = arith.constant dense<0.000000e+00> : vector<128xf32>
    %777 = vector.multi_reduction <add>, %776, %cst_136 [0] : vector<16x128xf32> to vector<128xf32>
    %778 = vector.shape_cast %777 : vector<128xf32> to vector<1x128xf32>
    %779 = arith.mulf %727, %51 : vector<16x128xf32>
    %cst_137 = arith.constant dense<0.000000e+00> : vector<128xf32>
    %780 = vector.multi_reduction <add>, %779, %cst_137 [0] : vector<16x128xf32> to vector<128xf32>
    %781 = vector.shape_cast %780 : vector<128xf32> to vector<1x128xf32>
    %782 = arith.mulf %730, %51 : vector<16x128xf32>
    %cst_138 = arith.constant dense<0.000000e+00> : vector<128xf32>
    %783 = vector.multi_reduction <add>, %782, %cst_138 [0] : vector<16x128xf32> to vector<128xf32>
    %784 = vector.shape_cast %783 : vector<128xf32> to vector<1x128xf32>
    %785 = arith.mulf %733, %51 : vector<16x128xf32>
    %cst_139 = arith.constant dense<0.000000e+00> : vector<128xf32>
    %786 = vector.multi_reduction <add>, %785, %cst_139 [0] : vector<16x128xf32> to vector<128xf32>
    %787 = vector.shape_cast %786 : vector<128xf32> to vector<1x128xf32>
    %788 = arith.mulf %736, %51 : vector<16x128xf32>
    %cst_140 = arith.constant dense<0.000000e+00> : vector<128xf32>
    %789 = vector.multi_reduction <add>, %788, %cst_140 [0] : vector<16x128xf32> to vector<128xf32>
    %790 = vector.shape_cast %789 : vector<128xf32> to vector<1x128xf32>
    %791 = arith.mulf %739, %51 : vector<16x128xf32>
    %cst_141 = arith.constant dense<0.000000e+00> : vector<128xf32>
    %792 = vector.multi_reduction <add>, %791, %cst_141 [0] : vector<16x128xf32> to vector<128xf32>
    %793 = vector.shape_cast %792 : vector<128xf32> to vector<1x128xf32>
    %794 = arith.mulf %742, %51 : vector<16x128xf32>
    %cst_142 = arith.constant dense<0.000000e+00> : vector<128xf32>
    %795 = vector.multi_reduction <add>, %794, %cst_142 [0] : vector<16x128xf32> to vector<128xf32>
    %796 = vector.shape_cast %795 : vector<128xf32> to vector<1x128xf32>
    %797 = arith.mulf %718, %60 : vector<16x128xf32>
    %cst_143 = arith.constant dense<0.000000e+00> : vector<128xf32>
    %798 = vector.multi_reduction <add>, %797, %cst_143 [0] : vector<16x128xf32> to vector<128xf32>
    %799 = vector.shape_cast %798 : vector<128xf32> to vector<1x128xf32>
    %800 = arith.mulf %721, %60 : vector<16x128xf32>
    %cst_144 = arith.constant dense<0.000000e+00> : vector<128xf32>
    %801 = vector.multi_reduction <add>, %800, %cst_144 [0] : vector<16x128xf32> to vector<128xf32>
    %802 = vector.shape_cast %801 : vector<128xf32> to vector<1x128xf32>
    %803 = arith.mulf %724, %60 : vector<16x128xf32>
    %cst_145 = arith.constant dense<0.000000e+00> : vector<128xf32>
    %804 = vector.multi_reduction <add>, %803, %cst_145 [0] : vector<16x128xf32> to vector<128xf32>
    %805 = vector.shape_cast %804 : vector<128xf32> to vector<1x128xf32>
    %806 = arith.mulf %727, %60 : vector<16x128xf32>
    %cst_146 = arith.constant dense<0.000000e+00> : vector<128xf32>
    %807 = vector.multi_reduction <add>, %806, %cst_146 [0] : vector<16x128xf32> to vector<128xf32>
    %808 = vector.shape_cast %807 : vector<128xf32> to vector<1x128xf32>
    %809 = arith.mulf %730, %60 : vector<16x128xf32>
    %cst_147 = arith.constant dense<0.000000e+00> : vector<128xf32>
    %810 = vector.multi_reduction <add>, %809, %cst_147 [0] : vector<16x128xf32> to vector<128xf32>
    %811 = vector.shape_cast %810 : vector<128xf32> to vector<1x128xf32>
    %812 = arith.mulf %733, %60 : vector<16x128xf32>
    %cst_148 = arith.constant dense<0.000000e+00> : vector<128xf32>
    %813 = vector.multi_reduction <add>, %812, %cst_148 [0] : vector<16x128xf32> to vector<128xf32>
    %814 = vector.shape_cast %813 : vector<128xf32> to vector<1x128xf32>
    %815 = arith.mulf %736, %60 : vector<16x128xf32>
    %cst_149 = arith.constant dense<0.000000e+00> : vector<128xf32>
    %816 = vector.multi_reduction <add>, %815, %cst_149 [0] : vector<16x128xf32> to vector<128xf32>
    %817 = vector.shape_cast %816 : vector<128xf32> to vector<1x128xf32>
    %818 = arith.mulf %739, %60 : vector<16x128xf32>
    %cst_150 = arith.constant dense<0.000000e+00> : vector<128xf32>
    %819 = vector.multi_reduction <add>, %818, %cst_150 [0] : vector<16x128xf32> to vector<128xf32>
    %820 = vector.shape_cast %819 : vector<128xf32> to vector<1x128xf32>
    %821 = arith.mulf %742, %60 : vector<16x128xf32>
    %cst_151 = arith.constant dense<0.000000e+00> : vector<128xf32>
    %822 = vector.multi_reduction <add>, %821, %cst_151 [0] : vector<16x128xf32> to vector<128xf32>
    %823 = vector.shape_cast %822 : vector<128xf32> to vector<1x128xf32>
    %824 = arith.mulf %718, %69 : vector<16x128xf32>
    %cst_152 = arith.constant dense<0.000000e+00> : vector<128xf32>
    %825 = vector.multi_reduction <add>, %824, %cst_152 [0] : vector<16x128xf32> to vector<128xf32>
    %826 = vector.shape_cast %825 : vector<128xf32> to vector<1x128xf32>
    %827 = arith.mulf %721, %69 : vector<16x128xf32>
    %cst_153 = arith.constant dense<0.000000e+00> : vector<128xf32>
    %828 = vector.multi_reduction <add>, %827, %cst_153 [0] : vector<16x128xf32> to vector<128xf32>
    %829 = vector.shape_cast %828 : vector<128xf32> to vector<1x128xf32>
    %830 = arith.mulf %724, %69 : vector<16x128xf32>
    %cst_154 = arith.constant dense<0.000000e+00> : vector<128xf32>
    %831 = vector.multi_reduction <add>, %830, %cst_154 [0] : vector<16x128xf32> to vector<128xf32>
    %832 = vector.shape_cast %831 : vector<128xf32> to vector<1x128xf32>
    %833 = arith.mulf %727, %69 : vector<16x128xf32>
    %cst_155 = arith.constant dense<0.000000e+00> : vector<128xf32>
    %834 = vector.multi_reduction <add>, %833, %cst_155 [0] : vector<16x128xf32> to vector<128xf32>
    %835 = vector.shape_cast %834 : vector<128xf32> to vector<1x128xf32>
    %836 = arith.mulf %730, %69 : vector<16x128xf32>
    %cst_156 = arith.constant dense<0.000000e+00> : vector<128xf32>
    %837 = vector.multi_reduction <add>, %836, %cst_156 [0] : vector<16x128xf32> to vector<128xf32>
    %838 = vector.shape_cast %837 : vector<128xf32> to vector<1x128xf32>
    %839 = arith.mulf %733, %69 : vector<16x128xf32>
    %cst_157 = arith.constant dense<0.000000e+00> : vector<128xf32>
    %840 = vector.multi_reduction <add>, %839, %cst_157 [0] : vector<16x128xf32> to vector<128xf32>
    %841 = vector.shape_cast %840 : vector<128xf32> to vector<1x128xf32>
    %842 = arith.mulf %736, %69 : vector<16x128xf32>
    %cst_158 = arith.constant dense<0.000000e+00> : vector<128xf32>
    %843 = vector.multi_reduction <add>, %842, %cst_158 [0] : vector<16x128xf32> to vector<128xf32>
    %844 = vector.shape_cast %843 : vector<128xf32> to vector<1x128xf32>
    %845 = arith.mulf %739, %69 : vector<16x128xf32>
    %cst_159 = arith.constant dense<0.000000e+00> : vector<128xf32>
    %846 = vector.multi_reduction <add>, %845, %cst_159 [0] : vector<16x128xf32> to vector<128xf32>
    %847 = vector.shape_cast %846 : vector<128xf32> to vector<1x128xf32>
    %848 = arith.mulf %742, %69 : vector<16x128xf32>
    %cst_160 = arith.constant dense<0.000000e+00> : vector<128xf32>
    %849 = vector.multi_reduction <add>, %848, %cst_160 [0] : vector<16x128xf32> to vector<128xf32>
    %850 = vector.shape_cast %849 : vector<128xf32> to vector<1x128xf32>
    %851 = arith.mulf %718, %78 : vector<16x128xf32>
    %cst_161 = arith.constant dense<0.000000e+00> : vector<128xf32>
    %852 = vector.multi_reduction <add>, %851, %cst_161 [0] : vector<16x128xf32> to vector<128xf32>
    %853 = vector.shape_cast %852 : vector<128xf32> to vector<1x128xf32>
    %854 = arith.mulf %721, %78 : vector<16x128xf32>
    %cst_162 = arith.constant dense<0.000000e+00> : vector<128xf32>
    %855 = vector.multi_reduction <add>, %854, %cst_162 [0] : vector<16x128xf32> to vector<128xf32>
    %856 = vector.shape_cast %855 : vector<128xf32> to vector<1x128xf32>
    %857 = arith.mulf %724, %78 : vector<16x128xf32>
    %cst_163 = arith.constant dense<0.000000e+00> : vector<128xf32>
    %858 = vector.multi_reduction <add>, %857, %cst_163 [0] : vector<16x128xf32> to vector<128xf32>
    %859 = vector.shape_cast %858 : vector<128xf32> to vector<1x128xf32>
    %860 = arith.mulf %727, %78 : vector<16x128xf32>
    %cst_164 = arith.constant dense<0.000000e+00> : vector<128xf32>
    %861 = vector.multi_reduction <add>, %860, %cst_164 [0] : vector<16x128xf32> to vector<128xf32>
    %862 = vector.shape_cast %861 : vector<128xf32> to vector<1x128xf32>
    %863 = arith.mulf %730, %78 : vector<16x128xf32>
    %cst_165 = arith.constant dense<0.000000e+00> : vector<128xf32>
    %864 = vector.multi_reduction <add>, %863, %cst_165 [0] : vector<16x128xf32> to vector<128xf32>
    %865 = vector.shape_cast %864 : vector<128xf32> to vector<1x128xf32>
    %866 = arith.mulf %733, %78 : vector<16x128xf32>
    %cst_166 = arith.constant dense<0.000000e+00> : vector<128xf32>
    %867 = vector.multi_reduction <add>, %866, %cst_166 [0] : vector<16x128xf32> to vector<128xf32>
    %868 = vector.shape_cast %867 : vector<128xf32> to vector<1x128xf32>
    %869 = arith.mulf %736, %78 : vector<16x128xf32>
    %cst_167 = arith.constant dense<0.000000e+00> : vector<128xf32>
    %870 = vector.multi_reduction <add>, %869, %cst_167 [0] : vector<16x128xf32> to vector<128xf32>
    %871 = vector.shape_cast %870 : vector<128xf32> to vector<1x128xf32>
    %872 = arith.mulf %739, %78 : vector<16x128xf32>
    %cst_168 = arith.constant dense<0.000000e+00> : vector<128xf32>
    %873 = vector.multi_reduction <add>, %872, %cst_168 [0] : vector<16x128xf32> to vector<128xf32>
    %874 = vector.shape_cast %873 : vector<128xf32> to vector<1x128xf32>
    %875 = arith.mulf %742, %78 : vector<16x128xf32>
    %cst_169 = arith.constant dense<0.000000e+00> : vector<128xf32>
    %876 = vector.multi_reduction <add>, %875, %cst_169 [0] : vector<16x128xf32> to vector<128xf32>
    %877 = vector.shape_cast %876 : vector<128xf32> to vector<1x128xf32>
    %878 = arith.mulf %718, %87 : vector<16x128xf32>
    %cst_170 = arith.constant dense<0.000000e+00> : vector<128xf32>
    %879 = vector.multi_reduction <add>, %878, %cst_170 [0] : vector<16x128xf32> to vector<128xf32>
    %880 = vector.shape_cast %879 : vector<128xf32> to vector<1x128xf32>
    %881 = arith.mulf %721, %87 : vector<16x128xf32>
    %cst_171 = arith.constant dense<0.000000e+00> : vector<128xf32>
    %882 = vector.multi_reduction <add>, %881, %cst_171 [0] : vector<16x128xf32> to vector<128xf32>
    %883 = vector.shape_cast %882 : vector<128xf32> to vector<1x128xf32>
    %884 = arith.mulf %724, %87 : vector<16x128xf32>
    %cst_172 = arith.constant dense<0.000000e+00> : vector<128xf32>
    %885 = vector.multi_reduction <add>, %884, %cst_172 [0] : vector<16x128xf32> to vector<128xf32>
    %886 = vector.shape_cast %885 : vector<128xf32> to vector<1x128xf32>
    %887 = arith.mulf %727, %87 : vector<16x128xf32>
    %cst_173 = arith.constant dense<0.000000e+00> : vector<128xf32>
    %888 = vector.multi_reduction <add>, %887, %cst_173 [0] : vector<16x128xf32> to vector<128xf32>
    %889 = vector.shape_cast %888 : vector<128xf32> to vector<1x128xf32>
    %890 = arith.mulf %730, %87 : vector<16x128xf32>
    %cst_174 = arith.constant dense<0.000000e+00> : vector<128xf32>
    %891 = vector.multi_reduction <add>, %890, %cst_174 [0] : vector<16x128xf32> to vector<128xf32>
    %892 = vector.shape_cast %891 : vector<128xf32> to vector<1x128xf32>
    %893 = arith.mulf %733, %87 : vector<16x128xf32>
    %cst_175 = arith.constant dense<0.000000e+00> : vector<128xf32>
    %894 = vector.multi_reduction <add>, %893, %cst_175 [0] : vector<16x128xf32> to vector<128xf32>
    %895 = vector.shape_cast %894 : vector<128xf32> to vector<1x128xf32>
    %896 = arith.mulf %736, %87 : vector<16x128xf32>
    %cst_176 = arith.constant dense<0.000000e+00> : vector<128xf32>
    %897 = vector.multi_reduction <add>, %896, %cst_176 [0] : vector<16x128xf32> to vector<128xf32>
    %898 = vector.shape_cast %897 : vector<128xf32> to vector<1x128xf32>
    %899 = arith.mulf %739, %87 : vector<16x128xf32>
    %cst_177 = arith.constant dense<0.000000e+00> : vector<128xf32>
    %900 = vector.multi_reduction <add>, %899, %cst_177 [0] : vector<16x128xf32> to vector<128xf32>
    %901 = vector.shape_cast %900 : vector<128xf32> to vector<1x128xf32>
    %902 = arith.mulf %742, %87 : vector<16x128xf32>
    %cst_178 = arith.constant dense<0.000000e+00> : vector<128xf32>
    %903 = vector.multi_reduction <add>, %902, %cst_178 [0] : vector<16x128xf32> to vector<128xf32>
    %904 = vector.shape_cast %903 : vector<128xf32> to vector<1x128xf32>
    %905 = arith.mulf %718, %96 : vector<16x128xf32>
    %cst_179 = arith.constant dense<0.000000e+00> : vector<128xf32>
    %906 = vector.multi_reduction <add>, %905, %cst_179 [0] : vector<16x128xf32> to vector<128xf32>
    %907 = vector.shape_cast %906 : vector<128xf32> to vector<1x128xf32>
    %908 = arith.mulf %721, %96 : vector<16x128xf32>
    %cst_180 = arith.constant dense<0.000000e+00> : vector<128xf32>
    %909 = vector.multi_reduction <add>, %908, %cst_180 [0] : vector<16x128xf32> to vector<128xf32>
    %910 = vector.shape_cast %909 : vector<128xf32> to vector<1x128xf32>
    %911 = arith.mulf %724, %96 : vector<16x128xf32>
    %cst_181 = arith.constant dense<0.000000e+00> : vector<128xf32>
    %912 = vector.multi_reduction <add>, %911, %cst_181 [0] : vector<16x128xf32> to vector<128xf32>
    %913 = vector.shape_cast %912 : vector<128xf32> to vector<1x128xf32>
    %914 = arith.mulf %727, %96 : vector<16x128xf32>
    %cst_182 = arith.constant dense<0.000000e+00> : vector<128xf32>
    %915 = vector.multi_reduction <add>, %914, %cst_182 [0] : vector<16x128xf32> to vector<128xf32>
    %916 = vector.shape_cast %915 : vector<128xf32> to vector<1x128xf32>
    %917 = arith.mulf %730, %96 : vector<16x128xf32>
    %cst_183 = arith.constant dense<0.000000e+00> : vector<128xf32>
    %918 = vector.multi_reduction <add>, %917, %cst_183 [0] : vector<16x128xf32> to vector<128xf32>
    %919 = vector.shape_cast %918 : vector<128xf32> to vector<1x128xf32>
    %920 = arith.mulf %733, %96 : vector<16x128xf32>
    %cst_184 = arith.constant dense<0.000000e+00> : vector<128xf32>
    %921 = vector.multi_reduction <add>, %920, %cst_184 [0] : vector<16x128xf32> to vector<128xf32>
    %922 = vector.shape_cast %921 : vector<128xf32> to vector<1x128xf32>
    %923 = arith.mulf %736, %96 : vector<16x128xf32>
    %cst_185 = arith.constant dense<0.000000e+00> : vector<128xf32>
    %924 = vector.multi_reduction <add>, %923, %cst_185 [0] : vector<16x128xf32> to vector<128xf32>
    %925 = vector.shape_cast %924 : vector<128xf32> to vector<1x128xf32>
    %926 = arith.mulf %739, %96 : vector<16x128xf32>
    %cst_186 = arith.constant dense<0.000000e+00> : vector<128xf32>
    %927 = vector.multi_reduction <add>, %926, %cst_186 [0] : vector<16x128xf32> to vector<128xf32>
    %928 = vector.shape_cast %927 : vector<128xf32> to vector<1x128xf32>
    %929 = arith.mulf %742, %96 : vector<16x128xf32>
    %cst_187 = arith.constant dense<0.000000e+00> : vector<128xf32>
    %930 = vector.multi_reduction <add>, %929, %cst_187 [0] : vector<16x128xf32> to vector<128xf32>
    %931 = vector.shape_cast %930 : vector<128xf32> to vector<1x128xf32>
    %932 = arith.mulf %718, %105 : vector<16x128xf32>
    %cst_188 = arith.constant dense<0.000000e+00> : vector<128xf32>
    %933 = vector.multi_reduction <add>, %932, %cst_188 [0] : vector<16x128xf32> to vector<128xf32>
    %934 = vector.shape_cast %933 : vector<128xf32> to vector<1x128xf32>
    %935 = arith.mulf %721, %105 : vector<16x128xf32>
    %cst_189 = arith.constant dense<0.000000e+00> : vector<128xf32>
    %936 = vector.multi_reduction <add>, %935, %cst_189 [0] : vector<16x128xf32> to vector<128xf32>
    %937 = vector.shape_cast %936 : vector<128xf32> to vector<1x128xf32>
    %938 = arith.mulf %724, %105 : vector<16x128xf32>
    %cst_190 = arith.constant dense<0.000000e+00> : vector<128xf32>
    %939 = vector.multi_reduction <add>, %938, %cst_190 [0] : vector<16x128xf32> to vector<128xf32>
    %940 = vector.shape_cast %939 : vector<128xf32> to vector<1x128xf32>
    %941 = arith.mulf %727, %105 : vector<16x128xf32>
    %cst_191 = arith.constant dense<0.000000e+00> : vector<128xf32>
    %942 = vector.multi_reduction <add>, %941, %cst_191 [0] : vector<16x128xf32> to vector<128xf32>
    %943 = vector.shape_cast %942 : vector<128xf32> to vector<1x128xf32>
    %944 = arith.mulf %730, %105 : vector<16x128xf32>
    %cst_192 = arith.constant dense<0.000000e+00> : vector<128xf32>
    %945 = vector.multi_reduction <add>, %944, %cst_192 [0] : vector<16x128xf32> to vector<128xf32>
    %946 = vector.shape_cast %945 : vector<128xf32> to vector<1x128xf32>
    %947 = arith.mulf %733, %105 : vector<16x128xf32>
    %cst_193 = arith.constant dense<0.000000e+00> : vector<128xf32>
    %948 = vector.multi_reduction <add>, %947, %cst_193 [0] : vector<16x128xf32> to vector<128xf32>
    %949 = vector.shape_cast %948 : vector<128xf32> to vector<1x128xf32>
    %950 = arith.mulf %736, %105 : vector<16x128xf32>
    %cst_194 = arith.constant dense<0.000000e+00> : vector<128xf32>
    %951 = vector.multi_reduction <add>, %950, %cst_194 [0] : vector<16x128xf32> to vector<128xf32>
    %952 = vector.shape_cast %951 : vector<128xf32> to vector<1x128xf32>
    %953 = arith.mulf %739, %105 : vector<16x128xf32>
    %cst_195 = arith.constant dense<0.000000e+00> : vector<128xf32>
    %954 = vector.multi_reduction <add>, %953, %cst_195 [0] : vector<16x128xf32> to vector<128xf32>
    %955 = vector.shape_cast %954 : vector<128xf32> to vector<1x128xf32>
    %956 = arith.mulf %742, %105 : vector<16x128xf32>
    %cst_196 = arith.constant dense<0.000000e+00> : vector<128xf32>
    %957 = vector.multi_reduction <add>, %956, %cst_196 [0] : vector<16x128xf32> to vector<128xf32>
    %958 = vector.shape_cast %957 : vector<128xf32> to vector<1x128xf32>
    %959 = arith.mulf %718, %114 : vector<16x128xf32>
    %cst_197 = arith.constant dense<0.000000e+00> : vector<128xf32>
    %960 = vector.multi_reduction <add>, %959, %cst_197 [0] : vector<16x128xf32> to vector<128xf32>
    %961 = vector.shape_cast %960 : vector<128xf32> to vector<1x128xf32>
    %962 = arith.mulf %721, %114 : vector<16x128xf32>
    %cst_198 = arith.constant dense<0.000000e+00> : vector<128xf32>
    %963 = vector.multi_reduction <add>, %962, %cst_198 [0] : vector<16x128xf32> to vector<128xf32>
    %964 = vector.shape_cast %963 : vector<128xf32> to vector<1x128xf32>
    %965 = arith.mulf %724, %114 : vector<16x128xf32>
    %cst_199 = arith.constant dense<0.000000e+00> : vector<128xf32>
    %966 = vector.multi_reduction <add>, %965, %cst_199 [0] : vector<16x128xf32> to vector<128xf32>
    %967 = vector.shape_cast %966 : vector<128xf32> to vector<1x128xf32>
    %968 = arith.mulf %727, %114 : vector<16x128xf32>
    %cst_200 = arith.constant dense<0.000000e+00> : vector<128xf32>
    %969 = vector.multi_reduction <add>, %968, %cst_200 [0] : vector<16x128xf32> to vector<128xf32>
    %970 = vector.shape_cast %969 : vector<128xf32> to vector<1x128xf32>
    %971 = arith.mulf %730, %114 : vector<16x128xf32>
    %cst_201 = arith.constant dense<0.000000e+00> : vector<128xf32>
    %972 = vector.multi_reduction <add>, %971, %cst_201 [0] : vector<16x128xf32> to vector<128xf32>
    %973 = vector.shape_cast %972 : vector<128xf32> to vector<1x128xf32>
    %974 = arith.mulf %733, %114 : vector<16x128xf32>
    %cst_202 = arith.constant dense<0.000000e+00> : vector<128xf32>
    %975 = vector.multi_reduction <add>, %974, %cst_202 [0] : vector<16x128xf32> to vector<128xf32>
    %976 = vector.shape_cast %975 : vector<128xf32> to vector<1x128xf32>
    %977 = arith.mulf %736, %114 : vector<16x128xf32>
    %cst_203 = arith.constant dense<0.000000e+00> : vector<128xf32>
    %978 = vector.multi_reduction <add>, %977, %cst_203 [0] : vector<16x128xf32> to vector<128xf32>
    %979 = vector.shape_cast %978 : vector<128xf32> to vector<1x128xf32>
    %980 = arith.mulf %739, %114 : vector<16x128xf32>
    %cst_204 = arith.constant dense<0.000000e+00> : vector<128xf32>
    %981 = vector.multi_reduction <add>, %980, %cst_204 [0] : vector<16x128xf32> to vector<128xf32>
    %982 = vector.shape_cast %981 : vector<128xf32> to vector<1x128xf32>
    %983 = arith.mulf %742, %114 : vector<16x128xf32>
    %cst_205 = arith.constant dense<0.000000e+00> : vector<128xf32>
    %984 = vector.multi_reduction <add>, %983, %cst_205 [0] : vector<16x128xf32> to vector<128xf32>
    %985 = vector.shape_cast %984 : vector<128xf32> to vector<1x128xf32>
    %986 = tpu.concatenate %745, %748, %751, %754, %757, %760, %763, %766, %769, %772, %775, %778, %781, %784, %787, %790 in 0 : vector<1x128xf32>, vector<1x128xf32>, vector<1x128xf32>, vector<1x128xf32>, vector<1x128xf32>, vector<1x128xf32>, vector<1x128xf32>, vector<1x128xf32>, vector<1x128xf32>, vector<1x128xf32>, vector<1x128xf32>, vector<1x128xf32>, vector<1x128xf32>, vector<1x128xf32>, vector<1x128xf32>, vector<1x128xf32> -> vector<16x128xf32>
    %987 = tpu.concatenate %793, %796, %799, %802, %805, %808, %811, %814, %817, %820, %823, %826, %829, %832, %835, %838 in 0 : vector<1x128xf32>, vector<1x128xf32>, vector<1x128xf32>, vector<1x128xf32>, vector<1x128xf32>, vector<1x128xf32>, vector<1x128xf32>, vector<1x128xf32>, vector<1x128xf32>, vector<1x128xf32>, vector<1x128xf32>, vector<1x128xf32>, vector<1x128xf32>, vector<1x128xf32>, vector<1x128xf32>, vector<1x128xf32> -> vector<16x128xf32>
    %988 = tpu.concatenate %841, %844, %847, %850, %853, %856, %859, %862, %865, %868, %871, %874, %877, %880, %883, %886 in 0 : vector<1x128xf32>, vector<1x128xf32>, vector<1x128xf32>, vector<1x128xf32>, vector<1x128xf32>, vector<1x128xf32>, vector<1x128xf32>, vector<1x128xf32>, vector<1x128xf32>, vector<1x128xf32>, vector<1x128xf32>, vector<1x128xf32>, vector<1x128xf32>, vector<1x128xf32>, vector<1x128xf32>, vector<1x128xf32> -> vector<16x128xf32>
    %989 = tpu.concatenate %889, %892, %895, %898, %901, %904, %907, %910, %913, %916, %919, %922, %925, %928, %931, %934 in 0 : vector<1x128xf32>, vector<1x128xf32>, vector<1x128xf32>, vector<1x128xf32>, vector<1x128xf32>, vector<1x128xf32>, vector<1x128xf32>, vector<1x128xf32>, vector<1x128xf32>, vector<1x128xf32>, vector<1x128xf32>, vector<1x128xf32>, vector<1x128xf32>, vector<1x128xf32>, vector<1x128xf32>, vector<1x128xf32> -> vector<16x128xf32>
    %990 = tpu.concatenate %937, %940, %943, %946, %949, %952, %955, %958, %961, %964, %967, %970, %973, %976, %979, %982 in 0 : vector<1x128xf32>, vector<1x128xf32>, vector<1x128xf32>, vector<1x128xf32>, vector<1x128xf32>, vector<1x128xf32>, vector<1x128xf32>, vector<1x128xf32>, vector<1x128xf32>, vector<1x128xf32>, vector<1x128xf32>, vector<1x128xf32>, vector<1x128xf32>, vector<1x128xf32>, vector<1x128xf32>, vector<1x128xf32> -> vector<16x128xf32>
    %991 = tpu.concatenate %986, %987, %988, %989, %990, %985 in 0 : vector<16x128xf32>, vector<16x128xf32>, vector<16x128xf32>, vector<16x128xf32>, vector<16x128xf32>, vector<1x128xf32> -> vector<81x128xf32>
    %c0_206 = arith.constant 0 : index
    %c0_207 = arith.constant 0 : index
    %c0_208 = arith.constant 0 : index
    %c0_209 = arith.constant 0 : index
    %992 = vector.load %arg5[%c0_206, %c0_207, %c0_208, %c0_209] : memref<1x1x81x128xf32, #tpu.memory_space<vmem>>, vector<1x1x81x128xf32>
    %993 = vector.shape_cast %992 : vector<1x1x81x128xf32> to vector<81x128xf32>
    %994 = vector.shape_cast %991 : vector<81x128xf32> to vector<1x1x81x128xf32>
    tpu.vector_store %arg5[%c0_206, %c0_207, %c0_208, %c0_209], %994 {strides = array<i32>} : memref<1x1x81x128xf32, #tpu.memory_space<vmem>>, vector<1x1x81x128xf32>,
    return
  }
  func.func @transform_0(%arg0: i32, %arg1: i32) -> (i32, i32, i32) {
    %c0_i32 = arith.constant 0 : i32
    %c0_i32_0 = arith.constant 0 : i32
    %c0_i32_1 = arith.constant 0 : i32
    return %arg0, %c0_i32, %c0_i32_0 : i32, i32, i32
  }
  func.func @transform_1(%arg0: i32, %arg1: i32) -> (i32, i32, i32) {
    %c0_i32 = arith.constant 0 : i32
    %c0_i32_0 = arith.constant 0 : i32
    return %arg0, %c0_i32, %arg1 : i32, i32, i32
  }
  func.func @transform_2(%arg0: i32, %arg1: i32) -> (i32, i32, i32) {
    %c0_i32 = arith.constant 0 : i32
    %c0_i32_0 = arith.constant 0 : i32
    return %arg0, %c0_i32, %arg1 : i32, i32, i32
  }
  func.func @transform_3(%arg0: i32, %arg1: i32) -> (i32, i32, i32, i32) {
    %c0_i32 = arith.constant 0 : i32
    %c0_i32_0 = arith.constant 0 : i32
    %c0_i32_1 = arith.constant 0 : i32
    return %arg0, %c0_i32, %c0_i32_0, %arg1 : i32, i32, i32, i32
  }
}

</mosaic_0001>

<bundles_post_ra>
// kernel: tpu_custom_call.1
= control target key start
LH: loop header
LB: loop body
LE: loop exit
PB: predicated region body
PF: predicated region fallthrough
CT: control target
= control target key end

     0   :  { %s8997_s0 = inlined_call_operand.hbm [shape: f32[2,256,256], index: 0, kind: input, shape index: {}]   ;;  %s8998_s1 = inlined_call_operand.hbm [shape: f32[2,2,256], index: 1, kind: input, shape index: {}]   ;;  %s8999_s2 = inlined_call_operand.hbm [shape: f32[2,2,256], index: 2, kind: input, shape index: {}]   ;;  %s9000_s3 = inlined_call_operand.vmem [shape: f32[2,1,81,256], index: 3, kind: output, shape index: {}]  }
   0x1   :  { %9200 = sst [smem:[#allocation87_spill]] %s8998_s1 }
   0x2   :  { %9201 = sst [smem:[#allocation88_spill]] %s8999_s2 }
   0x3   :  { %9202 = sst [smem:[#allocation89_spill]] %s9000_s3 }
   0x4   :  { %8 = vsyncpa [#allocation3], 0 }
   0x5   :  { %10 = vsyncpa [#allocation3 + $0x1], 0 }
   0x6   :  { %11 = vsyncpa [#allocation5], 0 }
   0x7   :  { %13 = vsyncpa [#allocation5 + $0x1], 0  ;;  %s5210_s12 = smov 0   ;;  %s5212_s13 = smov 0  }
   0x8   :  { %s5214_s14 = smov 0   ;;  %s5216_s15 = smov 0  }
   0x9   :  { %s5218_s16 = smov 0   ;;  %s5220_s17 = smov 0  }
   0xa   :  { %s5222_s18 = smov 0   ;;  %s5224_s19 = smov 0  }
   0xb   :  { %s5226_s20 = smov 0   ;;  %s5228_s21 = smov 0  }
   0xc   :  { %s5230_s22 = smov 0  }
   0xd LB: > { %9203 = sst [smem:[#allocation10_spill]] %s5154_s14  ;;  %s5264_s23 = sadd.s32 4294967295, %s5186_s22   ;;  %s5186_s22 = sphi %s5230_s22, %s19_s22   ;;  %s5182_s21 = sphi %s5228_s21, %s9736_s21   ;;  %s5178_s20 = sphi %s5226_s20, %s9729_s20   ;;  %s5174_s19 = sphi %s5224_s19, %s9735_s19   ;;  %s5170_s18 = sphi %s5222_s18, %s9728_s18   ;;  %s5166_s17 = sphi %s5220_s17, %s9727_s17   ;;  %s5162_s16 = sphi %s5218_s16, %s9734_s16   ;;  %s5158_s15 = sphi %s5216_s15, %s9733_s15   ;;  %s5154_s14 = sphi %s5214_s14, %s9725_s14   ;;  %s5150_s13 = sphi %s5212_s13, %s9732_s13   ;;  %s5146_s12 = sphi %s5210_s12, %s9731_s12  }
   0xe   : > { %9204 = sst [smem:[#allocation11_spill]] %s5166_s17  ;;  %s28_s24 = sadd.s32 1, %s5178_s20 }
   0xf   : > { %9205 = sst [smem:[#allocation12_spill]] %s5178_s20  ;;  %p29_p0 = scmp.ge.s32.totalorder %s28_s24, 2 }
  0x10   : > { %9206 = sst [smem:[#allocation13_spill]] %s5186_s22  ;;  %s31_s25 = sadd.s32 1, %s5182_s21 }
  0x11   : > { %s38_s26 = sadd.s32 1, %s5166_s17  ;;  %p45_p1 = scmp.ne.s32.totalorder %s5166_s17, %s5162_s16 }
  0x12   : > { %s9738_s24 = smov (%p29_p0, %s28_s24), 0  ;;  %s9740_s25 = smov (!%p29_p0, %s31_s25), %s5182_s21 }
  0x13   : > { %9207 = sst [smem:[#allocation14_spill]] %s9738_s24  ;;  %p46_p2 = scmp.eq.s32.totalorder %s5186_s22, 0 }
  0x14   : > { %p51_p3 = scmp.ne.s32.totalorder %s5162_s16, %s5158_s15  ;;  %p33_p4 = scmp.ge.s32.totalorder %s9740_s25, 2 }
  0x15   : > { %p52_p5 = scmp.eq.s32.totalorder %s5264_s23, 0  ;;  %p5279_p6 = por %p46_p2, %p45_p1 }
  0x16   : > { %s62_s28 = ssub.s32 %s5178_s20, %s9738_s24  ;;  %s9742_s25 = smov (%p33_p4, %s9740_s25), 0 }
  0x17   : > { %9209 = sst [smem:[#allocation15_spill]] %s9742_s25  ;;  %p5289_p7 = por %p52_p5, %p51_p3 }
  0x18   : > { %s66_s30 = sadd.s32 1, %s5154_s14  ;;  %s35_s4 = ssub.s32 %s5182_s21, %s9742_s25 }
  0x19   : > { %p73_p8 = scmp.ne.s32.totalorder %s5154_s14, %s5150_s13  ;;  %p36_p9 = scmp.eq.s32.totalorder %s35_s4, 0 }
  0x1a   : > { %s63_s5 = sor.u32 %s62_s28, %s35_s4  ;;  %p79_p12 = scmp.ne.s32.totalorder %s5150_s13, %s5146_s12 }
  0x1b   : > { %p64_p10 = scmp.eq.s32.totalorder %s63_s5, 0  ;;  %p5300_p11 = por %p73_p8, %p46_p2 }
  0x1c   : > { %s5305_s7 = scalar_select %p36_p9, %s5166_s17, %s38_s26  }
  0x1d   : > { %s5308_s8 = scalar_select %p64_p10, %s5154_s14, %s66_s30  }
  0x1e   : > { %9212 = sst [smem:[#allocation16_spill]] %s5305_s7  ;;  %p133_p13 = scmp.eq.s32.totalorder %s5264_s23, 3 }
  0x1f   : > { %9213 = sst [smem:[#allocation17_spill]] %s5308_s8  ;;  %p4907_p0 = scmp.lt.s32.totalorder %s5186_s22, 4 }
  0x20   : > { %p5316_p1 = por %p79_p12, %p52_p5  ;;  %p5320_p3 = por %p133_p13, %p73_p8 }
  0x21   : > { %p5328_p2 = pnand %p4907_p0, %p5279_p6  ;;  %s181_s12 = sand.u32 1, %s5186_s22  }
  0x22   : > { %s183_s15 = sand.u32 1, %s5154_s14   ;;  %s4876_s28 = sshll.u32 %s5182_s21, 1 }
  0x23   : > { %s5334_s26 = sshll.u32 %s183_s15, 1  ;;  %s189_s30 = sadd.s32 %s5178_s20, %s4876_s28 }
  0x24   : > { %s185_s4 = scalar_lea.vmem [#allocation4], %s5334_s26  ;;  %s4877_s25 = sshll.u32 %s189_s30, 1 }
  0x25   : > { %s195_s5 = sshll.u32 %s185_s4, 4  ;;  %s9217_s1 = sld [smem:[#allocation87_spill]]  ;;  %s196_s5 = int_to_ptr.vmem [resolvable:$true] %s195_s5 }
  0x26   : > { %p5346_p4 = pnand %p4907_p0, %p5300_p11  ;;  %s182_s14 = scalar_lea.sflag [#allocation5], %s181_s12 }
  0x27   : > { %s9219_s2 = sld [smem:[#allocation88_spill]]  ;;  %p4881_p5 = scmp.ge.s32.totalorder %s5186_s22, 1 }
  0x28   : > { %p221_p6 = scmp.lt.s32.totalorder %s5186_s22, 5  ;;  %s159_s6 = sand.u32 1, %s5166_s17  }
  0x29   : > { %s4888_s27 = sshll.u32 %s5182_s21, 9  ;;  %s5188_s4 = smov 256  }
  0x2a   : > { %p5357_p8 = pnand %p4881_p5, %p221_p6  ;;  %s168_s12 = scalar_lea.hbm %s8997_s0, %s4888_s27 }
  0x2b   : > { %s191_s7 = scalar_lea.hbm %s9217_s1, %s4877_s25  ;;  %s4872_s1 = sshll.u32 %s159_s6, 9 }
  0x2c   : > { %s193_s15 = sshll.u32 %s191_s7, 4  ;;  %s206_s3 = scalar_lea.vmem [#allocation6], %s5334_s26  ;;  %s194_s15 = int_to_ptr.hbm [resolvable:$true] %s193_s15 }
  0x2d   : > { %4903 = dma.hbm_to_vmem [thread:$0]  (!%p5346_p4), %s194_s15, 32, %s196_s5, %s182_s14  }
  0x2e   : > { %s212_s30 = scalar_lea.hbm %s9219_s2, %s4877_s25  ;;  %s169_s5 = sshll.u32 %s168_s12, 4  ;;  %s170_s5 = int_to_ptr.hbm [resolvable:$true] %s169_s5 }
  0x2f   : > { %s163_s15 = scalar_lea.vmem [#allocation2], %s4872_s1  ;;  %s160_s25 = scalar_lea.sflag [#allocation3], %s159_s6 }
  0x30   : > { %s171_s28 = sshll.u32 %s163_s15, 4  ;;  %s5189_s2 = smov 16   ;;  %s172_s28 = int_to_ptr.vmem [resolvable:$true] %s171_s28 }
  0x31   : > { %4900 = dma.hbm_to_vmem [thread:$0]  (!%p5328_p2), %s170_s5, 8192, %s172_s28, %s160_s25, %s5188_s4, %s5188_s4, %s5189_s2  }
  0x32   : > { %s214_s22 = sshll.u32 %s212_s30, 4  ;;  %s216_s17 = sshll.u32 %s206_s3, 4  ;;  %s215_s22 = int_to_ptr.hbm [resolvable:$true] %s214_s22  ;;  %s217_s17 = int_to_ptr.vmem [resolvable:$true] %s216_s17 }
  0x33   : > { %4906 = dma.hbm_to_vmem [thread:$0]  (!%p5346_p4), %s215_s22, 32, %s217_s17, %s182_s14  }
  0x34   : > { %225 = sbr.rel (%p5357_p8) target bundleno = 1289 (0x509), region = 32 }
  0x39   : > { %s227_s1 = sand.u32 1, %s5162_s16  }
  0x3a   : > { %s4882_s20 = sshll.u32 %s227_s1, 9  ;;  %s228_s27 = scalar_lea.sflag [#allocation3], %s227_s1 }
  0x3b   : > { %s5374_s6 = scalar_lea.vmem [#allocation2], %s4882_s20 }
  0x3c   : > { %5137 = dma.done.wait (%p5289_p7), %s228_s27, 8192  }
  0x3d   : > { %5139 = vsyncadd (%p5289_p7), %s228_s27, 4294959104  ;;  %s237_s2 = sand.u32 1, %s5264_s23   ;;  %s239_s3 = sand.u32 1, %s5150_s13  }
  0x3e   : > { %s5384_s14 = sshll.u32 %s239_s3, 1  ;;  %s238_s17 = scalar_lea.sflag [#allocation5], %s237_s2 }
  0x3f   : > { %s241_s22 = scalar_lea.vmem [#allocation4], %s5384_s14 }
  0x40   : > { %5141 = dma.done.wait (%p5316_p1), %s238_s17, 64  }
  0x41   : > { %5143 = vsyncadd (%p5316_p1), %s238_s17, 4294967232  ;;  %v288_v0 = vlaneseq  ;;  %v5395_v5 = vld [vmem:[%s241_s22 + $0x1] ss:$0 sm:$0xff]  ;;  %v4999_v6 = vld [vmem:[%s241_s22] ss:$0 sm:$0xff]  ;;  %s6774_s23 = scalar_lea.vmem [#allocation6], %s5384_s14 }
  0x42   : > { %vm4574_vm0 = vcmask 1040384   ;;  %vm4576_vm1 = vcmask 1041408   ;;  %vm4578_vm2 = vcmask 1042432   ;;  %vm4580_vm3 = vcmask 1043456   ;;  %s4889_s29 = smul.u32 88, %s239_s3  ;;  %s9722_s10 = sld [smem:[#allocation89_spill]] (%p5320_p3) }
  0x43   : > { %v289_v1 = vshrl.u32 %v288_v0, 7  ;;  %vm4582_vm4 = vcmask 1044480   ;;  %vm4584_vm5 = vcmask 1045504   ;;  %vm4586_vm6 = vcmask 1046528   ;;  %s4890_s9 = smul.u32 (%p5320_p3), 22, %s5174_s19 }
  0x44   : > { %s8826_s8 = scalar_lea.vmem [#allocation7], %s4889_s29 }
  0x45   : > { %v290_v2 = vadd.s32 8, %v289_v1  ;;  %v5391_v3 = vcvt.s32.f32 %v289_v1  ;;  %s4670_s11 = sadd.s32 (%p5320_p3), %s5170_s18, %s4890_s9 }
  0x46   : > { %s4885_s26 = sshll.u32 (%p5320_p3), %s4670_s11, 3 }
  0x47   : > { %9221 = vst [vmem:[#allocation18_spill] sm:$0xff] %v5391_v3  ;;  %v5393_v4 = vcvt.s32.f32 %v290_v2  ;;  %v294_v7 = vsub.f32 %v5391_v3, %v5395_v5  ;;  %v303_v9 = vsub.f32 %v5391_v3, %v4999_v6 }
  0x48   : > { %s4672_s7 = scalar_lea.vmem (%p5320_p3), %s9722_s10, %s4885_s26 }
  0x49   : > { %9222 = vst [vmem:[#allocation19_spill] sm:$0xff] %v5393_v4  ;;  %v304_v8 = vsub.f32 %v5393_v4, %v4999_v6  ;;  %v296_v10 = vand.u32 2147483647, %v294_v7  ;;  %v305_v12 = vand.u32 2147483647, %v303_v9 }
  0x4b   : > { %v306_v11 = vand.u32 2147483647, %v304_v8  ;;  %v298_v13 = vsub.f32 1.0, %v296_v10  ;;  %v307_v15 = vsub.f32 1.0, %v305_v12 }
  0x4d   : > { %v308_v14 = vsub.f32 1.0, %v306_v11  ;;  %v5401_v16 = vmax.f32 %v298_v13, 0.0  ;;  %v5405_v18 = vmax.f32 %v307_v15, 0.0 }
  0x4f   : > { %v5403_v17 = vmax.f32 %v308_v14, 0.0  ;;  %v319_v19 = vrot.slane %v5401_v16, 7  ;;  %v318_v20 = vrot.slane %v5401_v16, 6  ;;  %v317_v21 = vrot.slane %v5401_v16, 5 }
  0x50   : > { %v316_v22 = vrot.slane %v5401_v16, 4  ;;  %v315_v23 = vrot.slane %v5401_v16, 3  ;;  %v314_v29 = vrot.slane %v5401_v16, 2  ;;  %v313_v45 = vrot.slane %v5401_v16, 1 }
  0x51   : > { %v334_v24 = vperm.slane %v319_v19, 0  ;;  %v333_v25 = vperm.slane %v318_v20, 0  ;;  %v332_v26 = vperm.slane %v317_v21, 0  ;;  %v327_v14 = vperm.slane %v5401_v16, 0 }
  0x52   : > { %v331_v27 = vperm.slane %v316_v22, 0  ;;  %v330_v28 = vperm.slane %v315_v23, 0  ;;  %v329_v57 = vperm.slane %v314_v29, 0  ;;  %v328_v7 = vperm.slane %v313_v45, 0  ;;  %v577_v22 = vld [vmem:[%s5374_s6] sm:$0xff] }
  0x53   : > { %v374_v30 = vmul.f32 %v334_v24, %v5403_v17  ;;  %v373_v31 = vmul.f32 %v334_v24, %v5405_v18  ;;  %v372_v32 = vmul.f32 %v333_v25, %v5403_v17  ;;  %v371_v33 = vmul.f32 %v333_v25, %v5405_v18 }
  0x54   : > { %v370_v34 = vmul.f32 %v332_v26, %v5403_v17  ;;  %v369_v35 = vmul.f32 %v332_v26, %v5405_v18  ;;  %v368_v36 = vmul.f32 %v331_v27, %v5403_v17  ;;  %v367_v37 = vmul.f32 %v331_v27, %v5405_v18 }
  0x55   : > { %v5421_v38 = vand.u32 4294901760, %v374_v30  ;;  %v5423_v39 = vand.u32 4294901760, %v373_v31  ;;  %v5425_v40 = vand.u32 4294901760, %v372_v32  ;;  %v5427_v41 = vand.u32 4294901760, %v371_v33 }
  0x56   : > { %v5429_v42 = vand.u32 4294901760, %v370_v34  ;;  %v5431_v43 = vand.u32 4294901760, %v369_v35  ;;  %v5433_v44 = vand.u32 4294901760, %v368_v36  ;;  %v5447_v49 = vand.u32 4294901760, %v367_v37 }
  0x57   : > { %642 = vmatpush.msra.mxu0 %v5421_v38  ;;  %v5438_v46 = vsub.f32 %v374_v30, %v5421_v38  ;;  %v5441_v47 = vsub.f32 %v373_v31, %v5423_v39  ;;  %1365 = vmatpush.msra.mxu3 %v5421_v38  ;;  %v5445_v48 = vsub.f32 %v372_v32, %v5425_v40  ;;  %v5528_v32 = vand.u32 4294901760, %v577_v22 }
  0x58   : > { %v5450_v50 = vsub.f32 %v371_v33, %v5427_v41  ;;  %v5453_v51 = vsub.f32 %v370_v34, %v5429_v42  ;;  %v5456_v52 = vsub.f32 %v369_v35, %v5431_v43  ;;  %v366_v53 = vmul.f32 %v330_v28, %v5403_v17 }
  0x59   : > { %644 = vmatpush.msra.mxu0 %v5423_v39  ;;  %1157 = vmatpush.msra.mxu2 %v5438_v46  ;;  %v932_v54 = vand.u32 4294901760, %v5438_v46  ;;  %v938_v55 = vand.u32 4294901760, %v5441_v47  ;;  %v944_v56 = vand.u32 4294901760, %v5445_v48  ;;  %v5468_v60 = vsub.f32 %v368_v36, %v5433_v44 }
  0x5a   : > { %1367 = vmatpush.msra.mxu3 %v5423_v39  ;;  %v950_v58 = vand.u32 4294901760, %v5450_v50  ;;  %v9017_v59 = vand.u32 4294901760, %v5453_v51  ;;  %v365_v61 = vmul.f32 %v330_v28, %v5405_v18  ;;  %v5482_v1 = vand.u32 4294901760, %v366_v53 }
  0x5b   : > { %646 = vmatpush.msra.mxu0 %v5425_v40  ;;  %1160 = vmatpush.msra.mxu2 %v5441_v47  ;;  %v933_v62 = vsub.f32 %v5438_v46, %v932_v54  ;;  %v939_v63 = vsub.f32 %v5441_v47, %v938_v55  ;;  %v945_v0 = vsub.f32 %v5445_v48, %v944_v56  ;;  %v9016_v2 = vand.u32 4294901760, %v5456_v52  ;;  %v585_v47 = vld [vmem:[%s5374_s6 + $0x40] sm:$0xff] }
  0x5c   : > { %1369 = vmatpush.msra.mxu3 %v5425_v40  ;;  %v5487_v6 = vsub.f32 %v367_v37, %v5447_v49  ;;  %v951_v10 = vsub.f32 %v5450_v50, %v950_v58  ;;  %v5494_v11 = vand.u32 4294901760, %v365_v61  ;;  %v957_v12 = vsub.f32 %v5453_v51, %v9017_v59 }
  0x5d   : > { %648 = vmatpush.msra.mxu0 %v5427_v41  ;;  %v934_v8 = vand.u32 4294901760, %v933_v62  ;;  %1163 = vmatpush.msra.mxu2 %v5445_v48  ;;  %v940_v9 = vand.u32 4294901760, %v939_v63  ;;  %v364_v13 = vmul.f32 %v329_v57, %v5403_v17  ;;  %v946_v15 = vand.u32 4294901760, %v945_v0 }
  0x5e   : > { %1371 = vmatpush.msra.mxu3 %v5427_v41  ;;  %v9013_v19 = vand.u32 4294901760, %v5468_v60  ;;  %v5505_v20 = vsub.f32 %v366_v53, %v5482_v1  ;;  %v363_v21 = vmul.f32 %v329_v57, %v5405_v18  ;;  %v963_v16 = vsub.f32 %v5456_v52, %v9016_v2 }
  0x5f   : > { %650 = vmatpush.msra.mxu0 %v5429_v42  ;;  %935 = vmatpush.msra.mxu1 %v934_v8  ;;  %v5514_v23 = vand.u32 4294901760, %v364_v13  ;;  %v9012_v24 = vand.u32 4294901760, %v5487_v6  ;;  %v362_v25 = vmul.f32 %v328_v7, %v5403_v17  ;;  %v952_v26 = vand.u32 4294901760, %v951_v10 }
  0x60   : > { %1166 = vmatpush.msra.mxu2 %v5450_v50  ;;  %1373 = vmatpush.msra.mxu3 %v5429_v42  ;;  %v5519_v27 = vand.u32 4294901760, %v363_v21  ;;  %v5522_v28 = vsub.f32 %v365_v61, %v5494_v11  ;;  %v361_v29 = vmul.f32 %v328_v7, %v5405_v18  ;;  %v958_v30 = vand.u32 4294901760, %v957_v12  ;;  %v579_v12 = vld [vmem:[%s5374_s6 + $0x10] sm:$0xff] }
  0x61   : > { %652 = vmatpush.msra.mxu0 %v5431_v43  ;;  %941 = vmatpush.msra.mxu1 %v940_v9  ;;  %v360_v31 = vmul.f32 %v327_v14, %v5403_v17  ;;  %v969_v33 = vsub.f32 %v5468_v60, %v9013_v19  ;;  %v5534_v34 = vand.u32 4294901760, %v362_v25  ;;  %v9011_v35 = vand.u32 4294901760, %v5505_v20 }
  0x62   : > { %1169 = vmatpush.msra.mxu2 %v5453_v51  ;;  %1375 = vmatpush.msra.mxu3 %v5431_v43  ;;  %v5538_v36 = vsub.f32 %v364_v13, %v5514_v23  ;;  %v964_v37 = vand.u32 4294901760, %v963_v16  ;;  %v975_v45 = vsub.f32 %v5487_v6, %v9012_v24  ;;  %v5546_v53 = vand.u32 4294901760, %v361_v29 }
  0x63   : > { %654 = vmatpush.msra.mxu0 %v5433_v44  ;;  %947 = vmatpush.msra.mxu1 %v946_v15  ;;  %v9009_v57 = vand.u32 4294901760, %v5522_v28  ;;  %v5550_v61 = vsub.f32 %v363_v21, %v5519_v27  ;;  %v359_v62 = vmul.f32 %v327_v14, %v5405_v18  ;;  %v5555_v63 = vand.u32 4294901760, %v360_v31 }
  0x64   : > { %1172 = vmatpush.msra.mxu2 %v5456_v52  ;;  %1377 = vmatpush.msra.mxu3 %v5433_v44  ;;  %v5558_v0 = vsub.f32 %v577_v22, %v5528_v32  ;;  %v970_v7 = vand.u32 4294901760, %v969_v33  ;;  %v981_v8 = vsub.f32 %v5505_v20, %v9011_v35  ;;  %v9007_v9 = vand.u32 4294901760, %v5538_v36 }
  0x65   : > { %656 = vmatpush.msra.mxu0 %v5447_v49  ;;  %953 = vmatpush.msra.mxu1 %v952_v26  ;;  %v5566_v10 = vsub.f32 %v362_v25, %v5534_v34  ;;  %v976_v13 = vand.u32 4294901760, %v975_v45  ;;  %v295_v14 = vsub.f32 %v5393_v4, %v5395_v5  ;;  %v987_v15 = vsub.f32 %v5522_v28, %v9009_v57  ;;  %v581_v57 = vld [vmem:[%s5374_s6 + $0x20] sm:$0xff] }
  0x66   : > { %1175 = vmatpush.msra.mxu2 %v5468_v60  ;;  %1379 = vmatpush.msra.mxu3 %v5447_v49  ;;  %v5577_v21 = vand.u32 4294901760, %v359_v62  ;;  %v9008_v22 = vand.u32 4294901760, %v5550_v61  ;;  %v5581_v16 = vsub.f32 %v361_v29, %v5546_v53  ;;  %v675_v5 = vand.u32 4294901760, %v5558_v0 }
  0x67   : > { %658 = vmatpush.msra.mxu0 %v5482_v1  ;;  %959 = vmatpush.msra.mxu1 %v958_v30  ;;  %v297_v25 = vand.u32 2147483647, %v295_v14  ;;  %v5586_v26 = vand.u32 4294901760, %v579_v12  ;;  %v982_v30 = vand.u32 4294901760, %v981_v8  ;;  %v993_v33 = vsub.f32 %v5538_v36, %v9007_v9 }
  0x68   : > { %1178 = vmatpush.msra.mxu2 %v5487_v6  ;;  %1381 = vmatpush.msra.mxu3 %v5482_v1  ;;  %v9010_v29 = vand.u32 4294901760, %v5566_v10  ;;  %v999_v8 = vsub.f32 %v5550_v61, %v9008_v22  ;;  %v9014_v14 = vand.u32 4294901760, %v5581_v16  ;;  %v5604_v9 = vsub.f32 %v359_v62, %v5577_v21 }
  0x69   : > { %660 = vmatpush.msra.mxu0 %v5494_v11  ;;  %965 = vmatpush.msra.mxu1 %v964_v37  ;;  %v5594_v37 = vsub.f32 %v360_v31, %v5555_v63  ;;  %v299_v45 = vsub.f32 1.0, %v297_v25  ;;  %v676_v31 = vsub.f32 %v5558_v0, %v675_v5  ;;  %v5633_v19 = vand.u32 4294901760, %v581_v57 }
  0x6a   : > { %1181 = vmatpush.msra.mxu2 %v5505_v20  ;;  %1383 = vmatpush.msra.mxu3 %v5494_v11  ;;  %v1005_v62 = vsub.f32 %v5566_v10, %v9010_v29  ;;  %v9224_v50 = vand.u32 4294901760, %v5456_v52 }
  0x6b   : > { %662 = vmatpush.msra.mxu0 %v5514_v23  ;;  %971 = vmatpush.msra.mxu1 %v970_v7  ;;  %v988_v7 = vand.u32 4294901760, %v987_v15  ;;  %v5611_v25 = vmax.f32 %v299_v45, 0.0  ;;  %v994_v15 = vand.u32 4294901760, %v993_v33  ;;  %v9015_v22 = vand.u32 4294901760, %v5594_v37 }
  0x6c   : > { %1184 = vmatpush.msra.mxu2 %v5522_v28  ;;  %1385 = vmatpush.msra.mxu3 %v5514_v23  ;;  %v9018_v33 = vand.u32 4294901760, %v5604_v9  ;;  %v677_v29 = vand.u32 4294901760, %v676_v31  ;;  %v5652_v2 = vsub.f32 %v581_v57, %v5633_v19 }
  0x6d   : > { %664 = vmatpush.msra.mxu0 %v5519_v27  ;;  %977 = vmatpush.msra.mxu1 %v976_v13  ;;  %v5614_v13 = vsub.f32 %v579_v12, %v5586_v26  ;;  %v326_v45 = vrot.slane %v5611_v25, 7  ;;  %v1000_v12 = vand.u32 4294901760, %v999_v8  ;;  %v1017_v8 = vsub.f32 %v5594_v37, %v9015_v22 }
  0x6e   : > { %1187 = vmatpush.msra.mxu2 %v5538_v36  ;;  %1387 = vmatpush.msra.mxu3 %v5519_v27 }
  0x6f   : > { %666 = vmatpush.msra.mxu0 %v5534_v34  ;;  %983 = vmatpush.msra.mxu1 %v982_v30  ;;  %v1011_v30 = vsub.f32 %v5581_v16, %v9014_v14  ;;  %v342_v35 = vperm.slane %v326_v45, 0  ;;  %v683_v24 = vand.u32 4294901760, %v5614_v13 }
  0x70   : > { %1190 = vmatpush.msra.mxu2 %v5550_v61  ;;  %1389 = vmatpush.msra.mxu3 %v5534_v34 }
  0x71   : > { %668 = vmatpush.msra.mxu0 %v5546_v53  ;;  %989 = vmatpush.msra.mxu1 %v988_v7  ;;  %v1006_v7 = vand.u32 4294901760, %v1005_v62  ;;  %v390_v31 = vmul.f32 %v342_v35, %v5403_v17  ;;  %v389_v45 = vmul.f32 %v342_v35, %v5405_v18  ;;  %v1012_v14 = vand.u32 4294901760, %v1011_v30  ;;  %v583_v35 = vld [vmem:[%s5374_s6 + $0x30] sm:$0xff] }
  0x72   : > { %1193 = vmatpush.msra.mxu2 %v5566_v10  ;;  %1391 = vmatpush.msra.mxu3 %v5546_v53  ;;  %v684_v22 = vsub.f32 %v5614_v13, %v683_v24 }
  0x73   : > { %670 = vmatpush.msra.mxu0 %v5555_v63  ;;  %995 = vmatpush.msra.mxu1 %v994_v15  ;;  %v1023_v15 = vsub.f32 %v5604_v9, %v9018_v33  ;;  %v5648_v62 = vand.u32 4294901760, %v390_v31  ;;  %v5654_v59 = vand.u32 4294901760, %v389_v45  ;;  %v5668_v33 = vand.u32 4294901760, %v583_v35 }
  0x74   : > { %1196 = vmatpush.msra.mxu2 %v5581_v16  ;;  %1393 = vmatpush.msra.mxu3 %v5555_v63 }
  0x75   : > { %672 = vmatpush.msra.mxu0 %v5577_v21  ;;  %1001 = vmatpush.msra.mxu1 %v1000_v12  ;;  %v1018_v12 = vand.u32 4294901760, %v1017_v8  ;;  %v5665_v30 = vsub.f32 %v389_v45, %v5654_v59  ;;  %v1024_v57 = vand.u32 4294901760, %v1023_v15  ;;  %v685_v8 = vand.u32 4294901760, %v684_v22 }
  0x76   : > { %678 = vmatmul.f32.vlgmr.msra.gmra.mxu0 %v677_v29  ;;  %1199 = vmatpush.msra.mxu2 %v5594_v37  ;;  %v5662_v29 = vsub.f32 %v390_v31, %v5648_v62  ;;  %v691_v31 = vand.u32 4294901760, %v5652_v2 }
  0x77   : > { %1007 = vmatpush.msra.mxu1 %v1006_v7  ;;  %1395 = vmatpush.msra.mxu3 %v5577_v21  ;;  %v325_v7 = vrot.slane %v5611_v25, 6  ;;  %v9027_v45 = vand.u32 4294901760, %v5665_v30 }
  0x78   : > { %1202 = vmatpush.msra.mxu2 %v5604_v9  ;;  %1399 = vmatmul.f32.vlgmr.msra.gmra.mxu3 %v675_v5  ;;  %v9028_v5 = vand.u32 4294901760, %v5662_v29  ;;  %v692_v15 = vsub.f32 %v5652_v2, %v691_v31 }
  0x79   : > { %1013 = vmatpush.msra.mxu1 %v1012_v14  ;;  %1205 = vmatmul.f32.vlgmr.msra.gmra.mxu2 %v5558_v0  ;;  %v341_v0 = vperm.slane %v325_v7, 0  ;;  %v2241_v46 = vsub.f32 %v5665_v30, %v9027_v45  ;;  %v698_v7 = vsub.f32 %v583_v35, %v5668_v33 }
  0x7a   : > { %1944 = vmatpush.msrb.mxu2 %v5648_v62  ;;  %1592 = vmatpush.msrb.mxu0 %v932_v54  ;;  %v2235_v14 = vsub.f32 %v5662_v29, %v9028_v5 }
  0x7b   : > { %1019 = vmatpush.msra.mxu1 %v1018_v12  ;;  %v388_v54 = vmul.f32 %v341_v0, %v5403_v17  ;;  %v2242_v12 = vand.u32 4294901760, %v2241_v46  ;;  %v587_v46 = vld [vmem:[%s5374_s6 + $0x50] sm:$0xff] }
  0x7c   : > { %1946 = vmatpush.msrb.mxu2 %v5654_v59  ;;  %1596 = vmatpush.msrb.mxu0 %v938_v55  ;;  %v2236_v22 = vand.u32 4294901760, %v2235_v14  ;;  %v699_v14 = vand.u32 4294901760, %v698_v7 }
  0x7d   : > { %1025 = vmatpush.msra.mxu1 %v1024_v57  ;;  %v5692_v55 = vand.u32 4294901760, %v388_v54 }
  0x7e   : > { %686 = vmatmul.f32.gmra.mxu0 %v685_v8  ;;  %1027 = vmatmul.f32.vlgmr.msra.gmra.mxu1 %v5528_v32  ;;  %v693_v8 = vand.u32 4294901760, %v692_v15 }
  0x7f   : > { %1783 = vmatpush.msrb.mxu1 %v5421_v38  ;;  %1600 = vmatpush.msrb.mxu0 %v944_v56  ;;  %v5698_v57 = vsub.f32 %v388_v54, %v5692_v55  ;;  %v5701_v38 = vand.u32 4294901760, %v585_v47  ;;  %v5721_v54 = vand.u32 4294901760, %v587_v46 }
  0x80   : > { %2237 = vmatpush.msrb.mxu3 %v2236_v22  ;;  %1948 = vmatpush.msrb.mxu2 %v5692_v55 }
  0x81   : > { %1210 = vmatmul.f32.gmra.mxu2 %v5614_v13  ;;  %1405 = vmatmul.f32.gmra.mxu3 %v683_v24  ;;  %v9026_v48 = vand.u32 4294901760, %v5698_v57  ;;  %v9223_v24 = vand.u32 4294901760, %v5453_v51  ;;  %v706_v13 = vsub.f32 %v585_v47, %v5701_v38 }
  0x82   : > { %2243 = vmatpush.msrb.mxu3 %v2242_v12  ;;  %1785 = vmatpush.msrb.mxu1 %v5423_v39  ;;  %v700_v39 = vsub.f32 %v698_v7, %v699_v14 }
  0x83   : > { %1604 = vmatpush.msrb.mxu0 %v950_v58  ;;  %v2247_v56 = vsub.f32 %v5698_v57, %v9026_v48  ;;  %v707_v58 = vand.u32 4294901760, %v706_v13 }
  0x84   : > { %1787 = vmatpush.msrb.mxu1 %v5425_v40  ;;  %v387_v40 = vmul.f32 %v341_v0, %v5405_v18  ;;  %v701_v51 = vand.u32 4294901760, %v700_v39  ;;  %v589_v0 = vld [vmem:[%s5374_s6 + $0x60] sm:$0xff]  ;;  %v9232_v39 = vand.u32 4294901760, %v5566_v10 }
  0x85   : > { %1608 = vmatpush.msrb.mxu0 %v9223_v24  ;;  %v2248_v35 = vand.u32 4294901760, %v2247_v56  ;;  %v5745_v47 = vand.u32 4294901760, %v589_v0  ;;  %v591_v56 = vld [vmem:[%s5374_s6 + $0x70] sm:$0xff] }
  0x86   : > { %694 = vmatmul.f32.gmra.mxu0 %v693_v8  ;;  %1031 = vmatmul.f32.gmra.mxu1 %v5586_v26  ;;  %v5724_v22 = vand.u32 4294901760, %v387_v40  ;;  %v9228_v8 = vand.u32 4294901760, %v5522_v28  ;;  %v5760_v24 = vand.u32 4294901760, %v591_v56 }
  0x87   : > { %1789 = vmatpush.msrb.mxu1 %v5427_v41  ;;  %1612 = vmatpush.msrb.mxu0 %v9224_v50  ;;  %v9225_v41 = vand.u32 4294901760, %v5468_v60  ;;  %v593_v50 = vld [vmem:[%s5374_s6 + $0x80] sm:$0xff] }
  0x88   : > { %2249 = vmatpush.msrb.mxu3 %v2248_v35  ;;  %1950 = vmatpush.msrb.mxu2 %v5724_v22  ;;  %v5731_v52 = vsub.f32 %v387_v40, %v5724_v22  ;;  %9231 = vst [vmem:[#allocation20_spill] sm:$0xff] %v5760_v24 }
  0x89   : > { %1215 = vmatmul.f32.gmra.mxu2 %v5652_v2  ;;  %1411 = vmatmul.f32.gmra.mxu3 %v691_v31  ;;  %v9226_v2 = vand.u32 4294901760, %v5487_v6  ;;  %v708_v31 = vsub.f32 %v706_v13, %v707_v58 }
  0x8a   : > { %1791 = vmatpush.msrb.mxu1 %v5429_v42  ;;  %1616 = vmatpush.msrb.mxu0 %v9225_v41  ;;  %v714_v42 = vsub.f32 %v587_v46, %v5721_v54  ;;  %v9025_v60 = vand.u32 4294901760, %v5731_v52  ;;  %v730_v46 = vsub.f32 %v591_v56, %v5760_v24 }
  0x8b   : > { %v709_v15 = vand.u32 4294901760, %v708_v31  ;;  %v595_v31 = vld [vmem:[%s5374_s6 + $0x90] sm:$0xff] }
  0x8c   : > { %1793 = vmatpush.msrb.mxu1 %v5431_v43  ;;  %1620 = vmatpush.msrb.mxu0 %v9226_v2  ;;  %v9227_v43 = vand.u32 4294901760, %v5505_v20  ;;  %v2253_v6 = vsub.f32 %v5731_v52, %v9025_v60  ;;  %v715_v12 = vand.u32 4294901760, %v714_v42  ;;  %v9229_v20 = vand.u32 4294901760, %v5538_v36 }
  0x8e   : > { %702 = vmatmul.f32.gmra.mxu0 %v701_v51  ;;  %1035 = vmatmul.f32.gmra.mxu1 %v5633_v19  ;;  %v5780_v51 = vand.u32 4294901760, %v593_v50 }
  0x8f   : > { %1795 = vmatpush.msrb.mxu1 %v5433_v44  ;;  %1624 = vmatpush.msrb.mxu0 %v9227_v43  ;;  %v2254_v44 = vand.u32 4294901760, %v2253_v6 }
  0x90   : > { %9235 = vst [vmem:[#allocation21_spill] sm:$0xff] %v5780_v51  ;;  %v738_v2 = vsub.f32 %v593_v50, %v5780_v51 }
  0x91   : > { %1220 = vmatmul.f32.gmra.mxu2 %v698_v7  ;;  %1417 = vmatmul.f32.gmra.mxu3 %v699_v14  ;;  %v716_v7 = vsub.f32 %v714_v42, %v715_v12  ;;  %v722_v14 = vsub.f32 %v589_v0, %v5745_v47  ;;  %v5799_v0 = vand.u32 4294901760, %v595_v31 }
  0x92   : > { %1797 = vmatpush.msrb.mxu1 %v5447_v49  ;;  %1628 = vmatpush.msrb.mxu0 %v9228_v8  ;;  %v9230_v49 = vand.u32 4294901760, %v5550_v61 }
  0x93   : > { %2255 = vmatpush.msrb.mxu3 %v2254_v44  ;;  %v717_v28 = vand.u32 4294901760, %v716_v7  ;;  %v723_v36 = vand.u32 4294901760, %v722_v14  ;;  %9237 = vst [vmem:[#allocation22_spill] sm:$0xff] %v5799_v0 }
  0x94   : > { %1799 = vmatpush.msrb.mxu1 %v5482_v1  ;;  %1632 = vmatpush.msrb.mxu0 %v9229_v20  ;;  %v324_v1 = vrot.slane %v5611_v25, 5 }
  0x96   : > { %710 = vmatmul.f32.gmra.mxu0 %v709_v15  ;;  %1039 = vmatmul.f32.gmra.mxu1 %v5668_v33  ;;  %v340_v35 = vperm.slane %v324_v1, 0  ;;  %v746_v15 = vsub.f32 %v595_v31, %v5799_v0 }
  0x97   : > { %1801 = vmatpush.msrb.mxu1 %v5494_v11  ;;  %1636 = vmatpush.msrb.mxu0 %v9230_v49  ;;  %v9233_v11 = vand.u32 4294901760, %v5581_v16  ;;  %v731_v16 = vand.u32 4294901760, %v730_v46 }
  0x98   : > { %v386_v61 = vmul.f32 %v340_v35, %v5403_v17  ;;  %v747_v7 = vand.u32 4294901760, %v746_v15 }
  0x99   : > { %1225 = vmatmul.f32.gmra.mxu2 %v706_v13  ;;  %1423 = vmatmul.f32.gmra.mxu3 %v707_v58  ;;  %v724_v13 = vsub.f32 %v722_v14, %v723_v36  ;;  %v732_v41 = vsub.f32 %v730_v46, %v731_v16 }
  0x9a   : > { %1803 = vmatpush.msrb.mxu1 %v5514_v23  ;;  %1640 = vmatpush.msrb.mxu0 %v9232_v39  ;;  %v5772_v40 = vand.u32 4294901760, %v386_v61  ;;  %v9234_v23 = vand.u32 4294901760, %v5594_v37  ;;  %v748_v49 = vsub.f32 %v746_v15, %v747_v7 }
  0x9b   : > { %v725_v10 = vand.u32 4294901760, %v724_v13 }
  0x9c   : > { %1805 = vmatpush.msrb.mxu1 %v5519_v27  ;;  %1644 = vmatpush.msrb.mxu0 %v9233_v11  ;;  %v5778_v27 = vsub.f32 %v386_v61, %v5772_v40  ;;  %v749_v39 = vand.u32 4294901760, %v748_v49 }
  0x9d   : > { %1952 = vmatpush.msrb.mxu2 %v5772_v40 }
  0x9e   : > { %718 = vmatmul.f32.gmra.mxu0 %v717_v28  ;;  %1043 = vmatmul.f32.gmra.mxu1 %v5701_v38  ;;  %v9023_v58 = vand.u32 4294901760, %v5778_v27  ;;  %v599_v28 = vld [vmem:[%s5374_s6 + $0xb0] sm:$0xff] }
  0x9f   : > { %1807 = vmatpush.msrb.mxu1 %v5534_v34  ;;  %1648 = vmatpush.msrb.mxu0 %v9234_v23  ;;  %v9236_v34 = vand.u32 4294901760, %v5604_v9  ;;  %v733_v9 = vand.u32 4294901760, %v732_v41  ;;  %v5829_v11 = vand.u32 4294901760, %v599_v28  ;;  %v601_v23 = vld [vmem:[%s5374_s6 + $0xc0] sm:$0xff] }
  0xa0   : > { %v2259_v37 = vsub.f32 %v5778_v27, %v9023_v58  ;;  %v5840_v41 = vand.u32 4294901760, %v601_v23  ;;  %v615_v58 = vld [vmem:[%s5374_s6 + $0x130] sm:$0xff] }
  0xa1   : > { %1230 = vmatmul.f32.gmra.mxu2 %v714_v42  ;;  %1429 = vmatmul.f32.gmra.mxu3 %v715_v12  ;;  %v739_v42 = vand.u32 4294901760, %v738_v2  ;;  %v597_v12 = vld [vmem:[%s5374_s6 + $0xa0] sm:$0xff]  ;;  %9239 = vst [vmem:[#allocation24_spill] sm:$0xff] %v5829_v11  ;;  %v762_v50 = vsub.f32 %v599_v28, %v5829_v11 }
  0xa2   : > { %1809 = vmatpush.msrb.mxu1 %v5546_v53  ;;  %1652 = vmatpush.msrb.mxu0 %v9236_v34  ;;  %v2260_v53 = vand.u32 4294901760, %v2259_v37  ;;  %9240 = vst [vmem:[#allocation25_spill] sm:$0xff] %v5840_v41 }
  0xa3   : > { %v740_v6 = vsub.f32 %v738_v2, %v739_v42  ;;  %v763_v37 = vand.u32 4294901760, %v762_v50 }
  0xa4   : > { %1811 = vmatpush.msrb.mxu1 %v5555_v63  ;;  %2459 = vmatpush.msra.mxu0 %v5662_v29  ;;  %v385_v63 = vmul.f32 %v340_v35, %v5405_v18 }
  0xa5   : > { %2261 = vmatpush.msrb.mxu3 %v2260_v53  ;;  %v741_v20 = vand.u32 4294901760, %v740_v6  ;;  %v764_v31 = vsub.f32 %v762_v50, %v763_v37 }
  0xa6   : > { %726 = vmatmul.f32.gmra.mxu0 %v725_v10  ;;  %1047 = vmatmul.f32.gmra.mxu1 %v5721_v54  ;;  %v5802_v43 = vand.u32 4294901760, %v385_v63 }
  0xa7   : > { %1813 = vmatpush.msrb.mxu1 %v5577_v21  ;;  %2462 = vmatpush.msra.mxu0 %v5665_v30 }
  0xa8   : > { %1954 = vmatpush.msrb.mxu2 %v5802_v43  ;;  %v5808_v21 = vsub.f32 %v385_v63, %v5802_v43  ;;  %v770_v63 = vsub.f32 %v601_v23, %v5840_v41 }
  0xa9   : > { %2667 = vmatpush.msra.mxu1 %v5648_v62  ;;  %1235 = vmatmul.f32.gmra.mxu2 %v722_v14  ;;  %v5820_v14 = vand.u32 4294901760, %v597_v12 }
  0xaa   : > { %1435 = vmatmul.f32.gmra.mxu3 %v723_v36  ;;  %2465 = vmatpush.msra.mxu0 %v5698_v57  ;;  %v9022_v8 = vand.u32 4294901760, %v5808_v21  ;;  %v323_v36 = vrot.slane %v5611_v25, 4 }
  0xab   : > { %2669 = vmatpush.msra.mxu1 %v5654_v59  ;;  %9238 = vst [vmem:[#allocation23_spill] sm:$0xff] %v5820_v14  ;;  %v754_v1 = vsub.f32 %v597_v12, %v5820_v14  ;;  %v771_v12 = vand.u32 4294901760, %v770_v63 }
  0xac   : > { %2468 = vmatpush.msra.mxu0 %v5731_v52  ;;  %v2265_v44 = vsub.f32 %v5808_v21, %v9022_v8  ;;  %v339_v61 = vperm.slane %v323_v36, 0 }
  0xad   : > { %2671 = vmatpush.msra.mxu1 %v5692_v55  ;;  %v755_v35 = vand.u32 4294901760, %v754_v1 }
  0xae   : > { %734 = vmatmul.f32.gmra.mxu0 %v733_v9  ;;  %1051 = vmatmul.f32.gmra.mxu1 %v5745_v47  ;;  %v2266_v56 = vand.u32 4294901760, %v2265_v44  ;;  %v384_v13 = vmul.f32 %v339_v61, %v5403_v17  ;;  %v383_v6 = vmul.f32 %v339_v61, %v5405_v18 }
  0xaf   : > { %2673 = vmatpush.msra.mxu1 %v5724_v22  ;;  %2471 = vmatpush.msra.mxu0 %v5778_v27 }
  0xb0   : > { %2267 = vmatpush.msrb.mxu3 %v2266_v56  ;;  %v5835_v10 = vand.u32 4294901760, %v384_v13  ;;  %v772_v56 = vsub.f32 %v770_v63, %v771_v12 }
  0xb1   : > { %1240 = vmatmul.f32.gmra.mxu2 %v730_v46  ;;  %2675 = vmatpush.msra.mxu1 %v5772_v40  ;;  %v756_v46 = vsub.f32 %v754_v1, %v755_v35 }
  0xb2   : > { %1441 = vmatmul.f32.gmra.mxu3 %v731_v16  ;;  %2474 = vmatpush.msra.mxu0 %v5808_v21  ;;  %v5838_v16 = vsub.f32 %v384_v13, %v5835_v10 }
  0xb3   : > { %2677 = vmatpush.msra.mxu1 %v5802_v43  ;;  %v757_v34 = vand.u32 4294901760, %v756_v46  ;;  %1956 = vmatpush.msrb.mxu2 %v5835_v10 }
  0xb4   : > { %2477 = vmatpush.msra.mxu0 %v5838_v16 }
  0xb5   : > { %2679 = vmatpush.msra.mxu1 %v5835_v10 }
  0xb6   : > { %742 = vmatmul.f32.gmra.mxu0 %v741_v20  ;;  %1055 = vmatmul.f32.gmra.mxu1 %v5760_v24  ;;  %v5855_v20 = vand.u32 4294901760, %v383_v6 }
  0xb8   : > { %1958 = vmatpush.msrb.mxu2 %v5855_v20  ;;  %2681 = vmatpush.msra.mxu1 %v5855_v20 }
  0xb9   : > { %1245 = vmatmul.f32.gmra.mxu2 %v738_v2  ;;  %v9020_v2 = vand.u32 4294901760, %v5838_v16 }
  0xba   : > { %1447 = vmatmul.f32.gmra.mxu3 %v739_v42  ;;  %v603_v42 = vld [vmem:[%s5374_s6 + $0xd0] sm:$0xff] }
  0xbb   : > { %v2271_v53 = vsub.f32 %v5838_v16, %v9020_v2  ;;  %v5853_v44 = vand.u32 4294901760, %v603_v42 }
  0xbd   : > { %v2272_v9 = vand.u32 4294901760, %v2271_v53  ;;  %9241 = vst [vmem:[#allocation26_spill] sm:$0xff] %v5853_v44  ;;  %v778_v49 = vsub.f32 %v603_v42, %v5853_v44 }
  0xbe   : > { %750 = vmatmul.f32.gmra.mxu0 %v749_v39  ;;  %1059 = vmatmul.f32.gmra.mxu1 %v5780_v51  ;;  %v773_v39 = vand.u32 4294901760, %v772_v56  ;;  %v609_v56 = vld [vmem:[%s5374_s6 + $0x100] sm:$0xff] }
  0xbf   : > { %2273 = vmatpush.msrb.mxu3 %v2272_v9 }
  0xc1   : > { %1250 = vmatmul.f32.gmra.mxu2 %v746_v15  ;;  %v765_v15 = vand.u32 4294901760, %v764_v31 }
  0xc2   : > { %1453 = vmatmul.f32.gmra.mxu3 %v747_v7  ;;  %v5859_v7 = vsub.f32 %v383_v6, %v5855_v20 }
  0xc4   : > { %v9019_v28 = vand.u32 4294901760, %v5859_v7  ;;  %2480 = vmatpush.msra.mxu0 %v5859_v7 }
  0xc6   : > { %758 = vmatmul.f32.gmra.mxu0 %v757_v34  ;;  %1063 = vmatmul.f32.gmra.mxu1 %v5799_v0  ;;  %v2277_v36 = vsub.f32 %v5859_v7, %v9019_v28  ;;  %v607_v34 = vld [vmem:[%s5374_s6 + $0xf0] sm:$0xff] }
  0xc7   : > { %v5876_v31 = vand.u32 4294901760, %v607_v34 }
  0xc8   : > { %v2278_v13 = vand.u32 4294901760, %v2277_v36 }
  0xc9   : > { %1255 = vmatmul.f32.gmra.mxu2 %v754_v1  ;;  %v605_v1 = vld [vmem:[%s5374_s6 + $0xe0] sm:$0xff]  ;;  %9243 = vst [vmem:[#allocation28_spill] sm:$0xff] %v5876_v31 }
  0xca   : > { %1459 = vmatmul.f32.gmra.mxu3 %v755_v35  ;;  %v779_v35 = vand.u32 4294901760, %v778_v49  ;;  %v5870_v61 = vand.u32 4294901760, %v605_v1 }
  0xcb   : > { %2279 = vmatpush.msrb.mxu3 %v2278_v13 }
  0xcc   : > { %9242 = vst [vmem:[#allocation27_spill] sm:$0xff] %v5870_v61  ;;  %v780_v46 = vsub.f32 %v778_v49, %v779_v35  ;;  %v786_v23 = vsub.f32 %v605_v1, %v5870_v61 }
  0xce   : > { %766 = vmatmul.f32.gmra.mxu0 %v765_v15  ;;  %1067 = vmatmul.f32.gmra.mxu1 %v5820_v14  ;;  %v787_v53 = vand.u32 4294901760, %v786_v23  ;;  %v794_v15 = vsub.f32 %v607_v34, %v5876_v31 }
  0xd0   : > { %v788_v6 = vsub.f32 %v786_v23, %v787_v53  ;;  %v795_v36 = vand.u32 4294901760, %v794_v15 }
  0xd1   : > { %1260 = vmatmul.f32.gmra.mxu2 %v762_v50  ;;  %v322_v50 = vrot.slane %v5611_v25, 3 }
  0xd2   : > { %1465 = vmatmul.f32.gmra.mxu3 %v763_v37  ;;  %v781_v37 = vand.u32 4294901760, %v780_v46 }
  0xd3   : > { %v338_v9 = vperm.slane %v322_v50, 0  ;;  %v611_v50 = vld [vmem:[%s5374_s6 + $0x110] sm:$0xff] }
  0xd4   : > { %v5900_v28 = vand.u32 4294901760, %v611_v50 }
  0xd5   : > { %v382_v42 = vmul.f32 %v338_v9, %v5403_v17 }
  0xd6   : > { %774 = vmatmul.f32.gmra.mxu0 %v773_v39  ;;  %1071 = vmatmul.f32.gmra.mxu1 %v5829_v11  ;;  %v5887_v39 = vand.u32 4294901760, %v609_v56  ;;  %9245 = vst [vmem:[#allocation30_spill] sm:$0xff] %v5900_v28 }
  0xd7   : > { %v5882_v1 = vand.u32 4294901760, %v382_v42 }
  0xd8   : > { %9244 = vst [vmem:[#allocation29_spill] sm:$0xff] %v5887_v39  ;;  %v802_v46 = vsub.f32 %v609_v56, %v5887_v39 }
  0xd9   : > { %1265 = vmatmul.f32.gmra.mxu2 %v770_v63  ;;  %v5885_v63 = vsub.f32 %v382_v42, %v5882_v1  ;;  %2683 = vmatpush.msra.mxu1 %v5882_v1 }
  0xda   : > { %1471 = vmatmul.f32.gmra.mxu3 %v771_v12  ;;  %v789_v12 = vand.u32 4294901760, %v788_v6  ;;  %1960 = vmatpush.msrb.mxu2 %v5882_v1  ;;  %v803_v6 = vand.u32 4294901760, %v802_v46 }
  0xdb   : > { %v9021_v13 = vand.u32 4294901760, %v5885_v63  ;;  %2483 = vmatpush.msra.mxu0 %v5885_v63 }
  0xde   : > { %782 = vmatmul.f32.gmra.mxu0 %v781_v37  ;;  %1075 = vmatmul.f32.gmra.mxu1 %v5840_v41  ;;  %v381_v37 = vmul.f32 %v338_v9, %v5405_v18  ;;  %v613_v9 = vld [vmem:[%s5374_s6 + $0x120] sm:$0xff] }
  0xe0   : > { %v5902_v2 = vand.u32 4294901760, %v381_v37 }
  0xe1   : > { %1270 = vmatmul.f32.gmra.mxu2 %v778_v49  ;;  %v2283_v49 = vsub.f32 %v5885_v63, %v9021_v13 }
  0xe2   : > { %1477 = vmatmul.f32.gmra.mxu3 %v779_v35  ;;  %v796_v35 = vsub.f32 %v794_v15, %v795_v36  ;;  %1962 = vmatpush.msrb.mxu2 %v5902_v2 }
  0xe3   : > { %v2284_v34 = vand.u32 4294901760, %v2283_v49  ;;  %2685 = vmatpush.msra.mxu1 %v5902_v2 }
  0xe4   : > { %v797_v42 = vand.u32 4294901760, %v796_v35 }
  0xe5   : > { %2285 = vmatpush.msrb.mxu3 %v2284_v34 }
  0xe6   : > { %790 = vmatmul.f32.gmra.mxu0 %v789_v12  ;;  %1079 = vmatmul.f32.gmra.mxu1 %v5853_v44  ;;  %v5906_v12 = vsub.f32 %v381_v37, %v5902_v2  ;;  %v5917_v37 = vand.u32 4294901760, %v613_v9 }
  0xe8   : > { %v9024_v56 = vand.u32 4294901760, %v5906_v12  ;;  %2486 = vmatpush.msra.mxu0 %v5906_v12  ;;  %9246 = vst [vmem:[#allocation31_spill] sm:$0xff] %v5917_v37  ;;  %v818_v8 = vsub.f32 %v613_v9, %v5917_v37  ;;  %v617_v9 = vld [vmem:[%s5374_s6 + $0x140] sm:$0xff] }
  0xe9   : > { %1275 = vmatmul.f32.gmra.mxu2 %v786_v23  ;;  %v804_v23 = vsub.f32 %v802_v46, %v803_v6 }
  0xea   : > { %1483 = vmatmul.f32.gmra.mxu3 %v787_v53  ;;  %v810_v53 = vsub.f32 %v611_v50, %v5900_v28  ;;  %v2289_v49 = vsub.f32 %v5906_v12, %v9024_v56  ;;  %v5923_v56 = vand.u32 4294901760, %v615_v58 }
  0xeb   : > { %v805_v35 = vand.u32 4294901760, %v804_v23  ;;  %v819_v23 = vand.u32 4294901760, %v818_v8 }
  0xec   : > { %v811_v34 = vand.u32 4294901760, %v810_v53  ;;  %v2290_v13 = vand.u32 4294901760, %v2289_v49  ;;  %9247 = vst [vmem:[#allocation32_spill] sm:$0xff] %v5923_v56 }
  0xee   : > { %798 = vmatmul.f32.gmra.mxu0 %v797_v42  ;;  %1083 = vmatmul.f32.gmra.mxu1 %v5870_v61  ;;  %v812_v50 = vsub.f32 %v810_v53, %v811_v34 }
  0xef   : > { %2291 = vmatpush.msrb.mxu3 %v2290_v13 }
  0xf1   : > { %1280 = vmatmul.f32.gmra.mxu2 %v794_v15  ;;  %v321_v15 = vrot.slane %v5611_v25, 2 }
  0xf2   : > { %1489 = vmatmul.f32.gmra.mxu3 %v795_v36  ;;  %v813_v36 = vand.u32 4294901760, %v812_v50 }
  0xf3   : > { %v679_v42 = vpop.f32.mrf.mxu0  ;;  %v337_v49 = vperm.slane %v321_v15, 0 }
  0xf5   : > { %v380_v5 = vmul.f32 %v337_v49, %v5403_v17 }
  0xf6   : > { %806 = vmatmul.f32.gmra.mxu0 %v805_v35  ;;  %1087 = vmatmul.f32.gmra.mxu1 %v5876_v31  ;;  %v5936_v31 = vand.u32 4294901760, %v617_v9 }
  0xf7   : > { %v5929_v50 = vand.u32 4294901760, %v380_v5 }
  0xf8   : > { %9249 = vst [vmem:[#allocation34_spill] sm:$0xff] %v5936_v31 }
  0xf9   : > { %1285 = vmatmul.f32.gmra.mxu2 %v802_v46  ;;  %v820_v46 = vsub.f32 %v818_v8, %v819_v23  ;;  %2687 = vmatpush.msra.mxu1 %v5929_v50 }
  0xfa   : > { %1495 = vmatmul.f32.gmra.mxu3 %v803_v6  ;;  %v826_v6 = vsub.f32 %v615_v58, %v5923_v56  ;;  %1964 = vmatpush.msrb.mxu2 %v5929_v50 }
  0xfb   : > { %v687_v60 = vpop.f32.mrf.mxu0  ;;  %v1028_v48 = vpop.f32.mrf.mxu1 }
  0xfc   : > { %v1029_v13 = vadd.f32 %v1028_v48, %v679_v42  ;;  %v1206_v35 = vpop.f32.mrf.mxu2  ;;  %v1400_v45 = vpop.f32.mrf.mxu3  ;;  %v5934_v48 = vsub.f32 %v380_v5, %v5929_v50  ;;  %v821_v42 = vand.u32 4294901760, %v820_v46  ;;  %v827_v15 = vand.u32 4294901760, %v826_v6 }
  0xfd   : > { %v834_v46 = vsub.f32 %v617_v9, %v5936_v31 }
  0xfe   : > { %v1207_v4 = vadd.f32 %v1206_v35, %v1029_v13  ;;  %814 = vmatmul.f32.gmra.mxu0 %v813_v36  ;;  %1091 = vmatmul.f32.gmra.mxu1 %v5887_v39  ;;  %v9041_v13 = vand.u32 4294901760, %v5934_v48  ;;  %v828_v35 = vsub.f32 %v826_v6, %v827_v15  ;;  %v619_v39 = vld [vmem:[%s5374_s6 + $0x150] sm:$0xff] }
  0xff   : > { %2489 = vmatpush.msra.mxu0 %v5934_v48  ;;  %v835_v44 = vand.u32 4294901760, %v834_v46 }
 0x100   : > { %v5931_v3 = vadd.f32 %v1400_v45, %v1207_v4  ;;  %v2295_v5 = vsub.f32 %v5934_v48, %v9041_v13  ;;  %v5951_v13 = vand.u32 4294901760, %v619_v39 }
 0x101   : > { %1290 = vmatmul.f32.gmra.mxu2 %v810_v53 }
 0x102   : > { %9248 = vst [vmem:[#allocation33_spill] sm:$0xff] %v5931_v3  ;;  %1501 = vmatmul.f32.gmra.mxu3 %v811_v34  ;;  %v2296_v3 = vand.u32 4294901760, %v2295_v5 }
 0x103   : > { %v695_v58 = vpop.f32.mrf.mxu0  ;;  %v1032_v36 = vpop.f32.mrf.mxu1  ;;  %9251 = vst [vmem:[#allocation36_spill] sm:$0xff] %v5951_v13 }
 0x104   : > { %v1033_v4 = vadd.f32 %v1032_v36, %v687_v60  ;;  %v1211_v45 = vpop.f32.mrf.mxu2  ;;  %v1406_v53 = vpop.f32.mrf.mxu3  ;;  %v379_v60 = vmul.f32 %v337_v49, %v5405_v18  ;;  %v829_v36 = vand.u32 4294901760, %v828_v35  ;;  %2297 = vmatpush.msrb.mxu3 %v2296_v3  ;;  %v836_v3 = vsub.f32 %v834_v46, %v835_v44 }
 0x105   : > { %v842_v49 = vsub.f32 %v619_v39, %v5951_v13 }
 0x106   : > { %v1212_v34 = vadd.f32 %v1211_v45, %v1033_v4  ;;  %822 = vmatmul.f32.gmra.mxu0 %v821_v42  ;;  %1095 = vmatmul.f32.gmra.mxu1 %v5900_v28  ;;  %v5953_v45 = vand.u32 4294901760, %v379_v60 }
 0x108   : > { %v5948_v61 = vadd.f32 %v1406_v53, %v1212_v34  ;;  %1966 = vmatpush.msrb.mxu2 %v5953_v45  ;;  %2689 = vmatpush.msra.mxu1 %v5953_v45  ;;  %v621_v53 = vld [vmem:[%s5374_s6 + $0x160] sm:$0xff] }
 0x109   : > { %1295 = vmatmul.f32.gmra.mxu2 %v818_v8  ;;  %v5957_v8 = vsub.f32 %v379_v60, %v5953_v45  ;;  %v843_v60 = vand.u32 4294901760, %v842_v49 }
 0x10a   : > { %9250 = vst [vmem:[#allocation35_spill] sm:$0xff] %v5948_v61  ;;  %1507 = vmatmul.f32.gmra.mxu3 %v819_v23 }
 0x10b   : > { %v703_v42 = vpop.f32.mrf.mxu0  ;;  %v1036_v4 = vpop.f32.mrf.mxu1  ;;  %v9048_v34 = vand.u32 4294901760, %v5957_v8  ;;  %2492 = vmatpush.msra.mxu0 %v5957_v8 }
 0x10c   : > { %v1037_v28 = vadd.f32 %v1036_v4, %v695_v58  ;;  %v1216_v9 = vpop.f32.mrf.mxu2  ;;  %v1412_v5 = vpop.f32.mrf.mxu3 }
 0x10d   : > { %v2301_v35 = vsub.f32 %v5957_v8, %v9048_v34 }
 0x10e   : > { %v1217_v23 = vadd.f32 %v1216_v9, %v1037_v28  ;;  %830 = vmatmul.f32.gmra.mxu0 %v829_v36  ;;  %1099 = vmatmul.f32.gmra.mxu1 %v5917_v37  ;;  %v837_v28 = vand.u32 4294901760, %v836_v3  ;;  %v5970_v36 = vand.u32 4294901760, %v621_v53  ;;  %v320_v3 = vrot.slane %v5611_v25, 1 }
 0x10f   : > { %v2302_v9 = vand.u32 4294901760, %v2301_v35 }
 0x110   : > { %v5965_v58 = vadd.f32 %v1412_v5, %v1217_v23  ;;  %9253 = vst [vmem:[#allocation38_spill] sm:$0xff] %v5970_v36  ;;  %v623_v23 = vld [vmem:[%s5374_s6 + $0x170] sm:$0xff] }
 0x111   : > { %1300 = vmatmul.f32.gmra.mxu2 %v826_v6  ;;  %2303 = vmatpush.msrb.mxu3 %v2302_v9  ;;  %v844_v6 = vsub.f32 %v842_v49, %v843_v60 }
 0x112   : > { %9252 = vst [vmem:[#allocation37_spill] sm:$0xff] %v5965_v58  ;;  %1513 = vmatmul.f32.gmra.mxu3 %v827_v15  ;;  %v850_v15 = vsub.f32 %v621_v53, %v5970_v36 }
 0x113   : > { %v711_v4 = vpop.f32.mrf.mxu0  ;;  %v1040_v39 = vpop.f32.mrf.mxu1  ;;  %v845_v35 = vand.u32 4294901760, %v844_v6 }
 0x114   : > { %v1041_v37 = vadd.f32 %v1040_v39, %v703_v42  ;;  %v1221_v61 = vpop.f32.mrf.mxu2  ;;  %v1418_v41 = vpop.f32.mrf.mxu3  ;;  %v851_v42 = vand.u32 4294901760, %v850_v15  ;;  %v5978_v39 = vand.u32 4294901760, %v623_v23 }
 0x116   : > { %v1222_v5 = vadd.f32 %v1221_v61, %v1041_v37  ;;  %838 = vmatmul.f32.gmra.mxu0 %v837_v28  ;;  %1103 = vmatmul.f32.gmra.mxu1 %v5923_v56  ;;  %9255 = vst [vmem:[#allocation40_spill] sm:$0xff] %v5978_v39  ;;  %v336_v37 = vperm.slane %v320_v3, 0 }
 0x118   : > { %v5975_v34 = vadd.f32 %v1418_v41, %v1222_v5  ;;  %v378_v53 = vmul.f32 %v336_v37, %v5403_v17  ;;  %v852_v41 = vsub.f32 %v850_v15, %v851_v42 }
 0x119   : > { %1305 = vmatmul.f32.gmra.mxu2 %v834_v46  ;;  %v625_v46 = vld [vmem:[%s5374_s6 + $0x180] sm:$0xff] }
 0x11a   : > { %9254 = vst [vmem:[#allocation39_spill] sm:$0xff] %v5975_v34  ;;  %1519 = vmatmul.f32.gmra.mxu3 %v835_v44  ;;  %v858_v44 = vsub.f32 %v623_v23, %v5978_v39  ;;  %v5984_v5 = vand.u32 4294901760, %v378_v53  ;;  %v853_v3 = vand.u32 4294901760, %v852_v41  ;;  %v5991_v34 = vand.u32 4294901760, %v625_v46 }
 0x11b   : > { %v719_v9 = vpop.f32.mrf.mxu0  ;;  %v1044_v61 = vpop.f32.mrf.mxu1 }
 0x11c   : > { %v1045_v28 = vadd.f32 %v1044_v61, %v711_v4  ;;  %v1226_v56 = vpop.f32.mrf.mxu2  ;;  %v1424_v58 = vpop.f32.mrf.mxu3  ;;  %v5989_v4 = vsub.f32 %v378_v53, %v5984_v5  ;;  %v859_v61 = vand.u32 4294901760, %v858_v44  ;;  %9257 = vst [vmem:[#allocation42_spill] sm:$0xff] %v5991_v34  ;;  %1968 = vmatpush.msrb.mxu2 %v5984_v5  ;;  %2691 = vmatpush.msra.mxu1 %v5984_v5 }
 0x11d   : > { %v866_v41 = vsub.f32 %v625_v46, %v5991_v34 }
 0x11e   : > { %v1227_v11 = vadd.f32 %v1226_v56, %v1045_v28  ;;  %846 = vmatmul.f32.gmra.mxu0 %v845_v35  ;;  %1107 = vmatmul.f32.gmra.mxu1 %v5936_v31  ;;  %v9059_v35 = vand.u32 4294901760, %v5989_v4  ;;  %v860_v53 = vsub.f32 %v858_v44, %v859_v61  ;;  %v627_v31 = vld [vmem:[%s5374_s6 + $0x190] sm:$0xff] }
 0x11f   : > { %2495 = vmatpush.msra.mxu0 %v5989_v4  ;;  %v867_v0 = vand.u32 4294901760, %v866_v41 }
 0x120   : > { %v5986_v6 = vadd.f32 %v1424_v58, %v1227_v11 }
 0x121   : > { %1310 = vmatmul.f32.gmra.mxu2 %v842_v49 }
 0x122   : > { %9256 = vst [vmem:[#allocation41_spill] sm:$0xff] %v5986_v6  ;;  %1525 = vmatmul.f32.gmra.mxu3 %v843_v60  ;;  %v2307_v60 = vsub.f32 %v5989_v4, %v9059_v35  ;;  %v6006_v35 = vand.u32 4294901760, %v627_v31 }
 0x123   : > { %v727_v56 = vpop.f32.mrf.mxu0  ;;  %v1048_v23 = vpop.f32.mrf.mxu1 }
 0x124   : > { %v1049_v11 = vadd.f32 %v1048_v23, %v719_v9  ;;  %v1231_v49 = vpop.f32.mrf.mxu2  ;;  %v1430_v58 = vpop.f32.mrf.mxu3  ;;  %v2308_v6 = vand.u32 4294901760, %v2307_v60  ;;  %v377_v9 = vmul.f32 %v336_v37, %v5405_v18  ;;  %v861_v23 = vand.u32 4294901760, %v860_v53  ;;  %9259 = vst [vmem:[#allocation44_spill] sm:$0xff] %v6006_v35 }
 0x125   : > { %v868_v37 = vsub.f32 %v866_v41, %v867_v0 }
 0x126   : > { %v1232_v28 = vadd.f32 %v1231_v49, %v1049_v11  ;;  %854 = vmatmul.f32.gmra.mxu0 %v853_v3  ;;  %1111 = vmatmul.f32.gmra.mxu1 %v5951_v13  ;;  %v6008_v49 = vand.u32 4294901760, %v377_v9 }
 0x127   : > { %2309 = vmatpush.msrb.mxu3 %v2308_v6  ;;  %v874_v6 = vsub.f32 %v627_v31, %v6006_v35 }
 0x128   : > { %v6003_v14 = vadd.f32 %v1430_v58, %v1232_v28  ;;  %1970 = vmatpush.msrb.mxu2 %v6008_v49  ;;  %2693 = vmatpush.msra.mxu1 %v6008_v49  ;;  %v629_v58 = vld [vmem:[%s5374_s6 + $0x1a0] sm:$0xff] }
 0x129   : > { %1315 = vmatmul.f32.gmra.mxu2 %v850_v15  ;;  %v6012_v15 = vsub.f32 %v377_v9, %v6008_v49  ;;  %v875_v9 = vand.u32 4294901760, %v874_v6 }
 0x12a   : > { %9258 = vst [vmem:[#allocation43_spill] sm:$0xff] %v6003_v14  ;;  %1531 = vmatmul.f32.gmra.mxu3 %v851_v42 }
 0x12b   : > { %v735_v3 = vpop.f32.mrf.mxu0  ;;  %v1052_v11 = vpop.f32.mrf.mxu1  ;;  %v9066_v28 = vand.u32 4294901760, %v6012_v15  ;;  %2498 = vmatpush.msra.mxu0 %v6012_v15 }
 0x12c   : > { %v1053_v13 = vadd.f32 %v1052_v11, %v727_v56  ;;  %v1236_v46 = vpop.f32.mrf.mxu2 }
 0x12d   : > { %v1436_v60 = vpop.f32.mrf.mxu3  ;;  %v2313_v53 = vsub.f32 %v6012_v15, %v9066_v28 }
 0x12e   : > { %v1237_v42 = vadd.f32 %v1236_v46, %v1053_v13  ;;  %862 = vmatmul.f32.gmra.mxu0 %v861_v23  ;;  %1115 = vmatmul.f32.gmra.mxu1 %v5970_v36  ;;  %v869_v13 = vand.u32 4294901760, %v868_v37  ;;  %v6025_v23 = vand.u32 4294901760, %v629_v58  ;;  %v335_v37 = vperm.slane %v5611_v25, 0 }
 0x12f   : > { %v2314_v46 = vand.u32 4294901760, %v2313_v53 }
 0x130   : > { %v6020_v56 = vadd.f32 %v1436_v60, %v1237_v42  ;;  %v631_v42 = vld [vmem:[%s5374_s6 + $0x1b0] sm:$0xff]  ;;  %v375_v24 = vmul.f32 %v335_v37, %v5405_v18 }
 0x131   : > { %1320 = vmatmul.f32.gmra.mxu2 %v858_v44  ;;  %2315 = vmatpush.msrb.mxu3 %v2314_v46  ;;  %v876_v44 = vsub.f32 %v874_v6, %v875_v9 }
 0x132   : > { %9260 = vst [vmem:[#allocation45_spill] sm:$0xff] %v6020_v56  ;;  %1537 = vmatmul.f32.gmra.mxu3 %v859_v61  ;;  %v882_v61 = vsub.f32 %v629_v58, %v6025_v23 }
 0x133   : > { %v743_v11 = vpop.f32.mrf.mxu0  ;;  %v1056_v31 = vpop.f32.mrf.mxu1  ;;  %v877_v53 = vand.u32 4294901760, %v876_v44 }
 0x134   : > { %v1057_v36 = vadd.f32 %v1056_v31, %v735_v3  ;;  %v1241_v14 = vpop.f32.mrf.mxu2  ;;  %v883_v3 = vand.u32 4294901760, %v882_v61  ;;  %v6033_v31 = vand.u32 4294901760, %v631_v42 }
 0x135   : > { %v1442_v51 = vpop.f32.mrf.mxu3 }
 0x136   : > { %v1242_v60 = vadd.f32 %v1241_v14, %v1057_v36  ;;  %870 = vmatmul.f32.gmra.mxu0 %v869_v13  ;;  %1119 = vmatmul.f32.gmra.mxu1 %v5978_v39  ;;  %v376_v36 = vmul.f32 %v335_v37, %v5403_v17  ;;  %v890_v25 = vsub.f32 %v631_v42, %v6033_v31 }
 0x138   : > { %v6030_v28 = vadd.f32 %v1442_v51, %v1242_v60  ;;  %v6036_v58 = vand.u32 4294901760, %v376_v36  ;;  %v891_v44 = vand.u32 4294901760, %v890_v25 }
 0x139   : > { %1325 = vmatmul.f32.gmra.mxu2 %v866_v41  ;;  %v633_v41 = vld [vmem:[%s5374_s6 + $0x1c0] sm:$0xff] }
 0x13a   : > { %9261 = vst [vmem:[#allocation46_spill] sm:$0xff] %v6030_v28  ;;  %1543 = vmatmul.f32.gmra.mxu3 %v867_v0  ;;  %v884_v0 = vsub.f32 %v882_v61, %v883_v3  ;;  %1972 = vmatpush.msrb.mxu2 %v6036_v58  ;;  %v6043_v60 = vsub.f32 %v376_v36, %v6036_v58 }
 0x13b   : > { %v751_v46 = vpop.f32.mrf.mxu0  ;;  %v1060_v14 = vpop.f32.mrf.mxu1  ;;  %2695 = vmatpush.msra.mxu1 %v6036_v58 }
 0x13c   : > { %v1061_v13 = vadd.f32 %v1060_v14, %v743_v11  ;;  %v1246_v39 = vpop.f32.mrf.mxu2  ;;  %v885_v11 = vand.u32 4294901760, %v884_v0  ;;  %2501 = vmatpush.msra.mxu0 %v6043_v60  ;;  %v892_v0 = vsub.f32 %v890_v25, %v891_v44 }
 0x13d   : > { %v1448_v56 = vpop.f32.mrf.mxu3 }
 0x13e   : > { %v1247_v51 = vadd.f32 %v1246_v39, %v1061_v13  ;;  %878 = vmatmul.f32.gmra.mxu0 %v877_v53  ;;  %1123 = vmatmul.f32.gmra.mxu1 %v5991_v34  ;;  %v9073_v39 = vand.u32 4294901760, %v6043_v60  ;;  %v6049_v53 = vand.u32 4294901760, %v633_v41  ;;  %v635_v34 = vld [vmem:[%s5374_s6 + $0x1d0] sm:$0xff] }
 0x140   : > { %v6046_v17 = vadd.f32 %v1448_v56, %v1247_v51  ;;  %v2319_v36 = vsub.f32 %v6043_v60, %v9073_v39  ;;  %v893_v39 = vand.u32 4294901760, %v892_v0  ;;  %v9265_v0 = vand.u32 4294901760, %v5665_v30 }
 0x141   : > { %1330 = vmatmul.f32.gmra.mxu2 %v874_v6  ;;  %v9267_v30 = vand.u32 4294901760, %v5731_v52 }
 0x142   : > { %9262 = vst [vmem:[#allocation47_spill] sm:$0xff] %v6046_v17  ;;  %1549 = vmatmul.f32.gmra.mxu3 %v875_v9  ;;  %v2320_v6 = vand.u32 4294901760, %v2319_v36  ;;  %v898_v17 = vsub.f32 %v633_v41, %v6049_v53 }
 0x143   : > { %v759_v42 = vpop.f32.mrf.mxu0  ;;  %v1064_v14 = vpop.f32.mrf.mxu1 }
 0x144   : > { %v1065_v13 = vadd.f32 %v1064_v14, %v751_v46  ;;  %v1251_v56 = vpop.f32.mrf.mxu2  ;;  %2321 = vmatpush.msrb.mxu3 %v2320_v6  ;;  %v899_v46 = vand.u32 4294901760, %v898_v17  ;;  %v6061_v14 = vand.u32 4294901760, %v635_v34 }
 0x145   : > { %v1454_v51 = vpop.f32.mrf.mxu3 }
 0x146   : > { %v1252_v9 = vadd.f32 %v1251_v56, %v1065_v13  ;;  %886 = vmatmul.f32.gmra.mxu0 %v885_v11  ;;  %1127 = vmatmul.f32.gmra.mxu1 %v6006_v35  ;;  %v6063_v13 = vand.u32 4294901760, %v375_v24  ;;  %v906_v37 = vsub.f32 %v635_v34, %v6061_v14 }
 0x148   : > { %v6058_v28 = vadd.f32 %v1454_v51, %v1252_v9  ;;  %1974 = vmatpush.msrb.mxu2 %v6063_v13  ;;  %v6067_v51 = vsub.f32 %v375_v24, %v6063_v13  ;;  %2697 = vmatpush.msra.mxu1 %v6063_v13 }
 0x149   : > { %1335 = vmatmul.f32.gmra.mxu2 %v882_v61  ;;  %v900_v61 = vsub.f32 %v898_v17, %v899_v46 }
 0x14a   : > { %1555 = vmatmul.f32.gmra.mxu3 %v883_v3  ;;  %v637_v3 = vld [vmem:[%s5374_s6 + $0x1e0] sm:$0xff]  ;;  %v9076_v6 = vand.u32 4294901760, %v6067_v51  ;;  %2504 = vmatpush.msra.mxu0 %v6067_v51 }
 0x14b   : > { %v767_v36 = vpop.f32.mrf.mxu0  ;;  %v1068_v11 = vpop.f32.mrf.mxu1  ;;  %v6082_v34 = vand.u32 4294901760, %v637_v3 }
 0x14c   : > { %v1069_v56 = vadd.f32 %v1068_v11, %v759_v42  ;;  %v1256_v35 = vpop.f32.mrf.mxu2  ;;  %v9263_v42 = vand.u32 4294901760, %v5662_v29  ;;  %v2325_v24 = vsub.f32 %v6067_v51, %v9076_v6 }
 0x14d   : > { %v1460_v41 = vpop.f32.mrf.mxu3  ;;  %v914_v6 = vsub.f32 %v637_v3, %v6082_v34 }
 0x14e   : > { %v1257_v18 = vadd.f32 %v1256_v35, %v1069_v56  ;;  %894 = vmatmul.f32.gmra.mxu0 %v893_v39  ;;  %1131 = vmatmul.f32.gmra.mxu1 %v6025_v23  ;;  %v901_v35 = vand.u32 4294901760, %v900_v61  ;;  %v907_v39 = vand.u32 4294901760, %v906_v37  ;;  %v2326_v56 = vand.u32 4294901760, %v2325_v24 }
 0x14f   : > { %2894 = vmatpush.msra.mxu2 %v9263_v42  ;;  %v915_v24 = vand.u32 4294901760, %v914_v6 }
 0x150   : > { %v6077_v9 = vadd.f32 %v1460_v41, %v1257_v18  ;;  %2327 = vmatpush.msrb.mxu3 %v2326_v56  ;;  %v908_v61 = vsub.f32 %v906_v37, %v907_v39 }
 0x151   : > { %1340 = vmatmul.f32.gmra.mxu2 %v890_v25  ;;  %v9266_v25 = vand.u32 4294901760, %v5698_v57 }
 0x152   : > { %9264 = vst [vmem:[#allocation48_spill] sm:$0xff] %v6077_v9  ;;  %1561 = vmatmul.f32.gmra.mxu3 %v891_v44  ;;  %2898 = vmatpush.msra.mxu2 %v9265_v0  ;;  %v639_v9 = vld [vmem:[%s5374_s6 + $0x1f0] sm:$0xff]  ;;  %v909_v57 = vand.u32 4294901760, %v908_v61 }
 0x153   : > { %v775_v29 = vpop.f32.mrf.mxu0  ;;  %v1072_v11 = vpop.f32.mrf.mxu1  ;;  %3085 = vmatpush.msra.mxu3 %v5648_v62  ;;  %v6096_v0 = vand.u32 4294901760, %v639_v9 }
 0x154   : > { %v1073_v42 = vadd.f32 %v1072_v11, %v767_v36  ;;  %v1261_v41 = vpop.f32.mrf.mxu2  ;;  %2902 = vmatpush.msra.mxu2 %v9266_v25 }
 0x155   : > { %v1466_v18 = vpop.f32.mrf.mxu3  ;;  %3087 = vmatpush.msra.mxu3 %v5654_v59  ;;  %v922_v59 = vsub.f32 %v639_v9, %v6096_v0 }
 0x156   : > { %v1262_v44 = vadd.f32 %v1261_v41, %v1073_v42  ;;  %902 = vmatmul.f32.gmra.mxu0 %v901_v35  ;;  %1135 = vmatmul.f32.gmra.mxu1 %v6033_v31  ;;  %v9268_v35 = vand.u32 4294901760, %v5778_v27  ;;  %v916_v42 = vsub.f32 %v914_v6, %v915_v24  ;;  %v9270_v27 = vand.u32 4294901760, %v5838_v16 }
 0x157   : > { %2906 = vmatpush.msra.mxu2 %v9267_v30  ;;  %3089 = vmatpush.msra.mxu3 %v5692_v55  ;;  %v923_v41 = vand.u32 4294901760, %v922_v59  ;;  %v9272_v16 = vand.u32 4294901760, %v5885_v63 }
 0x158   : > { %v6094_v36 = vadd.f32 %v1466_v18, %v1262_v44  ;;  %v917_v55 = vand.u32 4294901760, %v916_v42  ;;  %v9271_v18 = vand.u32 4294901760, %v5859_v7  ;;  %v9273_v7 = vand.u32 4294901760, %v5906_v12 }
 0x159   : > { %1345 = vmatmul.f32.gmra.mxu2 %v898_v17  ;;  %v9269_v17 = vand.u32 4294901760, %v5808_v21  ;;  %3091 = vmatpush.msra.mxu3 %v5724_v22  ;;  %v578_v21 = vld [vmem:[%s5374_s6 + $0x8] sm:$0xff] }
 0x15a   : > { %1567 = vmatmul.f32.gmra.mxu3 %v899_v46  ;;  %2910 = vmatpush.msra.mxu2 %v9268_v35  ;;  %v9274_v35 = vand.u32 4294901760, %v5934_v48 }
 0x15b   : > { %v783_v3 = vpop.f32.mrf.mxu0  ;;  %v1076_v11 = vpop.f32.mrf.mxu1  ;;  %3093 = vmatpush.msra.mxu3 %v5772_v40  ;;  %v924_v40 = vsub.f32 %v922_v59, %v923_v41 }
 0x15c   : > { %v1077_v56 = vadd.f32 %v1076_v11, %v775_v29  ;;  %v1266_v62 = vpop.f32.mrf.mxu2  ;;  %2914 = vmatpush.msra.mxu2 %v9269_v17  ;;  %v582_v17 = vld [vmem:[%s5374_s6 + $0x28] sm:$0xff] }
 0x15d   : > { %v1472_v52 = vpop.f32.mrf.mxu3  ;;  %3095 = vmatpush.msra.mxu3 %v5802_v43  ;;  %v925_v63 = vand.u32 4294901760, %v924_v40 }
 0x15e   : > { %v1267_v46 = vadd.f32 %v1266_v62, %v1077_v56  ;;  %910 = vmatmul.f32.gmra.mxu0 %v909_v57  ;;  %1139 = vmatmul.f32.gmra.mxu1 %v6049_v53  ;;  %v580_v57 = vld [vmem:[%s5374_s6 + $0x18] sm:$0xff] }
 0x15f   : > { %2918 = vmatpush.msra.mxu2 %v9270_v27  ;;  %3097 = vmatpush.msra.mxu3 %v5835_v10  ;;  %v6137_v62 = vand.u32 4294901760, %v580_v57 }
 0x160   : > { %v6109_v29 = vadd.f32 %v1472_v52, %v1267_v46  ;;  %v9277_v46 = vand.u32 4294901760, %v6012_v15  ;;  %v9279_v15 = vand.u32 4294901760, %v6067_v51 }
 0x161   : > { %1350 = vmatmul.f32.gmra.mxu2 %v906_v37  ;;  %v6118_v37 = vand.u32 4294901760, %v578_v21  ;;  %3099 = vmatpush.msra.mxu3 %v5855_v20  ;;  %v9276_v20 = vand.u32 4294901760, %v5989_v4 }
 0x162   : > { %1573 = vmatmul.f32.gmra.mxu3 %v907_v39  ;;  %2922 = vmatpush.msra.mxu2 %v9271_v18  ;;  %v6159_v18 = vand.u32 4294901760, %v582_v17 }
 0x163   : > { %v791_v25 = vpop.f32.mrf.mxu0  ;;  %v1080_v44 = vpop.f32.mrf.mxu1  ;;  %v6127_v43 = vsub.f32 %v578_v21, %v6118_v37  ;;  %3101 = vmatpush.msra.mxu3 %v5882_v1 }
 0x164   : > { %v1081_v9 = vadd.f32 %v1080_v44, %v783_v3  ;;  %v1271_v61 = vpop.f32.mrf.mxu2  ;;  %2926 = vmatpush.msra.mxu2 %v9272_v16  ;;  %v584_v44 = vld [vmem:[%s5374_s6 + $0x38] sm:$0xff] }
 0x165   : > { %v1478_v22 = vpop.f32.mrf.mxu3  ;;  %3103 = vmatpush.msra.mxu3 %v5902_v2  ;;  %v6179_v40 = vand.u32 4294901760, %v584_v44 }
 0x166   : > { %v1272_v39 = vadd.f32 %v1271_v61, %v1081_v9  ;;  %918 = vmatmul.f32.gmra.mxu0 %v917_v55  ;;  %1143 = vmatmul.f32.gmra.mxu1 %v6061_v14 }
 0x167   : > { %2930 = vmatpush.msra.mxu2 %v9273_v7  ;;  %3105 = vmatpush.msra.mxu3 %v5929_v50 }
 0x168   : > { %v6124_v30 = vadd.f32 %v1478_v22, %v1272_v39 }
 0x169   : > { %1355 = vmatmul.f32.gmra.mxu2 %v914_v6  ;;  %v9275_v6 = vand.u32 4294901760, %v5957_v8  ;;  %v6149_v8 = vsub.f32 %v580_v57, %v6137_v62  ;;  %3107 = vmatpush.msra.mxu3 %v5953_v45  ;;  %v586_v57 = vld [vmem:[%s5374_s6 + $0x48] sm:$0xff] }
 0x16a   : > { %1579 = vmatmul.f32.gmra.mxu3 %v915_v24  ;;  %2934 = vmatpush.msra.mxu2 %v9274_v35  ;;  %v9087_v24 = vand.u32 4294901760, %v6127_v43 }
 0x16b   : > { %v799_v3 = vpop.f32.mrf.mxu0  ;;  %v1084_v11 = vpop.f32.mrf.mxu1  ;;  %v9086_v21 = vand.u32 4294901760, %v6149_v8  ;;  %3109 = vmatpush.msra.mxu3 %v5984_v5 }
 0x16c   : > { %v1085_v10 = vadd.f32 %v1084_v11, %v791_v25  ;;  %v1276_v56 = vpop.f32.mrf.mxu2  ;;  %2938 = vmatpush.msra.mxu2 %v9275_v6  ;;  %v1978_v1 = vsub.f32 %v6127_v43, %v9087_v24  ;;  %v9291_v24 = vld [vmem:[#allocation24_spill] sm:$0xff] }
 0x16d   : > { %v1484_v12 = vpop.f32.mrf.mxu3  ;;  %v1986_v45 = vsub.f32 %v6149_v8, %v9086_v21  ;;  %3111 = vmatpush.msra.mxu3 %v6008_v49 }
 0x16e   : > { %v1277_v52 = vadd.f32 %v1276_v56, %v1085_v10  ;;  %926 = vmatmul.f32.gmra.mxu0 %v925_v63  ;;  %1147 = vmatmul.f32.gmra.mxu1 %v6082_v34  ;;  %v6191_v63 = vsub.f32 %v584_v44, %v6179_v40  ;;  %v590_v44 = vld [vmem:[%s5374_s6 + $0x68] sm:$0xff] }
 0x16f   : > { %2942 = vmatpush.msra.mxu2 %v9276_v20  ;;  %3113 = vmatpush.msra.mxu3 %v6036_v58  ;;  %v1987_v16 = vand.u32 4294901760, %v1986_v45 }
 0x170   : > { %v6143_v48 = vadd.f32 %v1484_v12, %v1277_v52  ;;  %v9083_v56 = vand.u32 4294901760, %v6191_v63  ;;  %v6195_v12 = vand.u32 4294901760, %v586_v57 }
 0x171   : > { %1360 = vmatmul.f32.gmra.mxu2 %v922_v59  ;;  %v9278_v59 = vand.u32 4294901760, %v6043_v60  ;;  %v6173_v60 = vsub.f32 %v582_v17, %v6159_v18  ;;  %3115 = vmatpush.msra.mxu3 %v6063_v13  ;;  %v588_v17 = vld [vmem:[%s5374_s6 + $0x58] sm:$0xff] }
 0x172   : > { %1585 = vmatmul.f32.gmra.mxu3 %v923_v41  ;;  %2946 = vmatpush.msra.mxu2 %v9277_v46  ;;  %v1979_v41 = vand.u32 4294901760, %v1978_v1  ;;  %v2002_v20 = vsub.f32 %v6191_v63, %v9083_v56  ;;  %v6206_v1 = vsub.f32 %v586_v57, %v6195_v12  ;;  %v9288_v56 = vld [vmem:[#allocation23_spill] sm:$0xff] }
 0x173   : > { %v807_v2 = vpop.f32.mrf.mxu0  ;;  %v1088_v4 = vpop.f32.mrf.mxu1  ;;  %v9085_v39 = vand.u32 4294901760, %v6173_v60 }
 0x174   : > { %v1089_v42 = vadd.f32 %v1088_v4, %v799_v3  ;;  %v1281_v27 = vpop.f32.mrf.mxu2  ;;  %2950 = vmatpush.msra.mxu2 %v9278_v59  ;;  %v6210_v59 = vand.u32 4294901760, %v588_v17 }
 0x175   : > { %v1490_v55 = vpop.f32.mrf.mxu3  ;;  %v1994_v58 = vsub.f32 %v6173_v60, %v9085_v39 }
 0x176   : > { %v1282_v50 = vadd.f32 %v1281_v27, %v1089_v42  ;;  %1151 = vmatmul.f32.gmra.mxu1 %v6096_v0  ;;  %1654 = vmatmul.f32.vlgmr.msrb.gmra.mxu0 %v5528_v32  ;;  %v6221_v45 = vsub.f32 %v588_v17, %v6210_v59 }
 0x177   : > { %2954 = vmatpush.msra.mxu2 %v9279_v15  ;;  %v1995_v13 = vand.u32 4294901760, %v1994_v58 }
 0x178   : > { %v6166_v25 = vadd.f32 %v1490_v55, %v1282_v50  ;;  %v9082_v55 = vand.u32 4294901760, %v6206_v1 }
 0x179   : > { %1980 = vmatmul.f32.vlgmr.msrb.gmra.mxu2 %v1979_v41 }
 0x17a   : > { %2329 = vmatmul.f32.vlgmr.msrb.gmra.mxu3 %v6118_v37  ;;  %v2010_v15 = vsub.f32 %v6206_v1, %v9082_v55 }
 0x17b   : > { %v815_v9 = vpop.f32.mrf.mxu0  ;;  %v1092_v5 = vpop.f32.mrf.mxu1 }
 0x17c   : > { %v1093_v61 = vadd.f32 %v1092_v5, %v807_v2  ;;  %v1286_v51 = vpop.f32.mrf.mxu2 }
 0x17d   : > { %v1496_v22 = vpop.f32.mrf.mxu3 }
 0x17e   : > { %v1287_v7 = vadd.f32 %v1286_v51, %v1093_v61  ;;  %1658 = vmatmul.f32.gmra.mxu0 %v5586_v26  ;;  %1815 = vmatmul.f32.vlgmr.msrb.gmra.mxu1 %v5528_v32 }
 0x180   : > { %v6184_v49 = vadd.f32 %v1496_v22, %v1287_v7  ;;  %v6225_v7 = vand.u32 4294901760, %v590_v44 }
 0x181   : > { %1988 = vmatmul.f32.gmra.mxu2 %v1987_v16  ;;  %v9081_v16 = vand.u32 4294901760, %v6221_v45 }
 0x182   : > { %2333 = vmatmul.f32.gmra.mxu3 %v6137_v62 }
 0x183   : > { %v823_v35 = vpop.f32.mrf.mxu0  ;;  %v1096_v3 = vpop.f32.mrf.mxu1 }
 0x184   : > { %v1097_v11 = vadd.f32 %v1096_v3, %v815_v9  ;;  %v1291_v32 = vpop.f32.mrf.mxu2  ;;  %v6236_v3 = vsub.f32 %v590_v44, %v6225_v7 }
 0x185   : > { %v1502_v10 = vpop.f32.mrf.mxu3 }
 0x186   : > { %v1292_v6 = vadd.f32 %v1291_v32, %v1097_v11  ;;  %1662 = vmatmul.f32.gmra.mxu0 %v5633_v19  ;;  %1819 = vmatmul.f32.gmra.mxu1 %v5586_v26  ;;  %v2003_v26 = vand.u32 4294901760, %v2002_v20  ;;  %v592_v11 = vld [vmem:[%s5374_s6 + $0x78] sm:$0xff]  ;;  %v9079_v17 = vand.u32 4294901760, %v6236_v3 }
 0x188   : > { %v6199_v52 = vadd.f32 %v1502_v10, %v1292_v6 }
 0x189   : > { %1996 = vmatmul.f32.gmra.mxu2 %v1995_v13 }
 0x18a   : > { %2337 = vmatmul.f32.gmra.mxu3 %v6159_v18 }
 0x18b   : > { %v831_v46 = vpop.f32.mrf.mxu0  ;;  %v1100_v2 = vpop.f32.mrf.mxu1 }
 0x18c   : > { %v1101_v4 = vadd.f32 %v1100_v2, %v823_v35  ;;  %v1296_v42 = vpop.f32.mrf.mxu2  ;;  %v2018_v35 = vsub.f32 %v6221_v45, %v9081_v16 }
 0x18d   : > { %v1508_v27 = vpop.f32.mrf.mxu3 }
 0x18e   : > { %v1297_v41 = vadd.f32 %v1296_v42, %v1101_v4  ;;  %1666 = vmatmul.f32.gmra.mxu0 %v5668_v33  ;;  %1823 = vmatmul.f32.gmra.mxu1 %v5633_v19  ;;  %v2011_v19 = vand.u32 4294901760, %v2010_v15  ;;  %v2026_v42 = vsub.f32 %v6236_v3, %v9079_v17  ;;  %v9285_v17 = vld [vmem:[#allocation22_spill] sm:$0xff] }
 0x190   : > { %v6214_v50 = vadd.f32 %v1508_v27, %v1297_v41 }
 0x191   : > { %2004 = vmatmul.f32.gmra.mxu2 %v2003_v26  ;;  %v594_v26 = vld [vmem:[%s5374_s6 + $0x88] sm:$0xff] }
 0x192   : > { %2341 = vmatmul.f32.gmra.mxu3 %v6179_v40 }
 0x193   : > { %v839_v9 = vpop.f32.mrf.mxu0  ;;  %v1104_v5 = vpop.f32.mrf.mxu1 }
 0x194   : > { %v1105_v61 = vadd.f32 %v1104_v5, %v831_v46  ;;  %v1301_v51 = vpop.f32.mrf.mxu2  ;;  %v6240_v46 = vand.u32 4294901760, %v592_v11 }
 0x195   : > { %v1514_v22 = vpop.f32.mrf.mxu3 }
 0x196   : > { %v1302_v58 = vadd.f32 %v1301_v51, %v1105_v61  ;;  %1670 = vmatmul.f32.gmra.mxu0 %v5701_v38  ;;  %1827 = vmatmul.f32.gmra.mxu1 %v5668_v33  ;;  %v2019_v33 = vand.u32 4294901760, %v2018_v35  ;;  %v6251_v27 = vsub.f32 %v592_v11, %v6240_v46  ;;  %v6255_v51 = vand.u32 4294901760, %v594_v26  ;;  %v596_v11 = vld [vmem:[%s5374_s6 + $0x98] sm:$0xff] }
 0x198   : > { %v6229_v57 = vadd.f32 %v1514_v22, %v1302_v58  ;;  %v9078_v61 = vand.u32 4294901760, %v6251_v27  ;;  %v6266_v35 = vsub.f32 %v594_v26, %v6255_v51 }
 0x199   : > { %2012 = vmatmul.f32.gmra.mxu2 %v2011_v19 }
 0x19a   : > { %2345 = vmatmul.f32.gmra.mxu3 %v6195_v12  ;;  %v2034_v58 = vsub.f32 %v6251_v27, %v9078_v61 }
 0x19b   : > { %v847_v32 = vpop.f32.mrf.mxu0  ;;  %v1108_v10 = vpop.f32.mrf.mxu1 }
 0x19c   : > { %v1109_v13 = vadd.f32 %v1108_v10, %v839_v9  ;;  %v1306_v6 = vpop.f32.mrf.mxu2 }
 0x19d   : > { %v1520_v20 = vpop.f32.mrf.mxu3 }
 0x19e   : > { %v1307_v2 = vadd.f32 %v1306_v6, %v1109_v13  ;;  %1674 = vmatmul.f32.gmra.mxu0 %v5721_v54  ;;  %1831 = vmatmul.f32.gmra.mxu1 %v5701_v38  ;;  %v2027_v38 = vand.u32 4294901760, %v2026_v42 }
 0x1a0   : > { %v6244_v4 = vadd.f32 %v1520_v20, %v1307_v2  ;;  %v6270_v2 = vand.u32 4294901760, %v596_v11 }
 0x1a1   : > { %2020 = vmatmul.f32.gmra.mxu2 %v2019_v33  ;;  %v9077_v33 = vand.u32 4294901760, %v6266_v35 }
 0x1a2   : > { %2349 = vmatmul.f32.gmra.mxu3 %v6210_v59 }
 0x1a3   : > { %v855_v41 = vpop.f32.mrf.mxu0  ;;  %v1112_v15 = vpop.f32.mrf.mxu1  ;;  %v2042_v26 = vsub.f32 %v6266_v35, %v9077_v33 }
 0x1a4   : > { %v1113_v44 = vadd.f32 %v1112_v15, %v847_v32  ;;  %v1311_v9 = vpop.f32.mrf.mxu2  ;;  %v9280_v15 = vld [vmem:[#allocation20_spill] sm:$0xff] }
 0x1a5   : > { %v1526_v5 = vpop.f32.mrf.mxu3 }
 0x1a6   : > { %v1312_v22 = vadd.f32 %v1311_v9, %v1113_v44  ;;  %1678 = vmatmul.f32.gmra.mxu0 %v5745_v47  ;;  %1835 = vmatmul.f32.gmra.mxu1 %v5721_v54  ;;  %v2035_v54 = vand.u32 4294901760, %v2034_v58  ;;  %v598_v9 = vld [vmem:[%s5374_s6 + $0xa8] sm:$0xff] }
 0x1a8   : > { %v6259_v19 = vadd.f32 %v1526_v5, %v1312_v22 }
 0x1a9   : > { %2028 = vmatmul.f32.gmra.mxu2 %v2027_v38 }
 0x1aa   : > { %2353 = vmatmul.f32.gmra.mxu3 %v6225_v7 }
 0x1ab   : > { %v863_v32 = vpop.f32.mrf.mxu0  ;;  %v1116_v10 = vpop.f32.mrf.mxu1 }
 0x1ac   : > { %v1117_v13 = vadd.f32 %v1116_v10, %v855_v41  ;;  %v1316_v6 = vpop.f32.mrf.mxu2  ;;  %v6281_v41 = vsub.f32 %v596_v11, %v6270_v2 }
 0x1ad   : > { %v1532_v20 = vpop.f32.mrf.mxu3 }
 0x1ae   : > { %v1317_v42 = vadd.f32 %v1316_v6, %v1117_v13  ;;  %1682 = vmatmul.f32.gmra.mxu0 %v9280_v15  ;;  %1839 = vmatmul.f32.gmra.mxu1 %v5745_v47  ;;  %v2043_v47 = vand.u32 4294901760, %v2042_v26  ;;  %v9080_v13 = vand.u32 4294901760, %v6281_v41  ;;  %v6285_v6 = vand.u32 4294901760, %v598_v9  ;;  %v600_v26 = vld [vmem:[%s5374_s6 + $0xb8] sm:$0xff] }
 0x1b0   : > { %v6274_v44 = vadd.f32 %v1532_v20, %v1317_v42  ;;  %9281 = vst [vmem:[#allocation20_spill] sm:$0xff] %v6285_v6  ;;  %v2050_v11 = vsub.f32 %v6281_v41, %v9080_v13 }
 0x1b1   : > { %2036 = vmatmul.f32.gmra.mxu2 %v2035_v54  ;;  %v9282_v54 = vld [vmem:[#allocation21_spill] sm:$0xff] }
 0x1b2   : > { %2357 = vmatmul.f32.gmra.mxu3 %v6240_v46 }
 0x1b3   : > { %v871_v5 = vpop.f32.mrf.mxu0  ;;  %v1120_v38 = vpop.f32.mrf.mxu1 }
 0x1b4   : > { %v1121_v22 = vadd.f32 %v1120_v38, %v863_v32  ;;  %v1321_v58 = vpop.f32.mrf.mxu2  ;;  %v6296_v32 = vsub.f32 %v598_v9, %v6285_v6 }
 0x1b5   : > { %v1538_v10 = vpop.f32.mrf.mxu3 }
 0x1b6   : > { %v1322_v20 = vadd.f32 %v1321_v58, %v1121_v22  ;;  %1686 = vmatmul.f32.gmra.mxu0 %v9282_v54  ;;  %1843 = vmatmul.f32.gmra.mxu1 %v9280_v15  ;;  %9283 = vst [vmem:[#allocation21_spill] sm:$0xff] %v6296_v32  ;;  %v2051_v15 = vand.u32 4294901760, %v2050_v11  ;;  %v602_v11 = vld [vmem:[%s5374_s6 + $0xc8] sm:$0xff] }
 0x1b8   : > { %v6289_v42 = vadd.f32 %v1538_v10, %v1322_v20  ;;  %v9084_v10 = vand.u32 4294901760, %v6296_v32 }
 0x1b9   : > { %2044 = vmatmul.f32.gmra.mxu2 %v2043_v47  ;;  %v6300_v47 = vand.u32 4294901760, %v600_v26 }
 0x1ba   : > { %2361 = vmatmul.f32.gmra.mxu3 %v6255_v51  ;;  %v2058_v9 = vsub.f32 %v6296_v32, %v9084_v10  ;;  %v9316_v32 = vld [vmem:[#allocation30_spill] sm:$0xff] }
 0x1bb   : > { %v879_v38 = vpop.f32.mrf.mxu0  ;;  %v1124_v22 = vpop.f32.mrf.mxu1  ;;  %9284 = vst [vmem:[#allocation49_spill] sm:$0xff] %v6300_v47 }
 0x1bc   : > { %v1125_v58 = vadd.f32 %v1124_v22, %v871_v5  ;;  %v1326_v33 = vpop.f32.mrf.mxu2  ;;  %v6311_v5 = vsub.f32 %v600_v26, %v6300_v47 }
 0x1bd   : > { %v1544_v61 = vpop.f32.mrf.mxu3 }
 0x1be   : > { %v1327_v20 = vadd.f32 %v1326_v33, %v1125_v58  ;;  %1690 = vmatmul.f32.gmra.mxu0 %v9285_v17  ;;  %1847 = vmatmul.f32.gmra.mxu1 %v9282_v54  ;;  %9286 = vst [vmem:[#allocation22_spill] sm:$0xff] %v6311_v5  ;;  %v2059_v54 = vand.u32 4294901760, %v2058_v9  ;;  %v604_v9 = vld [vmem:[%s5374_s6 + $0xd8] sm:$0xff] }
 0x1c0   : > { %v6304_v13 = vadd.f32 %v1544_v61, %v1327_v20  ;;  %v9088_v61 = vand.u32 4294901760, %v6311_v5 }
 0x1c1   : > { %2052 = vmatmul.f32.gmra.mxu2 %v2051_v15  ;;  %v6315_v15 = vand.u32 4294901760, %v602_v11 }
 0x1c2   : > { %2365 = vmatmul.f32.gmra.mxu3 %v6270_v2  ;;  %v2066_v26 = vsub.f32 %v6311_v5, %v9088_v61 }
 0x1c3   : > { %v887_v22 = vpop.f32.mrf.mxu0  ;;  %v1128_v33 = vpop.f32.mrf.mxu1  ;;  %9287 = vst [vmem:[#allocation50_spill] sm:$0xff] %v6315_v15 }
 0x1c4   : > { %v1129_v58 = vadd.f32 %v1128_v33, %v879_v38  ;;  %v1331_v16 = vpop.f32.mrf.mxu2  ;;  %v6326_v38 = vsub.f32 %v602_v11, %v6315_v15 }
 0x1c5   : > { %v1550_v55 = vpop.f32.mrf.mxu3 }
 0x1c6   : > { %v1332_v20 = vadd.f32 %v1331_v16, %v1129_v58  ;;  %1694 = vmatmul.f32.gmra.mxu0 %v9288_v56  ;;  %1851 = vmatmul.f32.gmra.mxu1 %v9285_v17  ;;  %9289 = vst [vmem:[#allocation23_spill] sm:$0xff] %v6326_v38  ;;  %v2067_v17 = vand.u32 4294901760, %v2066_v26  ;;  %v606_v26 = vld [vmem:[%s5374_s6 + $0xe8] sm:$0xff] }
 0x1c8   : > { %v6319_v10 = vadd.f32 %v1550_v55, %v1332_v20  ;;  %v9095_v55 = vand.u32 4294901760, %v6326_v38 }
 0x1c9   : > { %2060 = vmatmul.f32.gmra.mxu2 %v2059_v54  ;;  %v6330_v54 = vand.u32 4294901760, %v604_v9 }
 0x1ca   : > { %2369 = vmatmul.f32.gmra.mxu3 %v6285_v6  ;;  %v2074_v11 = vsub.f32 %v6326_v38, %v9095_v55 }
 0x1cb   : > { %v895_v33 = vpop.f32.mrf.mxu0  ;;  %v1132_v16 = vpop.f32.mrf.mxu1  ;;  %9290 = vst [vmem:[#allocation51_spill] sm:$0xff] %v6330_v54 }
 0x1cc   : > { %v1133_v58 = vadd.f32 %v1132_v16, %v887_v22  ;;  %v1336_v39 = vpop.f32.mrf.mxu2  ;;  %v6341_v22 = vsub.f32 %v604_v9, %v6330_v54 }
 0x1cd   : > { %v1556_v21 = vpop.f32.mrf.mxu3 }
 0x1ce   : > { %v1337_v20 = vadd.f32 %v1336_v39, %v1133_v58  ;;  %1698 = vmatmul.f32.gmra.mxu0 %v9291_v24  ;;  %1855 = vmatmul.f32.gmra.mxu1 %v9288_v56  ;;  %9293 = vst [vmem:[#allocation52_spill] sm:$0xff] %v6341_v22  ;;  %v2075_v56 = vand.u32 4294901760, %v2074_v11  ;;  %v608_v11 = vld [vmem:[%s5374_s6 + $0xf8] sm:$0xff] }
 0x1d0   : > { %v6334_v61 = vadd.f32 %v1556_v21, %v1337_v20  ;;  %v9100_v21 = vand.u32 4294901760, %v6341_v22 }
 0x1d1   : > { %2068 = vmatmul.f32.gmra.mxu2 %v2067_v17  ;;  %v6345_v17 = vand.u32 4294901760, %v606_v26 }
 0x1d2   : > { %9292 = vst [vmem:[#allocation24_spill] sm:$0xff] %v6334_v61  ;;  %2373 = vmatmul.f32.gmra.mxu3 %v6300_v47  ;;  %v9295_v47 = vld [vmem:[#allocation25_spill] sm:$0xff]  ;;  %v2082_v9 = vsub.f32 %v6341_v22, %v9100_v21 }
 0x1d3   : > { %v903_v16 = vpop.f32.mrf.mxu0  ;;  %v1136_v39 = vpop.f32.mrf.mxu1  ;;  %9294 = vst [vmem:[#allocation53_spill] sm:$0xff] %v6345_v17 }
 0x1d4   : > { %v1137_v58 = vadd.f32 %v1136_v39, %v895_v33  ;;  %v1341_v5 = vpop.f32.mrf.mxu2  ;;  %v6356_v33 = vsub.f32 %v606_v26, %v6345_v17 }
 0x1d5   : > { %v1562_v6 = vpop.f32.mrf.mxu3 }
 0x1d6   : > { %v1342_v20 = vadd.f32 %v1341_v5, %v1137_v58  ;;  %1702 = vmatmul.f32.gmra.mxu0 %v9295_v47  ;;  %1859 = vmatmul.f32.gmra.mxu1 %v9291_v24  ;;  %9297 = vst [vmem:[#allocation54_spill] sm:$0xff] %v6356_v33  ;;  %v2083_v24 = vand.u32 4294901760, %v2082_v9  ;;  %v610_v9 = vld [vmem:[%s5374_s6 + $0x108] sm:$0xff] }
 0x1d8   : > { %v6349_v55 = vadd.f32 %v1562_v6, %v1342_v20  ;;  %v9105_v6 = vand.u32 4294901760, %v6356_v33 }
 0x1d9   : > { %2076 = vmatmul.f32.gmra.mxu2 %v2075_v56  ;;  %v6360_v56 = vand.u32 4294901760, %v608_v11 }
 0x1da   : > { %9296 = vst [vmem:[#allocation25_spill] sm:$0xff] %v6349_v55  ;;  %2377 = vmatmul.f32.gmra.mxu3 %v6315_v15  ;;  %v9299_v15 = vld [vmem:[#allocation26_spill] sm:$0xff]  ;;  %v2090_v26 = vsub.f32 %v6356_v33, %v9105_v6 }
 0x1db   : > { %v911_v39 = vpop.f32.mrf.mxu0  ;;  %v1140_v5 = vpop.f32.mrf.mxu1  ;;  %9298 = vst [vmem:[#allocation55_spill] sm:$0xff] %v6360_v56 }
 0x1dc   : > { %v1141_v58 = vadd.f32 %v1140_v5, %v903_v16  ;;  %v1346_v38 = vpop.f32.mrf.mxu2  ;;  %v6371_v16 = vsub.f32 %v608_v11, %v6360_v56 }
 0x1dd   : > { %v1568_v61 = vpop.f32.mrf.mxu3 }
 0x1de   : > { %v1347_v20 = vadd.f32 %v1346_v38, %v1141_v58  ;;  %1706 = vmatmul.f32.gmra.mxu0 %v9299_v15  ;;  %1863 = vmatmul.f32.gmra.mxu1 %v9295_v47  ;;  %9301 = vst [vmem:[#allocation56_spill] sm:$0xff] %v6371_v16  ;;  %v2091_v47 = vand.u32 4294901760, %v2090_v26  ;;  %v612_v26 = vld [vmem:[%s5374_s6 + $0x118] sm:$0xff] }
 0x1e0   : > { %v6364_v21 = vadd.f32 %v1568_v61, %v1347_v20  ;;  %v9110_v61 = vand.u32 4294901760, %v6371_v16 }
 0x1e1   : > { %2084 = vmatmul.f32.gmra.mxu2 %v2083_v24  ;;  %v6375_v24 = vand.u32 4294901760, %v610_v9 }
 0x1e2   : > { %9300 = vst [vmem:[#allocation26_spill] sm:$0xff] %v6364_v21  ;;  %2381 = vmatmul.f32.gmra.mxu3 %v6330_v54  ;;  %v9303_v54 = vld [vmem:[#allocation27_spill] sm:$0xff]  ;;  %v2098_v11 = vsub.f32 %v6371_v16, %v9110_v61 }
 0x1e3   : > { %v919_v5 = vpop.f32.mrf.mxu0  ;;  %v1144_v38 = vpop.f32.mrf.mxu1  ;;  %9302 = vst [vmem:[#allocation57_spill] sm:$0xff] %v6375_v24 }
 0x1e4   : > { %v1145_v58 = vadd.f32 %v1144_v38, %v911_v39  ;;  %v1351_v22 = vpop.f32.mrf.mxu2  ;;  %v6386_v39 = vsub.f32 %v610_v9, %v6375_v24 }
 0x1e5   : > { %v1574_v55 = vpop.f32.mrf.mxu3 }
 0x1e6   : > { %v1352_v20 = vadd.f32 %v1351_v22, %v1145_v58  ;;  %1710 = vmatmul.f32.gmra.mxu0 %v9303_v54  ;;  %1867 = vmatmul.f32.gmra.mxu1 %v9299_v15  ;;  %9305 = vst [vmem:[#allocation58_spill] sm:$0xff] %v6386_v39  ;;  %v2099_v15 = vand.u32 4294901760, %v2098_v11  ;;  %v614_v11 = vld [vmem:[%s5374_s6 + $0x128] sm:$0xff] }
 0x1e8   : > { %v6379_v6 = vadd.f32 %v1574_v55, %v1352_v20  ;;  %v9115_v55 = vand.u32 4294901760, %v6386_v39 }
 0x1e9   : > { %2092 = vmatmul.f32.gmra.mxu2 %v2091_v47  ;;  %v6390_v47 = vand.u32 4294901760, %v612_v26 }
 0x1ea   : > { %9304 = vst [vmem:[#allocation27_spill] sm:$0xff] %v6379_v6  ;;  %2385 = vmatmul.f32.gmra.mxu3 %v6345_v17  ;;  %v9307_v17 = vld [vmem:[#allocation28_spill] sm:$0xff]  ;;  %v2106_v9 = vsub.f32 %v6386_v39, %v9115_v55  ;;  %v616_v39 = vld [vmem:[%s5374_s6 + $0x138] sm:$0xff] }
 0x1eb   : > { %v927_v38 = vpop.f32.mrf.mxu0  ;;  %v1148_v22 = vpop.f32.mrf.mxu1  ;;  %9306 = vst [vmem:[#allocation59_spill] sm:$0xff] %v6390_v47 }
 0x1ec   : > { %v1149_v58 = vadd.f32 %v1148_v22, %v919_v5  ;;  %v1356_v33 = vpop.f32.mrf.mxu2  ;;  %v6401_v5 = vsub.f32 %v612_v26, %v6390_v47 }
 0x1ed   : > { %v1580_v21 = vpop.f32.mrf.mxu3 }
 0x1ee   : > { %v1357_v20 = vadd.f32 %v1356_v33, %v1149_v58  ;;  %1714 = vmatmul.f32.gmra.mxu0 %v9307_v17  ;;  %1871 = vmatmul.f32.gmra.mxu1 %v9303_v54  ;;  %9309 = vst [vmem:[#allocation60_spill] sm:$0xff] %v6401_v5  ;;  %v2107_v54 = vand.u32 4294901760, %v2106_v9  ;;  %v9314_v9 = vld [vmem:[#allocation33_spill] sm:$0xff] }
 0x1f0   : > { %v6394_v61 = vadd.f32 %v1580_v21, %v1357_v20  ;;  %v9122_v21 = vand.u32 4294901760, %v6401_v5 }
 0x1f1   : > { %2100 = vmatmul.f32.gmra.mxu2 %v2099_v15  ;;  %v6405_v15 = vand.u32 4294901760, %v614_v11 }
 0x1f2   : > { %9308 = vst [vmem:[#allocation28_spill] sm:$0xff] %v6394_v61  ;;  %2389 = vmatmul.f32.gmra.mxu3 %v6360_v56  ;;  %v9311_v56 = vld [vmem:[#allocation29_spill] sm:$0xff]  ;;  %v2114_v26 = vsub.f32 %v6401_v5, %v9122_v21 }
 0x1f3   : > { %v1152_v22 = vpop.f32.mrf.mxu1  ;;  %v1655_v16 = vpop.f32.mrf.mxu0  ;;  %9310 = vst [vmem:[#allocation61_spill] sm:$0xff] %v6405_v15 }
 0x1f4   : > { %v1153_v33 = vadd.f32 %v1152_v22, %v927_v38  ;;  %v1361_v58 = vpop.f32.mrf.mxu2  ;;  %v6416_v38 = vsub.f32 %v614_v11, %v6405_v15  ;;  %v1656_v22 = vadd.f32 %v1655_v16, %v9314_v9  ;;  %v9319_v9 = vld [vmem:[#allocation35_spill] sm:$0xff] }
 0x1f5   : > { %v1586_v6 = vpop.f32.mrf.mxu3 }
 0x1f6   : > { %v1362_v20 = vadd.f32 %v1361_v58, %v1153_v33  ;;  %1718 = vmatmul.f32.gmra.mxu0 %v9311_v56  ;;  %1875 = vmatmul.f32.gmra.mxu1 %v9307_v17  ;;  %9313 = vst [vmem:[#allocation62_spill] sm:$0xff] %v6416_v38 }
 0x1f8   : > { %v6409_v55 = vadd.f32 %v1586_v6, %v1362_v20  ;;  %v2115_v20 = vand.u32 4294901760, %v2114_v26 }
 0x1f9   : > { %2108 = vmatmul.f32.gmra.mxu2 %v2107_v54  ;;  %v9127_v54 = vand.u32 4294901760, %v6416_v38 }
 0x1fa   : > { %9312 = vst [vmem:[#allocation29_spill] sm:$0xff] %v6409_v55  ;;  %2393 = vmatmul.f32.gmra.mxu3 %v6375_v24  ;;  %v6421_v24 = vand.u32 4294901760, %v616_v39 }
 0x1fb   : > { %v1659_v33 = vpop.f32.mrf.mxu0  ;;  %v1816_v58 = vpop.f32.mrf.mxu1  ;;  %v2122_v16 = vsub.f32 %v6416_v38, %v9127_v54 }
 0x1fc   : > { %v1817_v61 = vadd.f32 %v1816_v58, %v1656_v22  ;;  %v1981_v17 = vpop.f32.mrf.mxu2  ;;  %9315 = vst [vmem:[#allocation33_spill] sm:$0xff] %v6421_v24  ;;  %v6432_v26 = vsub.f32 %v616_v39, %v6421_v24  ;;  %v1660_v22 = vadd.f32 %v1659_v33, %v9319_v9  ;;  %v618_v58 = vld [vmem:[%s5374_s6 + $0x148] sm:$0xff]  ;;  %v9324_v9 = vld [vmem:[#allocation37_spill] sm:$0xff] }
 0x1fd   : > { %v2330_v6 = vpop.f32.mrf.mxu3 }
 0x1fe   : > { %v1982_v55 = vadd.f32 %v1981_v17, %v1817_v61  ;;  %1722 = vmatmul.f32.gmra.mxu0 %v9316_v32  ;;  %1879 = vmatmul.f32.gmra.mxu1 %v9311_v56  ;;  %9318 = vst [vmem:[#allocation63_spill] sm:$0xff] %v6432_v26 }
 0x200   : > { %v6425_v11 = vadd.f32 %v2330_v6, %v1982_v55  ;;  %v2123_v6 = vand.u32 4294901760, %v2122_v16 }
 0x201   : > { %2116 = vmatmul.f32.gmra.mxu2 %v2115_v20  ;;  %v9132_v20 = vand.u32 4294901760, %v6432_v26 }
 0x202   : > { %9317 = vst [vmem:[#allocation30_spill] sm:$0xff] %v6425_v11  ;;  %2397 = vmatmul.f32.gmra.mxu3 %v6390_v47  ;;  %v6437_v47 = vand.u32 4294901760, %v618_v58  ;;  %v9321_v11 = vld [vmem:[#allocation31_spill] sm:$0xff] }
 0x203   : > { %v1663_v61 = vpop.f32.mrf.mxu0  ;;  %v1820_v17 = vpop.f32.mrf.mxu1  ;;  %v2130_v33 = vsub.f32 %v6432_v26, %v9132_v20 }
 0x204   : > { %v1821_v21 = vadd.f32 %v1820_v17, %v1660_v22  ;;  %v1989_v56 = vpop.f32.mrf.mxu2  ;;  %9320 = vst [vmem:[#allocation35_spill] sm:$0xff] %v6437_v47  ;;  %v6448_v16 = vsub.f32 %v618_v58, %v6437_v47  ;;  %v1664_v22 = vadd.f32 %v1663_v61, %v9324_v9  ;;  %v620_v17 = vld [vmem:[%s5374_s6 + $0x158] sm:$0xff]  ;;  %v9329_v9 = vld [vmem:[#allocation39_spill] sm:$0xff] }
 0x205   : > { %v2334_v55 = vpop.f32.mrf.mxu3 }
 0x206   : > { %v1990_v5 = vadd.f32 %v1989_v56, %v1821_v21  ;;  %1726 = vmatmul.f32.gmra.mxu0 %v9321_v11  ;;  %1883 = vmatmul.f32.gmra.mxu1 %v9316_v32  ;;  %9323 = vst [vmem:[#allocation64_spill] sm:$0xff] %v6448_v16 }
 0x208   : > { %v6441_v39 = vadd.f32 %v2334_v55, %v1990_v5  ;;  %v2131_v55 = vand.u32 4294901760, %v2130_v33 }
 0x209   : > { %2124 = vmatmul.f32.gmra.mxu2 %v2123_v6  ;;  %v9137_v6 = vand.u32 4294901760, %v6448_v16 }
 0x20a   : > { %9322 = vst [vmem:[#allocation31_spill] sm:$0xff] %v6441_v39  ;;  %2401 = vmatmul.f32.gmra.mxu3 %v6405_v15  ;;  %v6453_v15 = vand.u32 4294901760, %v620_v17  ;;  %v9326_v39 = vld [vmem:[#allocation32_spill] sm:$0xff] }
 0x20b   : > { %v1667_v21 = vpop.f32.mrf.mxu0  ;;  %v1824_v56 = vpop.f32.mrf.mxu1  ;;  %v2138_v61 = vsub.f32 %v6448_v16, %v9137_v6 }
 0x20c   : > { %v1825_v54 = vadd.f32 %v1824_v56, %v1664_v22  ;;  %v1997_v32 = vpop.f32.mrf.mxu2  ;;  %9325 = vst [vmem:[#allocation37_spill] sm:$0xff] %v6453_v15  ;;  %v6464_v33 = vsub.f32 %v620_v17, %v6453_v15  ;;  %v1668_v22 = vadd.f32 %v1667_v21, %v9329_v9  ;;  %v622_v56 = vld [vmem:[%s5374_s6 + $0x168] sm:$0xff]  ;;  %v9334_v9 = vld [vmem:[#allocation41_spill] sm:$0xff] }
 0x20d   : > { %v2338_v5 = vpop.f32.mrf.mxu3 }
 0x20e   : > { %v1998_v38 = vadd.f32 %v1997_v32, %v1825_v54  ;;  %1730 = vmatmul.f32.gmra.mxu0 %v9326_v39  ;;  %1887 = vmatmul.f32.gmra.mxu1 %v9321_v11  ;;  %9328 = vst [vmem:[#allocation65_spill] sm:$0xff] %v6464_v33 }
 0x210   : > { %v6457_v58 = vadd.f32 %v2338_v5, %v1998_v38  ;;  %v2139_v5 = vand.u32 4294901760, %v2138_v61 }
 0x211   : > { %2132 = vmatmul.f32.gmra.mxu2 %v2131_v55  ;;  %v9142_v55 = vand.u32 4294901760, %v6464_v33 }
 0x212   : > { %9327 = vst [vmem:[#allocation32_spill] sm:$0xff] %v6457_v58  ;;  %2405 = vmatmul.f32.gmra.mxu3 %v6421_v24  ;;  %v6469_v24 = vand.u32 4294901760, %v622_v56  ;;  %v9331_v58 = vld [vmem:[#allocation34_spill] sm:$0xff] }
 0x213   : > { %v1671_v54 = vpop.f32.mrf.mxu0  ;;  %v1828_v32 = vpop.f32.mrf.mxu1  ;;  %v2146_v21 = vsub.f32 %v6464_v33, %v9142_v55 }
 0x214   : > { %v1829_v20 = vadd.f32 %v1828_v32, %v1668_v22  ;;  %v2005_v11 = vpop.f32.mrf.mxu2  ;;  %9330 = vst [vmem:[#allocation39_spill] sm:$0xff] %v6469_v24  ;;  %v6480_v61 = vsub.f32 %v622_v56, %v6469_v24  ;;  %v1672_v22 = vadd.f32 %v1671_v54, %v9334_v9  ;;  %v624_v32 = vld [vmem:[%s5374_s6 + $0x178] sm:$0xff]  ;;  %v9339_v9 = vld [vmem:[#allocation43_spill] sm:$0xff] }
 0x215   : > { %v2342_v38 = vpop.f32.mrf.mxu3 }
 0x216   : > { %v2006_v26 = vadd.f32 %v2005_v11, %v1829_v20  ;;  %1734 = vmatmul.f32.gmra.mxu0 %v9331_v58  ;;  %1891 = vmatmul.f32.gmra.mxu1 %v9326_v39  ;;  %9333 = vst [vmem:[#allocation66_spill] sm:$0xff] %v6480_v61 }
 0x218   : > { %v6473_v17 = vadd.f32 %v2342_v38, %v2006_v26  ;;  %v2147_v38 = vand.u32 4294901760, %v2146_v21 }
 0x219   : > { %2140 = vmatmul.f32.gmra.mxu2 %v2139_v5  ;;  %v9147_v5 = vand.u32 4294901760, %v6480_v61 }
 0x21a   : > { %9332 = vst [vmem:[#allocation34_spill] sm:$0xff] %v6473_v17  ;;  %2409 = vmatmul.f32.gmra.mxu3 %v6437_v47  ;;  %v6485_v47 = vand.u32 4294901760, %v624_v32  ;;  %v9336_v17 = vld [vmem:[#allocation36_spill] sm:$0xff] }
 0x21b   : > { %v1675_v20 = vpop.f32.mrf.mxu0  ;;  %v1832_v11 = vpop.f32.mrf.mxu1  ;;  %v2154_v54 = vsub.f32 %v6480_v61, %v9147_v5 }
 0x21c   : > { %v1833_v6 = vadd.f32 %v1832_v11, %v1672_v22  ;;  %v2013_v39 = vpop.f32.mrf.mxu2  ;;  %9335 = vst [vmem:[#allocation41_spill] sm:$0xff] %v6485_v47  ;;  %v6496_v21 = vsub.f32 %v624_v32, %v6485_v47  ;;  %v1676_v22 = vadd.f32 %v1675_v20, %v9339_v9  ;;  %v626_v11 = vld [vmem:[%s5374_s6 + $0x188] sm:$0xff]  ;;  %v9344_v9 = vld [vmem:[#allocation45_spill] sm:$0xff] }
 0x21d   : > { %v2346_v26 = vpop.f32.mrf.mxu3 }
 0x21e   : > { %v2014_v16 = vadd.f32 %v2013_v39, %v1833_v6  ;;  %1738 = vmatmul.f32.gmra.mxu0 %v9336_v17  ;;  %1895 = vmatmul.f32.gmra.mxu1 %v9331_v58  ;;  %9338 = vst [vmem:[#allocation67_spill] sm:$0xff] %v6496_v21 }
 0x220   : > { %v6489_v56 = vadd.f32 %v2346_v26, %v2014_v16  ;;  %v2155_v26 = vand.u32 4294901760, %v2154_v54 }
 0x221   : > { %2148 = vmatmul.f32.gmra.mxu2 %v2147_v38  ;;  %v9152_v38 = vand.u32 4294901760, %v6496_v21 }
 0x222   : > { %9337 = vst [vmem:[#allocation36_spill] sm:$0xff] %v6489_v56  ;;  %2413 = vmatmul.f32.gmra.mxu3 %v6453_v15  ;;  %v6501_v15 = vand.u32 4294901760, %v626_v11  ;;  %v9341_v56 = vld [vmem:[#allocation38_spill] sm:$0xff] }
 0x223   : > { %v1679_v6 = vpop.f32.mrf.mxu0  ;;  %v1836_v39 = vpop.f32.mrf.mxu1  ;;  %v2162_v20 = vsub.f32 %v6496_v21, %v9152_v38 }
 0x224   : > { %v1837_v55 = vadd.f32 %v1836_v39, %v1676_v22  ;;  %v2021_v58 = vpop.f32.mrf.mxu2  ;;  %9340 = vst [vmem:[#allocation43_spill] sm:$0xff] %v6501_v15  ;;  %v6512_v54 = vsub.f32 %v626_v11, %v6501_v15  ;;  %v1680_v22 = vadd.f32 %v1679_v6, %v9344_v9  ;;  %v628_v39 = vld [vmem:[%s5374_s6 + $0x198] sm:$0xff] }
 0x225   : > { %v2350_v16 = vpop.f32.mrf.mxu3  ;;  %v9348_v9 = vld [vmem:[#allocation46_spill] sm:$0xff] }
 0x226   : > { %v2022_v33 = vadd.f32 %v2021_v58, %v1837_v55  ;;  %1742 = vmatmul.f32.gmra.mxu0 %v9341_v56  ;;  %1899 = vmatmul.f32.gmra.mxu1 %v9336_v17  ;;  %9343 = vst [vmem:[#allocation68_spill] sm:$0xff] %v6512_v54 }
 0x228   : > { %v6505_v32 = vadd.f32 %v2350_v16, %v2022_v33  ;;  %v2163_v16 = vand.u32 4294901760, %v2162_v20 }
 0x229   : > { %2156 = vmatmul.f32.gmra.mxu2 %v2155_v26  ;;  %v9157_v26 = vand.u32 4294901760, %v6512_v54 }
 0x22a   : > { %9342 = vst [vmem:[#allocation38_spill] sm:$0xff] %v6505_v32  ;;  %2417 = vmatmul.f32.gmra.mxu3 %v6469_v24  ;;  %v6517_v24 = vand.u32 4294901760, %v628_v39  ;;  %v9346_v32 = vld [vmem:[#allocation40_spill] sm:$0xff] }
 0x22b   : > { %v1683_v55 = vpop.f32.mrf.mxu0  ;;  %v1840_v58 = vpop.f32.mrf.mxu1  ;;  %v2170_v6 = vsub.f32 %v6512_v54, %v9157_v26 }
 0x22c   : > { %v1841_v5 = vadd.f32 %v1840_v58, %v1680_v22  ;;  %v2029_v17 = vpop.f32.mrf.mxu2  ;;  %9345 = vst [vmem:[#allocation45_spill] sm:$0xff] %v6517_v24  ;;  %v6528_v20 = vsub.f32 %v628_v39, %v6517_v24  ;;  %v1684_v22 = vadd.f32 %v1683_v55, %v9348_v9  ;;  %v630_v58 = vld [vmem:[%s5374_s6 + $0x1a8] sm:$0xff]  ;;  %v9353_v9 = vld [vmem:[#allocation47_spill] sm:$0xff] }
 0x22d   : > { %v2354_v33 = vpop.f32.mrf.mxu3 }
 0x22e   : > { %v2030_v61 = vadd.f32 %v2029_v17, %v1841_v5  ;;  %1746 = vmatmul.f32.gmra.mxu0 %v9346_v32  ;;  %1903 = vmatmul.f32.gmra.mxu1 %v9341_v56 }
 0x230   : > { %v6521_v11 = vadd.f32 %v2354_v33, %v2030_v61  ;;  %v2171_v33 = vand.u32 4294901760, %v2170_v6 }
 0x231   : > { %2164 = vmatmul.f32.gmra.mxu2 %v2163_v16  ;;  %v9162_v16 = vand.u32 4294901760, %v6528_v20 }
 0x232   : > { %9347 = vst [vmem:[#allocation40_spill] sm:$0xff] %v6521_v11  ;;  %2421 = vmatmul.f32.gmra.mxu3 %v6485_v47  ;;  %v6533_v47 = vand.u32 4294901760, %v630_v58  ;;  %v9350_v11 = vld [vmem:[#allocation42_spill] sm:$0xff] }
 0x233   : > { %v1687_v5 = vpop.f32.mrf.mxu0  ;;  %v1844_v17 = vpop.f32.mrf.mxu1  ;;  %v2178_v55 = vsub.f32 %v6528_v20, %v9162_v16 }
 0x234   : > { %v1845_v38 = vadd.f32 %v1844_v17, %v1684_v22  ;;  %v2037_v56 = vpop.f32.mrf.mxu2  ;;  %9349 = vst [vmem:[#allocation46_spill] sm:$0xff] %v6533_v47  ;;  %v6544_v6 = vsub.f32 %v630_v58, %v6533_v47  ;;  %v1688_v22 = vadd.f32 %v1687_v5, %v9353_v9  ;;  %v632_v17 = vld [vmem:[%s5374_s6 + $0x1b8] sm:$0xff] }
 0x235   : > { %v2358_v61 = vpop.f32.mrf.mxu3 }
 0x236   : > { %v2038_v21 = vadd.f32 %v2037_v56, %v1845_v38  ;;  %1750 = vmatmul.f32.gmra.mxu0 %v9350_v11  ;;  %1907 = vmatmul.f32.gmra.mxu1 %v9346_v32  ;;  %9352 = vst [vmem:[#allocation69_spill] sm:$0xff] %v6544_v6 }
 0x238   : > { %v6537_v39 = vadd.f32 %v2358_v61, %v2038_v21  ;;  %v2179_v61 = vand.u32 4294901760, %v2178_v55 }
 0x239   : > { %2172 = vmatmul.f32.gmra.mxu2 %v2171_v33  ;;  %v9165_v33 = vand.u32 4294901760, %v6544_v6 }
 0x23a   : > { %9351 = vst [vmem:[#allocation42_spill] sm:$0xff] %v6537_v39  ;;  %2425 = vmatmul.f32.gmra.mxu3 %v6501_v15  ;;  %v6549_v15 = vand.u32 4294901760, %v632_v17  ;;  %v9355_v39 = vld [vmem:[#allocation44_spill] sm:$0xff] }
 0x23b   : > { %v1691_v38 = vpop.f32.mrf.mxu0  ;;  %v1848_v56 = vpop.f32.mrf.mxu1  ;;  %v2186_v5 = vsub.f32 %v6544_v6, %v9165_v33 }
 0x23c   : > { %v1849_v26 = vadd.f32 %v1848_v56, %v1688_v22  ;;  %v2045_v32 = vpop.f32.mrf.mxu2  ;;  %9354 = vst [vmem:[#allocation47_spill] sm:$0xff] %v6549_v15  ;;  %v6560_v55 = vsub.f32 %v632_v17, %v6549_v15  ;;  %v1692_v9 = vadd.f32 %v1691_v38, %v6058_v28  ;;  %v634_v22 = vld [vmem:[%s5374_s6 + $0x1c8] sm:$0xff] }
 0x23d   : > { %v2362_v21 = vpop.f32.mrf.mxu3  ;;  %v6565_v16 = vand.u32 4294901760, %v634_v22 }
 0x23e   : > { %v2046_v54 = vadd.f32 %v2045_v32, %v1849_v26  ;;  %1754 = vmatmul.f32.gmra.mxu0 %v9355_v39  ;;  %1911 = vmatmul.f32.gmra.mxu1 %v9350_v11 }
 0x23f   : > { %9356 = vst [vmem:[#allocation44_spill] sm:$0xff] %v6565_v16  ;;  %v6576_v38 = vsub.f32 %v634_v22, %v6565_v16 }
 0x240   : > { %v6553_v58 = vadd.f32 %v2362_v21, %v2046_v54  ;;  %v2187_v21 = vand.u32 4294901760, %v2186_v5  ;;  %v9357_v5 = vld [vmem:[#allocation48_spill] sm:$0xff] }
 0x241   : > { %2180 = vmatmul.f32.gmra.mxu2 %v2179_v61  ;;  %v9170_v61 = vand.u32 4294901760, %v6560_v55 }
 0x242   : > { %2429 = vmatmul.f32.gmra.mxu3 %v6517_v24 }
 0x243   : > { %v1695_v26 = vpop.f32.mrf.mxu0  ;;  %v1852_v56 = vpop.f32.mrf.mxu1  ;;  %v2194_v28 = vsub.f32 %v6560_v55, %v9170_v61 }
 0x244   : > { %v1853_v32 = vadd.f32 %v1852_v56, %v1692_v9  ;;  %v2053_v11 = vpop.f32.mrf.mxu2  ;;  %v1696_v9 = vadd.f32 %v1695_v26, %v9357_v5  ;;  %v636_v56 = vld [vmem:[%s5374_s6 + $0x1d8] sm:$0xff] }
 0x245   : > { %v2366_v54 = vpop.f32.mrf.mxu3 }
 0x246   : > { %v2054_v24 = vadd.f32 %v2053_v11, %v1853_v32  ;;  %1758 = vmatmul.f32.gmra.mxu0 %v6025_v23  ;;  %1915 = vmatmul.f32.gmra.mxu1 %v9355_v39 }
 0x248   : > { %v6569_v17 = vadd.f32 %v2366_v54, %v2054_v24  ;;  %v2195_v54 = vand.u32 4294901760, %v2194_v28 }
 0x249   : > { %2188 = vmatmul.f32.gmra.mxu2 %v2187_v21  ;;  %v9173_v21 = vand.u32 4294901760, %v6576_v38 }
 0x24a   : > { %2433 = vmatmul.f32.gmra.mxu3 %v6533_v47  ;;  %v6581_v47 = vand.u32 4294901760, %v636_v56 }
 0x24b   : > { %v1699_v32 = vpop.f32.mrf.mxu0  ;;  %v1856_v11 = vpop.f32.mrf.mxu1  ;;  %v2202_v26 = vsub.f32 %v6576_v38, %v9173_v21 }
 0x24c   : > { %v1857_v33 = vadd.f32 %v1856_v11, %v1696_v9  ;;  %v2061_v39 = vpop.f32.mrf.mxu2  ;;  %9358 = vst [vmem:[#allocation48_spill] sm:$0xff] %v6581_v47  ;;  %v6592_v28 = vsub.f32 %v636_v56, %v6581_v47  ;;  %v1700_v5 = vadd.f32 %v1699_v32, %v6094_v36  ;;  %v638_v9 = vld [vmem:[%s5374_s6 + $0x1e8] sm:$0xff] }
 0x24d   : > { %v2370_v24 = vpop.f32.mrf.mxu3  ;;  %v6597_v61 = vand.u32 4294901760, %v638_v9 }
 0x24e   : > { %v2062_v6 = vadd.f32 %v2061_v39, %v1857_v33  ;;  %1762 = vmatmul.f32.gmra.mxu0 %v6033_v31  ;;  %1919 = vmatmul.f32.gmra.mxu1 %v6025_v23  ;;  %9359 = vst [vmem:[#allocation70_spill] sm:$0xff] %v6592_v28 }
 0x24f   : > { %9360 = vst [vmem:[#allocation71_spill] sm:$0xff] %v6597_v61  ;;  %v6608_v32 = vsub.f32 %v638_v9, %v6597_v61 }
 0x250   : > { %v6585_v22 = vadd.f32 %v2370_v24, %v2062_v6  ;;  %v2203_v24 = vand.u32 4294901760, %v2202_v26 }
 0x251   : > { %2196 = vmatmul.f32.gmra.mxu2 %v2195_v54  ;;  %v9176_v54 = vand.u32 4294901760, %v6592_v28  ;;  %9361 = vst [vmem:[#allocation72_spill] sm:$0xff] %v6608_v32 }
 0x252   : > { %2437 = vmatmul.f32.gmra.mxu3 %v6549_v15 }
 0x253   : > { %v1703_v33 = vpop.f32.mrf.mxu0  ;;  %v1860_v11 = vpop.f32.mrf.mxu1  ;;  %v2210_v36 = vsub.f32 %v6592_v28, %v9176_v54 }
 0x254   : > { %v1861_v39 = vadd.f32 %v1860_v11, %v1700_v5  ;;  %v2069_v23 = vpop.f32.mrf.mxu2  ;;  %v1704_v26 = vadd.f32 %v1703_v33, %v6109_v29  ;;  %v640_v5 = vld [vmem:[%s5374_s6 + $0x1f8] sm:$0xff] }
 0x255   : > { %v2374_v6 = vpop.f32.mrf.mxu3 }
 0x256   : > { %v2070_v15 = vadd.f32 %v2069_v23, %v1861_v39  ;;  %1766 = vmatmul.f32.gmra.mxu0 %v6049_v53  ;;  %1923 = vmatmul.f32.gmra.mxu1 %v6033_v31 }
 0x258   : > { %v6601_v56 = vadd.f32 %v2374_v6, %v2070_v15  ;;  %v2211_v15 = vand.u32 4294901760, %v2210_v36  ;;  %v9177_v6 = vand.u32 4294901760, %v6608_v32 }
 0x259   : > { %2204 = vmatmul.f32.gmra.mxu2 %v2203_v24  ;;  %v6613_v24 = vand.u32 4294901760, %v640_v5 }
 0x25a   : > { %2441 = vmatmul.f32.gmra.mxu3 %v6565_v16  ;;  %v2218_v29 = vsub.f32 %v6608_v32, %v9177_v6 }
 0x25b   : > { %v1707_v11 = vpop.f32.mrf.mxu0  ;;  %v1864_v39 = vpop.f32.mrf.mxu1  ;;  %9362 = vst [vmem:[#allocation73_spill] sm:$0xff] %v6613_v24  ;;  %v6624_v33 = vsub.f32 %v640_v5, %v6613_v24 }
 0x25c   : > { %v1865_v23 = vadd.f32 %v1864_v39, %v1704_v26  ;;  %v2077_v21 = vpop.f32.mrf.mxu2  ;;  %v1708_v36 = vadd.f32 %v1707_v11, %v6124_v30 }
 0x25d   : > { %v2378_v31 = vpop.f32.mrf.mxu3  ;;  %9363 = vst [vmem:[#allocation74_spill] sm:$0xff] %v6624_v33 }
 0x25e   : > { %v2078_v16 = vadd.f32 %v2077_v21, %v1865_v23  ;;  %1770 = vmatmul.f32.gmra.mxu0 %v6061_v14  ;;  %1927 = vmatmul.f32.gmra.mxu1 %v6049_v53  ;;  %v2219_v53 = vand.u32 4294901760, %v2218_v29 }
 0x260   : > { %v6617_v9 = vadd.f32 %v2378_v31, %v2078_v16  ;;  %v9178_v16 = vand.u32 4294901760, %v6624_v33 }
 0x261   : > { %2212 = vmatmul.f32.gmra.mxu2 %v2211_v15 }
 0x262   : > { %2445 = vmatmul.f32.gmra.mxu3 %v6581_v47  ;;  %v2226_v30 = vsub.f32 %v6624_v33, %v9178_v16 }
 0x263   : > { %v1711_v26 = vpop.f32.mrf.mxu0  ;;  %v1868_v21 = vpop.f32.mrf.mxu1 }
 0x264   : > { %v1869_v39 = vadd.f32 %v1868_v21, %v1708_v36  ;;  %v2085_v23 = vpop.f32.mrf.mxu2  ;;  %v1712_v5 = vadd.f32 %v1711_v26, %v6143_v48 }
 0x265   : > { %v2382_v54 = vpop.f32.mrf.mxu3 }
 0x266   : > { %v2086_v31 = vadd.f32 %v2085_v23, %v1869_v39  ;;  %1774 = vmatmul.f32.gmra.mxu0 %v6082_v34  ;;  %1931 = vmatmul.f32.gmra.mxu1 %v6061_v14  ;;  %v2227_v23 = vand.u32 4294901760, %v2226_v30 }
 0x268   : > { %v6630_v15 = vadd.f32 %v2382_v54, %v2086_v31 }
 0x269   : > { %2220 = vmatmul.f32.gmra.mxu2 %v2219_v53 }
 0x26a   : > { %9364 = vst [vmem:[#allocation75_spill] sm:$0xff] %v6630_v15  ;;  %2449 = vmatmul.f32.gmra.mxu3 %v6597_v61  ;;  %v9436_v61 = vld [vmem:[#allocation65_spill] sm:$0xff] }
 0x26b   : > { %v1715_v11 = vpop.f32.mrf.mxu0  ;;  %v1872_v29 = vpop.f32.mrf.mxu1 }
 0x26c   : > { %v1873_v36 = vadd.f32 %v1872_v29, %v1712_v5  ;;  %v2093_v21 = vpop.f32.mrf.mxu2  ;;  %v1716_v54 = vadd.f32 %v1715_v11, %v6166_v25 }
 0x26d   : > { %v2386_v39 = vpop.f32.mrf.mxu3 }
 0x26e   : > { %v2094_v6 = vadd.f32 %v2093_v21, %v1873_v36  ;;  %1778 = vmatmul.f32.gmra.mxu0 %v6096_v0  ;;  %1935 = vmatmul.f32.gmra.mxu1 %v6082_v34 }
 0x270   : > { %v6639_v14 = vadd.f32 %v2386_v39, %v2094_v6 }
 0x271   : > { %2228 = vmatmul.f32.gmra.mxu2 %v2227_v23 }
 0x272   : > { %9365 = vst [vmem:[#allocation76_spill] sm:$0xff] %v6639_v14  ;;  %2453 = vmatmul.f32.gmra.mxu3 %v6613_v24 }
 0x273   : > { %v1719_v53 = vpop.f32.mrf.mxu0  ;;  %v1876_v48 = vpop.f32.mrf.mxu1 }
 0x274   : > { %v1877_v26 = vadd.f32 %v1876_v48, %v1716_v54  ;;  %v2101_v31 = vpop.f32.mrf.mxu2  ;;  %v1720_v34 = vadd.f32 %v1719_v53, %v6184_v49 }
 0x275   : > { %v2390_v5 = vpop.f32.mrf.mxu3 }
 0x276   : > { %v2102_v29 = vadd.f32 %v2101_v31, %v1877_v26  ;;  %1939 = vmatmul.f32.gmra.mxu1 %v6096_v0  ;;  %2507 = vmatmul.f32.vlgmr.msra.gmra.mxu0 %v6127_v43  ;;  %v9367_v0 = vand.u32 4294901760, %v6127_v43 }
 0x278   : > { %v6645_v30 = vadd.f32 %v2390_v5, %v2102_v29  ;;  %v9369_v5 = vand.u32 4294901760, %v6149_v8 }
 0x279   : > { %2956 = vmatmul.f32.vlgmr.msra.gmra.mxu2 %v6118_v37 }
 0x27a   : > { %9366 = vst [vmem:[#allocation77_spill] sm:$0xff] %v6645_v30  ;;  %3117 = vmatmul.f32.vlgmr.msra.gmra.mxu3 %v6118_v37 }
 0x27b   : > { %v1723_v6 = vpop.f32.mrf.mxu0  ;;  %v1880_v25 = vpop.f32.mrf.mxu1 }
 0x27c   : > { %v1881_v11 = vadd.f32 %v1880_v25, %v1720_v34  ;;  %v2109_v36 = vpop.f32.mrf.mxu2  ;;  %v1724_v37 = vadd.f32 %v1723_v6, %v6199_v52 }
 0x27d   : > { %v2394_v21 = vpop.f32.mrf.mxu3 }
 0x27e   : > { %v2110_v39 = vadd.f32 %v2109_v36, %v1881_v11  ;;  %2512 = vmatmul.f32.gmra.mxu0 %v6149_v8  ;;  %2701 = vmatmul.f32.vlgmr.msra.gmra.mxu1 %v9367_v0  ;;  %v9371_v36 = vand.u32 4294901760, %v6173_v60 }
 0x280   : > { %v6653_v23 = vadd.f32 %v2394_v21, %v2110_v39 }
 0x281   : > { %2960 = vmatmul.f32.gmra.mxu2 %v6137_v62 }
 0x282   : > { %9368 = vst [vmem:[#allocation78_spill] sm:$0xff] %v6653_v23  ;;  %3121 = vmatmul.f32.gmra.mxu3 %v6137_v62 }
 0x283   : > { %v1727_v49 = vpop.f32.mrf.mxu0  ;;  %v1884_v54 = vpop.f32.mrf.mxu1 }
 0x284   : > { %v1885_v53 = vadd.f32 %v1884_v54, %v1724_v37  ;;  %v2117_v48 = vpop.f32.mrf.mxu2  ;;  %v1728_v62 = vadd.f32 %v1727_v49, %v6214_v50  ;;  %v9373_v54 = vand.u32 4294901760, %v6191_v63 }
 0x285   : > { %v2398_v26 = vpop.f32.mrf.mxu3 }
 0x286   : > { %v2118_v31 = vadd.f32 %v2117_v48, %v1885_v53  ;;  %2517 = vmatmul.f32.gmra.mxu0 %v6173_v60  ;;  %2707 = vmatmul.f32.gmra.mxu1 %v9369_v5 }
 0x288   : > { %v6661_v43 = vadd.f32 %v2398_v26, %v2118_v31 }
 0x289   : > { %2964 = vmatmul.f32.gmra.mxu2 %v6159_v18 }
 0x28a   : > { %9370 = vst [vmem:[#allocation79_spill] sm:$0xff] %v6661_v43  ;;  %3125 = vmatmul.f32.gmra.mxu3 %v6159_v18 }
 0x28b   : > { %v1731_v52 = vpop.f32.mrf.mxu0  ;;  %v1888_v29 = vpop.f32.mrf.mxu1 }
 0x28c   : > { %v1889_v34 = vadd.f32 %v1888_v29, %v1728_v62  ;;  %v2125_v6 = vpop.f32.mrf.mxu2  ;;  %v1732_v18 = vadd.f32 %v1731_v52, %v6229_v57  ;;  %v9375_v62 = vand.u32 4294901760, %v6206_v1 }
 0x28d   : > { %v2402_v25 = vpop.f32.mrf.mxu3 }
 0x28e   : > { %v2126_v11 = vadd.f32 %v2125_v6, %v1889_v34  ;;  %2522 = vmatmul.f32.gmra.mxu0 %v6191_v63  ;;  %2713 = vmatmul.f32.gmra.mxu1 %v9371_v36 }
 0x290   : > { %v6669_v8 = vadd.f32 %v2402_v25, %v2126_v11  ;;  %v9377_v11 = vand.u32 4294901760, %v6221_v45 }
 0x291   : > { %2968 = vmatmul.f32.gmra.mxu2 %v6179_v40 }
 0x292   : > { %9372 = vst [vmem:[#allocation80_spill] sm:$0xff] %v6669_v8  ;;  %3129 = vmatmul.f32.gmra.mxu3 %v6179_v40 }
 0x293   : > { %v1735_v50 = vpop.f32.mrf.mxu0  ;;  %v1892_v21 = vpop.f32.mrf.mxu1 }
 0x294   : > { %v1893_v39 = vadd.f32 %v1892_v21, %v1732_v18  ;;  %v2133_v0 = vpop.f32.mrf.mxu2  ;;  %v1736_v40 = vadd.f32 %v1735_v50, %v6244_v4 }
 0x295   : > { %v2406_v37 = vpop.f32.mrf.mxu3 }
 0x296   : > { %v2134_v49 = vadd.f32 %v2133_v0, %v1893_v39  ;;  %2527 = vmatmul.f32.gmra.mxu0 %v6206_v1  ;;  %2719 = vmatmul.f32.gmra.mxu1 %v9373_v54  ;;  %v9379_v0 = vand.u32 4294901760, %v6236_v3 }
 0x298   : > { %v6677_v60 = vadd.f32 %v2406_v37, %v2134_v49 }
 0x299   : > { %2972 = vmatmul.f32.gmra.mxu2 %v6195_v12 }
 0x29a   : > { %9374 = vst [vmem:[#allocation81_spill] sm:$0xff] %v6677_v60  ;;  %3133 = vmatmul.f32.gmra.mxu3 %v6195_v12 }
 0x29b   : > { %v1739_v57 = vpop.f32.mrf.mxu0  ;;  %v1896_v53 = vpop.f32.mrf.mxu1 }
 0x29c   : > { %v1897_v48 = vadd.f32 %v1896_v53, %v1736_v40  ;;  %v2141_v26 = vpop.f32.mrf.mxu2  ;;  %v1740_v12 = vadd.f32 %v1739_v57, %v6259_v19  ;;  %v9381_v53 = vand.u32 4294901760, %v6251_v27 }
 0x29d   : > { %v2410_v31 = vpop.f32.mrf.mxu3 }
 0x29e   : > { %v2142_v5 = vadd.f32 %v2141_v26, %v1897_v48  ;;  %2532 = vmatmul.f32.gmra.mxu0 %v6221_v45  ;;  %2725 = vmatmul.f32.gmra.mxu1 %v9375_v62 }
 0x2a0   : > { %v6685_v63 = vadd.f32 %v2410_v31, %v2142_v5 }
 0x2a1   : > { %2976 = vmatmul.f32.gmra.mxu2 %v6210_v59 }
 0x2a2   : > { %9376 = vst [vmem:[#allocation82_spill] sm:$0xff] %v6685_v63  ;;  %3137 = vmatmul.f32.gmra.mxu3 %v6210_v59 }
 0x2a3   : > { %v1743_v4 = vpop.f32.mrf.mxu0  ;;  %v1900_v52 = vpop.f32.mrf.mxu1 }
 0x2a4   : > { %v1901_v29 = vadd.f32 %v1900_v52, %v1740_v12  ;;  %v2149_v34 = vpop.f32.mrf.mxu2  ;;  %v1744_v59 = vadd.f32 %v1743_v4, %v6274_v44  ;;  %v9383_v12 = vand.u32 4294901760, %v6266_v35 }
 0x2a5   : > { %v2414_v6 = vpop.f32.mrf.mxu3 }
 0x2a6   : > { %v2150_v25 = vadd.f32 %v2149_v34, %v1901_v29  ;;  %2537 = vmatmul.f32.gmra.mxu0 %v6236_v3  ;;  %2731 = vmatmul.f32.gmra.mxu1 %v9377_v11  ;;  %v9386_v11 = vand.u32 4294901760, %v6281_v41 }
 0x2a8   : > { %v6693_v1 = vadd.f32 %v2414_v6, %v2150_v25  ;;  %v9385_v25 = vld [vmem:[#allocation21_spill] sm:$0xff] }
 0x2a9   : > { %2980 = vmatmul.f32.gmra.mxu2 %v6225_v7 }
 0x2aa   : > { %9378 = vst [vmem:[#allocation83_spill] sm:$0xff] %v6693_v1  ;;  %3141 = vmatmul.f32.gmra.mxu3 %v6225_v7 }
 0x2ab   : > { %v1747_v19 = vpop.f32.mrf.mxu0  ;;  %v1904_v36 = vpop.f32.mrf.mxu1 }
 0x2ac   : > { %v1905_v18 = vadd.f32 %v1904_v36, %v1744_v59  ;;  %v2157_v50 = vpop.f32.mrf.mxu2  ;;  %v1748_v7 = vadd.f32 %v1747_v19, %v6289_v42  ;;  %v9388_v59 = vld [vmem:[#allocation20_spill] sm:$0xff] }
 0x2ad   : > { %v2418_v21 = vpop.f32.mrf.mxu3 }
 0x2ae   : > { %v2158_v39 = vadd.f32 %v2157_v50, %v1905_v18  ;;  %2542 = vmatmul.f32.gmra.mxu0 %v6251_v27  ;;  %2737 = vmatmul.f32.gmra.mxu1 %v9379_v0  ;;  %v9390_v0 = vld [vmem:[#allocation22_spill] sm:$0xff] }
 0x2b0   : > { %v6701_v45 = vadd.f32 %v2418_v21, %v2158_v39 }
 0x2b1   : > { %2984 = vmatmul.f32.gmra.mxu2 %v6240_v46 }
 0x2b2   : > { %9380 = vst [vmem:[#allocation84_spill] sm:$0xff] %v6701_v45  ;;  %3145 = vmatmul.f32.gmra.mxu3 %v6240_v46 }
 0x2b3   : > { %v1751_v44 = vpop.f32.mrf.mxu0  ;;  %v1908_v37 = vpop.f32.mrf.mxu1 }
 0x2b4   : > { %v1909_v49 = vadd.f32 %v1908_v37, %v1748_v7  ;;  %v2165_v54 = vpop.f32.mrf.mxu2  ;;  %v1752_v46 = vadd.f32 %v1751_v44, %v6304_v13  ;;  %v9391_v7 = vand.u32 4294901760, %v9385_v25  ;;  %v9393_v44 = vld [vmem:[#allocation49_spill] sm:$0xff] }
 0x2b5   : > { %v2422_v40 = vpop.f32.mrf.mxu3  ;;  %v9394_v37 = vld [vmem:[#allocation25_spill] sm:$0xff] }
 0x2b6   : > { %v2166_v57 = vadd.f32 %v2165_v54, %v1909_v49  ;;  %2547 = vmatmul.f32.gmra.mxu0 %v6266_v35  ;;  %2743 = vmatmul.f32.gmra.mxu1 %v9381_v53 }
 0x2b8   : > { %v6709_v3 = vadd.f32 %v2422_v40, %v2166_v57 }
 0x2b9   : > { %2988 = vmatmul.f32.gmra.mxu2 %v6255_v51 }
 0x2ba   : > { %9382 = vst [vmem:[#allocation85_spill] sm:$0xff] %v6709_v3  ;;  %3149 = vmatmul.f32.gmra.mxu3 %v6255_v51 }
 0x2bb   : > { %v1755_v42 = vpop.f32.mrf.mxu0  ;;  %v1912_v48 = vpop.f32.mrf.mxu1 }
 0x2bc   : > { %v1913_v26 = vadd.f32 %v1912_v48, %v1752_v46  ;;  %v2173_v31 = vpop.f32.mrf.mxu2  ;;  %v1756_v51 = vadd.f32 %v1755_v42, %v6319_v10  ;;  %v9395_v48 = vld [vmem:[#allocation23_spill] sm:$0xff] }
 0x2bd   : > { %v2426_v5 = vpop.f32.mrf.mxu3 }
 0x2be   : > { %v2174_v62 = vadd.f32 %v2173_v31, %v1913_v26  ;;  %2552 = vmatmul.f32.gmra.mxu0 %v6281_v41  ;;  %2749 = vmatmul.f32.gmra.mxu1 %v9383_v12  ;;  %v9396_v26 = vand.u32 4294901760, %v9390_v0 }
 0x2c0   : > { %v6717_v27 = vadd.f32 %v2426_v5, %v2174_v62  ;;  %v9398_v5 = vld [vmem:[#allocation50_spill] sm:$0xff] }
 0x2c1   : > { %2992 = vmatmul.f32.gmra.mxu2 %v6270_v2  ;;  %v9399_v62 = vld [vmem:[#allocation26_spill] sm:$0xff] }
 0x2c2   : > { %9384 = vst [vmem:[#allocation86_spill] sm:$0xff] %v6717_v27  ;;  %3153 = vmatmul.f32.gmra.mxu3 %v6270_v2  ;;  %v9389_v2 = vld [vmem:[#allocation24_spill] sm:$0xff] }
 0x2c3   : > { %v1759_v13 = vpop.f32.mrf.mxu0  ;;  %v1916_v4 = vpop.f32.mrf.mxu1 }
 0x2c4   : > { %v1917_v52 = vadd.f32 %v1916_v4, %v1756_v51  ;;  %v2181_v29 = vpop.f32.mrf.mxu2  ;;  %v1760_v19 = vadd.f32 %v1759_v13, %v9389_v2  ;;  %v9404_v2 = vld [vmem:[#allocation27_spill] sm:$0xff] }
 0x2c5   : > { %v2430_v34 = vpop.f32.mrf.mxu3 }
 0x2c6   : > { %v2182_v6 = vadd.f32 %v2181_v29, %v1917_v52  ;;  %2557 = vmatmul.f32.gmra.mxu0 %v9385_v25  ;;  %2755 = vmatmul.f32.gmra.mxu1 %v9386_v11  ;;  %v9401_v25 = vand.u32 4294901760, %v9395_v48 }
 0x2c8   : > { %v6725_v35 = vadd.f32 %v2430_v34, %v2182_v6  ;;  %v9400_v6 = vld [vmem:[#allocation52_spill] sm:$0xff] }
 0x2c9   : > { %2996 = vmatmul.f32.gmra.mxu2 %v9388_v59 }
 0x2ca   : > { %9387 = vst [vmem:[#allocation21_spill] sm:$0xff] %v6725_v35  ;;  %3157 = vmatmul.f32.gmra.mxu3 %v9388_v59  ;;  %v9403_v59 = vld [vmem:[#allocation51_spill] sm:$0xff] }
 0x2cb   : > { %v1763_v10 = vpop.f32.mrf.mxu0  ;;  %v1920_v36 = vpop.f32.mrf.mxu1 }
 0x2cc   : > { %v1921_v18 = vadd.f32 %v1920_v36, %v1760_v19  ;;  %v2189_v50 = vpop.f32.mrf.mxu2  ;;  %v1764_v49 = vadd.f32 %v1763_v10, %v9394_v37  ;;  %v9408_v37 = vld [vmem:[#allocation53_spill] sm:$0xff] }
 0x2cd   : > { %v2434_v21 = vpop.f32.mrf.mxu3 }
 0x2ce   : > { %v2190_v39 = vadd.f32 %v2189_v50, %v1921_v18  ;;  %2562 = vmatmul.f32.gmra.mxu0 %v9390_v0  ;;  %2761 = vmatmul.f32.gmra.mxu1 %v9391_v7  ;;  %v9405_v0 = vld [vmem:[#allocation54_spill] sm:$0xff]  ;;  %v9406_v7 = vand.u32 4294901760, %v9400_v6 }
 0x2d0   : > { %v6733_v41 = vadd.f32 %v2434_v21, %v2190_v39 }
 0x2d1   : > { %3000 = vmatmul.f32.gmra.mxu2 %v9393_v44 }
 0x2d2   : > { %9392 = vst [vmem:[#allocation20_spill] sm:$0xff] %v6733_v41  ;;  %3161 = vmatmul.f32.gmra.mxu3 %v9393_v44 }
 0x2d3   : > { %v1767_v54 = vpop.f32.mrf.mxu0  ;;  %v1924_v40 = vpop.f32.mrf.mxu1 }
 0x2d4   : > { %v1925_v57 = vadd.f32 %v1924_v40, %v1764_v49  ;;  %v2197_v53 = vpop.f32.mrf.mxu2  ;;  %v1768_v12 = vadd.f32 %v1767_v54, %v9399_v62  ;;  %v9409_v49 = vld [vmem:[#allocation28_spill] sm:$0xff] }
 0x2d5   : > { %v2438_v46 = vpop.f32.mrf.mxu3 }
 0x2d6   : > { %v2198_v42 = vadd.f32 %v2197_v53, %v1925_v57  ;;  %2567 = vmatmul.f32.gmra.mxu0 %v9395_v48  ;;  %2767 = vmatmul.f32.gmra.mxu1 %v9396_v26  ;;  %v9410_v26 = vld [vmem:[#allocation56_spill] sm:$0xff] }
 0x2d8   : > { %v6741_v31 = vadd.f32 %v2438_v46, %v2198_v42 }
 0x2d9   : > { %3004 = vmatmul.f32.gmra.mxu2 %v9398_v5 }
 0x2da   : > { %9397 = vst [vmem:[#allocation24_spill] sm:$0xff] %v6741_v31  ;;  %3165 = vmatmul.f32.gmra.mxu3 %v9398_v5  ;;  %v9411_v5 = vand.u32 4294901760, %v9405_v0 }
 0x2db   : > { %v1771_v51 = vpop.f32.mrf.mxu0  ;;  %v1928_v13 = vpop.f32.mrf.mxu1 }
 0x2dc   : > { %v1929_v4 = vadd.f32 %v1928_v13, %v1768_v12  ;;  %v2205_v52 = vpop.f32.mrf.mxu2  ;;  %v1772_v19 = vadd.f32 %v1771_v51, %v9404_v2  ;;  %v9413_v12 = vld [vmem:[#allocation55_spill] sm:$0xff]  ;;  %v9414_v51 = vld [vmem:[#allocation29_spill] sm:$0xff]  ;;  %v9416_v2 = vand.u32 4294901760, %v9410_v26 }
 0x2dd   : > { %v2442_v29 = vpop.f32.mrf.mxu3 }
 0x2de   : > { %v2206_v34 = vadd.f32 %v2205_v52, %v1929_v4  ;;  %2572 = vmatmul.f32.gmra.mxu0 %v9400_v6  ;;  %2773 = vmatmul.f32.gmra.mxu1 %v9401_v25 }
 0x2e0   : > { %v6749_v11 = vadd.f32 %v2442_v29, %v2206_v34 }
 0x2e1   : > { %3008 = vmatmul.f32.gmra.mxu2 %v9403_v59 }
 0x2e2   : > { %9402 = vst [vmem:[#allocation22_spill] sm:$0xff] %v6749_v11  ;;  %3169 = vmatmul.f32.gmra.mxu3 %v9403_v59  ;;  %v9415_v59 = vld [vmem:[#allocation58_spill] sm:$0xff] }
 0x2e3   : > { %v1775_v10 = vpop.f32.mrf.mxu0  ;;  %v1932_v36 = vpop.f32.mrf.mxu1 }
 0x2e4   : > { %v1933_v18 = vadd.f32 %v1932_v36, %v1772_v19  ;;  %v2213_v50 = vpop.f32.mrf.mxu2  ;;  %v1776_v54 = vadd.f32 %v1775_v10, %v9409_v49  ;;  %v6777_v19 = vld [vmem:[%s6774_s23 + $0x1] sm:$0x1]  ;;  %v9418_v36 = vld [vmem:[#allocation57_spill] sm:$0xff] }
 0x2e5   : > { %v2446_v21 = vpop.f32.mrf.mxu3  ;;  %v513_v49 = vsub.f32 4.0, %v6777_v19 }
 0x2e6   : > { %v2214_v39 = vadd.f32 %v2213_v50, %v1933_v18  ;;  %2577 = vmatmul.f32.gmra.mxu0 %v9405_v0  ;;  %2779 = vmatmul.f32.gmra.mxu1 %v9406_v7  ;;  %v9419_v18 = vld [vmem:[#allocation30_spill] sm:$0xff]  ;;  %v505_v7 = vsub.f32 2.0, %v6777_v19 }
 0x2e8   : > { %v6757_v44 = vadd.f32 %v2446_v21, %v2214_v39  ;;  %v501_v21 = vsub.f32 1.0, %v6777_v19 }
 0x2e9   : > { %3012 = vmatmul.f32.gmra.mxu2 %v9408_v37 }
 0x2ea   : > { %9407 = vst [vmem:[#allocation49_spill] sm:$0xff] %v6757_v44  ;;  %3173 = vmatmul.f32.gmra.mxu3 %v9408_v37  ;;  %v509_v37 = vsub.f32 3.0, %v6777_v19  ;;  %v9424_v44 = vld [vmem:[#allocation62_spill] sm:$0xff] }
 0x2eb   : > { %v1779_v40 = vpop.f32.mrf.mxu0  ;;  %v1936_v57 = vpop.f32.mrf.mxu1 }
 0x2ec   : > { %v1937_v53 = vadd.f32 %v1936_v57, %v1776_v54  ;;  %v2221_v46 = vpop.f32.mrf.mxu2  ;;  %v1780_v13 = vadd.f32 %v1779_v40, %v9414_v51  ;;  %v489_v57 = vsub.f32 -2.0, %v6777_v19  ;;  %v9421_v51 = vand.u32 4294901760, %v9415_v59 }
 0x2ed   : > { %v2450_v42 = vpop.f32.mrf.mxu3 }
 0x2ee   : > { %v2222_v48 = vadd.f32 %v2221_v46, %v1937_v53  ;;  %2582 = vmatmul.f32.gmra.mxu0 %v9410_v26  ;;  %2785 = vmatmul.f32.gmra.mxu1 %v9411_v5  ;;  %v493_v53 = vsub.f32 -1.0, %v6777_v19  ;;  %v497_v46 = vsub.f32 0.0, %v6777_v19  ;;  %v485_v26 = vsub.f32 -3.0, %v6777_v19 }
 0x2f0   : > { %v6765_v62 = vadd.f32 %v2450_v42, %v2222_v48  ;;  %v481_v48 = vsub.f32 -4.0, %v6777_v19 }
 0x2f1   : > { %3016 = vmatmul.f32.gmra.mxu2 %v9413_v12 }
 0x2f2   : > { %9412 = vst [vmem:[#allocation25_spill] sm:$0xff] %v6765_v62  ;;  %3177 = vmatmul.f32.gmra.mxu3 %v9413_v12  ;;  %v9420_v12 = vld [vmem:[#allocation60_spill] sm:$0xff] }
 0x2f3   : > { %v1940_v4 = vpop.f32.mrf.mxu1  ;;  %v2508_v52 = vpop.f32.mrf.mxu0 }
 0x2f4   : > { %v1941_v29 = vadd.f32 %v1940_v4, %v1780_v13  ;;  %v2229_v34 = vpop.f32.mrf.mxu2  ;;  %v2509_v50 = vadd.f32 %v2508_v52, %v9419_v18  ;;  %v502_v13 = vand.u32 2147483647, %v501_v21  ;;  %v517_v4 = vsub.f32 5.0, %v6777_v19 }
 0x2f5   : > { %v2454_v6 = vpop.f32.mrf.mxu3  ;;  %v506_v52 = vand.u32 2147483647, %v505_v7  ;;  %v482_v18 = vand.u32 2147483647, %v481_v48 }
 0x2f6   : > { %v2230_v25 = vadd.f32 %v2229_v34, %v1941_v29  ;;  %2587 = vmatmul.f32.gmra.mxu0 %v9415_v59  ;;  %2791 = vmatmul.f32.gmra.mxu1 %v9416_v2  ;;  %v510_v29 = vand.u32 2147483647, %v509_v37  ;;  %v514_v34 = vand.u32 2147483647, %v513_v49  ;;  %v498_v2 = vand.u32 2147483647, %v497_v46 }
 0x2f7   : > { %v503_v21 = vsub.f32 1.0, %v502_v13 }
 0x2f8   : > { %v6779_v10 = vadd.f32 %v2454_v6, %v2230_v25  ;;  %v490_v6 = vand.u32 2147483647, %v489_v57  ;;  %v494_v25 = vand.u32 2147483647, %v493_v53  ;;  %v511_v16 = vsub.f32 1.0, %v510_v29 }
 0x2f9   : > { %3020 = vmatmul.f32.gmra.mxu2 %v9418_v36  ;;  %v515_v7 = vsub.f32 1.0, %v514_v34  ;;  %v499_v46 = vsub.f32 1.0, %v498_v2 }
 0x2fa   : > { %9417 = vst [vmem:[#allocation23_spill] sm:$0xff] %v6779_v10  ;;  %3181 = vmatmul.f32.gmra.mxu3 %v9418_v36  ;;  %v491_v57 = vsub.f32 1.0, %v490_v6  ;;  %v495_v53 = vsub.f32 1.0, %v494_v25  ;;  %v512_v29 = vmax.f32 %v511_v16, 0.0 }
 0x2fb   : > { %v2513_v39 = vpop.f32.mrf.mxu0  ;;  %v2702_v0 = vpop.f32.mrf.mxu1  ;;  %v516_v34 = vmax.f32 %v515_v7, 0.0  ;;  %v500_v25 = vmax.f32 %v499_v46, 0.0 }
 0x2fc   : > { %v2703_v54 = vadd.f32 %v2702_v0, %v2509_v50  ;;  %v2957_v40 = vpop.f32.mrf.mxu2  ;;  %v486_v50 = vand.u32 2147483647, %v485_v26  ;;  %v9422_v0 = vld [vmem:[#allocation59_spill] sm:$0xff]  ;;  %v483_v26 = vsub.f32 1.0, %v482_v18  ;;  %v496_v6 = vmax.f32 %v495_v53, 0.0 }
 0x2fd   : > { %v3118_v42 = vpop.f32.mrf.mxu3  ;;  %v6815_v16 = vperm.slane %v512_v29, 0 }
 0x2fe   : > { %v2958_v5 = vadd.f32 %v2957_v40, %v2703_v54  ;;  %2592 = vmatmul.f32.gmra.mxu0 %v9420_v12  ;;  %2797 = vmatmul.f32.gmra.mxu1 %v9421_v51  ;;  %v9423_v54 = vld [vmem:[#allocation31_spill] sm:$0xff]  ;;  %v518_v40 = vand.u32 2147483647, %v517_v4  ;;  %v507_v51 = vsub.f32 1.0, %v506_v52  ;;  %v487_v10 = vsub.f32 1.0, %v486_v50  ;;  %v9426_v50 = vld [vmem:[#allocation61_spill] sm:$0xff] }
 0x2ff   : > { %v2514_v59 = vadd.f32 %v2513_v39, %v9423_v54  ;;  %v9425_v39 = vand.u32 4294901760, %v9420_v12  ;;  %v504_v4 = vmax.f32 %v503_v21, 0.0  ;;  %v6807_v54 = vmax.f32 %v483_v26, 0.0 }
 0x300   : > { %v6797_v36 = vadd.f32 %v3118_v42, %v2958_v5  ;;  %v519_v13 = vsub.f32 1.0, %v518_v40  ;;  %v508_v52 = vmax.f32 %v507_v51, 0.0  ;;  %v488_v18 = vmax.f32 %v487_v10, 0.0 }
 0x301   : > { %3024 = vmatmul.f32.gmra.mxu2 %v9422_v0  ;;  %v521_v12 = vsub.f32 6.0, %v6777_v19  ;;  %v6813_v51 = vperm.slane %v516_v34, 0  ;;  %v6821_v10 = vperm.slane %v500_v25, 0  ;;  %v6823_v53 = vperm.slane %v496_v6, 0 }
 0x302   : > { %3185 = vmatmul.f32.gmra.mxu3 %v9422_v0  ;;  %v492_v0 = vmax.f32 %v491_v57, 0.0  ;;  %v520_v21 = vmax.f32 %v519_v13, 0.0  ;;  %v6817_v7 = vperm.slane %v508_v52, 0  ;;  %v9179_v26 = vperm.slane %v6807_v54, 0  ;;  %v9428_v52 = vld [vmem:[#allocation63_spill] sm:$0xff] }
 0x303   : > { %v2518_v37 = vpop.f32.mrf.mxu0  ;;  %v2708_v49 = vpop.f32.mrf.mxu1  ;;  %v3246_v34 = vmul.f32 %v6813_v51, %v6797_v36 }
 0x304   : > { %v2709_v42 = vadd.f32 %v2708_v49, %v2514_v59  ;;  %v2961_v5 = vpop.f32.mrf.mxu2  ;;  %v9427_v59 = vld [vmem:[#allocation32_spill] sm:$0xff]  ;;  %v6825_v46 = vperm.slane %v492_v0, 0  ;;  %v6833_v29 = vperm.slane %v520_v21, 0  ;;  %v3251_v0 = vmul.f32 %v6815_v16, %v6797_v36  ;;  %v9430_v21 = vld [vmem:[#allocation34_spill] sm:$0xff] }
 0x305   : > { %v3122_v48 = vpop.f32.mrf.mxu3  ;;  %v2519_v40 = vadd.f32 %v2518_v37, %v9427_v59  ;;  %v3256_v6 = vmul.f32 %v6817_v7, %v6797_v36 }
 0x306   : > { %v2962_v62 = vadd.f32 %v2961_v5, %v2709_v42  ;;  %2597 = vmatmul.f32.gmra.mxu0 %v9424_v44  ;;  %2803 = vmatmul.f32.gmra.mxu1 %v9425_v39  ;;  %v522_v39 = vand.u32 2147483647, %v521_v12 }
 0x308   : > { %v6805_v2 = vadd.f32 %v3122_v48, %v2962_v62  ;;  %v6819_v62 = vperm.slane %v504_v4, 0  ;;  %v6827_v48 = vperm.slane %v488_v18, 0  ;;  %v9429_v4 = vand.u32 4294901760, %v9424_v44 }
 0x309   : > { %3028 = vmatmul.f32.gmra.mxu2 %v9426_v50  ;;  %v3266_v18 = vmul.f32 %v6821_v10, %v6797_v36  ;;  %v3271_v44 = vmul.f32 %v6823_v53, %v6797_v36 }
 0x30a   : > { %3189 = vmatmul.f32.gmra.mxu3 %v9426_v50  ;;  %v3261_v25 = vmul.f32 %v6819_v62, %v6797_v36  ;;  %v3276_v50 = vmul.f32 %v6825_v46, %v6797_v36  ;;  %v3281_v59 = vmul.f32 %v6827_v48, %v6797_v36 }
 0x30b   : > { %v2523_v49 = vpop.f32.mrf.mxu0  ;;  %v2714_v57 = vpop.f32.mrf.mxu1 }
 0x30c   : > { %v2715_v42 = vadd.f32 %v2714_v57, %v2519_v40  ;;  %v2965_v5 = vpop.f32.mrf.mxu2  ;;  %v3286_v40 = vmul.f32 %v9179_v26, %v6797_v36  ;;  %v2524_v57 = vadd.f32 %v2523_v49, %v9430_v21 }
 0x30d   : > { %v3126_v37 = vpop.f32.mrf.mxu3 }
 0x30e   : > { %v2966_v13 = vadd.f32 %v2965_v5, %v2715_v42  ;;  %2602 = vmatmul.f32.gmra.mxu0 %v9428_v52  ;;  %2809 = vmatmul.f32.gmra.mxu1 %v9429_v4  ;;  %v9431_v42 = vld [vmem:[#allocation33_spill] sm:$0xff]  ;;  %v523_v5 = vsub.f32 1.0, %v522_v39 }
 0x310   : > { %v3127_v12 = vadd.f32 %v3126_v37, %v2966_v13 }
 0x311   : > { %3032 = vmatmul.f32.gmra.mxu2 %v9431_v42 }
 0x312   : > { %3193 = vmatmul.f32.gmra.mxu3 %v9431_v42  ;;  %v3291_v4 = vmul.f32 %v6833_v29, %v3127_v12  ;;  %v3295_v11 = vmul.f32 %v6813_v51, %v3127_v12  ;;  %v3299_v37 = vmul.f32 %v6815_v16, %v3127_v12  ;;  %v3303_v13 = vmul.f32 %v6817_v7, %v3127_v12 }
 0x313   : > { %v3307_v31 = vmul.f32 %v6819_v62, %v3127_v12  ;;  %v3311_v41 = vmul.f32 %v6821_v10, %v3127_v12  ;;  %v3315_v36 = vmul.f32 %v6823_v53, %v3127_v12  ;;  %v3319_v49 = vmul.f32 %v6825_v46, %v3127_v12  ;;  %v2528_v21 = vpop.f32.mrf.mxu0  ;;  %v2720_v26 = vpop.f32.mrf.mxu1 }
 0x314   : > { %v6865_v42 = vadd.f32 %v3291_v4, %v3246_v34  ;;  %v6867_v39 = vadd.f32 %v3295_v11, %v3251_v0  ;;  %v6869_v35 = vadd.f32 %v3299_v37, %v3256_v6  ;;  %v6871_v27 = vadd.f32 %v3303_v13, %v3261_v25  ;;  %v2969_v3 = vpop.f32.mrf.mxu2  ;;  %v9432_v34 = vld [vmem:[#allocation36_spill] sm:$0xff] }
 0x315   : > { %v3130_v45 = vpop.f32.mrf.mxu3  ;;  %v6873_v1 = vadd.f32 %v3307_v31, %v3266_v18  ;;  %v6875_v63 = vadd.f32 %v3311_v41, %v3271_v44  ;;  %v6877_v60 = vadd.f32 %v3315_v36, %v3276_v50  ;;  %v6879_v8 = vadd.f32 %v3319_v49, %v3281_v59  ;;  %v9433_v0 = vld [vmem:[#allocation64_spill] sm:$0xff]  ;;  %v9435_v44 = vld [vmem:[#allocation35_spill] sm:$0xff] }
 0x316   : > { %v3323_v43 = vmul.f32 %v6827_v48, %v3127_v12  ;;  %v2529_v4 = vadd.f32 %v2528_v21, %v9432_v34  ;;  %v2721_v11 = vadd.f32 %v2720_v26, %v2524_v57  ;;  %2607 = vmatmul.f32.gmra.mxu0 %v9433_v0  ;;  %v9434_v6 = vand.u32 4294901760, %v9428_v52 }
 0x317   : > { %v3247_v41 = vmul.f32 %v6813_v51, %v6805_v2  ;;  %v3252_v18 = vmul.f32 %v6815_v16, %v6805_v2  ;;  %v524_v50 = vmax.f32 %v523_v5, 0.0  ;;  %v3257_v26 = vmul.f32 %v6817_v7, %v6805_v2 }
 0x318   : > { %2815 = vmatmul.f32.gmra.mxu1 %v9434_v6  ;;  %v6886_v25 = vadd.f32 %v3323_v43, %v3286_v40  ;;  %v2970_v31 = vadd.f32 %v2969_v3, %v2721_v11  ;;  %v3262_v52 = vmul.f32 %v6819_v62, %v6805_v2  ;;  %v3267_v43 = vmul.f32 %v6821_v10, %v6805_v2 }
 0x319   : > { %3036 = vmatmul.f32.gmra.mxu2 %v9435_v44  ;;  %v3272_v12 = vmul.f32 %v6823_v53, %v6805_v2  ;;  %v3277_v59 = vmul.f32 %v6825_v46, %v6805_v2  ;;  %v3282_v40 = vmul.f32 %v6827_v48, %v6805_v2  ;;  %v525_v37 = vsub.f32 7.0, %v6777_v19 }
 0x31a   : > { %3197 = vmatmul.f32.gmra.mxu3 %v9435_v44  ;;  %v3131_v3 = vadd.f32 %v3130_v45, %v2970_v31  ;;  %v9437_v15 = vand.u32 4294901760, %v9433_v0 }
 0x31b   : > { %v2533_v57 = vpop.f32.mrf.mxu0  ;;  %v2726_v5 = vpop.f32.mrf.mxu1 }
 0x31c   : > { %v3292_v13 = vmul.f32 %v6833_v29, %v3131_v3  ;;  %v3296_v36 = vmul.f32 %v6813_v51, %v3131_v3  ;;  %v3300_v49 = vmul.f32 %v6815_v16, %v3131_v3  ;;  %v3304_v45 = vmul.f32 %v6817_v7, %v3131_v3  ;;  %v2973_v21 = vpop.f32.mrf.mxu2 }
 0x31d   : > { %v3134_v34 = vpop.f32.mrf.mxu3  ;;  %v3308_v11 = vmul.f32 %v6819_v62, %v3131_v3  ;;  %v3312_v6 = vmul.f32 %v6821_v10, %v3131_v3  ;;  %v3316_v31 = vmul.f32 %v6823_v53, %v3131_v3  ;;  %v3320_v44 = vmul.f32 %v6825_v46, %v3131_v3 }
 0x31e   : > { %v6915_v23 = vadd.f32 %v3292_v13, %v3247_v41  ;;  %v6917_v24 = vadd.f32 %v3296_v36, %v3252_v18  ;;  %v6919_v33 = vadd.f32 %v3300_v49, %v3257_v26  ;;  %v6921_v30 = vadd.f32 %v3304_v45, %v3262_v52  ;;  %2612 = vmatmul.f32.gmra.mxu0 %v9436_v61  ;;  %v9439_v52 = vld [vmem:[#allocation38_spill] sm:$0xff] }
 0x31f   : > { %v6924_v32 = vadd.f32 %v3308_v11, %v3267_v43  ;;  %v6926_v14 = vadd.f32 %v3312_v6, %v3272_v12  ;;  %v6928_v47 = vadd.f32 %v3316_v31, %v3277_v59  ;;  %v6930_v28 = vadd.f32 %v3320_v44, %v3282_v40  ;;  %v9440_v43 = vld [vmem:[#allocation37_spill] sm:$0xff] }
 0x320   : > { %2821 = vmatmul.f32.gmra.mxu1 %v9437_v15  ;;  %v9438_v41 = vperm.slane %v6807_v54, 0  ;;  %v3324_v26 = vmul.f32 %v6827_v48, %v3131_v3  ;;  %v2534_v13 = vadd.f32 %v2533_v57, %v9439_v52  ;;  %v2727_v36 = vadd.f32 %v2726_v5, %v2529_v4 }
 0x321   : > { %3040 = vmatmul.f32.gmra.mxu2 %v9440_v43  ;;  %v526_v12 = vand.u32 2147483647, %v525_v37  ;;  %v6943_v49 = vperm.slane %v524_v50, 0  ;;  %v529_v3 = vsub.f32 8.0, %v6777_v19  ;;  %v9442_v44 = vand.u32 4294901760, %v9436_v61 }
 0x322   : > { %v3287_v18 = vmul.f32 %v9438_v41, %v6805_v2  ;;  %3201 = vmatmul.f32.gmra.mxu3 %v9440_v43  ;;  %v2974_v40 = vadd.f32 %v2973_v21, %v2727_v36  ;;  %v9441_v21 = vld [vmem:[#allocation66_spill] sm:$0xff] }
 0x323   : > { %v2538_v15 = vpop.f32.mrf.mxu0  ;;  %v2732_v0 = vpop.f32.mrf.mxu1  ;;  %v527_v48 = vsub.f32 1.0, %v526_v12 }
 0x324   : > { %v6941_v59 = vadd.f32 %v3324_v26, %v3287_v18  ;;  %v3135_v45 = vadd.f32 %v3134_v34, %v2974_v40  ;;  %v2977_v54 = vpop.f32.mrf.mxu2  ;;  %v2733_v11 = vadd.f32 %v2732_v0, %v2534_v13 }
 0x325   : > { %v3138_v2 = vpop.f32.mrf.mxu3 }
 0x326   : > { %v3328_v4 = vmul.f32 %v6943_v49, %v3135_v45  ;;  %v3332_v57 = vmul.f32 %v6833_v29, %v3135_v45  ;;  %v3336_v5 = vmul.f32 %v6813_v51, %v3135_v45  ;;  %v3340_v37 = vmul.f32 %v6815_v16, %v3135_v45  ;;  %2617 = vmatmul.f32.gmra.mxu0 %v9441_v21 }
 0x327   : > { %v3344_v50 = vmul.f32 %v6817_v7, %v3135_v45  ;;  %v3348_v34 = vmul.f32 %v6819_v62, %v3135_v45  ;;  %v3352_v6 = vmul.f32 %v6821_v10, %v3135_v45  ;;  %v3356_v31 = vmul.f32 %v6823_v53, %v3135_v45 }
 0x328   : > { %2827 = vmatmul.f32.gmra.mxu1 %v9442_v44  ;;  %v6958_v41 = vadd.f32 %v3328_v4, %v6865_v42  ;;  %v6961_v18 = vadd.f32 %v3332_v57, %v6867_v39  ;;  %v6964_v26 = vadd.f32 %v3336_v5, %v6869_v35  ;;  %v6967_v52 = vadd.f32 %v3340_v37, %v6871_v27  ;;  %v9443_v39 = vld [vmem:[#allocation39_spill] sm:$0xff]  ;;  %v9444_v27 = vld [vmem:[#allocation40_spill] sm:$0xff] }
 0x329   : > { %v6970_v13 = vadd.f32 %v3344_v50, %v6873_v1  ;;  %v6973_v36 = vadd.f32 %v3348_v34, %v6875_v63  ;;  %v6976_v61 = vadd.f32 %v3352_v6, %v6877_v60  ;;  %v6979_v42 = vadd.f32 %v3356_v31, %v6879_v8  ;;  %3044 = vmatmul.f32.gmra.mxu2 %v9443_v39 }
 0x32a   : > { %v3360_v35 = vmul.f32 %v6825_v46, %v3135_v45  ;;  %v2978_v43 = vadd.f32 %v2977_v54, %v2733_v11  ;;  %3205 = vmatmul.f32.gmra.mxu3 %v9443_v39  ;;  %v2539_v12 = vadd.f32 %v2538_v15, %v9444_v27  ;;  %v528_v8 = vmax.f32 %v527_v48, 0.0  ;;  %v9445_v11 = vld [vmem:[#allocation67_spill] sm:$0xff] }
 0x32b   : > { %v2543_v1 = vpop.f32.mrf.mxu0  ;;  %v2738_v40 = vpop.f32.mrf.mxu1  ;;  %v6988_v5 = vand.u32 2147483647, %v529_v3  ;;  %v9446_v3 = vand.u32 4294901760, %v9441_v21 }
 0x32c   : > { %v6986_v63 = vadd.f32 %v3360_v35, %v6886_v25  ;;  %v3139_v0 = vadd.f32 %v3138_v2, %v2978_v43  ;;  %v2981_v60 = vpop.f32.mrf.mxu2  ;;  %v2739_v57 = vadd.f32 %v2738_v40, %v2539_v12  ;;  %v7027_v27 = vperm.slane %v528_v8, 0 }
 0x32d   : > { %v3142_v4 = vpop.f32.mrf.mxu3 }
 0x32e   : > { %v3329_v37 = vmul.f32 %v6943_v49, %v3139_v0  ;;  %v3333_v45 = vmul.f32 %v6833_v29, %v3139_v0  ;;  %v3337_v54 = vmul.f32 %v6813_v51, %v3139_v0  ;;  %v3341_v15 = vmul.f32 %v6815_v16, %v3139_v0  ;;  %2622 = vmatmul.f32.gmra.mxu0 %v9445_v11 }
 0x32f   : > { %v3345_v25 = vmul.f32 %v6817_v7, %v3139_v0  ;;  %v3349_v2 = vmul.f32 %v6819_v62, %v3139_v0  ;;  %v3353_v50 = vmul.f32 %v6821_v10, %v3139_v0  ;;  %v3357_v48 = vmul.f32 %v6823_v53, %v3139_v0 }
 0x330   : > { %2833 = vmatmul.f32.gmra.mxu1 %v9446_v3  ;;  %v7002_v34 = vadd.f32 %v3329_v37, %v6915_v23  ;;  %v7005_v6 = vadd.f32 %v3333_v45, %v6917_v24  ;;  %v7008_v31 = vadd.f32 %v3337_v54, %v6919_v33  ;;  %v7011_v44 = vadd.f32 %v3341_v15, %v6921_v30  ;;  %v9447_v24 = vld [vmem:[#allocation41_spill] sm:$0xff] }
 0x331   : > { %v7014_v39 = vadd.f32 %v3345_v25, %v6924_v32  ;;  %v7017_v35 = vadd.f32 %v3349_v2, %v6926_v14  ;;  %v7020_v21 = vadd.f32 %v3353_v50, %v6928_v47  ;;  %v7023_v23 = vadd.f32 %v3357_v48, %v6930_v28  ;;  %3048 = vmatmul.f32.gmra.mxu2 %v9447_v24  ;;  %v9448_v32 = vld [vmem:[#allocation42_spill] sm:$0xff] }
 0x332   : > { %v3361_v33 = vmul.f32 %v6825_v46, %v3139_v0  ;;  %v2982_v43 = vadd.f32 %v2981_v60, %v2739_v57  ;;  %3209 = vmatmul.f32.gmra.mxu3 %v9447_v24  ;;  %v2544_v30 = vadd.f32 %v2543_v1, %v9448_v32  ;;  %v531_v46 = vsub.f32 1.0, %v6988_v5 }
 0x333   : > { %v2548_v12 = vpop.f32.mrf.mxu0  ;;  %v2744_v14 = vpop.f32.mrf.mxu1  ;;  %v533_v0 = vsub.f32 9.0, %v6777_v19  ;;  %v9450_v25 = vand.u32 4294901760, %v9445_v11 }
 0x334   : > { %v7032_v40 = vadd.f32 %v3361_v33, %v6941_v59  ;;  %v3143_v47 = vadd.f32 %v3142_v4, %v2982_v43  ;;  %v2549_v28 = vadd.f32 %v2548_v12, %v6553_v58  ;;  %v2985_v37 = vpop.f32.mrf.mxu2  ;;  %v2745_v54 = vadd.f32 %v2744_v14, %v2544_v30  ;;  %v9449_v59 = vld [vmem:[#allocation68_spill] sm:$0xff] }
 0x335   : > { %v3146_v45 = vpop.f32.mrf.mxu3 }
 0x336   : > { %v3365_v60 = vmul.f32 %v7027_v27, %v3143_v47  ;;  %v3369_v57 = vmul.f32 %v6943_v49, %v3143_v47  ;;  %v3373_v1 = vmul.f32 %v6833_v29, %v3143_v47  ;;  %v3377_v8 = vmul.f32 %v6813_v51, %v3143_v47  ;;  %2627 = vmatmul.f32.gmra.mxu0 %v9449_v59 }
 0x337   : > { %v3381_v4 = vmul.f32 %v6815_v16, %v3143_v47  ;;  %v3385_v58 = vmul.f32 %v6817_v7, %v3143_v47  ;;  %v3389_v15 = vmul.f32 %v6819_v62, %v3143_v47  ;;  %v3393_v5 = vmul.f32 %v6821_v10, %v3143_v47 }
 0x338   : > { %2839 = vmatmul.f32.gmra.mxu1 %v9450_v25  ;;  %v7049_v2 = vadd.f32 %v3365_v60, %v6958_v41  ;;  %v7052_v50 = vadd.f32 %v3369_v57, %v6961_v18  ;;  %v7055_v48 = vadd.f32 %v3373_v1, %v6964_v26  ;;  %v7058_v3 = vadd.f32 %v3377_v8, %v6967_v52  ;;  %v9451_v18 = vld [vmem:[#allocation43_spill] sm:$0xff] }
 0x339   : > { %v7061_v24 = vadd.f32 %v3381_v4, %v6970_v13  ;;  %v7064_v33 = vadd.f32 %v3385_v58, %v6973_v36  ;;  %v7067_v11 = vadd.f32 %v3389_v15, %v6976_v61  ;;  %v7070_v41 = vadd.f32 %v3393_v5, %v6979_v42  ;;  %3052 = vmatmul.f32.gmra.mxu2 %v9451_v18 }
 0x33a   : > { %v3397_v26 = vmul.f32 %v6823_v53, %v3143_v47  ;;  %v2986_v43 = vadd.f32 %v2985_v37, %v2745_v54  ;;  %3213 = vmatmul.f32.gmra.mxu3 %v9451_v18  ;;  %v532_v42 = vmax.f32 %v531_v46, 0.0  ;;  %v7079_v60 = vand.u32 2147483647, %v533_v0 }
 0x33b   : > { %v2553_v52 = vpop.f32.mrf.mxu0  ;;  %v2750_v32 = vpop.f32.mrf.mxu1  ;;  %v9452_v46 = vand.u32 4294901760, %v9449_v59 }
 0x33c   : > { %v7076_v13 = vadd.f32 %v3397_v26, %v6986_v63  ;;  %v3147_v36 = vadd.f32 %v3146_v45, %v2986_v43  ;;  %v2554_v30 = vadd.f32 %v2553_v52, %v6569_v17  ;;  %v2751_v61 = vadd.f32 %v2750_v32, %v2549_v28  ;;  %v2989_v12 = vpop.f32.mrf.mxu2 }
 0x33d   : > { %v3150_v14 = vpop.f32.mrf.mxu3  ;;  %v7118_v25 = vperm.slane %v532_v42, 0  ;;  %v535_v52 = vsub.f32 1.0, %v7079_v60  ;;  %v9455_v60 = vand.u32 4294901760, %v6528_v20 }
 0x33e   : > { %v3366_v57 = vmul.f32 %v7027_v27, %v3147_v36  ;;  %v3370_v47 = vmul.f32 %v6943_v49, %v3147_v36  ;;  %v3374_v37 = vmul.f32 %v6833_v29, %v3147_v36  ;;  %v3378_v54 = vmul.f32 %v6813_v51, %v3147_v36  ;;  %2632 = vmatmul.f32.gmra.mxu0 %v6528_v20 }
 0x33f   : > { %v3382_v63 = vmul.f32 %v6815_v16, %v3147_v36  ;;  %v3386_v17 = vmul.f32 %v6817_v7, %v3147_v36  ;;  %v3390_v28 = vmul.f32 %v6819_v62, %v3147_v36  ;;  %v3394_v45 = vmul.f32 %v6821_v10, %v3147_v36 }
 0x340   : > { %2845 = vmatmul.f32.gmra.mxu1 %v9452_v46  ;;  %v7093_v0 = vadd.f32 %v3366_v57, %v7002_v34  ;;  %v7096_v1 = vadd.f32 %v3370_v47, %v7005_v6  ;;  %v7099_v8 = vadd.f32 %v3374_v37, %v7008_v31  ;;  %v7102_v4 = vadd.f32 %v3378_v54, %v7011_v44  ;;  %v9453_v6 = vld [vmem:[#allocation45_spill] sm:$0xff] }
 0x341   : > { %v7105_v58 = vadd.f32 %v3382_v63, %v7014_v39  ;;  %v7108_v15 = vadd.f32 %v3386_v17, %v7017_v35  ;;  %v7111_v59 = vadd.f32 %v3390_v28, %v7020_v21  ;;  %v7114_v34 = vadd.f32 %v3394_v45, %v7023_v23  ;;  %3056 = vmatmul.f32.gmra.mxu2 %v9453_v6 }
 0x342   : > { %v3398_v31 = vmul.f32 %v6823_v53, %v3147_v36  ;;  %v2990_v5 = vadd.f32 %v2989_v12, %v2751_v61  ;;  %3217 = vmatmul.f32.gmra.mxu3 %v9453_v6  ;;  %v537_v53 = vsub.f32 10.0, %v6777_v19 }
 0x343   : > { %v2558_v44 = vpop.f32.mrf.mxu0  ;;  %v2756_v39 = vpop.f32.mrf.mxu1 }
 0x344   : > { %v7122_v35 = vadd.f32 %v3398_v31, %v7032_v40  ;;  %v3151_v18 = vadd.f32 %v3150_v14, %v2990_v5  ;;  %v2559_v21 = vadd.f32 %v2558_v44, %v6585_v22  ;;  %v2757_v26 = vadd.f32 %v2756_v39, %v2554_v30  ;;  %v2993_v23 = vpop.f32.mrf.mxu2  ;;  %v9454_v40 = vld [vmem:[#allocation69_spill] sm:$0xff] }
 0x345   : > { %v3154_v43 = vpop.f32.mrf.mxu3  ;;  %v7169_v5 = vand.u32 2147483647, %v537_v53 }
 0x346   : > { %v3402_v32 = vmul.f32 %v7118_v25, %v3151_v18  ;;  %v3406_v36 = vmul.f32 %v7027_v27, %v3151_v18  ;;  %v3410_v61 = vmul.f32 %v6943_v49, %v3151_v18  ;;  %v3414_v12 = vmul.f32 %v6833_v29, %v3151_v18  ;;  %2637 = vmatmul.f32.gmra.mxu0 %v9454_v40 }
 0x347   : > { %v3418_v14 = vmul.f32 %v6813_v51, %v3151_v18  ;;  %v3422_v22 = vmul.f32 %v6815_v16, %v3151_v18  ;;  %v3426_v30 = vmul.f32 %v6817_v7, %v3151_v18  ;;  %v3430_v42 = vmul.f32 %v6819_v62, %v3151_v18 }
 0x348   : > { %2851 = vmatmul.f32.gmra.mxu1 %v9455_v60  ;;  %v7139_v57 = vadd.f32 %v3402_v32, %v7049_v2  ;;  %v7142_v47 = vadd.f32 %v3406_v36, %v7052_v50  ;;  %v7145_v37 = vadd.f32 %v3410_v61, %v7055_v48  ;;  %v7148_v54 = vadd.f32 %v3414_v12, %v7058_v3  ;;  %v9456_v50 = vld [vmem:[#allocation46_spill] sm:$0xff] }
 0x349   : > { %v7151_v63 = vadd.f32 %v3418_v14, %v7061_v24  ;;  %v7154_v17 = vadd.f32 %v3422_v22, %v7064_v33  ;;  %v7157_v20 = vadd.f32 %v3426_v30, %v7067_v11  ;;  %v7160_v2 = vadd.f32 %v3430_v42, %v7070_v41  ;;  %3060 = vmatmul.f32.gmra.mxu2 %v9456_v50 }
 0x34a   : > { %v3434_v48 = vmul.f32 %v6821_v10, %v3151_v18  ;;  %v2994_v28 = vadd.f32 %v2993_v23, %v2757_v26  ;;  %3221 = vmatmul.f32.gmra.mxu3 %v9456_v50  ;;  %v536_v41 = vmax.f32 %v535_v52, 0.0  ;;  %v539_v50 = vsub.f32 1.0, %v7169_v5 }
 0x34b   : > { %v2563_v3 = vpop.f32.mrf.mxu0  ;;  %v2762_v45 = vpop.f32.mrf.mxu1 }
 0x34c   : > { %v7166_v24 = vadd.f32 %v3434_v48, %v7076_v13  ;;  %v3155_v33 = vadd.f32 %v3154_v43, %v2994_v28  ;;  %v2564_v46 = vadd.f32 %v2563_v3, %v6601_v56  ;;  %v2763_v11 = vadd.f32 %v2762_v45, %v2559_v21  ;;  %v2997_v6 = vpop.f32.mrf.mxu2 }
 0x34d   : > { %v3158_v31 = vpop.f32.mrf.mxu3  ;;  %v9457_v43 = vand.u32 4294901760, %v9454_v40  ;;  %v7208_v22 = vperm.slane %v536_v41, 0 }
 0x34e   : > { %v3403_v44 = vmul.f32 %v7118_v25, %v3155_v33  ;;  %v3407_v39 = vmul.f32 %v7027_v27, %v3155_v33  ;;  %v3411_v18 = vmul.f32 %v6943_v49, %v3155_v33  ;;  %v3415_v26 = vmul.f32 %v6833_v29, %v3155_v33  ;;  %2642 = vmatmul.f32.gmra.mxu0 %v6560_v55 }
 0x34f   : > { %v3419_v13 = vmul.f32 %v6813_v51, %v3155_v33  ;;  %v3423_v56 = vmul.f32 %v6815_v16, %v3155_v33  ;;  %v3427_v21 = vmul.f32 %v6817_v7, %v3155_v33  ;;  %v3431_v23 = vmul.f32 %v6819_v62, %v3155_v33 }
 0x350   : > { %2857 = vmatmul.f32.gmra.mxu1 %v9457_v43  ;;  %v7183_v52 = vadd.f32 %v3403_v44, %v7093_v0  ;;  %v7186_v53 = vadd.f32 %v3407_v39, %v7096_v1  ;;  %v7189_v32 = vadd.f32 %v3411_v18, %v7099_v8  ;;  %v7192_v36 = vadd.f32 %v3415_v26, %v7102_v4  ;;  %v9458_v1 = vld [vmem:[#allocation47_spill] sm:$0xff] }
 0x351   : > { %v7195_v61 = vadd.f32 %v3419_v13, %v7105_v58  ;;  %v7198_v12 = vadd.f32 %v3423_v56, %v7108_v15  ;;  %v7201_v40 = vadd.f32 %v3427_v21, %v7111_v59  ;;  %v7204_v0 = vadd.f32 %v3431_v23, %v7114_v34  ;;  %3064 = vmatmul.f32.gmra.mxu2 %v9458_v1  ;;  %v9461_v13 = vld [vmem:[#allocation75_spill] sm:$0xff] }
 0x352   : > { %v3435_v8 = vmul.f32 %v6821_v10, %v3155_v33  ;;  %v2998_v14 = vadd.f32 %v2997_v6, %v2763_v11  ;;  %3225 = vmatmul.f32.gmra.mxu3 %v9458_v1  ;;  %v541_v10 = vsub.f32 11.0, %v6777_v19  ;;  %v9459_v11 = vand.u32 4294901760, %v6560_v55 }
 0x353   : > { %v2568_v4 = vpop.f32.mrf.mxu0  ;;  %v2768_v58 = vpop.f32.mrf.mxu1 }
 0x354   : > { %v7212_v15 = vadd.f32 %v3435_v8, %v7122_v35  ;;  %v3159_v30 = vadd.f32 %v3158_v31, %v2998_v14  ;;  %v2569_v59 = vadd.f32 %v2568_v4, %v6617_v9  ;;  %v2769_v42 = vadd.f32 %v2768_v58, %v2564_v46  ;;  %v3001_v34 = vpop.f32.mrf.mxu2  ;;  %v9462_v58 = vld [vmem:[#allocation70_spill] sm:$0xff] }
 0x355   : > { %v3162_v60 = vpop.f32.mrf.mxu3  ;;  %v7259_v43 = vand.u32 2147483647, %v541_v10 }
 0x356   : > { %v3439_v48 = vmul.f32 %v7208_v22, %v3159_v30  ;;  %v3443_v28 = vmul.f32 %v7118_v25, %v3159_v30  ;;  %v3447_v3 = vmul.f32 %v7027_v27, %v3159_v30  ;;  %v3451_v45 = vmul.f32 %v6943_v49, %v3159_v30  ;;  %2647 = vmatmul.f32.gmra.mxu0 %v6576_v38 }
 0x357   : > { %v3455_v35 = vmul.f32 %v6833_v29, %v3159_v30  ;;  %v3459_v9 = vmul.f32 %v6813_v51, %v3159_v30  ;;  %v3463_v33 = vmul.f32 %v6815_v16, %v3159_v30  ;;  %v3467_v46 = vmul.f32 %v6817_v7, %v3159_v30 }
 0x358   : > { %2863 = vmatmul.f32.gmra.mxu1 %v9459_v11  ;;  %v7229_v6 = vadd.f32 %v3439_v48, %v7139_v57  ;;  %v7232_v31 = vadd.f32 %v3443_v28, %v7142_v47  ;;  %v7235_v41 = vadd.f32 %v3447_v3, %v7145_v37  ;;  %v7238_v5 = vadd.f32 %v3451_v45, %v7148_v54  ;;  %v9460_v47 = vld [vmem:[#allocation44_spill] sm:$0xff] }
 0x359   : > { %v7241_v44 = vadd.f32 %v3455_v35, %v7151_v63  ;;  %v7244_v39 = vadd.f32 %v3459_v9, %v7154_v17  ;;  %v7247_v55 = vadd.f32 %v3463_v33, %v7157_v20  ;;  %v7250_v57 = vadd.f32 %v3467_v46, %v7160_v2  ;;  %3068 = vmatmul.f32.gmra.mxu2 %v9460_v47 }
 0x35a   : > { %v3471_v37 = vmul.f32 %v6819_v62, %v3159_v30  ;;  %v3002_v18 = vadd.f32 %v3001_v34, %v2769_v42  ;;  %3229 = vmatmul.f32.gmra.mxu3 %v9460_v47  ;;  %v540_v2 = vmax.f32 %v539_v50, 0.0  ;;  %v9463_v34 = vand.u32 4294901760, %v6576_v38 }
 0x35b   : > { %v2573_v54 = vpop.f32.mrf.mxu0  ;;  %v2774_v26 = vpop.f32.mrf.mxu1  ;;  %v543_v47 = vsub.f32 1.0, %v7259_v43 }
 0x35c   : > { %v7256_v63 = vadd.f32 %v3471_v37, %v7166_v24  ;;  %v3163_v17 = vadd.f32 %v3162_v60, %v3002_v18  ;;  %v2574_v56 = vadd.f32 %v2573_v54, %v9461_v13  ;;  %v2775_v20 = vadd.f32 %v2774_v26, %v2569_v59  ;;  %v3005_v21 = vpop.f32.mrf.mxu2 }
 0x35d   : > { %v3166_v23 = vpop.f32.mrf.mxu3  ;;  %v7298_v35 = vperm.slane %v540_v2, 0 }
 0x35e   : > { %v3440_v1 = vmul.f32 %v7208_v22, %v3163_v17  ;;  %v3444_v8 = vmul.f32 %v7118_v25, %v3163_v17  ;;  %v3448_v14 = vmul.f32 %v7027_v27, %v3163_v17  ;;  %v3452_v4 = vmul.f32 %v6943_v49, %v3163_v17  ;;  %2652 = vmatmul.f32.gmra.mxu0 %v9462_v58 }
 0x35f   : > { %v3456_v24 = vmul.f32 %v6833_v29, %v3163_v17  ;;  %v3460_v30 = vmul.f32 %v6813_v51, %v3163_v17  ;;  %v3464_v59 = vmul.f32 %v6815_v16, %v3163_v17  ;;  %v3468_v42 = vmul.f32 %v6817_v7, %v3163_v17 }
 0x360   : > { %2869 = vmatmul.f32.gmra.mxu1 %v9463_v34  ;;  %v7273_v60 = vadd.f32 %v3440_v1, %v7183_v52  ;;  %v7276_v50 = vadd.f32 %v3444_v8, %v7186_v53  ;;  %v7279_v10 = vadd.f32 %v3448_v14, %v7189_v32  ;;  %v7282_v48 = vadd.f32 %v3452_v4, %v7192_v36  ;;  %v9464_v53 = vld [vmem:[#allocation48_spill] sm:$0xff] }
 0x361   : > { %v7285_v28 = vadd.f32 %v3456_v24, %v7195_v61  ;;  %v7288_v3 = vadd.f32 %v3460_v30, %v7198_v12  ;;  %v7291_v38 = vadd.f32 %v3464_v59, %v7201_v40  ;;  %v7294_v52 = vadd.f32 %v3468_v42, %v7204_v0  ;;  %3072 = vmatmul.f32.gmra.mxu2 %v9464_v53  ;;  %v9465_v40 = vld [vmem:[#allocation76_spill] sm:$0xff] }
 0x362   : > { %v3472_v32 = vmul.f32 %v6819_v62, %v3163_v17  ;;  %v3006_v45 = vadd.f32 %v3005_v21, %v2775_v20  ;;  %3233 = vmatmul.f32.gmra.mxu3 %v9464_v53  ;;  %v545_v62 = vsub.f32 12.0, %v6777_v19  ;;  %v9467_v21 = vand.u32 4294901760, %v9462_v58 }
 0x363   : > { %v2578_v36 = vpop.f32.mrf.mxu0  ;;  %v2780_v61 = vpop.f32.mrf.mxu1  ;;  %v544_v53 = vmax.f32 %v543_v47, 0.0 }
 0x364   : > { %v7302_v12 = vadd.f32 %v3472_v32, %v7212_v15  ;;  %v3167_v9 = vadd.f32 %v3166_v23, %v3006_v45  ;;  %v2579_v33 = vadd.f32 %v2578_v36, %v9465_v40  ;;  %v2781_v46 = vadd.f32 %v2780_v61, %v2574_v56  ;;  %v3009_v0 = vpop.f32.mrf.mxu2  ;;  %v9466_v15 = vld [vmem:[#allocation72_spill] sm:$0xff] }
 0x365   : > { %v3170_v11 = vpop.f32.mrf.mxu3 }
 0x366   : > { %v3476_v37 = vmul.f32 %v7298_v35, %v3167_v9  ;;  %v3480_v18 = vmul.f32 %v7208_v22, %v3167_v9  ;;  %v3484_v54 = vmul.f32 %v7118_v25, %v3167_v9  ;;  %v3488_v26 = vmul.f32 %v7027_v27, %v3167_v9  ;;  %2657 = vmatmul.f32.gmra.mxu0 %v9466_v15 }
 0x367   : > { %v3492_v17 = vmul.f32 %v6943_v49, %v3167_v9  ;;  %v3496_v13 = vmul.f32 %v6833_v29, %v3167_v9  ;;  %v3500_v56 = vmul.f32 %v6813_v51, %v3167_v9  ;;  %v3504_v20 = vmul.f32 %v6815_v16, %v3167_v9 }
 0x368   : > { %2875 = vmatmul.f32.gmra.mxu1 %v9467_v21  ;;  %v7319_v23 = vadd.f32 %v3476_v37, %v7229_v6  ;;  %v7322_v2 = vadd.f32 %v3480_v18, %v7232_v31  ;;  %v7325_v43 = vadd.f32 %v3484_v54, %v7235_v41  ;;  %v7328_v1 = vadd.f32 %v3488_v26, %v7238_v5  ;;  %v9468_v31 = vld [vmem:[#allocation71_spill] sm:$0xff] }
 0x369   : > { %v7331_v8 = vadd.f32 %v3492_v17, %v7241_v44  ;;  %v7334_v14 = vadd.f32 %v3496_v13, %v7244_v39  ;;  %v7337_v4 = vadd.f32 %v3500_v56, %v7247_v55  ;;  %v7340_v6 = vadd.f32 %v3504_v20, %v7250_v57  ;;  %3076 = vmatmul.f32.gmra.mxu2 %v9468_v31  ;;  %v9469_v39 = vld [vmem:[#allocation77_spill] sm:$0xff]  ;;  %v9473_v20 = vld [vmem:[#allocation78_spill] sm:$0xff] }
 0x36a   : > { %v3508_v41 = vmul.f32 %v6817_v7, %v3167_v9  ;;  %v3010_v58 = vadd.f32 %v3009_v0, %v2781_v46  ;;  %3237 = vmatmul.f32.gmra.mxu3 %v9468_v31  ;;  %v546_v57 = vand.u32 2147483647, %v545_v62  ;;  %v9470_v9 = vld [vmem:[#allocation74_spill] sm:$0xff]  ;;  %v9471_v0 = vand.u32 4294901760, %v9466_v15  ;;  %v9472_v13 = vld [vmem:[#allocation73_spill] sm:$0xff] }
 0x36b   : > { %v2583_v5 = vpop.f32.mrf.mxu0  ;;  %v2786_v24 = vpop.f32.mrf.mxu1 }
 0x36c   : > { %v3510_v44 = vadd.f32 %v3508_v41, %v7256_v63  ;;  %v3171_v30 = vadd.f32 %v3170_v11, %v3010_v58  ;;  %v2584_v59 = vadd.f32 %v2583_v5, %v9469_v39  ;;  %v2787_v42 = vadd.f32 %v2786_v24, %v2579_v33  ;;  %v3013_v55 = vpop.f32.mrf.mxu2 }
 0x36d   : > { %v3174_v34 = vpop.f32.mrf.mxu3  ;;  %v549_v41 = vsub.f32 13.0, %v6777_v19 }
 0x36e   : > { %v3477_v32 = vmul.f32 %v7298_v35, %v3171_v30  ;;  %v3481_v45 = vmul.f32 %v7208_v22, %v3171_v30  ;;  %v3485_v36 = vmul.f32 %v7118_v25, %v3171_v30  ;;  %v3489_v61 = vmul.f32 %v7027_v27, %v3171_v30  ;;  %2662 = vmatmul.f32.gmra.mxu0 %v9470_v9 }
 0x36f   : > { %v3493_v63 = vmul.f32 %v6943_v49, %v3171_v30  ;;  %v3497_v40 = vmul.f32 %v6833_v29, %v3171_v30  ;;  %v3501_v33 = vmul.f32 %v6813_v51, %v3171_v30  ;;  %v3505_v46 = vmul.f32 %v6815_v16, %v3171_v30 }
 0x370   : > { %2881 = vmatmul.f32.gmra.mxu1 %v9471_v0  ;;  %v3479_v11 = vadd.f32 %v3477_v32, %v7273_v60  ;;  %v3483_v47 = vadd.f32 %v3481_v45, %v7276_v50  ;;  %v3487_v62 = vadd.f32 %v3485_v36, %v7279_v10  ;;  %v3491_v37 = vadd.f32 %v3489_v61, %v7282_v48 }
 0x371   : > { %v3495_v18 = vadd.f32 %v3493_v63, %v7285_v28  ;;  %v3499_v54 = vadd.f32 %v3497_v40, %v7288_v3  ;;  %v3503_v26 = vadd.f32 %v3501_v33, %v7291_v38  ;;  %v3507_v17 = vadd.f32 %v3505_v46, %v7294_v52  ;;  %3080 = vmatmul.f32.gmra.mxu2 %v9472_v13 }
 0x372   : > { %v3509_v15 = vmul.f32 %v6817_v7, %v3171_v30  ;;  %v3014_v56 = vadd.f32 %v3013_v55, %v2787_v42  ;;  %v7368_v60 = vperm.slane %v544_v53, 0  ;;  %3241 = vmatmul.f32.gmra.mxu3 %v9472_v13  ;;  %v547_v52 = vsub.f32 1.0, %v546_v57 }
 0x373   : > { %v2588_v50 = vpop.f32.mrf.mxu0  ;;  %v2792_v10 = vpop.f32.mrf.mxu1  ;;  %v9474_v42 = vand.u32 4294901760, %v9470_v9 }
 0x374   : > { %v3511_v48 = vadd.f32 %v3509_v15, %v7302_v12  ;;  %v3175_v28 = vadd.f32 %v3174_v34, %v3014_v56  ;;  %v2589_v3 = vadd.f32 %v2588_v50, %v9473_v20  ;;  %v2793_v21 = vadd.f32 %v2792_v10, %v2584_v59  ;;  %v3017_v38 = vpop.f32.mrf.mxu2 }
 0x375   : > { %v3178_v31 = vpop.f32.mrf.mxu3  ;;  %v548_v13 = vmax.f32 %v547_v52, 0.0 }
 0x376   : > { %v3513_v7 = vmul.f32 %v7368_v60, %v3175_v28  ;;  %v3517_v58 = vmul.f32 %v7298_v35, %v3175_v28  ;;  %v3521_v5 = vmul.f32 %v7208_v22, %v3175_v28  ;;  %v3525_v24 = vmul.f32 %v7118_v25, %v3175_v28 }
 0x377   : > { %v3529_v30 = vmul.f32 %v7027_v27, %v3175_v28  ;;  %v3533_v12 = vmul.f32 %v6943_v49, %v3175_v28  ;;  %v3537_v39 = vmul.f32 %v6833_v29, %v3175_v28  ;;  %v3541_v59 = vmul.f32 %v6813_v51, %v3175_v28 }
 0x378   : > { %2887 = vmatmul.f32.gmra.mxu1 %v9474_v42  ;;  %v3515_v19 = vadd.f32 %v3513_v7, %v7319_v23  ;;  %v3519_v55 = vadd.f32 %v3517_v58, %v7322_v2  ;;  %v3523_v34 = vadd.f32 %v3521_v5, %v7325_v43  ;;  %v3527_v53 = vadd.f32 %v3525_v24, %v7328_v1  ;;  %v9475_v2 = vld [vmem:[#allocation79_spill] sm:$0xff] }
 0x379   : > { %v3531_v57 = vadd.f32 %v3529_v30, %v7331_v8  ;;  %v3535_v32 = vadd.f32 %v3533_v12, %v7334_v14  ;;  %v3539_v45 = vadd.f32 %v3537_v39, %v7337_v4  ;;  %v3543_v36 = vadd.f32 %v3541_v59, %v7340_v6  ;;  %v9476_v59 = vld [vmem:[#allocation80_spill] sm:$0xff] }
 0x37a   : > { %v3545_v61 = vmul.f32 %v6815_v16, %v3175_v28  ;;  %v3018_v9 = vadd.f32 %v3017_v38, %v2793_v21  ;;  %v550_v8 = vand.u32 2147483647, %v549_v41  ;;  %v7403_v5 = vperm.slane %v548_v13, 0 }
 0x37b   : > { %v2593_v63 = vpop.f32.mrf.mxu0  ;;  %v2798_v40 = vpop.f32.mrf.mxu1 }
 0x37c   : > { %v3547_v23 = vadd.f32 %v3545_v61, %v3510_v44  ;;  %v3179_v33 = vadd.f32 %v3178_v31, %v3018_v9  ;;  %v2594_v46 = vadd.f32 %v2593_v63, %v9475_v2  ;;  %v2799_v43 = vadd.f32 %v2798_v40, %v2589_v3  ;;  %v3021_v0 = vpop.f32.mrf.mxu2 }
 0x37d   : > { %v3182_v1 = vpop.f32.mrf.mxu3 }
 0x37e   : > { %v3514_v14 = vmul.f32 %v7368_v60, %v3179_v33  ;;  %v3518_v4 = vmul.f32 %v7298_v35, %v3179_v33  ;;  %v3522_v6 = vmul.f32 %v7208_v22, %v3179_v33  ;;  %v3526_v15 = vmul.f32 %v7118_v25, %v3179_v33 }
 0x37f   : > { %v3530_v56 = vmul.f32 %v7027_v27, %v3179_v33  ;;  %v3534_v44 = vmul.f32 %v6943_v49, %v3179_v33  ;;  %v3538_v50 = vmul.f32 %v6833_v29, %v3179_v33  ;;  %v3542_v10 = vmul.f32 %v6813_v51, %v3179_v33 }
 0x380   : > { %v3516_v28 = vadd.f32 %v3514_v14, %v3479_v11  ;;  %v3520_v20 = vadd.f32 %v3518_v4, %v3483_v47  ;;  %v3524_v3 = vadd.f32 %v3522_v6, %v3487_v62  ;;  %v3528_v21 = vadd.f32 %v3526_v15, %v3491_v37 }
 0x381   : > { %v3532_v38 = vadd.f32 %v3530_v56, %v3495_v18  ;;  %v3536_v31 = vadd.f32 %v3534_v44, %v3499_v54  ;;  %v3540_v52 = vadd.f32 %v3538_v50, %v3503_v26  ;;  %v3544_v41 = vadd.f32 %v3542_v10, %v3507_v17  ;;  %v7407_v18 = vld [vmem:[%s6774_s23 + $0x1] sm:$0x1]  ;;  %v9477_v50 = vld [vmem:[#allocation81_spill] sm:$0xff] }
 0x382   : > { %v3546_v7 = vmul.f32 %v6815_v16, %v3179_v33  ;;  %v3022_v58 = vadd.f32 %v3021_v0, %v2799_v43  ;;  %v551_v37 = vsub.f32 1.0, %v550_v8  ;;  %v553_v54 = vsub.f32 14.0, %v7407_v18 }
 0x383   : > { %v2598_v24 = vpop.f32.mrf.mxu0  ;;  %v2804_v30 = vpop.f32.mrf.mxu1 }
 0x384   : > { %v3548_v12 = vadd.f32 %v3546_v7, %v3511_v48  ;;  %v3183_v39 = vadd.f32 %v3182_v1, %v3022_v58  ;;  %v2599_v42 = vadd.f32 %v2598_v24, %v9476_v59  ;;  %v2805_v11 = vadd.f32 %v2804_v30, %v2594_v46  ;;  %v3025_v47 = vpop.f32.mrf.mxu2 }
 0x385   : > { %v3186_v62 = vpop.f32.mrf.mxu3 }
 0x386   : > { %v3550_v26 = vmul.f32 %v7403_v5, %v3183_v39  ;;  %v3554_v16 = vmul.f32 %v7368_v60, %v3183_v39  ;;  %v3558_v17 = vmul.f32 %v7298_v35, %v3183_v39  ;;  %v3562_v61 = vmul.f32 %v7208_v22, %v3183_v39 }
 0x387   : > { %v3566_v48 = vmul.f32 %v7118_v25, %v3183_v39  ;;  %v3570_v9 = vmul.f32 %v7027_v27, %v3183_v39  ;;  %v3574_v63 = vmul.f32 %v6943_v49, %v3183_v39  ;;  %v3578_v40 = vmul.f32 %v6833_v29, %v3183_v39 }
 0x388   : > { %v3552_v33 = vadd.f32 %v3550_v26, %v3515_v19  ;;  %v3556_v2 = vadd.f32 %v3554_v16, %v3519_v55  ;;  %v3560_v46 = vadd.f32 %v3558_v17, %v3523_v34  ;;  %v3564_v43 = vadd.f32 %v3562_v61, %v3527_v53 }
 0x389   : > { %v3568_v0 = vadd.f32 %v3566_v48, %v3531_v57  ;;  %v3572_v1 = vadd.f32 %v3570_v9, %v3535_v32  ;;  %v3576_v13 = vadd.f32 %v3574_v63, %v3539_v45  ;;  %v3580_v8 = vadd.f32 %v3578_v40, %v3543_v36  ;;  %v9478_v40 = vld [vmem:[#allocation82_spill] sm:$0xff] }
 0x38a   : > { %v3582_v14 = vmul.f32 %v6813_v51, %v3183_v39  ;;  %v3026_v4 = vadd.f32 %v3025_v47, %v2805_v11  ;;  %v552_v19 = vmax.f32 %v551_v37, 0.0  ;;  %v554_v55 = vand.u32 2147483647, %v553_v54 }
 0x38b   : > { %v2603_v6 = vpop.f32.mrf.mxu0  ;;  %v2810_v15 = vpop.f32.mrf.mxu1 }
 0x38c   : > { %v3584_v56 = vadd.f32 %v3582_v14, %v3547_v23  ;;  %v3187_v44 = vadd.f32 %v3186_v62, %v3026_v4  ;;  %v2604_v10 = vadd.f32 %v2603_v6, %v9477_v50  ;;  %v2811_v7 = vadd.f32 %v2810_v15, %v2599_v42  ;;  %v3029_v58 = vpop.f32.mrf.mxu2 }
 0x38d   : > { %v3190_v24 = vpop.f32.mrf.mxu3  ;;  %v7429_v17 = vperm.slane %v552_v19, 0 }
 0x38e   : > { %v3551_v34 = vmul.f32 %v7403_v5, %v3187_v44  ;;  %v3555_v53 = vmul.f32 %v7368_v60, %v3187_v44  ;;  %v3559_v57 = vmul.f32 %v7298_v35, %v3187_v44  ;;  %v3563_v32 = vmul.f32 %v7208_v22, %v3187_v44 }
 0x38f   : > { %v3567_v45 = vmul.f32 %v7118_v25, %v3187_v44  ;;  %v3571_v36 = vmul.f32 %v7027_v27, %v3187_v44  ;;  %v3575_v23 = vmul.f32 %v6943_v49, %v3187_v44  ;;  %v3579_v30 = vmul.f32 %v6833_v29, %v3187_v44 }
 0x390   : > { %v3553_v39 = vadd.f32 %v3551_v34, %v3516_v28  ;;  %v3557_v59 = vadd.f32 %v3555_v53, %v3520_v20  ;;  %v3561_v42 = vadd.f32 %v3559_v57, %v3524_v3  ;;  %v3565_v11 = vadd.f32 %v3563_v32, %v3528_v21 }
 0x391   : > { %v3569_v47 = vadd.f32 %v3567_v45, %v3532_v38  ;;  %v3573_v62 = vadd.f32 %v3571_v36, %v3536_v31  ;;  %v3577_v37 = vadd.f32 %v3575_v23, %v3540_v52  ;;  %v3581_v54 = vadd.f32 %v3579_v30, %v3544_v41  ;;  %v9479_v36 = vld [vmem:[#allocation83_spill] sm:$0xff] }
 0x392   : > { %v3583_v26 = vmul.f32 %v6813_v51, %v3187_v44  ;;  %v3030_v16 = vadd.f32 %v3029_v58, %v2811_v7  ;;  %v555_v3 = vsub.f32 1.0, %v554_v55  ;;  %v557_v21 = vsub.f32 15.0, %v7407_v18 }
 0x393   : > { %v2608_v61 = vpop.f32.mrf.mxu0 }
 0x394   : > { %v3585_v9 = vadd.f32 %v3583_v26, %v3548_v12  ;;  %v3191_v63 = vadd.f32 %v3190_v24, %v3030_v16  ;;  %v2609_v14 = vadd.f32 %v2608_v61, %v9478_v40  ;;  %v3033_v28 = vpop.f32.mrf.mxu2  ;;  %v556_v61 = vmax.f32 %v555_v3, 0.0 }
 0x395   : > { %v2816_v48 = vpop.f32.mrf.mxu1  ;;  %v3194_v20 = vpop.f32.mrf.mxu3 }
 0x396   : > { %v2817_v4 = vadd.f32 %v2816_v48, %v2604_v10  ;;  %v3587_v38 = vmul.f32 %v7429_v17, %v3191_v63  ;;  %v3591_v31 = vmul.f32 %v7403_v5, %v3191_v63  ;;  %v3595_v51 = vmul.f32 %v7368_v60, %v3191_v63 }
 0x397   : > { %v3599_v52 = vmul.f32 %v7298_v35, %v3191_v63  ;;  %v3603_v41 = vmul.f32 %v7208_v22, %v3191_v63  ;;  %v3607_v12 = vmul.f32 %v7118_v25, %v3191_v63  ;;  %v3611_v6 = vmul.f32 %v7027_v27, %v3191_v63 }
 0x398   : > { %v3615_v15 = vmul.f32 %v6943_v49, %v3191_v63  ;;  %v3589_v44 = vadd.f32 %v3587_v38, %v3552_v33  ;;  %v3593_v50 = vadd.f32 %v3591_v31, %v3556_v2  ;;  %v3597_v10 = vadd.f32 %v3595_v51, %v3560_v46 }
 0x399   : > { %v3601_v7 = vadd.f32 %v3599_v52, %v3564_v43  ;;  %v3605_v58 = vadd.f32 %v3603_v41, %v3568_v0  ;;  %v3609_v24 = vadd.f32 %v3607_v12, %v3572_v1  ;;  %v3613_v19 = vadd.f32 %v3611_v6, %v3576_v13  ;;  %v9480_v6 = vld [vmem:[#allocation84_spill] sm:$0xff] }
 0x39a   : > { %v3617_v55 = vadd.f32 %v3615_v15, %v3580_v8  ;;  %v3619_v34 = vmul.f32 %v6833_v29, %v3191_v63  ;;  %v3034_v53 = vadd.f32 %v3033_v28, %v2817_v4  ;;  %v558_v2 = vand.u32 2147483647, %v557_v21 }
 0x39b   : > { %v2613_v57 = vpop.f32.mrf.mxu0  ;;  %v7452_v51 = vperm.slane %v556_v61, 0 }
 0x39c   : > { %v3621_v32 = vadd.f32 %v3619_v34, %v3584_v56  ;;  %v3195_v45 = vadd.f32 %v3194_v20, %v3034_v53  ;;  %v2614_v23 = vadd.f32 %v2613_v57, %v9479_v36  ;;  %v3037_v26 = vpop.f32.mrf.mxu2 }
 0x39d   : > { %v2822_v30 = vpop.f32.mrf.mxu1  ;;  %v3198_v33 = vpop.f32.mrf.mxu3 }
 0x39e   : > { %v2823_v16 = vadd.f32 %v2822_v30, %v2609_v14  ;;  %v3588_v46 = vmul.f32 %v7429_v17, %v3195_v45  ;;  %v3592_v43 = vmul.f32 %v7403_v5, %v3195_v45  ;;  %v3596_v0 = vmul.f32 %v7368_v60, %v3195_v45 }
 0x39f   : > { %v3600_v1 = vmul.f32 %v7298_v35, %v3195_v45  ;;  %v3604_v13 = vmul.f32 %v7208_v22, %v3195_v45  ;;  %v3608_v8 = vmul.f32 %v7118_v25, %v3195_v45  ;;  %v3612_v56 = vmul.f32 %v7027_v27, %v3195_v45 }
 0x3a0   : > { %v3616_v48 = vmul.f32 %v6943_v49, %v3195_v45  ;;  %v3590_v63 = vadd.f32 %v3588_v46, %v3553_v39  ;;  %v3594_v40 = vadd.f32 %v3592_v43, %v3557_v59  ;;  %v3598_v14 = vadd.f32 %v3596_v0, %v3561_v42 }
 0x3a1   : > { %v3602_v4 = vadd.f32 %v3600_v1, %v3565_v11  ;;  %v3606_v28 = vadd.f32 %v3604_v13, %v3569_v47  ;;  %v3610_v20 = vadd.f32 %v3608_v8, %v3573_v62  ;;  %v3614_v3 = vadd.f32 %v3612_v56, %v3577_v37 }
 0x3a2   : > { %v3618_v21 = vadd.f32 %v3616_v48, %v3581_v54  ;;  %v3620_v38 = vmul.f32 %v6833_v29, %v3195_v45  ;;  %v3038_v31 = vadd.f32 %v3037_v26, %v2823_v16  ;;  %v559_v42 = vsub.f32 1.0, %v558_v2 }
 0x3a3   : > { %v2618_v52 = vpop.f32.mrf.mxu0  ;;  %v561_v11 = vsub.f32 16.0, %v7407_v18 }
 0x3a4   : > { %v3622_v41 = vadd.f32 %v3620_v38, %v3585_v9  ;;  %v3199_v12 = vadd.f32 %v3198_v33, %v3038_v31  ;;  %v2619_v15 = vadd.f32 %v2618_v52, %v9480_v6  ;;  %v3041_v53 = vpop.f32.mrf.mxu2  ;;  %v560_v38 = vmax.f32 %v559_v42, 0.0 }
 0x3a5   : > { %v2828_v34 = vpop.f32.mrf.mxu1  ;;  %v3202_v59 = vpop.f32.mrf.mxu3  ;;  %v562_v52 = vand.u32 2147483647, %v561_v11 }
 0x3a6   : > { %v2829_v39 = vadd.f32 %v2828_v34, %v2614_v23  ;;  %v3624_v47 = vmul.f32 %v7452_v51, %v3199_v12  ;;  %v3628_v62 = vmul.f32 %v7429_v17, %v3199_v12  ;;  %v3632_v29 = vmul.f32 %v7403_v5, %v3199_v12 }
 0x3a7   : > { %v3636_v37 = vmul.f32 %v7368_v60, %v3199_v12  ;;  %v3640_v54 = vmul.f32 %v7298_v35, %v3199_v12  ;;  %v3644_v9 = vmul.f32 %v7208_v22, %v3199_v12  ;;  %v3648_v57 = vmul.f32 %v7118_v25, %v3199_v12 }
 0x3a8   : > { %v3652_v45 = vmul.f32 %v7027_v27, %v3199_v12  ;;  %v3626_v36 = vadd.f32 %v3624_v47, %v3589_v44  ;;  %v3630_v23 = vadd.f32 %v3628_v62, %v3593_v50  ;;  %v3634_v30 = vadd.f32 %v3632_v29, %v3597_v10  ;;  %v9481_v29 = vld [vmem:[#allocation85_spill] sm:$0xff] }
 0x3a9   : > { %v3638_v26 = vadd.f32 %v3636_v37, %v3601_v7  ;;  %v3642_v16 = vadd.f32 %v3640_v54, %v3605_v58  ;;  %v3646_v61 = vadd.f32 %v3644_v9, %v3609_v24  ;;  %v3650_v33 = vadd.f32 %v3648_v57, %v3613_v19 }
 0x3aa   : > { %v3654_v2 = vadd.f32 %v3652_v45, %v3617_v55  ;;  %v3656_v46 = vmul.f32 %v6943_v49, %v3199_v12  ;;  %v3042_v43 = vadd.f32 %v3041_v53, %v2829_v39  ;;  %v7474_v47 = vperm.slane %v560_v38, 0 }
 0x3ab   : > { %v2623_v0 = vpop.f32.mrf.mxu0  ;;  %v565_v62 = vsub.f32 17.0, %v7407_v18 }
 0x3ac   : > { %v3658_v1 = vadd.f32 %v3656_v46, %v3621_v32  ;;  %v3203_v13 = vadd.f32 %v3202_v59, %v3042_v43  ;;  %v3045_v56 = vpop.f32.mrf.mxu2  ;;  %v2624_v37 = vadd.f32 %v2623_v0, %v9481_v29 }
 0x3ad   : > { %v2834_v8 = vpop.f32.mrf.mxu1  ;;  %v3206_v31 = vpop.f32.mrf.mxu3 }
 0x3ae   : > { %v2835_v48 = vadd.f32 %v2834_v8, %v2619_v15  ;;  %v3625_v44 = vmul.f32 %v7452_v51, %v3203_v13  ;;  %v3629_v50 = vmul.f32 %v7429_v17, %v3203_v13  ;;  %v3633_v10 = vmul.f32 %v7403_v5, %v3203_v13 }
 0x3af   : > { %v3637_v7 = vmul.f32 %v7368_v60, %v3203_v13  ;;  %v3641_v58 = vmul.f32 %v7298_v35, %v3203_v13  ;;  %v3645_v24 = vmul.f32 %v7208_v22, %v3203_v13  ;;  %v3649_v19 = vmul.f32 %v7118_v25, %v3203_v13 }
 0x3b0   : > { %v3653_v55 = vmul.f32 %v7027_v27, %v3203_v13  ;;  %v3627_v32 = vadd.f32 %v3625_v44, %v3590_v63  ;;  %v3631_v12 = vadd.f32 %v3629_v50, %v3594_v40  ;;  %v3635_v6 = vadd.f32 %v3633_v10, %v3598_v14 }
 0x3b1   : > { %v3639_v15 = vadd.f32 %v3637_v7, %v3602_v4  ;;  %v3643_v34 = vadd.f32 %v3641_v58, %v3606_v28  ;;  %v3647_v53 = vadd.f32 %v3645_v24, %v3610_v20  ;;  %v3651_v39 = vadd.f32 %v3649_v19, %v3614_v3  ;;  %v9482_v7 = vld [vmem:[#allocation86_spill] sm:$0xff] }
 0x3b2   : > { %v3655_v59 = vadd.f32 %v3653_v55, %v3618_v21  ;;  %v3657_v42 = vmul.f32 %v6943_v49, %v3203_v13  ;;  %v3046_v11 = vadd.f32 %v3045_v56, %v2835_v48  ;;  %v563_v28 = vsub.f32 1.0, %v562_v52 }
 0x3b3   : > { %v2628_v54 = vpop.f32.mrf.mxu0  ;;  %v566_v20 = vand.u32 2147483647, %v565_v62 }
 0x3b4   : > { %v3659_v9 = vadd.f32 %v3657_v42, %v3622_v41  ;;  %v3207_v57 = vadd.f32 %v3206_v31, %v3046_v11  ;;  %v3049_v40 = vpop.f32.mrf.mxu2  ;;  %v2629_v58 = vadd.f32 %v2628_v54, %v9482_v7  ;;  %v564_v29 = vmax.f32 %v563_v28, 0.0 }
 0x3b5   : > { %v2840_v63 = vpop.f32.mrf.mxu1  ;;  %v3210_v4 = vpop.f32.mrf.mxu3 }
 0x3b6   : > { %v2841_v14 = vadd.f32 %v2840_v63, %v2624_v37  ;;  %v3661_v3 = vmul.f32 %v7474_v47, %v3207_v57  ;;  %v3665_v49 = vmul.f32 %v7452_v51, %v3207_v57  ;;  %v3669_v21 = vmul.f32 %v7429_v17, %v3207_v57 }
 0x3b7   : > { %v3673_v45 = vmul.f32 %v7403_v5, %v3207_v57  ;;  %v3677_v46 = vmul.f32 %v7368_v60, %v3207_v57  ;;  %v3681_v43 = vmul.f32 %v7298_v35, %v3207_v57  ;;  %v3685_v41 = vmul.f32 %v7208_v22, %v3207_v57 }
 0x3b8   : > { %v3689_v0 = vmul.f32 %v7118_v25, %v3207_v57  ;;  %v3663_v13 = vadd.f32 %v3661_v3, %v3626_v36  ;;  %v3667_v8 = vadd.f32 %v3665_v49, %v3630_v23  ;;  %v3671_v56 = vadd.f32 %v3669_v21, %v3634_v30 }
 0x3b9   : > { %v3675_v48 = vadd.f32 %v3673_v45, %v3638_v26  ;;  %v3679_v38 = vadd.f32 %v3677_v46, %v3642_v16  ;;  %v3683_v31 = vadd.f32 %v3681_v43, %v3646_v61  ;;  %v3687_v52 = vadd.f32 %v3685_v41, %v3650_v33  ;;  %v9483_v46 = vld [vmem:[#allocation21_spill] sm:$0xff] }
 0x3ba   : > { %v3691_v44 = vadd.f32 %v3689_v0, %v3654_v2  ;;  %v3693_v50 = vmul.f32 %v7027_v27, %v3207_v57  ;;  %v3050_v10 = vadd.f32 %v3049_v40, %v2841_v14  ;;  %v567_v23 = vsub.f32 1.0, %v566_v20 }
 0x3bb   : > { %v2633_v24 = vpop.f32.mrf.mxu0  ;;  %v7497_v21 = vperm.slane %v564_v29, 0  ;;  %v569_v45 = vsub.f32 18.0, %v7407_v18 }
 0x3bc   : > { %v3695_v19 = vadd.f32 %v3693_v50, %v3658_v1  ;;  %v3211_v55 = vadd.f32 %v3210_v4, %v3050_v10  ;;  %v3053_v11 = vpop.f32.mrf.mxu2  ;;  %v2634_v43 = vadd.f32 %v2633_v24, %v9483_v46 }
 0x3bd   : > { %v2846_v42 = vpop.f32.mrf.mxu1  ;;  %v3214_v36 = vpop.f32.mrf.mxu3 }
 0x3be   : > { %v2847_v62 = vadd.f32 %v2846_v42, %v2629_v58  ;;  %v3662_v30 = vmul.f32 %v7474_v47, %v3211_v55  ;;  %v3666_v26 = vmul.f32 %v7452_v51, %v3211_v55  ;;  %v3670_v16 = vmul.f32 %v7429_v17, %v3211_v55 }
 0x3bf   : > { %v3674_v61 = vmul.f32 %v7403_v5, %v3211_v55  ;;  %v3678_v33 = vmul.f32 %v7368_v60, %v3211_v55  ;;  %v3682_v2 = vmul.f32 %v7298_v35, %v3211_v55  ;;  %v3686_v1 = vmul.f32 %v7208_v22, %v3211_v55 }
 0x3c0   : > { %v3690_v37 = vmul.f32 %v7118_v25, %v3211_v55  ;;  %v3664_v54 = vadd.f32 %v3662_v30, %v3627_v32  ;;  %v3668_v57 = vadd.f32 %v3666_v26, %v3631_v12  ;;  %v3672_v63 = vadd.f32 %v3670_v16, %v3635_v6 }
 0x3c1   : > { %v3676_v40 = vadd.f32 %v3674_v61, %v3639_v15  ;;  %v3680_v14 = vadd.f32 %v3678_v33, %v3643_v34  ;;  %v3684_v4 = vadd.f32 %v3682_v2, %v3647_v53  ;;  %v3688_v28 = vadd.f32 %v3686_v1, %v3651_v39  ;;  %v9484_v61 = vld [vmem:[#allocation20_spill] sm:$0xff] }
 0x3c2   : > { %v3692_v20 = vadd.f32 %v3690_v37, %v3655_v59  ;;  %v3694_v3 = vmul.f32 %v7027_v27, %v3211_v55  ;;  %v3054_v49 = vadd.f32 %v3053_v11, %v2847_v62  ;;  %v568_v34 = vmax.f32 %v567_v23, 0.0 }
 0x3c3   : > { %v2638_v41 = vpop.f32.mrf.mxu0  ;;  %v570_v53 = vand.u32 2147483647, %v569_v45 }
 0x3c4   : > { %v3696_v0 = vadd.f32 %v3694_v3, %v3659_v9  ;;  %v3215_v50 = vadd.f32 %v3214_v36, %v3054_v49  ;;  %v3057_v12 = vpop.f32.mrf.mxu2  ;;  %v7529_v37 = vperm.slane %v568_v34, 0 }
 0x3c5   : > { %v2852_v32 = vpop.f32.mrf.mxu1  ;;  %v3218_v15 = vpop.f32.mrf.mxu3 }
 0x3c6   : > { %v2853_v6 = vadd.f32 %v2852_v32, %v2634_v43  ;;  %v3698_v39 = vmul.f32 %v7497_v21, %v3215_v50  ;;  %v3702_v27 = vmul.f32 %v7474_v47, %v3215_v50  ;;  %v3706_v59 = vmul.f32 %v7452_v51, %v3215_v50 }
 0x3c7   : > { %v3710_v10 = vmul.f32 %v7429_v17, %v3215_v50  ;;  %v3714_v7 = vmul.f32 %v7403_v5, %v3215_v50  ;;  %v3718_v58 = vmul.f32 %v7368_v60, %v3215_v50  ;;  %v3722_v9 = vmul.f32 %v7298_v35, %v3215_v50 }
 0x3c8   : > { %v3726_v24 = vmul.f32 %v7208_v22, %v3215_v50  ;;  %v7509_v55 = vadd.f32 %v3698_v39, %v3663_v13  ;;  %v7511_v42 = vadd.f32 %v3702_v27, %v3667_v8  ;;  %v7513_v11 = vadd.f32 %v3706_v59, %v3671_v56  ;;  %v7556_v39 = vld [vmem:[%s6774_s23] sm:$0x1] }
 0x3c9   : > { %v7515_v62 = vadd.f32 %v3710_v10, %v3675_v48  ;;  %v7517_v29 = vadd.f32 %v3714_v7, %v3679_v38  ;;  %v7519_v36 = vadd.f32 %v3718_v58, %v3683_v31  ;;  %v7521_v23 = vadd.f32 %v3722_v9, %v3687_v52 }
 0x3ca   : > { %v7523_v30 = vadd.f32 %v3726_v24, %v3691_v44  ;;  %v3730_v26 = vmul.f32 %v7118_v25, %v3215_v50  ;;  %v3058_v16 = vadd.f32 %v3057_v12, %v2853_v6  ;;  %v2639_v13 = vadd.f32 %v2638_v41, %v9484_v61 }
 0x3cb   : > { %v2643_v33 = vpop.f32.mrf.mxu0  ;;  %v571_v31 = vsub.f32 1.0, %v570_v53  ;;  %v7578_v24 = vadd.f32 1.0, %v7556_v39 }
 0x3cc   : > { %v7527_v8 = vadd.f32 %v3730_v26, %v3695_v19  ;;  %v3219_v56 = vadd.f32 %v3218_v15, %v3058_v16  ;;  %v3061_v48 = vpop.f32.mrf.mxu2 }
 0x3cd   : > { %v2858_v2 = vpop.f32.mrf.mxu1  ;;  %v3222_v38 = vpop.f32.mrf.mxu3  ;;  %v7563_v10 = vmax.f32 %v571_v31, 0.0 }
 0x3ce   : > { %v2859_v1 = vadd.f32 %v2858_v2, %v2639_v13  ;;  %v3699_v52 = vmul.f32 %v7497_v21, %v3219_v56  ;;  %v3703_v44 = vmul.f32 %v7474_v47, %v3219_v56  ;;  %v3707_v3 = vmul.f32 %v7452_v51, %v3219_v56 }
 0x3cf   : > { %v3711_v49 = vmul.f32 %v7429_v17, %v3219_v56  ;;  %v3715_v19 = vmul.f32 %v7403_v5, %v3219_v56  ;;  %v3719_v45 = vmul.f32 %v7368_v60, %v3219_v56  ;;  %v3723_v46 = vmul.f32 %v7298_v35, %v3219_v56 }
 0x3d0   : > { %v3727_v43 = vmul.f32 %v7208_v22, %v3219_v56  ;;  %v7539_v41 = vadd.f32 %v3699_v52, %v3664_v54  ;;  %v7541_v50 = vadd.f32 %v3703_v44, %v3668_v57  ;;  %v7543_v32 = vadd.f32 %v3707_v3, %v3672_v63  ;;  %v9485_v54 = vld [vmem:[#allocation24_spill] sm:$0xff]  ;;  %v7592_v44 = vld [vmem:[%s6774_s23] ss:$0 sm:$0xff] }
 0x3d1   : > { %v7545_v12 = vadd.f32 %v3711_v49, %v3676_v40  ;;  %v7547_v6 = vadd.f32 %v3715_v19, %v3680_v14  ;;  %v7549_v15 = vadd.f32 %v3719_v45, %v3684_v4  ;;  %v7551_v34 = vadd.f32 %v3723_v46, %v3688_v28 }
 0x3d2   : > { %v7553_v53 = vadd.f32 %v3727_v43, %v3692_v20  ;;  %v3731_v27 = vmul.f32 %v7118_v25, %v3219_v56  ;;  %v2644_v59 = vadd.f32 %v2643_v33, %v9485_v54  ;;  %v3062_v57 = vadd.f32 %v3061_v48, %v2859_v1 }
 0x3d3   : > { %v7561_v63 = vadd.f32 -4.0, %v7556_v39  ;;  %v2648_v40 = vpop.f32.mrf.mxu0  ;;  %v7566_v14 = vadd.f32 -3.0, %v7556_v39  ;;  %v7569_v4 = vadd.f32 -2.0, %v7556_v39  ;;  %v7572_v28 = vadd.f32 -1.0, %v7556_v39 }
 0x3d4   : > { %v7574_v20 = vadd.f32 %v3731_v27, %v3696_v0  ;;  %v3223_v25 = vadd.f32 %v3222_v38, %v3062_v57  ;;  %v3065_v58 = vpop.f32.mrf.mxu2 }
 0x3d5   : > { %v2864_v7 = vpop.f32.mrf.mxu1  ;;  %v9196_v9 = vperm.slane %v7561_v63, 0  ;;  %v3226_v16 = vpop.f32.mrf.mxu3  ;;  %v9194_v61 = vperm.slane %v7566_v14, 0  ;;  %v9193_v13 = vperm.slane %v7569_v4, 0  ;;  %v9192_v33 = vperm.slane %v7572_v28, 0 }
 0x3d6   : > { %v2865_v26 = vadd.f32 %v2864_v7, %v2644_v59  ;;  %v3735_v0 = vmul.f32 %v7529_v37, %v3223_v25  ;;  %v3739_v56 = vmul.f32 %v7497_v21, %v3223_v25  ;;  %v3743_v2 = vmul.f32 %v7474_v47, %v3223_v25  ;;  %v9487_v59 = vld [vmem:[#allocation22_spill] sm:$0xff] }
 0x3d7   : > { %v3747_v48 = vmul.f32 %v7452_v51, %v3223_v25  ;;  %v3751_v1 = vmul.f32 %v7429_v17, %v3223_v25  ;;  %v3755_v38 = vmul.f32 %v7403_v5, %v3223_v25  ;;  %v3759_v31 = vmul.f32 %v7368_v60, %v3223_v25 }
 0x3d8   : > { %v3763_v52 = vmul.f32 %v7298_v35, %v3223_v25  ;;  %v7595_v3 = vadd.f32 %v3735_v0, %v7509_v55  ;;  %v7598_v49 = vadd.f32 %v3739_v56, %v7511_v42  ;;  %v7601_v19 = vadd.f32 %v3743_v2, %v7513_v11  ;;  %v9486_v11 = vld [vmem:[#allocation18_spill] sm:$0xff] }
 0x3d9   : > { %v7604_v45 = vadd.f32 %v3747_v48, %v7515_v62  ;;  %v7607_v46 = vadd.f32 %v3751_v1, %v7517_v29  ;;  %v7610_v43 = vadd.f32 %v3755_v38, %v7519_v36  ;;  %v7613_v27 = vadd.f32 %v3759_v31, %v7521_v23 }
 0x3da   : > { %v7616_v55 = vadd.f32 %v3763_v52, %v7523_v30  ;;  %v3767_v42 = vmul.f32 %v7208_v22, %v3223_v25  ;;  %v3066_v54 = vadd.f32 %v3065_v58, %v2865_v26  ;;  %v393_v62 = vsub.f32 %v9486_v11, %v9196_v9 }
 0x3db   : > { %v403_v29 = vsub.f32 %v9486_v11, %v9194_v61  ;;  %v2649_v36 = vadd.f32 %v2648_v40, %v9487_v59  ;;  %v2653_v57 = vpop.f32.mrf.mxu0  ;;  %v413_v23 = vsub.f32 %v9486_v11, %v9193_v13  ;;  %v423_v30 = vsub.f32 %v9486_v11, %v9192_v33 }
 0x3dc   : > { %v433_v25 = vsub.f32 %v9486_v11, %v7592_v44  ;;  %v7635_v7 = vadd.f32 %v3767_v42, %v7527_v8  ;;  %v3227_v58 = vadd.f32 %v3226_v16, %v3066_v54  ;;  %v3069_v0 = vpop.f32.mrf.mxu2  ;;  %v395_v56 = vand.u32 2147483647, %v393_v62 }
 0x3dd   : > { %v2870_v26 = vpop.f32.mrf.mxu1  ;;  %v9195_v40 = vperm.slane %v7578_v24, 0  ;;  %v3230_v48 = vpop.f32.mrf.mxu3  ;;  %v405_v1 = vand.u32 2147483647, %v403_v29  ;;  %v415_v38 = vand.u32 2147483647, %v413_v23 }
 0x3de   : > { %v2871_v2 = vadd.f32 %v2870_v26, %v2649_v36  ;;  %v425_v31 = vand.u32 2147483647, %v423_v30  ;;  %v3736_v52 = vmul.f32 %v7529_v37, %v3227_v58  ;;  %v3740_v59 = vmul.f32 %v7497_v21, %v3227_v58 }
 0x3df   : > { %v3744_v33 = vmul.f32 %v7474_v47, %v3227_v58  ;;  %v3748_v8 = vmul.f32 %v7452_v51, %v3227_v58  ;;  %v3752_v16 = vmul.f32 %v7429_v17, %v3227_v58  ;;  %v3756_v42 = vmul.f32 %v7403_v5, %v3227_v58 }
 0x3e0   : > { %v3760_v54 = vmul.f32 %v7368_v60, %v3227_v58  ;;  %v3764_v62 = vmul.f32 %v7298_v35, %v3227_v58  ;;  %v7647_v29 = vadd.f32 %v3736_v52, %v7539_v41  ;;  %v7650_v36 = vadd.f32 %v3740_v59, %v7541_v50 }
 0x3e1   : > { %v7653_v23 = vadd.f32 %v3744_v33, %v7543_v32  ;;  %v7656_v30 = vadd.f32 %v3748_v8, %v7545_v12  ;;  %v7659_v26 = vadd.f32 %v3752_v16, %v7547_v6  ;;  %v7662_v13 = vadd.f32 %v3756_v42, %v7549_v15  ;;  %v9488_v33 = vld [vmem:[#allocation49_spill] sm:$0xff] }
 0x3e2   : > { %v7665_v61 = vadd.f32 %v3760_v54, %v7551_v34  ;;  %v7668_v41 = vadd.f32 %v3764_v62, %v7553_v53  ;;  %v3768_v50 = vmul.f32 %v7208_v22, %v3227_v58  ;;  %v3070_v52 = vadd.f32 %v3069_v0, %v2871_v2  ;;  %v9489_v62 = vld [vmem:[#allocation25_spill] sm:$0xff] }
 0x3e3   : > { %v7672_v32 = vperm.slane %v7563_v10, 0  ;;  %v397_v12 = vsub.f32 1.0, %v395_v56  ;;  %v2654_v59 = vadd.f32 %v2653_v57, %v9488_v33  ;;  %v2658_v6 = vpop.f32.mrf.mxu0  ;;  %v407_v8 = vsub.f32 1.0, %v405_v1 }
 0x3e4   : > { %v417_v16 = vsub.f32 1.0, %v415_v38  ;;  %v7676_v15 = vadd.f32 %v3768_v50, %v7574_v20  ;;  %v3231_v34 = vadd.f32 %v3230_v48, %v3070_v52  ;;  %v427_v54 = vsub.f32 1.0, %v425_v31  ;;  %v3073_v0 = vpop.f32.mrf.mxu2 }
 0x3e5   : > { %v2876_v42 = vpop.f32.mrf.mxu1  ;;  %v7678_v53 = vand.u32 2147483647, %v433_v25  ;;  %v2659_v22 = vadd.f32 %v2658_v6, %v9489_v62  ;;  %v7681_v10 = vmax.f32 %v397_v12, 0.0  ;;  %v443_v57 = vsub.f32 %v9486_v11, %v9195_v40  ;;  %v3234_v50 = vpop.f32.mrf.mxu3 }
 0x3e6   : > { %v2877_v58 = vadd.f32 %v2876_v42, %v2654_v59  ;;  %v3772_v56 = vmul.f32 %v7672_v32, %v3231_v34  ;;  %v3776_v20 = vmul.f32 %v7529_v37, %v3231_v34  ;;  %v3780_v2 = vmul.f32 %v7497_v21, %v3231_v34 }
 0x3e7   : > { %v3784_v48 = vmul.f32 %v7474_v47, %v3231_v34  ;;  %v3788_v25 = vmul.f32 %v7452_v51, %v3231_v34  ;;  %v3792_v1 = vmul.f32 %v7429_v17, %v3231_v34  ;;  %v3796_v38 = vmul.f32 %v7403_v5, %v3231_v34 }
 0x3e8   : > { %v3800_v31 = vmul.f32 %v7368_v60, %v3231_v34  ;;  %v7695_v52 = vadd.f32 %v3772_v56, %v7595_v3  ;;  %v7698_v12 = vadd.f32 %v3776_v20, %v7598_v49  ;;  %v7701_v33 = vadd.f32 %v3780_v2, %v7601_v19 }
 0x3e9   : > { %v7704_v59 = vadd.f32 %v3784_v48, %v7604_v45  ;;  %v7707_v6 = vadd.f32 %v3788_v25, %v7607_v46  ;;  %v7710_v42 = vadd.f32 %v3792_v1, %v7610_v43  ;;  %v7713_v62 = vadd.f32 %v3796_v38, %v7613_v27 }
 0x3ea   : > { %v7716_v3 = vadd.f32 %v3800_v31, %v7616_v55  ;;  %v3804_v49 = vmul.f32 %v7298_v35, %v3231_v34  ;;  %v3074_v56 = vadd.f32 %v3073_v0, %v2877_v58  ;;  %v7719_v19 = vmax.f32 %v407_v8, 0.0 }
 0x3eb   : > { %v445_v20 = vand.u32 2147483647, %v443_v57  ;;  %v7721_v45 = vmax.f32 %v417_v16, 0.0  ;;  %v437_v46 = vsub.f32 1.0, %v7678_v53  ;;  %v7725_v2 = vadd.f32 2.0, %v7556_v39 }
 0x3ec   : > { %v7728_v43 = vadd.f32 3.0, %v7556_v39  ;;  %v7731_v27 = vadd.f32 %v3804_v49, %v7635_v7  ;;  %v3235_v55 = vadd.f32 %v3234_v50, %v3074_v56  ;;  %v7734_v34 = vadd.f32 4.0, %v7556_v39  ;;  %v3077_v31 = vpop.f32.mrf.mxu2 }
 0x3ed   : > { %v2882_v48 = vpop.f32.mrf.mxu1  ;;  %v573_v8 = vsub.f32 19.0, %v7407_v18  ;;  %v447_v58 = vsub.f32 1.0, %v445_v20  ;;  %v9199_v53 = vperm.slane %v7725_v2, 0 }
 0x3ee   : > { %v2883_v16 = vadd.f32 %v2882_v48, %v2659_v22  ;;  %v3773_v57 = vmul.f32 %v7672_v32, %v3235_v55  ;;  %v3777_v25 = vmul.f32 %v7529_v37, %v3235_v55  ;;  %v3781_v7 = vmul.f32 %v7497_v21, %v3235_v55  ;;  %v2663_v48 = vpop.f32.mrf.mxu0 }
 0x3ef   : > { %v3785_v1 = vmul.f32 %v7474_v47, %v3235_v55  ;;  %v3789_v38 = vmul.f32 %v7452_v51, %v3235_v55  ;;  %v3793_v39 = vmul.f32 %v7429_v17, %v3235_v55  ;;  %v3797_v18 = vmul.f32 %v7403_v5, %v3235_v55 }
 0x3f0   : > { %v3801_v22 = vmul.f32 %v7368_v60, %v3235_v55  ;;  %v7748_v50 = vadd.f32 %v3773_v57, %v7647_v29  ;;  %v7751_v49 = vadd.f32 %v3777_v25, %v7650_v36  ;;  %v7754_v56 = vadd.f32 %v3781_v7, %v7653_v23  ;;  %v3238_v36 = vpop.f32.mrf.mxu3 }
 0x3f1   : > { %v7757_v20 = vadd.f32 %v3785_v1, %v7656_v30  ;;  %v7760_v40 = vadd.f32 %v3789_v38, %v7659_v26  ;;  %v7763_v9 = vadd.f32 %v3793_v39, %v7662_v13  ;;  %v7766_v0 = vadd.f32 %v3797_v18, %v7665_v61  ;;  %v9490_v26 = vld [vmem:[#allocation23_spill] sm:$0xff] }
 0x3f2   : > { %v7769_v29 = vadd.f32 %v3801_v22, %v7668_v41  ;;  %v3805_v23 = vmul.f32 %v7298_v35, %v3235_v55  ;;  %v3078_v57 = vadd.f32 %v3077_v31, %v2883_v16  ;;  %v7772_v25 = vmax.f32 %v427_v54, 0.0 }
 0x3f3   : > { %v453_v30 = vsub.f32 %v9486_v11, %v9199_v53  ;;  %v2664_v7 = vadd.f32 %v2663_v48, %v9490_v26  ;;  %v9491_v13 = vperm.slane %v7728_v43, 0  ;;  %v9198_v1 = vperm.slane %v7734_v34, 0 }
 0x3f4   : > { %v574_v41 = vand.u32 2147483647, %v573_v8  ;;  %v7783_v38 = vadd.f32 %v3805_v23, %v7676_v15  ;;  %v7785_v35 = vmax.f32 %v437_v46, 0.0  ;;  %v3239_v55 = vadd.f32 %v3238_v36, %v3078_v57 }
 0x3f5   : > { %v463_v61 = vsub.f32 %v9486_v11, %v9491_v13  ;;  %v455_v54 = vand.u32 2147483647, %v453_v30  ;;  %v7787_v16 = vmax.f32 %v447_v58, 0.0  ;;  %v473_v18 = vsub.f32 %v9486_v11, %v9198_v1  ;;  %v2888_v30 = vpop.f32.mrf.mxu1 }
 0x3f6   : > { %v575_v22 = vsub.f32 1.0, %v574_v41  ;;  %v3813_v48 = vmul.f32 %v7672_v32, %v3239_v55  ;;  %v3817_v8 = vmul.f32 %v7529_v37, %v3239_v55  ;;  %v3821_v15 = vmul.f32 %v7497_v21, %v3239_v55 }
 0x3f7   : > { %v465_v39 = vand.u32 2147483647, %v463_v61  ;;  %v457_v31 = vsub.f32 1.0, %v455_v54  ;;  %v475_v46 = vand.u32 2147483647, %v473_v18  ;;  %v3825_v58 = vmul.f32 %v7474_v47, %v3239_v55  ;;  %v9493_v61 = vld [vmem:[#allocation19_spill] sm:$0xff] }
 0x3f8   : > { %v7795_v26 = vmax.f32 %v575_v22, 0.0  ;;  %v7799_v36 = vadd.f32 %v3813_v48, %v7698_v12  ;;  %v7802_v57 = vadd.f32 %v3817_v8, %v7701_v33  ;;  %v7805_v11 = vadd.f32 %v3821_v15, %v7704_v59 }
 0x3f9   : > { %v467_v23 = vsub.f32 1.0, %v465_v39  ;;  %v9492_v13 = vperm.slane %v7561_v63, 0  ;;  %v477_v54 = vsub.f32 1.0, %v475_v46  ;;  %v7814_v18 = vadd.f32 %v3825_v58, %v7707_v6 }
 0x3fa   : > { %v9197_v39 = vperm.slane %v7795_v26, 0  ;;  %v9494_v12 = vperm.slane %v7566_v14, 0  ;;  %v3829_v59 = vmul.f32 %v7452_v51, %v3239_v55  ;;  %v3833_v22 = vmul.f32 %v7429_v17, %v3239_v55 }
 0x3fb   : > { %v7810_v41 = vsub.f32 %v9493_v61, %v9492_v13  ;;  %v3837_v63 = vmul.f32 %v7403_v5, %v3239_v55  ;;  %v3841_v48 = vmul.f32 %v7368_v60, %v3239_v55  ;;  %v7825_v8 = vmax.f32 %v457_v31, 0.0 }
 0x3fc   : > { %v7819_v33 = vsub.f32 %v9493_v61, %v9494_v12  ;;  %v7827_v15 = vmax.f32 %v467_v23, 0.0  ;;  %v3809_v6 = vmul.f32 %v9197_v39, %v3239_v55  ;;  %v7831_v46 = vadd.f32 %v2888_v30, %v2664_v7 }
 0x3fd   : > { %v7834_v14 = vadd.f32 %v3829_v59, %v7710_v42  ;;  %v7837_v58 = vadd.f32 %v3833_v22, %v7713_v62  ;;  %v7840_v13 = vadd.f32 %v3837_v63, %v7716_v3  ;;  %v7843_v12 = vadd.f32 %v3841_v48, %v7731_v27 }
 0x3fe   : > { %v7845_v31 = vmax.f32 %v477_v54, 0.0  ;;  %v7848_v23 = vadd.f32 %v3809_v6, %v7695_v52  ;;  %v7852_v7 = vmul.f32 %v7799_v36, %v7681_v10  ;;  %v7856_v42 = vmul.f32 %v7802_v57, %v7681_v10 }
 0x3ff   : > { %v7860_v62 = vmul.f32 %v7805_v11, %v7681_v10  ;;  %v7864_v3 = vmul.f32 %v7814_v18, %v7681_v10  ;;  %v7868_v52 = vmul.f32 %v7834_v14, %v7681_v10  ;;  %v7872_v27 = vmul.f32 %v7799_v36, %v7719_v19 }
 0x400   : > { %v7876_v55 = vmul.f32 %v7848_v23, %v7681_v10  ;;  %v7880_v30 = vmul.f32 %v7837_v58, %v7681_v10  ;;  %v7884_v54 = vmul.f32 %v7840_v13, %v7681_v10  ;;  %v7888_v59 = vmul.f32 %v7843_v12, %v7681_v10 }
 0x401   : > { %v7892_v22 = vmul.f32 %v7848_v23, %v7719_v19  ;;  %v7896_v63 = vmul.f32 %v7802_v57, %v7719_v19  ;;  %v7900_v48 = vmul.f32 %v7805_v11, %v7719_v19  ;;  %v7904_v6 = vmul.f32 %v7814_v18, %v7719_v19 }
 0x402   : > { %v7908_v10 = vmul.f32 %v7834_v14, %v7719_v19  ;;  %v7912_v39 = vmul.f32 %v7837_v58, %v7719_v19  ;;  %v7916_v1 = vmul.f32 %v7840_v13, %v7719_v19  ;;  %v7920_v53 = vmul.f32 %v7843_v12, %v7719_v19 }
 0x403   : > { %9495 = vst [vmem:[#allocation50_spill] sm:$0xff] %v7900_v48  ;;  %v7924_v48 = vmul.f32 %v7848_v23, %v7721_v45  ;;  %v7940_v19 = vmul.f32 %v7814_v18, %v7721_v45 }
 0x404   : > { %9496 = vst [vmem:[#allocation26_spill] sm:$0xff] %v7904_v6  ;;  %v7928_v6 = vmul.f32 %v7799_v36, %v7721_v45 }
 0x405   : > { %9497 = vst [vmem:[#allocation52_spill] sm:$0xff] %v7908_v10  ;;  %v7932_v10 = vmul.f32 %v7802_v57, %v7721_v45 }
 0x406   : > { %9498 = vst [vmem:[#allocation51_spill] sm:$0xff] %v7912_v39  ;;  %v7936_v39 = vmul.f32 %v7805_v11, %v7721_v45 }
 0x407   : > { %9499 = vst [vmem:[#allocation27_spill] sm:$0xff] %v7920_v53  ;;  %v7944_v53 = vmul.f32 %v7834_v14, %v7721_v45 }
 0x408   : > { %9500 = vst [vmem:[#allocation54_spill] sm:$0xff] %v7924_v48  ;;  %v7948_v48 = vmul.f32 %v7837_v58, %v7721_v45 }
 0x409   : > { %9501 = vst [vmem:[#allocation53_spill] sm:$0xff] %v7928_v6  ;;  %v7952_v6 = vmul.f32 %v7840_v13, %v7721_v45 }
 0x40a   : > { %9502 = vst [vmem:[#allocation28_spill] sm:$0xff] %v7932_v10  ;;  %v7956_v10 = vmul.f32 %v7843_v12, %v7721_v45  ;;  %v7976_v45 = vmul.f32 %v7814_v18, %v7772_v25 }
 0x40b   : > { %9503 = vst [vmem:[#allocation56_spill] sm:$0xff] %v7936_v39  ;;  %v7960_v39 = vmul.f32 %v7848_v23, %v7772_v25 }
 0x40c   : > { %9504 = vst [vmem:[#allocation55_spill] sm:$0xff] %v7940_v19  ;;  %v7964_v19 = vmul.f32 %v7799_v36, %v7772_v25 }
 0x40d   : > { %9505 = vst [vmem:[#allocation29_spill] sm:$0xff] %v7944_v53  ;;  %v7968_v53 = vmul.f32 %v7802_v57, %v7772_v25 }
 0x40e   : > { %9506 = vst [vmem:[#allocation58_spill] sm:$0xff] %v7948_v48  ;;  %v7972_v48 = vmul.f32 %v7805_v11, %v7772_v25 }
 0x40f   : > { %9507 = vst [vmem:[#allocation57_spill] sm:$0xff] %v7956_v10  ;;  %v7980_v10 = vmul.f32 %v7834_v14, %v7772_v25 }
 0x410   : > { %9508 = vst [vmem:[#allocation30_spill] sm:$0xff] %v7960_v39  ;;  %v7984_v39 = vmul.f32 %v7837_v58, %v7772_v25 }
 0x411   : > { %9509 = vst [vmem:[#allocation60_spill] sm:$0xff] %v7964_v19  ;;  %v7988_v19 = vmul.f32 %v7840_v13, %v7772_v25 }
 0x412   : > { %9510 = vst [vmem:[#allocation59_spill] sm:$0xff] %v7968_v53  ;;  %v7992_v53 = vmul.f32 %v7843_v12, %v7772_v25  ;;  %v8012_v25 = vmul.f32 %v7814_v18, %v7785_v35 }
 0x413   : > { %9511 = vst [vmem:[#allocation31_spill] sm:$0xff] %v7972_v48  ;;  %v7996_v48 = vmul.f32 %v7848_v23, %v7785_v35 }
 0x414   : > { %9512 = vst [vmem:[#allocation62_spill] sm:$0xff] %v7976_v45  ;;  %v8000_v45 = vmul.f32 %v7799_v36, %v7785_v35 }
 0x415   : > { %9513 = vst [vmem:[#allocation61_spill] sm:$0xff] %v7980_v10  ;;  %v8004_v10 = vmul.f32 %v7802_v57, %v7785_v35 }
 0x416   : > { %9514 = vst [vmem:[#allocation32_spill] sm:$0xff] %v7984_v39  ;;  %v8008_v39 = vmul.f32 %v7805_v11, %v7785_v35 }
 0x417   : > { %9515 = vst [vmem:[#allocation63_spill] sm:$0xff] %v7992_v53  ;;  %v8016_v53 = vmul.f32 %v7834_v14, %v7785_v35 }
 0x418   : > { %9516 = vst [vmem:[#allocation34_spill] sm:$0xff] %v7996_v48  ;;  %v8020_v48 = vmul.f32 %v7837_v58, %v7785_v35 }
 0x419   : > { %9517 = vst [vmem:[#allocation33_spill] sm:$0xff] %v8000_v45  ;;  %v8024_v45 = vmul.f32 %v7840_v13, %v7785_v35 }
 0x41a   : > { %9518 = vst [vmem:[#allocation36_spill] sm:$0xff] %v8004_v10  ;;  %v8028_v10 = vmul.f32 %v7843_v12, %v7785_v35  ;;  %v8048_v35 = vmul.f32 %v7814_v18, %v7787_v16 }
 0x41b   : > { %9519 = vst [vmem:[#allocation64_spill] sm:$0xff] %v8008_v39  ;;  %v8032_v39 = vmul.f32 %v7848_v23, %v7787_v16 }
 0x41c   : > { %9520 = vst [vmem:[#allocation35_spill] sm:$0xff] %v8012_v25  ;;  %v8036_v25 = vmul.f32 %v7799_v36, %v7787_v16 }
 0x41d   : > { %9521 = vst [vmem:[#allocation65_spill] sm:$0xff] %v8016_v53  ;;  %v8040_v53 = vmul.f32 %v7802_v57, %v7787_v16 }
 0x41e   : > { %9522 = vst [vmem:[#allocation38_spill] sm:$0xff] %v8020_v48  ;;  %v8044_v48 = vmul.f32 %v7805_v11, %v7787_v16 }
 0x41f   : > { %9523 = vst [vmem:[#allocation37_spill] sm:$0xff] %v8028_v10  ;;  %v8052_v10 = vmul.f32 %v7834_v14, %v7787_v16 }
 0x420   : > { %9524 = vst [vmem:[#allocation66_spill] sm:$0xff] %v8032_v39  ;;  %v8056_v39 = vmul.f32 %v7837_v58, %v7787_v16 }
 0x421   : > { %9525 = vst [vmem:[#allocation39_spill] sm:$0xff] %v8036_v25  ;;  %v8060_v25 = vmul.f32 %v7840_v13, %v7787_v16 }
 0x422   : > { %9526 = vst [vmem:[#allocation40_spill] sm:$0xff] %v8040_v53  ;;  %v8064_v53 = vmul.f32 %v7843_v12, %v7787_v16  ;;  %v8084_v16 = vmul.f32 %v7814_v18, %v7825_v8 }
 0x423   : > { %9527 = vst [vmem:[#allocation67_spill] sm:$0xff] %v8044_v48  ;;  %v8068_v48 = vmul.f32 %v7848_v23, %v7825_v8 }
 0x424   : > { %9528 = vst [vmem:[#allocation41_spill] sm:$0xff] %v8048_v35  ;;  %v8072_v35 = vmul.f32 %v7799_v36, %v7825_v8 }
 0x425   : > { %9529 = vst [vmem:[#allocation42_spill] sm:$0xff] %v8052_v10  ;;  %v8076_v10 = vmul.f32 %v7802_v57, %v7825_v8 }
 0x426   : > { %9530 = vst [vmem:[#allocation68_spill] sm:$0xff] %v8056_v39  ;;  %v8080_v39 = vmul.f32 %v7805_v11, %v7825_v8 }
 0x427   : > { %9531 = vst [vmem:[#allocation43_spill] sm:$0xff] %v8064_v53  ;;  %v8088_v53 = vmul.f32 %v7834_v14, %v7825_v8 }
 0x428   : > { %9532 = vst [vmem:[#allocation45_spill] sm:$0xff] %v8068_v48  ;;  %v8092_v48 = vmul.f32 %v7837_v58, %v7825_v8 }
 0x429   : > { %9533 = vst [vmem:[#allocation69_spill] sm:$0xff] %v8072_v35  ;;  %v8096_v35 = vmul.f32 %v7840_v13, %v7825_v8 }
 0x42a   : > { %9534 = vst [vmem:[#allocation46_spill] sm:$0xff] %v8076_v10  ;;  %v8100_v10 = vmul.f32 %v7843_v12, %v7825_v8  ;;  %v8120_v8 = vmul.f32 %v7814_v18, %v7827_v15 }
 0x42b   : > { %9535 = vst [vmem:[#allocation47_spill] sm:$0xff] %v8080_v39  ;;  %v8104_v39 = vmul.f32 %v7848_v23, %v7827_v15 }
 0x42c   : > { %9536 = vst [vmem:[#allocation44_spill] sm:$0xff] %v8084_v16  ;;  %v8108_v16 = vmul.f32 %v7799_v36, %v7827_v15 }
 0x42d   : > { %9537 = vst [vmem:[#allocation75_spill] sm:$0xff] %v8088_v53  ;;  %v8112_v53 = vmul.f32 %v7802_v57, %v7827_v15 }
 0x42e   : > { %9538 = vst [vmem:[#allocation70_spill] sm:$0xff] %v8092_v48  ;;  %v8116_v48 = vmul.f32 %v7805_v11, %v7827_v15 }
 0x42f   : > { %9539 = vst [vmem:[#allocation48_spill] sm:$0xff] %v8096_v35  ;;  %v8152_v35 = vmul.f32 %v7805_v11, %v7845_v31  ;;  %v9557_v11 = vperm.slane %v7572_v28, 0 }
 0x430   : > { %9540 = vst [vmem:[#allocation76_spill] sm:$0xff] %v8100_v10  ;;  %v8124_v10 = vmul.f32 %v7834_v14, %v7827_v15 }
 0x431   : > { %9541 = vst [vmem:[#allocation72_spill] sm:$0xff] %v8104_v39  ;;  %v8128_v39 = vmul.f32 %v7837_v58, %v7827_v15 }
 0x432   : > { %9542 = vst [vmem:[#allocation71_spill] sm:$0xff] %v8108_v16  ;;  %v3081_v16 = vpop.f32.mrf.mxu2 }
 0x433   : > { %9543 = vst [vmem:[#allocation77_spill] sm:$0xff] %v8112_v53  ;;  %v8132_v53 = vmul.f32 %v7840_v13, %v7827_v15 }
 0x434   : > { %9544 = vst [vmem:[#allocation74_spill] sm:$0xff] %v8116_v48  ;;  %v8136_v48 = vmul.f32 %v7843_v12, %v7827_v15  ;;  %v8156_v15 = vmul.f32 %v7814_v18, %v7845_v31  ;;  %v434_v18 = vsub.f32 %v9493_v61, %v7592_v44  ;;  %v9561_v44 = vperm.slane %v7734_v34, 0 }
 0x435   : > { %9545 = vst [vmem:[#allocation73_spill] sm:$0xff] %v8120_v8  ;;  %v8140_v8 = vmul.f32 %v7848_v23, %v7845_v31  ;;  %v8160_v23 = vmul.f32 %v7834_v14, %v7845_v31  ;;  %v9558_v14 = vperm.slane %v7578_v24, 0  ;;  %v8195_v34 = vmul.f32 %v7843_v12, %v7845_v31 }
 0x436   : > { %9546 = vst [vmem:[#allocation78_spill] sm:$0xff] %v8124_v10  ;;  %v8144_v10 = vmul.f32 %v7799_v36, %v7845_v31  ;;  %v396_v36 = vand.u32 2147483647, %v7810_v41  ;;  %v474_v24 = vsub.f32 %v9493_v61, %v9561_v44 }
 0x437   : > { %9547 = vst [vmem:[#allocation79_spill] sm:$0xff] %v8128_v39  ;;  %v8148_v39 = vmul.f32 %v7802_v57, %v7845_v31  ;;  %v9556_v57 = vperm.slane %v7569_v4, 0 }
 0x438   : > { %9548 = vst [vmem:[#allocation80_spill] sm:$0xff] %v8132_v53  ;;  %v3242_v53 = vpop.f32.mrf.mxu3 }
 0x439   : > { %9549 = vst [vmem:[#allocation81_spill] sm:$0xff] %v8136_v48 }
 0x43a   : > { %9550 = vst [vmem:[#allocation82_spill] sm:$0xff] %v8140_v8  ;;  %v3082_v8 = vadd.f32 %v3081_v16, %v7831_v46  ;;  %v9559_v46 = vperm.slane %v7725_v2, 0  ;;  %v8187_v2 = vmul.f32 %v7837_v58, %v7845_v31 }
 0x43b   : > { %9551 = vst [vmem:[#allocation83_spill] sm:$0xff] %v8144_v10  ;;  %v406_v10 = vand.u32 2147483647, %v7819_v33  ;;  %v398_v33 = vsub.f32 1.0, %v396_v36 }
 0x43c   : > { %9552 = vst [vmem:[#allocation84_spill] sm:$0xff] %v8148_v39  ;;  %v414_v39 = vsub.f32 %v9493_v61, %v9556_v57  ;;  %v454_v41 = vsub.f32 %v9493_v61, %v9559_v46  ;;  %v9560_v57 = vperm.slane %v7728_v43, 0  ;;  %v3243_v46 = vadd.f32 %v3242_v53, %v3082_v8 }
 0x43d   : > { %9553 = vst [vmem:[#allocation85_spill] sm:$0xff] %v8152_v35  ;;  %v424_v35 = vsub.f32 %v9493_v61, %v9557_v11  ;;  %v408_v16 = vsub.f32 1.0, %v406_v10  ;;  %v436_v11 = vand.u32 2147483647, %v434_v18  ;;  %v8191_v10 = vmul.f32 %v7840_v13, %v7845_v31 }
 0x43e   : > { %9554 = vst [vmem:[#allocation86_spill] sm:$0xff] %v8156_v15  ;;  %v416_v4 = vand.u32 2147483647, %v414_v39  ;;  %v464_v28 = vsub.f32 %v9493_v61, %v9560_v57  ;;  %v456_v43 = vand.u32 2147483647, %v454_v41  ;;  %v9562_v41 = vperm.slane %v7795_v26, 0 }
 0x43f   : > { %9555 = vst [vmem:[#allocation21_spill] sm:$0xff] %v8160_v23  ;;  %v444_v23 = vsub.f32 %v9493_v61, %v9558_v14  ;;  %v426_v15 = vand.u32 2147483647, %v424_v35  ;;  %v438_v14 = vsub.f32 1.0, %v436_v11  ;;  %v8197_v61 = vmax.f32 %v398_v33, 0.0 }
 0x440   : > { %v418_v39 = vsub.f32 1.0, %v416_v4  ;;  %v466_v18 = vand.u32 2147483647, %v464_v28  ;;  %v8199_v58 = vmax.f32 %v408_v16, 0.0  ;;  %v8205_v4 = vsub.f32 1.0, %v456_v43 }
 0x441   : > { %v446_v48 = vand.u32 2147483647, %v444_v23  ;;  %v428_v36 = vsub.f32 1.0, %v426_v15  ;;  %v476_v23 = vand.u32 2147483647, %v474_v24  ;;  %v8207_v15 = vmax.f32 %v438_v14, 0.0 }
 0x442   : > { %v8201_v57 = vmax.f32 %v418_v39, 0.0  ;;  %v3810_v12 = vmul.f32 %v9562_v41, %v3243_v46  ;;  %v3814_v31 = vmul.f32 %v7672_v32, %v3243_v46  ;;  %v8214_v33 = vsub.f32 1.0, %v466_v18 }
 0x443   : > { %v448_v35 = vsub.f32 1.0, %v446_v48  ;;  %v8203_v13 = vmax.f32 %v428_v36, 0.0  ;;  %v3818_v53 = vmul.f32 %v7529_v37, %v3243_v46  ;;  %v3822_v8 = vmul.f32 %v7497_v21, %v3243_v46 }
 0x444   : > { %v3826_v16 = vmul.f32 %v7474_v47, %v3243_v46  ;;  %v8219_v28 = vsub.f32 1.0, %v476_v23  ;;  %v8222_v11 = vadd.f32 %v3810_v12, %v7748_v50  ;;  %v8225_v44 = vadd.f32 %v3814_v31, %v7751_v49 }
 0x445   : > { %v8209_v48 = vmax.f32 %v448_v35, 0.0  ;;  %v3830_v26 = vmul.f32 %v7452_v51, %v3243_v46  ;;  %v8229_v32 = vadd.f32 %v3818_v53, %v7754_v56  ;;  %v8232_v24 = vadd.f32 %v3822_v8, %v7757_v20 }
 0x446   : > { %v8235_v21 = vadd.f32 %v3826_v16, %v7760_v40  ;;  %v3834_v47 = vmul.f32 %v7429_v17, %v3243_v46  ;;  %v3838_v50 = vmul.f32 %v7403_v5, %v3243_v46  ;;  %v3842_v49 = vmul.f32 %v7368_v60, %v3243_v46 }
 0x447   : > { %v8239_v37 = vadd.f32 %v3830_v26, %v7763_v9  ;;  %v3846_v51 = vmul.f32 %v8222_v11, %v8197_v61  ;;  %v3855_v20 = vmul.f32 %v8225_v44, %v8197_v61  ;;  %v3864_v40 = vmul.f32 %v8229_v32, %v8197_v61 }
 0x448   : > { %v8246_v56 = vadd.f32 %v3834_v47, %v7766_v0  ;;  %v3873_v17 = vmul.f32 %v8232_v24, %v8197_v61  ;;  %v8255_v9 = vadd.f32 %v3838_v50, %v7769_v29  ;;  %v8258_v60 = vadd.f32 %v3842_v49, %v7783_v38 }
 0x449   : > { %v3847_v5 = vadd.f32 %v3846_v51, %v7876_v55  ;;  %v3882_v0 = vmul.f32 %v8235_v21, %v8197_v61  ;;  %v3856_v39 = vadd.f32 %v3855_v20, %v7852_v7  ;;  %v3865_v43 = vadd.f32 %v3864_v40, %v7856_v42 }
 0x44a   : > { %v3874_v36 = vadd.f32 %v3873_v17, %v7860_v62  ;;  %v3891_v14 = vmul.f32 %v8239_v37, %v8197_v61  ;;  %v3900_v38 = vmul.f32 %v8246_v56, %v8197_v61  ;;  %v3909_v55 = vmul.f32 %v8255_v9, %v8197_v61 }
 0x44b   : > { %v3848_v35 = vrot.slane %v3847_v5, 4  ;;  %v3883_v29 = vadd.f32 %v3882_v0, %v7864_v3  ;;  %v3857_v18 = vrot.slane %v3856_v39, 4  ;;  %v3866_v23 = vrot.slane %v3865_v43, 4 }
 0x44c   : > { %v3875_v46 = vrot.slane %v3874_v36, 4  ;;  %v3892_v7 = vadd.f32 %v3891_v14, %v7868_v52  ;;  %v3901_v62 = vadd.f32 %v3900_v38, %v7880_v30  ;;  %v3910_v12 = vadd.f32 %v3909_v55, %v7884_v54 }
 0x44d   : > { %v3849_v42 = vadd.f32 %v3848_v35, %v3847_v5  ;;  %v3884_v41 = vrot.slane %v3883_v29, 4  ;;  %v3858_v31 = vadd.f32 %v3857_v18, %v3856_v39  ;;  %v3867_v53 = vadd.f32 %v3866_v23, %v3865_v43 }
 0x44e   : > { %v3876_v3 = vadd.f32 %v3875_v46, %v3874_v36  ;;  %v3893_v8 = vrot.slane %v3892_v7, 4  ;;  %v3902_v47 = vrot.slane %v3901_v62, 4  ;;  %v3911_v50 = vrot.slane %v3910_v12, 4 }
 0x44f   : > { %v3850_v16 = vrot.slane %v3849_v42, 2  ;;  %v3885_v26 = vadd.f32 %v3884_v41, %v3883_v29  ;;  %v3859_v49 = vrot.slane %v3858_v31, 2  ;;  %v3868_v51 = vrot.slane %v3867_v53, 2 }
 0x450   : > { %v3877_v20 = vrot.slane %v3876_v3, 2  ;;  %v3894_v40 = vadd.f32 %v3893_v8, %v3892_v7  ;;  %v3903_v5 = vadd.f32 %v3902_v47, %v3901_v62  ;;  %v3912_v0 = vadd.f32 %v3911_v50, %v3910_v12 }
 0x451   : > { %v3851_v17 = vadd.f32 %v3850_v16, %v3849_v42  ;;  %v3886_v52 = vrot.slane %v3885_v26, 2  ;;  %v3860_v14 = vadd.f32 %v3859_v49, %v3858_v31  ;;  %v3869_v30 = vadd.f32 %v3868_v51, %v3867_v53 }
 0x452   : > { %v3878_v35 = vadd.f32 %v3877_v20, %v3876_v3  ;;  %v3895_v54 = vrot.slane %v3894_v40, 2  ;;  %v3904_v36 = vrot.slane %v3903_v5, 2  ;;  %v3913_v38 = vrot.slane %v3912_v0, 2 }
 0x453   : > { %v3852_v39 = vrot.slane %v3851_v17, 1  ;;  %v3887_v43 = vadd.f32 %v3886_v52, %v3885_v26  ;;  %v3861_v55 = vrot.slane %v3860_v14, 1  ;;  %v3870_v29 = vrot.slane %v3869_v30, 1 }
 0x454   : > { %v3879_v18 = vrot.slane %v3878_v35, 1  ;;  %v8276_v23 = vadd.f32 %v3895_v54, %v3894_v40  ;;  %v8279_v46 = vmax.f32 %v8205_v4, 0.0  ;;  %v8281_v42 = vadd.f32 %v3904_v36, %v3903_v5 }
 0x455   : > { %v3888_v7 = vrot.slane %v3887_v43, 1  ;;  %v8283_v41 = vadd.f32 %v3913_v38, %v3912_v0  ;;  %v8286_v62 = vmax.f32 %v8214_v33, 0.0  ;;  %v8289_v12 = vmax.f32 %v8219_v28, 0.0  ;;  %v9568_v0 = vld [vmem:[#allocation50_spill] sm:$0xff] }
 0x456   : > { %v8291_v31 = vadd.f32 %v3852_v39, %v3851_v17  ;;  %v8293_v53 = vadd.f32 %v3861_v55, %v3860_v14  ;;  %v8295_v3 = vadd.f32 %v3870_v29, %v3869_v30  ;;  %v8297_v8 = vadd.f32 %v3879_v18, %v3878_v35  ;;  %v9571_v55 = vld [vmem:[#allocation51_spill] sm:$0xff] }
 0x457   : > { %v3897_v4 = vrot.slane %v8276_v23, 1  ;;  %v3918_v16 = vmul.f32 %v8258_v60, %v8197_v61  ;;  %v8302_v26 = vadd.f32 %v3888_v7, %v3887_v43  ;;  %v3927_v33 = vmul.f32 %v8222_v11, %v8199_v58 }
 0x458   : > { %9563 = vst [vmem:[#allocation20_spill] sm:$0xff] %v8291_v31  ;;  %v3936_v28 = vmul.f32 %v8225_v44, %v8199_v58  ;;  %v3945_v47 = vmul.f32 %v8229_v32, %v8199_v58  ;;  %v3906_v50 = vrot.slane %v8281_v42, 1  ;;  %v3915_v49 = vrot.slane %v8283_v41, 1 }
 0x459   : > { %9564 = vst [vmem:[#allocation24_spill] sm:$0xff] %v8293_v53  ;;  %v3919_v51 = vadd.f32 %v3918_v16, %v7888_v59  ;;  %v3954_v61 = vmul.f32 %v8232_v24, %v8199_v58  ;;  %v3928_v20 = vadd.f32 %v3927_v33, %v7892_v22  ;;  %v3963_v52 = vmul.f32 %v8235_v21, %v8199_v58  ;;  %v9569_v22 = vld [vmem:[#allocation26_spill] sm:$0xff] }
 0x45a   : > { %9565 = vst [vmem:[#allocation18_spill] sm:$0xff] %v8295_v3  ;;  %v3937_v40 = vadd.f32 %v3936_v28, %v7872_v27  ;;  %v3946_v17 = vadd.f32 %v3945_v47, %v7896_v63  ;;  %v3972_v30 = vmul.f32 %v8239_v37, %v8199_v58  ;;  %v3981_v59 = vmul.f32 %v8246_v56, %v8199_v58  ;;  %v9570_v63 = vld [vmem:[#allocation52_spill] sm:$0xff] }
 0x45b   : > { %9566 = vst [vmem:[#allocation22_spill] sm:$0xff] %v8297_v8  ;;  %v3920_v5 = vrot.slane %v3919_v51, 4  ;;  %v3955_v14 = vadd.f32 %v3954_v61, %v9568_v0  ;;  %v3929_v35 = vrot.slane %v3928_v20, 4  ;;  %v3964_v43 = vadd.f32 %v3963_v52, %v9569_v22 }
 0x45c   : > { %9567 = vst [vmem:[#allocation49_spill] sm:$0xff] %v8302_v26  ;;  %v3938_v54 = vrot.slane %v3937_v40, 4  ;;  %v3947_v39 = vrot.slane %v3946_v17, 4  ;;  %v3973_v38 = vadd.f32 %v3972_v30, %v9570_v63  ;;  %v3982_v29 = vadd.f32 %v3981_v59, %v9571_v55 }
 0x45d   : > { %v3921_v27 = vadd.f32 %v3920_v5, %v3919_v51  ;;  %v3956_v36 = vrot.slane %v3955_v14, 4  ;;  %v3930_v18 = vadd.f32 %v3929_v35, %v3928_v20  ;;  %v3965_v33 = vrot.slane %v3964_v43, 4 }
 0x45e   : > { %v3939_v7 = vadd.f32 %v3938_v54, %v3937_v40  ;;  %v3948_v16 = vadd.f32 %v3947_v39, %v3946_v17  ;;  %v3974_v61 = vrot.slane %v3973_v38, 4  ;;  %v3983_v0 = vrot.slane %v3982_v29, 4 }
 0x45f   : > { %v3922_v28 = vrot.slane %v3921_v27, 2  ;;  %v3957_v47 = vadd.f32 %v3956_v36, %v3955_v14  ;;  %v3931_v26 = vrot.slane %v3930_v18, 2  ;;  %v3966_v31 = vadd.f32 %v3965_v33, %v3964_v43 }
 0x460   : > { %v3940_v8 = vrot.slane %v3939_v7, 2  ;;  %v3949_v3 = vrot.slane %v3948_v16, 2  ;;  %v3975_v51 = vadd.f32 %v3974_v61, %v3973_v38  ;;  %v3984_v5 = vadd.f32 %v3983_v0, %v3982_v29  ;;  %v9579_v61 = vld [vmem:[#allocation54_spill] sm:$0xff] }
 0x461   : > { %v3923_v53 = vadd.f32 %v3922_v28, %v3921_v27  ;;  %v3958_v52 = vrot.slane %v3957_v47, 2  ;;  %v3932_v22 = vadd.f32 %v3931_v26, %v3930_v18  ;;  %v3967_v59 = vrot.slane %v3966_v31, 2  ;;  %v9578_v28 = vld [vmem:[#allocation27_spill] sm:$0xff] }
 0x462   : > { %v3941_v30 = vadd.f32 %v3940_v8, %v3939_v7  ;;  %v3950_v63 = vadd.f32 %v3949_v3, %v3948_v16  ;;  %v3976_v17 = vrot.slane %v3975_v51, 2  ;;  %v3985_v35 = vrot.slane %v3984_v5, 2 }
 0x463   : > { %v3924_v20 = vrot.slane %v3923_v53, 1  ;;  %v3959_v40 = vadd.f32 %v3958_v52, %v3957_v47  ;;  %v3933_v54 = vrot.slane %v3932_v22, 1  ;;  %v8328_v36 = vadd.f32 %v3967_v59, %v3966_v31 }
 0x464   : > { %v3942_v14 = vrot.slane %v3941_v30, 1  ;;  %v3951_v39 = vrot.slane %v3950_v63, 1  ;;  %v8331_v55 = vadd.f32 %v3897_v4, %v8276_v23  ;;  %v8333_v27 = vadd.f32 %v3976_v17, %v3975_v51  ;;  %v9582_v17 = vld [vmem:[#allocation56_spill] sm:$0xff] }
 0x465   : > { %v3960_v43 = vrot.slane %v3959_v40, 1  ;;  %v8335_v38 = vadd.f32 %v3985_v35, %v3984_v5  ;;  %v8338_v3 = vadd.f32 %v3906_v50, %v8281_v42  ;;  %v8341_v8 = vadd.f32 %v3915_v49, %v8283_v41 }
 0x466   : > { %9572 = vst [vmem:[#allocation25_spill] sm:$0xff] %v8331_v55  ;;  %v8343_v26 = vadd.f32 %v3924_v20, %v3923_v53  ;;  %v8345_v29 = vadd.f32 %v3933_v54, %v3932_v22  ;;  %v8347_v31 = vadd.f32 %v3942_v14, %v3941_v30  ;;  %v8349_v18 = vadd.f32 %v3951_v39, %v3950_v63  ;;  %v9581_v22 = vld [vmem:[#allocation28_spill] sm:$0xff]  ;;  %v9583_v39 = vld [vmem:[#allocation55_spill] sm:$0xff] }
 0x467   : > { %9573 = vst [vmem:[#allocation23_spill] sm:$0xff] %v8338_v3  ;;  %v3969_v23 = vrot.slane %v8328_v36, 1  ;;  %v3990_v4 = vmul.f32 %v8255_v9, %v8199_v58  ;;  %v8354_v7 = vadd.f32 %v3960_v43, %v3959_v40  ;;  %v3999_v42 = vmul.f32 %v8258_v60, %v8199_v58  ;;  %v9580_v58 = vld [vmem:[#allocation53_spill] sm:$0xff] }
 0x468   : > { %9574 = vst [vmem:[#allocation19_spill] sm:$0xff] %v8341_v8  ;;  %v4008_v41 = vmul.f32 %v8222_v11, %v8201_v57  ;;  %v4017_v53 = vmul.f32 %v8225_v44, %v8201_v57  ;;  %v3978_v50 = vrot.slane %v8333_v27, 1  ;;  %v3987_v49 = vrot.slane %v8335_v38, 1 }
 0x469   : > { %9575 = vst [vmem:[#allocation50_spill] sm:$0xff] %v8347_v31  ;;  %v3991_v16 = vadd.f32 %v3990_v4, %v7916_v1  ;;  %v4026_v33 = vmul.f32 %v8229_v32, %v8201_v57  ;;  %v4000_v47 = vadd.f32 %v3999_v42, %v9578_v28  ;;  %v4035_v51 = vmul.f32 %v8232_v24, %v8201_v57  ;;  %v9584_v4 = vld [vmem:[#allocation29_spill] sm:$0xff] }
 0x46a   : > { %9576 = vst [vmem:[#allocation26_spill] sm:$0xff] %v8349_v18  ;;  %v4009_v0 = vadd.f32 %v4008_v41, %v9579_v61  ;;  %v4018_v52 = vadd.f32 %v4017_v53, %v9580_v58  ;;  %v4044_v63 = vmul.f32 %v8235_v21, %v8201_v57  ;;  %v4053_v1 = vmul.f32 %v8239_v37, %v8201_v57 }
 0x46b   : > { %9577 = vst [vmem:[#allocation52_spill] sm:$0xff] %v8354_v7  ;;  %v3992_v5 = vrot.slane %v3991_v16, 4  ;;  %v4027_v30 = vadd.f32 %v4026_v33, %v9581_v22  ;;  %v4001_v59 = vrot.slane %v4000_v47, 4  ;;  %v4036_v35 = vadd.f32 %v4035_v51, %v9582_v17 }
 0x46c   : > { %v4010_v20 = vrot.slane %v4009_v0, 4  ;;  %v4019_v40 = vrot.slane %v4018_v52, 4  ;;  %v4045_v43 = vadd.f32 %v4044_v63, %v9583_v39  ;;  %v4054_v42 = vadd.f32 %v4053_v1, %v9584_v4 }
 0x46d   : > { %v3993_v54 = vadd.f32 %v3992_v5, %v3991_v16  ;;  %v4028_v14 = vrot.slane %v4027_v30, 4  ;;  %v4002_v41 = vadd.f32 %v4001_v59, %v4000_v47  ;;  %v4037_v28 = vrot.slane %v4036_v35, 4 }
 0x46e   : > { %v4011_v53 = vadd.f32 %v4010_v20, %v4009_v0  ;;  %v4020_v33 = vadd.f32 %v4019_v40, %v4018_v52  ;;  %v4046_v22 = vrot.slane %v4045_v43, 4  ;;  %v4055_v8 = vrot.slane %v4054_v42, 4 }
 0x46f   : > { %v3994_v61 = vrot.slane %v3993_v54, 2  ;;  %v4029_v58 = vadd.f32 %v4028_v14, %v4027_v30  ;;  %v4003_v7 = vrot.slane %v4002_v41, 2  ;;  %v4038_v55 = vadd.f32 %v4037_v28, %v4036_v35 }
 0x470   : > { %v4012_v3 = vrot.slane %v4011_v53, 2  ;;  %v4021_v18 = vrot.slane %v4020_v33, 2  ;;  %v4047_v16 = vadd.f32 %v4046_v22, %v4045_v43  ;;  %v4056_v5 = vadd.f32 %v4055_v8, %v4054_v42 }
 0x471   : > { %v3995_v31 = vadd.f32 %v3994_v61, %v3993_v54  ;;  %v4030_v51 = vrot.slane %v4029_v58, 2  ;;  %v4004_v17 = vadd.f32 %v4003_v7, %v4002_v41  ;;  %v4039_v1 = vrot.slane %v4038_v55, 2 }
 0x472   : > { %v4013_v63 = vadd.f32 %v4012_v3, %v4011_v53  ;;  %v4022_v39 = vadd.f32 %v4021_v18, %v4020_v33  ;;  %v4048_v52 = vrot.slane %v4047_v16, 2  ;;  %v4057_v59 = vrot.slane %v4056_v5, 2  ;;  %v9591_v53 = vld [vmem:[#allocation58_spill] sm:$0xff] }
 0x473   : > { %v3996_v47 = vrot.slane %v3995_v31, 1  ;;  %v4031_v0 = vadd.f32 %v4030_v51, %v4029_v58  ;;  %v4005_v20 = vrot.slane %v4004_v17, 1  ;;  %v8380_v14 = vadd.f32 %v4039_v1, %v4038_v55  ;;  %v9592_v58 = vld [vmem:[#allocation57_spill] sm:$0xff]  ;;  %v9593_v51 = vld [vmem:[#allocation30_spill] sm:$0xff] }
 0x474   : > { %v4014_v30 = vrot.slane %v4013_v63, 1  ;;  %v4023_v40 = vrot.slane %v4022_v39, 1  ;;  %v8383_v4 = vadd.f32 %v3969_v23, %v8328_v36  ;;  %v8385_v54 = vadd.f32 %v4048_v52, %v4047_v16 }
 0x475   : > { %v4032_v35 = vrot.slane %v4031_v0, 1  ;;  %v8387_v8 = vadd.f32 %v4057_v59, %v4056_v5  ;;  %v8390_v3 = vadd.f32 %v3978_v50, %v8333_v27  ;;  %v8393_v18 = vadd.f32 %v3987_v49, %v8335_v38 }
 0x476   : > { %9585 = vst [vmem:[#allocation51_spill] sm:$0xff] %v8383_v4  ;;  %v8395_v7 = vadd.f32 %v3996_v47, %v3995_v31  ;;  %v8397_v43 = vadd.f32 %v4005_v20, %v4004_v17  ;;  %v8399_v55 = vadd.f32 %v4014_v30, %v4013_v63  ;;  %v8401_v42 = vadd.f32 %v4023_v40, %v4022_v39  ;;  %v9594_v17 = vld [vmem:[#allocation60_spill] sm:$0xff]  ;;  %v9596_v40 = vld [vmem:[#allocation31_spill] sm:$0xff] }
 0x477   : > { %9586 = vst [vmem:[#allocation27_spill] sm:$0xff] %v8390_v3  ;;  %v4041_v36 = vrot.slane %v8380_v14, 1  ;;  %v4062_v23 = vmul.f32 %v8246_v56, %v8201_v57  ;;  %v8406_v41 = vadd.f32 %v4032_v35, %v4031_v0  ;;  %v4071_v27 = vmul.f32 %v8255_v9, %v8201_v57 }
 0x478   : > { %9587 = vst [vmem:[#allocation54_spill] sm:$0xff] %v8393_v18  ;;  %v4080_v38 = vmul.f32 %v8258_v60, %v8201_v57  ;;  %v4089_v31 = vmul.f32 %v8222_v11, %v8203_v13  ;;  %v4050_v50 = vrot.slane %v8385_v54, 1  ;;  %v4059_v49 = vrot.slane %v8387_v8, 1 }
 0x479   : > { %9588 = vst [vmem:[#allocation53_spill] sm:$0xff] %v8399_v55  ;;  %v4063_v33 = vadd.f32 %v4062_v23, %v9591_v53  ;;  %v4098_v28 = vmul.f32 %v8225_v44, %v8203_v13  ;;  %v4072_v61 = vadd.f32 %v4071_v27, %v7952_v6  ;;  %v4107_v57 = vmul.f32 %v8229_v32, %v8203_v13  ;;  %v9595_v6 = vld [vmem:[#allocation59_spill] sm:$0xff]  ;;  %v9597_v23 = vld [vmem:[#allocation62_spill] sm:$0xff] }
 0x47a   : > { %9589 = vst [vmem:[#allocation28_spill] sm:$0xff] %v8401_v42  ;;  %v4081_v22 = vadd.f32 %v4080_v38, %v9592_v58  ;;  %v4090_v16 = vadd.f32 %v4089_v31, %v9593_v51  ;;  %v4116_v39 = vmul.f32 %v8232_v24, %v8203_v13  ;;  %v4125_v1 = vmul.f32 %v8235_v21, %v8203_v13 }
 0x47b   : > { %9590 = vst [vmem:[#allocation56_spill] sm:$0xff] %v8406_v41  ;;  %v4064_v5 = vrot.slane %v4063_v33, 4  ;;  %v4099_v63 = vadd.f32 %v4098_v28, %v9594_v17  ;;  %v4073_v47 = vrot.slane %v4072_v61, 4  ;;  %v4108_v59 = vadd.f32 %v4107_v57, %v9595_v6 }
 0x47c   : > { %v4082_v0 = vrot.slane %v4081_v22, 4  ;;  %v4091_v52 = vrot.slane %v4090_v16, 4  ;;  %v4117_v35 = vadd.f32 %v4116_v39, %v9596_v40  ;;  %v4126_v27 = vadd.f32 %v4125_v1, %v9597_v23 }
 0x47d   : > { %v4065_v20 = vadd.f32 %v4064_v5, %v4063_v33  ;;  %v4100_v30 = vrot.slane %v4099_v63, 4  ;;  %v4074_v38 = vadd.f32 %v4073_v47, %v4072_v61  ;;  %v4109_v28 = vrot.slane %v4108_v59, 4 }
 0x47e   : > { %v4083_v31 = vadd.f32 %v4082_v0, %v4081_v22  ;;  %v4092_v53 = vadd.f32 %v4091_v52, %v4090_v16  ;;  %v4118_v17 = vrot.slane %v4117_v35, 4  ;;  %v4127_v18 = vrot.slane %v4126_v27, 4 }
 0x47f   : > { %v4066_v58 = vrot.slane %v4065_v20, 2  ;;  %v4101_v51 = vadd.f32 %v4100_v30, %v4099_v63  ;;  %v4075_v3 = vrot.slane %v4074_v38, 2  ;;  %v4110_v42 = vadd.f32 %v4109_v28, %v4108_v59 }
 0x480   : > { %v4084_v41 = vrot.slane %v4083_v31, 2  ;;  %v4093_v4 = vrot.slane %v4092_v53, 2  ;;  %v4119_v33 = vadd.f32 %v4118_v17, %v4117_v35  ;;  %v4128_v5 = vadd.f32 %v4127_v18, %v4126_v27 }
 0x481   : > { %v4067_v55 = vadd.f32 %v4066_v58, %v4065_v20  ;;  %v4102_v57 = vrot.slane %v4101_v51, 2  ;;  %v4076_v6 = vadd.f32 %v4075_v3, %v4074_v38  ;;  %v4111_v1 = vrot.slane %v4110_v42, 2  ;;  %v9605_v58 = vld [vmem:[#allocation32_spill] sm:$0xff] }
 0x482   : > { %v4085_v39 = vadd.f32 %v4084_v41, %v4083_v31  ;;  %v4094_v40 = vadd.f32 %v4093_v4, %v4092_v53  ;;  %v4120_v16 = vrot.slane %v4119_v33, 2  ;;  %v4129_v47 = vrot.slane %v4128_v5, 2  ;;  %v9604_v31 = vld [vmem:[#allocation61_spill] sm:$0xff] }
 0x483   : > { %v4068_v61 = vrot.slane %v4067_v55, 1  ;;  %v4103_v22 = vadd.f32 %v4102_v57, %v4101_v51  ;;  %v4077_v0 = vrot.slane %v4076_v6, 1  ;;  %v8432_v30 = vadd.f32 %v4111_v1, %v4110_v42  ;;  %v9606_v57 = vld [vmem:[#allocation63_spill] sm:$0xff] }
 0x484   : > { %v4086_v63 = vrot.slane %v4085_v39, 1  ;;  %v4095_v52 = vrot.slane %v4094_v40, 1  ;;  %v8435_v23 = vadd.f32 %v4041_v36, %v8380_v14  ;;  %v8437_v20 = vadd.f32 %v4120_v16, %v4119_v33 }
 0x485   : > { %v4104_v59 = vrot.slane %v4103_v22, 1  ;;  %v8439_v18 = vadd.f32 %v4129_v47, %v4128_v5  ;;  %v8442_v4 = vadd.f32 %v4050_v50, %v8385_v54  ;;  %v8445_v3 = vadd.f32 %v4059_v49, %v8387_v8  ;;  %v9608_v47 = vld [vmem:[#allocation33_spill] sm:$0xff] }
 0x486   : > { %9598 = vst [vmem:[#allocation55_spill] sm:$0xff] %v8435_v23  ;;  %v8447_v41 = vadd.f32 %v4068_v61, %v4067_v55  ;;  %v8449_v35 = vadd.f32 %v4077_v0, %v4076_v6  ;;  %v8451_v42 = vadd.f32 %v4086_v63, %v4085_v39  ;;  %v8453_v27 = vadd.f32 %v4095_v52, %v4094_v40  ;;  %v9609_v52 = vld [vmem:[#allocation36_spill] sm:$0xff] }
 0x487   : > { %9599 = vst [vmem:[#allocation29_spill] sm:$0xff] %v8442_v4  ;;  %v4113_v14 = vrot.slane %v8432_v30, 1  ;;  %v4134_v36 = vmul.f32 %v8239_v37, %v8203_v13  ;;  %v8458_v38 = vadd.f32 %v4104_v59, %v4103_v22  ;;  %v4143_v54 = vmul.f32 %v8246_v56, %v8203_v13 }
 0x488   : > { %9600 = vst [vmem:[#allocation58_spill] sm:$0xff] %v8445_v3  ;;  %v4152_v8 = vmul.f32 %v8255_v9, %v8203_v13  ;;  %v4161_v55 = vmul.f32 %v8258_v60, %v8203_v13  ;;  %v4122_v50 = vrot.slane %v8437_v20, 1  ;;  %v4131_v49 = vrot.slane %v8439_v18, 1  ;;  %v9607_v13 = vld [vmem:[#allocation34_spill] sm:$0xff] }
 0x489   : > { %9601 = vst [vmem:[#allocation57_spill] sm:$0xff] %v8451_v42  ;;  %v4135_v53 = vadd.f32 %v4134_v36, %v9604_v31  ;;  %v4170_v28 = vmul.f32 %v8222_v11, %v8207_v15  ;;  %v4144_v51 = vadd.f32 %v4143_v54, %v9605_v58  ;;  %v4179_v5 = vmul.f32 %v8225_v44, %v8207_v15  ;;  %v9610_v36 = vld [vmem:[#allocation64_spill] sm:$0xff] }
 0x48a   : > { %9602 = vst [vmem:[#allocation30_spill] sm:$0xff] %v8453_v27  ;;  %v4153_v17 = vadd.f32 %v4152_v8, %v7988_v19  ;;  %v4162_v33 = vadd.f32 %v4161_v55, %v9606_v57  ;;  %v4188_v40 = vmul.f32 %v8229_v32, %v8207_v15  ;;  %v4197_v1 = vmul.f32 %v8232_v24, %v8207_v15 }
 0x48b   : > { %9603 = vst [vmem:[#allocation60_spill] sm:$0xff] %v8458_v38  ;;  %v4136_v6 = vrot.slane %v4135_v53, 4  ;;  %v4171_v39 = vadd.f32 %v4170_v28, %v9607_v13  ;;  %v4145_v61 = vrot.slane %v4144_v51, 4  ;;  %v4180_v0 = vadd.f32 %v4179_v5, %v9608_v47 }
 0x48c   : > { %v4154_v22 = vrot.slane %v4153_v17, 4  ;;  %v4163_v16 = vrot.slane %v4162_v33, 4  ;;  %v4189_v59 = vadd.f32 %v4188_v40, %v9609_v52  ;;  %v4198_v54 = vadd.f32 %v4197_v1, %v9610_v36 }
 0x48d   : > { %v4137_v19 = vadd.f32 %v4136_v6, %v4135_v53  ;;  %v4172_v63 = vrot.slane %v4171_v39, 4  ;;  %v4146_v8 = vadd.f32 %v4145_v61, %v4144_v51  ;;  %v4181_v28 = vrot.slane %v4180_v0, 4 }
 0x48e   : > { %v4155_v55 = vadd.f32 %v4154_v22, %v4153_v17  ;;  %v4164_v31 = vadd.f32 %v4163_v16, %v4162_v33  ;;  %v4190_v13 = vrot.slane %v4189_v59, 4  ;;  %v4199_v3 = vrot.slane %v4198_v54, 4 }
 0x48f   : > { %v4138_v58 = vrot.slane %v4137_v19, 2  ;;  %v4173_v57 = vadd.f32 %v4172_v63, %v4171_v39  ;;  %v4147_v38 = vrot.slane %v4146_v8, 2  ;;  %v4182_v23 = vadd.f32 %v4181_v28, %v4180_v0 }
 0x490   : > { %v4156_v4 = vrot.slane %v4155_v55, 2  ;;  %v4165_v27 = vrot.slane %v4164_v31, 2  ;;  %v4191_v53 = vadd.f32 %v4190_v13, %v4189_v59  ;;  %v4200_v6 = vadd.f32 %v4199_v3, %v4198_v54  ;;  %v9619_v13 = vld [vmem:[#allocation38_spill] sm:$0xff] }
 0x491   : > { %v4139_v42 = vadd.f32 %v4138_v58, %v4137_v19  ;;  %v4174_v5 = vrot.slane %v4173_v57, 2  ;;  %v4148_v47 = vadd.f32 %v4147_v38, %v4146_v8  ;;  %v4183_v1 = vrot.slane %v4182_v23, 2  ;;  %v9618_v58 = vld [vmem:[#allocation65_spill] sm:$0xff] }
 0x492   : > { %v4157_v40 = vadd.f32 %v4156_v4, %v4155_v55  ;;  %v4166_v52 = vadd.f32 %v4165_v27, %v4164_v31  ;;  %v4192_v33 = vrot.slane %v4191_v53, 2  ;;  %v4201_v61 = vrot.slane %v4200_v6, 2  ;;  %v9617_v55 = vld [vmem:[#allocation35_spill] sm:$0xff] }
 0x493   : > { %v4140_v51 = vrot.slane %v4139_v42, 1  ;;  %v4175_v17 = vadd.f32 %v4174_v5, %v4173_v57  ;;  %v4149_v22 = vrot.slane %v4148_v47, 1  ;;  %v8484_v63 = vadd.f32 %v4183_v1, %v4182_v23 }
 0x494   : > { %v4158_v39 = vrot.slane %v4157_v40, 1  ;;  %v4167_v16 = vrot.slane %v4166_v52, 1  ;;  %v8487_v36 = vadd.f32 %v4113_v14, %v8432_v30  ;;  %v8489_v19 = vadd.f32 %v4192_v33, %v4191_v53 }
 0x495   : > { %v4176_v0 = vrot.slane %v4175_v17, 1  ;;  %v8491_v3 = vadd.f32 %v4201_v61, %v4200_v6  ;;  %v8494_v4 = vadd.f32 %v4122_v50, %v8437_v20  ;;  %v8497_v27 = vadd.f32 %v4131_v49, %v8439_v18  ;;  %v9621_v61 = vld [vmem:[#allocation66_spill] sm:$0xff] }
 0x496   : > { %9611 = vst [vmem:[#allocation59_spill] sm:$0xff] %v8487_v36  ;;  %v8499_v38 = vadd.f32 %v4140_v51, %v4139_v42  ;;  %v8501_v59 = vadd.f32 %v4149_v22, %v4148_v47  ;;  %v8503_v23 = vadd.f32 %v4158_v39, %v4157_v40  ;;  %v8505_v54 = vadd.f32 %v4167_v16, %v4166_v52  ;;  %v9620_v40 = vld [vmem:[#allocation37_spill] sm:$0xff] }
 0x497   : > { %9612 = vst [vmem:[#allocation31_spill] sm:$0xff] %v8494_v4  ;;  %v4185_v30 = vrot.slane %v8484_v63, 1  ;;  %v4206_v14 = vmul.f32 %v8235_v21, %v8207_v15  ;;  %v8510_v8 = vadd.f32 %v4176_v0, %v4175_v17  ;;  %v4215_v20 = vmul.f32 %v8239_v37, %v8207_v15 }
 0x498   : > { %9613 = vst [vmem:[#allocation62_spill] sm:$0xff] %v8497_v27  ;;  %v4224_v18 = vmul.f32 %v8246_v56, %v8207_v15  ;;  %v4233_v42 = vmul.f32 %v8255_v9, %v8207_v15  ;;  %v4194_v50 = vrot.slane %v8489_v19, 1  ;;  %v4203_v49 = vrot.slane %v8491_v3, 1 }
 0x499   : > { %9614 = vst [vmem:[#allocation61_spill] sm:$0xff] %v8503_v23  ;;  %v4207_v31 = vadd.f32 %v4206_v14, %v9617_v55  ;;  %v4242_v28 = vmul.f32 %v8258_v60, %v8207_v15  ;;  %v4216_v57 = vadd.f32 %v4215_v20, %v9618_v58  ;;  %v4251_v6 = vmul.f32 %v8222_v11, %v8209_v48  ;;  %v9623_v14 = vld [vmem:[#allocation40_spill] sm:$0xff] }
 0x49a   : > { %9615 = vst [vmem:[#allocation32_spill] sm:$0xff] %v8505_v54  ;;  %v4225_v5 = vadd.f32 %v4224_v18, %v9619_v13  ;;  %v4234_v53 = vadd.f32 %v4233_v42, %v8024_v45  ;;  %v4260_v1 = vmul.f32 %v8225_v44, %v8209_v48  ;;  %v4269_v51 = vmul.f32 %v8229_v32, %v8209_v48  ;;  %v9622_v45 = vld [vmem:[#allocation39_spill] sm:$0xff] }
 0x49b   : > { %9616 = vst [vmem:[#allocation63_spill] sm:$0xff] %v8510_v8  ;;  %v4208_v47 = vrot.slane %v4207_v31, 4  ;;  %v4243_v52 = vadd.f32 %v4242_v28, %v9620_v40  ;;  %v4217_v17 = vrot.slane %v4216_v57, 4  ;;  %v4252_v22 = vadd.f32 %v4251_v6, %v9621_v61 }
 0x49c   : > { %v4226_v15 = vrot.slane %v4225_v5, 4  ;;  %v4235_v33 = vrot.slane %v4234_v53, 4  ;;  %v4261_v0 = vadd.f32 %v4260_v1, %v9622_v45  ;;  %v4270_v20 = vadd.f32 %v4269_v51, %v9623_v14 }
 0x49d   : > { %v4209_v39 = vadd.f32 %v4208_v47, %v4207_v31  ;;  %v4244_v16 = vrot.slane %v4243_v52, 4  ;;  %v4218_v18 = vadd.f32 %v4217_v17, %v4216_v57  ;;  %v4253_v28 = vrot.slane %v4252_v22, 4 }
 0x49e   : > { %v4227_v42 = vadd.f32 %v4226_v15, %v4225_v5  ;;  %v4236_v55 = vadd.f32 %v4235_v33, %v4234_v53  ;;  %v4262_v40 = vrot.slane %v4261_v0, 4  ;;  %v4271_v8 = vrot.slane %v4270_v20, 4 }
 0x49f   : > { %v4210_v58 = vrot.slane %v4209_v39, 2  ;;  %v4245_v13 = vadd.f32 %v4244_v16, %v4243_v52  ;;  %v4219_v27 = vrot.slane %v4218_v18, 2  ;;  %v4254_v23 = vadd.f32 %v4253_v28, %v4252_v22 }
 0x4a0   : > { %v4228_v54 = vrot.slane %v4227_v42, 2  ;;  %v4237_v4 = vrot.slane %v4236_v55, 2  ;;  %v4263_v31 = vadd.f32 %v4262_v40, %v4261_v0  ;;  %v4272_v47 = vadd.f32 %v4271_v8, %v4270_v20  ;;  %v9632_v40 = vld [vmem:[#allocation42_spill] sm:$0xff] }
 0x4a1   : > { %v4211_v36 = vadd.f32 %v4210_v58, %v4209_v39  ;;  %v4246_v6 = vrot.slane %v4245_v13, 2  ;;  %v4220_v61 = vadd.f32 %v4219_v27, %v4218_v18  ;;  %v4255_v51 = vrot.slane %v4254_v23, 2  ;;  %v9631_v58 = vld [vmem:[#allocation41_spill] sm:$0xff] }
 0x4a2   : > { %v4229_v1 = vadd.f32 %v4228_v54, %v4227_v42  ;;  %v4238_v45 = vadd.f32 %v4237_v4, %v4236_v55  ;;  %v4264_v53 = vrot.slane %v4263_v31, 2  ;;  %v4273_v17 = vrot.slane %v4272_v47, 2  ;;  %v9630_v42 = vld [vmem:[#allocation67_spill] sm:$0xff] }
 0x4a3   : > { %v4212_v57 = vrot.slane %v4211_v36, 1  ;;  %v4247_v5 = vadd.f32 %v4246_v6, %v4245_v13  ;;  %v4221_v15 = vrot.slane %v4220_v61, 1  ;;  %v8536_v16 = vadd.f32 %v4255_v51, %v4254_v23 }
 0x4a4   : > { %v4230_v52 = vrot.slane %v4229_v1, 1  ;;  %v4239_v33 = vrot.slane %v4238_v45, 1  ;;  %v8539_v14 = vadd.f32 %v4185_v30, %v8484_v63  ;;  %v8541_v39 = vadd.f32 %v4264_v53, %v4263_v31  ;;  %v9633_v31 = vld [vmem:[#allocation68_spill] sm:$0xff] }
 0x4a5   : > { %v4248_v22 = vrot.slane %v4247_v5, 1  ;;  %v8543_v8 = vadd.f32 %v4273_v17, %v4272_v47  ;;  %v8546_v4 = vadd.f32 %v4194_v50, %v8489_v19  ;;  %v8549_v27 = vadd.f32 %v4203_v49, %v8491_v3 }
 0x4a6   : > { %9624 = vst [vmem:[#allocation34_spill] sm:$0xff] %v8539_v14  ;;  %v8551_v54 = vadd.f32 %v4212_v57, %v4211_v36  ;;  %v8553_v0 = vadd.f32 %v4221_v15, %v4220_v61  ;;  %v8555_v23 = vadd.f32 %v4230_v52, %v4229_v1  ;;  %v8557_v20 = vadd.f32 %v4239_v33, %v4238_v45  ;;  %v9634_v15 = vld [vmem:[#allocation43_spill] sm:$0xff] }
 0x4a7   : > { %9625 = vst [vmem:[#allocation33_spill] sm:$0xff] %v8546_v4  ;;  %v4257_v63 = vrot.slane %v8536_v16, 1  ;;  %v4278_v30 = vmul.f32 %v8232_v24, %v8209_v48  ;;  %v8562_v18 = vadd.f32 %v4248_v22, %v4247_v5  ;;  %v4287_v19 = vmul.f32 %v8235_v21, %v8209_v48 }
 0x4a8   : > { %9626 = vst [vmem:[#allocation36_spill] sm:$0xff] %v8549_v27  ;;  %v4296_v36 = vmul.f32 %v8239_v37, %v8209_v48  ;;  %v4305_v3 = vmul.f32 %v8246_v56, %v8209_v48  ;;  %v4266_v50 = vrot.slane %v8541_v39, 1  ;;  %v4275_v49 = vrot.slane %v8543_v8, 1 }
 0x4a9   : > { %9627 = vst [vmem:[#allocation64_spill] sm:$0xff] %v8555_v23  ;;  %v4279_v55 = vadd.f32 %v4278_v30, %v9630_v42  ;;  %v4314_v28 = vmul.f32 %v8255_v9, %v8209_v48  ;;  %v4288_v13 = vadd.f32 %v4287_v19, %v9631_v58  ;;  %v4323_v61 = vmul.f32 %v8258_v60, %v8209_v48  ;;  %v9635_v30 = vld [vmem:[#allocation45_spill] sm:$0xff] }
 0x4aa   : > { %9628 = vst [vmem:[#allocation35_spill] sm:$0xff] %v8557_v20  ;;  %v4297_v6 = vadd.f32 %v4296_v36, %v9632_v40  ;;  %v4306_v47 = vadd.f32 %v4305_v3, %v9633_v31  ;;  %v4332_v51 = vmul.f32 %v8222_v11, %v8279_v46  ;;  %v4341_v57 = vmul.f32 %v8225_v44, %v8279_v46  ;;  %v9636_v36 = vld [vmem:[#allocation69_spill] sm:$0xff] }
 0x4ab   : > { %9629 = vst [vmem:[#allocation65_spill] sm:$0xff] %v8562_v18  ;;  %v4280_v1 = vrot.slane %v4279_v55, 4  ;;  %v4315_v45 = vadd.f32 %v4314_v28, %v8060_v25  ;;  %v4289_v5 = vrot.slane %v4288_v13, 4  ;;  %v4324_v52 = vadd.f32 %v4323_v61, %v9634_v15 }
 0x4ac   : > { %v4298_v53 = vrot.slane %v4297_v6, 4  ;;  %v4307_v17 = vrot.slane %v4306_v47, 4  ;;  %v4333_v19 = vadd.f32 %v4332_v51, %v9635_v30  ;;  %v4342_v48 = vadd.f32 %v4341_v57, %v9636_v36 }
 0x4ad   : > { %v4281_v33 = vadd.f32 %v4280_v1, %v4279_v55  ;;  %v4316_v22 = vrot.slane %v4315_v45, 4  ;;  %v4290_v3 = vadd.f32 %v4289_v5, %v4288_v13  ;;  %v4325_v28 = vrot.slane %v4324_v52, 4 }
 0x4ae   : > { %v4299_v42 = vadd.f32 %v4298_v53, %v4297_v6  ;;  %v4308_v25 = vadd.f32 %v4307_v17, %v4306_v47  ;;  %v4334_v31 = vrot.slane %v4333_v19, 4  ;;  %v4343_v27 = vrot.slane %v4342_v48, 4 }
 0x4af   : > { %v4282_v58 = vrot.slane %v4281_v33, 2  ;;  %v4317_v40 = vadd.f32 %v4316_v22, %v4315_v45  ;;  %v4291_v4 = vrot.slane %v4290_v3, 2  ;;  %v4326_v20 = vadd.f32 %v4325_v28, %v4324_v52 }
 0x4b0   : > { %v4300_v18 = vrot.slane %v4299_v42, 2  ;;  %v4309_v14 = vrot.slane %v4308_v25, 2  ;;  %v4335_v55 = vadd.f32 %v4334_v31, %v4333_v19  ;;  %v4344_v1 = vadd.f32 %v4343_v27, %v4342_v48  ;;  %v9646_v31 = vld [vmem:[#allocation44_spill] sm:$0xff] }
 0x4b1   : > { %v4283_v23 = vadd.f32 %v4282_v58, %v4281_v33  ;;  %v4318_v61 = vrot.slane %v4317_v40, 2  ;;  %v4292_v15 = vadd.f32 %v4291_v4, %v4290_v3  ;;  %v4327_v57 = vrot.slane %v4326_v20, 2  ;;  %v9645_v58 = vld [vmem:[#allocation47_spill] sm:$0xff] }
 0x4b2   : > { %v4301_v51 = vadd.f32 %v4300_v18, %v4299_v42  ;;  %v4310_v30 = vadd.f32 %v4309_v14, %v4308_v25  ;;  %v4336_v47 = vrot.slane %v4335_v55, 2  ;;  %v4345_v5 = vrot.slane %v4344_v1, 2  ;;  %v9644_v42 = vld [vmem:[#allocation46_spill] sm:$0xff] }
 0x4b3   : > { %v4284_v13 = vrot.slane %v4283_v23, 1  ;;  %v4319_v6 = vadd.f32 %v4318_v61, %v4317_v40  ;;  %v4293_v53 = vrot.slane %v4292_v15, 1  ;;  %v8588_v22 = vadd.f32 %v4327_v57, %v4326_v20 }
 0x4b4   : > { %v4302_v45 = vrot.slane %v4301_v51, 1  ;;  %v4311_v17 = vrot.slane %v4310_v30, 1  ;;  %v8591_v36 = vadd.f32 %v4257_v63, %v8536_v16  ;;  %v8593_v33 = vadd.f32 %v4336_v47, %v4335_v55  ;;  %v9647_v55 = vld [vmem:[#allocation75_spill] sm:$0xff] }
 0x4b5   : > { %v4320_v52 = vrot.slane %v4319_v6, 1  ;;  %v8595_v27 = vadd.f32 %v4345_v5, %v4344_v1  ;;  %v8598_v14 = vadd.f32 %v4266_v50, %v8541_v39  ;;  %v8601_v4 = vadd.f32 %v4275_v49, %v8543_v8 }
 0x4b6   : > { %9637 = vst [vmem:[#allocation38_spill] sm:$0xff] %v8591_v36  ;;  %v8603_v18 = vadd.f32 %v4284_v13, %v4283_v23  ;;  %v8605_v19 = vadd.f32 %v4293_v53, %v4292_v15  ;;  %v8607_v20 = vadd.f32 %v4302_v45, %v4301_v51  ;;  %v8609_v48 = vadd.f32 %v4311_v17, %v4310_v30  ;;  %v9648_v30 = vld [vmem:[#allocation70_spill] sm:$0xff]  ;;  %v9649_v45 = vld [vmem:[#allocation48_spill] sm:$0xff] }
 0x4b7   : > { %9638 = vst [vmem:[#allocation37_spill] sm:$0xff] %v8598_v14  ;;  %v4329_v16 = vrot.slane %v8588_v22, 1  ;;  %v4350_v63 = vmul.f32 %v8229_v32, %v8279_v46  ;;  %v8614_v3 = vadd.f32 %v4320_v52, %v4319_v6  ;;  %v4359_v39 = vmul.f32 %v8232_v24, %v8279_v46 }
 0x4b8   : > { %9639 = vst [vmem:[#allocation66_spill] sm:$0xff] %v8601_v4  ;;  %v4368_v8 = vmul.f32 %v8235_v21, %v8279_v46  ;;  %v4377_v23 = vmul.f32 %v8239_v37, %v8279_v46  ;;  %v4338_v50 = vrot.slane %v8593_v33, 1  ;;  %v4347_v49 = vrot.slane %v8595_v27, 1 }
 0x4b9   : > { %9640 = vst [vmem:[#allocation39_spill] sm:$0xff] %v8603_v18  ;;  %v4351_v25 = vadd.f32 %v4350_v63, %v9644_v42  ;;  %v4386_v28 = vmul.f32 %v8246_v56, %v8279_v46  ;;  %v4360_v40 = vadd.f32 %v4359_v39, %v9645_v58  ;;  %v4395_v15 = vmul.f32 %v8255_v9, %v8279_v46  ;;  %v9650_v39 = vld [vmem:[#allocation76_spill] sm:$0xff] }
 0x4ba   : > { %9641 = vst [vmem:[#allocation40_spill] sm:$0xff] %v8607_v20  ;;  %v4369_v61 = vadd.f32 %v4368_v8, %v9646_v31  ;;  %v4378_v1 = vadd.f32 %v4377_v23, %v9647_v55  ;;  %v4404_v13 = vmul.f32 %v8258_v60, %v8279_v46  ;;  %v4413_v6 = vmul.f32 %v8222_v11, %v8286_v62  ;;  %v9651_v23 = vld [vmem:[#allocation72_spill] sm:$0xff] }
 0x4bb   : > { %9642 = vst [vmem:[#allocation67_spill] sm:$0xff] %v8609_v48  ;;  %v4352_v51 = vrot.slane %v4351_v25, 4  ;;  %v4387_v57 = vadd.f32 %v4386_v28, %v9648_v30  ;;  %v4361_v47 = vrot.slane %v4360_v40, 4  ;;  %v4396_v17 = vadd.f32 %v4395_v15, %v9649_v45 }
 0x4bc   : > { %9643 = vst [vmem:[#allocation41_spill] sm:$0xff] %v8614_v3  ;;  %v4370_v5 = vrot.slane %v4369_v61, 4  ;;  %v4379_v53 = vrot.slane %v4378_v1, 4  ;;  %v4405_v8 = vadd.f32 %v4404_v13, %v9650_v39  ;;  %v4414_v42 = vadd.f32 %v4413_v6, %v9651_v23 }
 0x4bd   : > { %v4353_v52 = vadd.f32 %v4352_v51, %v4351_v25  ;;  %v4388_v63 = vrot.slane %v4387_v57, 4  ;;  %v4362_v58 = vadd.f32 %v4361_v47, %v4360_v40  ;;  %v4397_v55 = vrot.slane %v4396_v17, 4 }
 0x4be   : > { %v4371_v31 = vadd.f32 %v4370_v5, %v4369_v61  ;;  %v4380_v28 = vadd.f32 %v4379_v53, %v4378_v1  ;;  %v4406_v4 = vrot.slane %v4405_v8, 4  ;;  %v4415_v3 = vrot.slane %v4414_v42, 4 }
 0x4bf   : > { %v4354_v30 = vrot.slane %v4353_v52, 2  ;;  %v4389_v46 = vadd.f32 %v4388_v63, %v4387_v57  ;;  %v4363_v14 = vrot.slane %v4362_v58, 2  ;;  %v4398_v20 = vadd.f32 %v4397_v55, %v4396_v17  ;;  %v9660_v55 = vld [vmem:[#allocation77_spill] sm:$0xff] }
 0x4c0   : > { %v4372_v48 = vrot.slane %v4371_v31, 2  ;;  %v4381_v36 = vrot.slane %v4380_v28, 2  ;;  %v4407_v25 = vadd.f32 %v4406_v4, %v4405_v8  ;;  %v4416_v51 = vadd.f32 %v4415_v3, %v4414_v42 }
 0x4c1   : > { %v4355_v18 = vadd.f32 %v4354_v30, %v4353_v52  ;;  %v4390_v15 = vrot.slane %v4389_v46, 2  ;;  %v4364_v45 = vadd.f32 %v4363_v14, %v4362_v58  ;;  %v4399_v6 = vrot.slane %v4398_v20, 2  ;;  %v9659_v58 = vld [vmem:[#allocation71_spill] sm:$0xff] }
 0x4c2   : > { %v4373_v13 = vadd.f32 %v4372_v48, %v4371_v31  ;;  %v4382_v39 = vadd.f32 %v4381_v36, %v4380_v28  ;;  %v4408_v1 = vrot.slane %v4407_v25, 2  ;;  %v4417_v47 = vrot.slane %v4416_v51, 2 }
 0x4c3   : > { %v4356_v40 = vrot.slane %v4355_v18, 1  ;;  %v4391_v61 = vadd.f32 %v4390_v15, %v4389_v46  ;;  %v4365_v5 = vrot.slane %v4364_v45, 1  ;;  %v8640_v63 = vadd.f32 %v4399_v6, %v4398_v20  ;;  %v9661_v46 = vld [vmem:[#allocation74_spill] sm:$0xff] }
 0x4c4   : > { %v4374_v57 = vrot.slane %v4373_v13, 1  ;;  %v4383_v53 = vrot.slane %v4382_v39, 1  ;;  %v8643_v23 = vadd.f32 %v4329_v16, %v8588_v22  ;;  %v8645_v52 = vadd.f32 %v4408_v1, %v4407_v25  ;;  %v9662_v25 = vld [vmem:[#allocation73_spill] sm:$0xff] }
 0x4c5   : > { %v4392_v17 = vrot.slane %v4391_v61, 1  ;;  %v8647_v4 = vadd.f32 %v4417_v47, %v4416_v51  ;;  %v8650_v36 = vadd.f32 %v4338_v50, %v8593_v33  ;;  %v8653_v14 = vadd.f32 %v4347_v49, %v8595_v27 }
 0x4c6   : > { %9652 = vst [vmem:[#allocation42_spill] sm:$0xff] %v8643_v23  ;;  %v8655_v48 = vadd.f32 %v4356_v40, %v4355_v18  ;;  %v8657_v3 = vadd.f32 %v4365_v5, %v4364_v45  ;;  %v8659_v20 = vadd.f32 %v4374_v57, %v4373_v13  ;;  %v8661_v8 = vadd.f32 %v4383_v53, %v4382_v39  ;;  %v9663_v39 = vld [vmem:[#allocation78_spill] sm:$0xff]  ;;  %v9664_v57 = vld [vmem:[#allocation79_spill] sm:$0xff] }
 0x4c7   : > { %9653 = vst [vmem:[#allocation68_spill] sm:$0xff] %v8650_v36  ;;  %v4401_v22 = vrot.slane %v8640_v63, 1  ;;  %v4422_v16 = vmul.f32 %v8225_v44, %v8286_v62  ;;  %v8666_v42 = vadd.f32 %v4392_v17, %v4391_v61  ;;  %v4431_v33 = vmul.f32 %v8229_v32, %v8286_v62 }
 0x4c8   : > { %9654 = vst [vmem:[#allocation43_spill] sm:$0xff] %v8653_v14  ;;  %v4440_v27 = vmul.f32 %v8232_v24, %v8286_v62  ;;  %v4449_v18 = vmul.f32 %v8235_v21, %v8286_v62  ;;  %v4410_v50 = vrot.slane %v8645_v52, 1  ;;  %v4419_v49 = vrot.slane %v8647_v4, 1 }
 0x4c9   : > { %9655 = vst [vmem:[#allocation45_spill] sm:$0xff] %v8655_v48  ;;  %v4423_v31 = vadd.f32 %v4422_v16, %v9659_v58  ;;  %v4458_v28 = vmul.f32 %v8239_v37, %v8286_v62  ;;  %v4432_v30 = vadd.f32 %v4431_v33, %v9660_v55  ;;  %v4467_v45 = vmul.f32 %v8246_v56, %v8286_v62  ;;  %v9665_v33 = vld [vmem:[#allocation80_spill] sm:$0xff] }
 0x4ca   : > { %9656 = vst [vmem:[#allocation69_spill] sm:$0xff] %v8659_v20  ;;  %v4441_v15 = vadd.f32 %v4440_v27, %v9661_v46  ;;  %v4450_v51 = vadd.f32 %v4449_v18, %v9662_v25  ;;  %v4476_v40 = vmul.f32 %v8255_v9, %v8286_v62  ;;  %v4485_v61 = vmul.f32 %v8258_v60, %v8286_v62  ;;  %v9666_v18 = vld [vmem:[#allocation81_spill] sm:$0xff] }
 0x4cb   : > { %9657 = vst [vmem:[#allocation46_spill] sm:$0xff] %v8661_v8  ;;  %v4424_v13 = vrot.slane %v4423_v31, 4  ;;  %v4459_v6 = vadd.f32 %v4458_v28, %v9663_v39  ;;  %v4433_v1 = vrot.slane %v4432_v30, 4  ;;  %v4468_v53 = vadd.f32 %v4467_v45, %v9664_v57 }
 0x4cc   : > { %9658 = vst [vmem:[#allocation47_spill] sm:$0xff] %v8666_v42  ;;  %v4442_v47 = vrot.slane %v4441_v15, 4  ;;  %v4451_v5 = vrot.slane %v4450_v51, 4  ;;  %v4477_v27 = vadd.f32 %v4476_v40, %v9665_v33  ;;  %v4486_v58 = vadd.f32 %v4485_v61, %v9666_v18 }
 0x4cd   : > { %v4425_v17 = vadd.f32 %v4424_v13, %v4423_v31  ;;  %v4460_v16 = vrot.slane %v4459_v6, 4  ;;  %v4434_v55 = vadd.f32 %v4433_v1, %v4432_v30  ;;  %v4469_v25 = vrot.slane %v4468_v53, 4 }
 0x4ce   : > { %v4443_v46 = vadd.f32 %v4442_v47, %v4441_v15  ;;  %v4452_v28 = vadd.f32 %v4451_v5, %v4450_v51  ;;  %v4478_v42 = vrot.slane %v4477_v27, 4  ;;  %v4487_v36 = vrot.slane %v4486_v58, 4 }
 0x4cf   : > { %v4426_v39 = vrot.slane %v4425_v17, 2  ;;  %v4461_v14 = vadd.f32 %v4460_v16, %v4459_v6  ;;  %v4435_v62 = vrot.slane %v4434_v55, 2  ;;  %v4470_v20 = vadd.f32 %v4469_v25, %v4468_v53 }
 0x4d0   : > { %v4444_v8 = vrot.slane %v4443_v46, 2  ;;  %v4453_v23 = vrot.slane %v4452_v28, 2  ;;  %v4479_v31 = vadd.f32 %v4478_v42, %v4477_v27  ;;  %v4488_v13 = vadd.f32 %v4487_v36, %v4486_v58 }
 0x4d1   : > { %v4427_v48 = vadd.f32 %v4426_v39, %v4425_v17  ;;  %v4462_v45 = vrot.slane %v4461_v14, 2  ;;  %v4436_v57 = vadd.f32 %v4435_v62, %v4434_v55  ;;  %v4471_v61 = vrot.slane %v4470_v20, 2  ;;  %v9667_v55 = vld [vmem:[#allocation82_spill] sm:$0xff]  ;;  %v9669_v39 = vld [vmem:[#allocation84_spill] sm:$0xff] }
 0x4d2   : > { %v4445_v40 = vadd.f32 %v4444_v8, %v4443_v46  ;;  %v4454_v33 = vadd.f32 %v4453_v23, %v4452_v28  ;;  %v4480_v51 = vrot.slane %v4479_v31, 2  ;;  %v4489_v1 = vrot.slane %v4488_v13, 2  ;;  %v9668_v28 = vld [vmem:[#allocation83_spill] sm:$0xff] }
 0x4d3   : > { %v4428_v30 = vrot.slane %v4427_v48, 1  ;;  %v4463_v15 = vadd.f32 %v4462_v45, %v4461_v14  ;;  %v4437_v47 = vrot.slane %v4436_v57, 1  ;;  %v8692_v16 = vadd.f32 %v4471_v61, %v4470_v20 }
 0x4d4   : > { %v4446_v6 = vrot.slane %v4445_v40, 1  ;;  %v4455_v5 = vrot.slane %v4454_v33, 1  ;;  %v8695_v18 = vadd.f32 %v4401_v22, %v8640_v63  ;;  %v8697_v17 = vadd.f32 %v4480_v51, %v4479_v31 }
 0x4d5   : > { %v4464_v53 = vrot.slane %v4463_v15, 1  ;;  %v8699_v36 = vadd.f32 %v4489_v1, %v4488_v13  ;;  %v8702_v23 = vadd.f32 %v4410_v50, %v8645_v52  ;;  %v8705_v14 = vadd.f32 %v4419_v49, %v8647_v4 }
 0x4d6   : > { %v8707_v8 = vadd.f32 %v4428_v30, %v4427_v48  ;;  %v8709_v42 = vadd.f32 %v4437_v47, %v4436_v57  ;;  %v8711_v20 = vadd.f32 %v4446_v6, %v4445_v40  ;;  %v8713_v27 = vadd.f32 %v4455_v5, %v4454_v33  ;;  %v9672_v30 = vld [vmem:[#allocation21_spill] sm:$0xff] }
 0x4d7   : > { %v4473_v63 = vrot.slane %v8692_v16, 1  ;;  %v4494_v22 = vmul.f32 %v8222_v11, %v8289_v12  ;;  %v8718_v58 = vadd.f32 %v4464_v53, %v4463_v15  ;;  %v4503_v52 = vmul.f32 %v8225_v44, %v8289_v12  ;;  %v9670_v44 = vld [vmem:[#allocation85_spill] sm:$0xff] }
 0x4d8   : > { %v4512_v4 = vmul.f32 %v8229_v32, %v8289_v12  ;;  %v4521_v48 = vmul.f32 %v8232_v24, %v8289_v12  ;;  %v4482_v50 = vrot.slane %v8697_v17, 1  ;;  %v4491_v49 = vrot.slane %v8699_v36, 1  ;;  %v9671_v24 = vld [vmem:[#allocation86_spill] sm:$0xff] }
 0x4d9   : > { %v4495_v46 = vadd.f32 %v4494_v22, %v9667_v55  ;;  %v4530_v11 = vmul.f32 %v8235_v21, %v8289_v12  ;;  %v4504_v25 = vadd.f32 %v4503_v52, %v9668_v28  ;;  %v4539_v32 = vmul.f32 %v8239_v37, %v8289_v12 }
 0x4da   : > { %v4513_v62 = vadd.f32 %v4512_v4, %v9669_v39  ;;  %v4522_v45 = vadd.f32 %v4521_v48, %v9670_v44  ;;  %v4548_v57 = vmul.f32 %v8246_v56, %v8289_v12  ;;  %v4557_v40 = vmul.f32 %v8255_v9, %v8289_v12 }
 0x4db   : > { %v4496_v31 = vrot.slane %v4495_v46, 4  ;;  %v4531_v13 = vadd.f32 %v4530_v11, %v9671_v24  ;;  %v4505_v33 = vrot.slane %v4504_v25, 4  ;;  %v4540_v15 = vadd.f32 %v4539_v32, %v9672_v30 }
 0x4dc   : > { %v4514_v21 = vrot.slane %v4513_v62, 4  ;;  %v4523_v61 = vrot.slane %v4522_v45, 4  ;;  %v4549_v47 = vadd.f32 %v4548_v57, %v8187_v2  ;;  %v4558_v37 = vadd.f32 %v4557_v40, %v8191_v10 }
 0x4dd   : > { %v4497_v51 = vadd.f32 %v4496_v31, %v4495_v46  ;;  %v4532_v1 = vrot.slane %v4531_v13, 4  ;;  %v4506_v6 = vadd.f32 %v4505_v33, %v4504_v25  ;;  %v4541_v22 = vrot.slane %v4540_v15, 4 }
 0x4de   : > { %v4515_v5 = vadd.f32 %v4514_v21, %v4513_v62  ;;  %v4524_v53 = vadd.f32 %v4523_v61, %v4522_v45  ;;  %v4550_v4 = vrot.slane %v4549_v47, 4  ;;  %v4559_v48 = vrot.slane %v4558_v37, 4 }
 0x4df   : > { %v4498_v52 = vrot.slane %v4497_v51, 2  ;;  %v4533_v56 = vadd.f32 %v4532_v1, %v4531_v13  ;;  %v4507_v9 = vrot.slane %v4506_v6, 2  ;;  %v4542_v28 = vadd.f32 %v4541_v22, %v4540_v15 }
 0x4e0   : > { %v4516_v55 = vrot.slane %v4515_v5, 2  ;;  %v4525_v11 = vrot.slane %v4524_v53, 2  ;;  %v4551_v46 = vadd.f32 %v4550_v4, %v4549_v47  ;;  %v4560_v32 = vadd.f32 %v4559_v48, %v4558_v37  ;;  %v9675_v4 = vld [vmem:[#allocation18_spill] sm:$0xff] }
 0x4e1   : > { %v4499_v39 = vadd.f32 %v4498_v52, %v4497_v51  ;;  %v4534_v44 = vrot.slane %v4533_v56, 2  ;;  %v4508_v31 = vadd.f32 %v4507_v9, %v4506_v6  ;;  %v4543_v10 = vrot.slane %v4542_v28, 2  ;;  %v9674_v52 = vld [vmem:[#allocation20_spill] sm:$0xff] }
 0x4e2   : > { %v4517_v2 = vadd.f32 %v4516_v55, %v4515_v5  ;;  %v4526_v24 = vadd.f32 %v4525_v11, %v4524_v53  ;;  %v4552_v45 = vrot.slane %v4551_v46, 2  ;;  %v4561_v57 = vrot.slane %v4560_v32, 2  ;;  %v9677_v55 = vld [vmem:[#allocation49_spill] sm:$0xff] }
 0x4e3   : > { %v4500_v25 = vrot.slane %v4499_v39, 1  ;;  %v4535_v62 = vadd.f32 %v4534_v44, %v4533_v56  ;;  %v4509_v40 = vrot.slane %v4508_v31, 1  ;;  %v8744_v21 = vadd.f32 %v4543_v10, %v4542_v28  ;;  %v9678_v28 = vld [vmem:[#allocation50_spill] sm:$0xff] }
 0x4e4   : > { %v4518_v13 = vrot.slane %v4517_v2, 1  ;;  %v4527_v33 = vrot.slane %v4526_v24, 1  ;;  %v8747_v61 = vadd.f32 %v4473_v63, %v8692_v16  ;;  %v8749_v15 = vadd.f32 %v4552_v45, %v4551_v46  ;;  %v9683_v45 = vld [vmem:[#allocation52_spill] sm:$0xff] }
 0x4e5   : > { %v4536_v30 = vrot.slane %v4535_v62, 1  ;;  %v8751_v51 = vadd.f32 %v4561_v57, %v4560_v32  ;;  %v8754_v1 = vadd.f32 %v4482_v50, %v8697_v17  ;;  %v8757_v47 = vadd.f32 %v4491_v49, %v8699_v36  ;;  %v9673_v49 = vld [vmem:[#allocation24_spill] sm:$0xff] }
 0x4e6   : > { %v8759_v37 = vadd.f32 %v4500_v25, %v4499_v39  ;;  %v8761_v6 = vadd.f32 %v4509_v40, %v4508_v31  ;;  %v8763_v5 = vadd.f32 %v4518_v13, %v4517_v2  ;;  %v8765_v16 = vadd.f32 %v4527_v33, %v4526_v24  ;;  %v9679_v31 = vld [vmem:[#allocation25_spill] sm:$0xff]  ;;  %v9680_v24 = vld [vmem:[#allocation26_spill] sm:$0xff]  ;;  %v9682_v25 = vld [vmem:[#allocation23_spill] sm:$0xff] }
 0x4e7   : > { %v4545_v63 = vrot.slane %v8744_v21, 1  ;;  %v4566_v53 = vmul.f32 %v8258_v60, %v8289_v12  ;;  %v8770_v22 = vadd.f32 %v4536_v30, %v4535_v62  ;;  %v4554_v17 = vrot.slane %v8749_v15, 1  ;;  %v9676_v12 = vld [vmem:[#allocation22_spill] sm:$0xff]  ;;  %v9686_v13 = vld [vmem:[#allocation19_spill] sm:$0xff] }
 0x4e8   : > { %v4563_v36 = vrot.slane %v8751_v51, 1  ;;  %v4575_v56 = vsel %vm4574_vm0, %v9674_v52, %v9673_v49  ;;  %v4595_v44 = vsel %vm4574_vm0, %v8395_v7, %v8397_v43  ;;  %v4602_v46 = vsel %vm4574_vm0, %v8447_v41, %v8449_v35  ;;  %v9684_v43 = vld [vmem:[#allocation28_spill] sm:$0xff]  ;;  %v9685_v41 = vld [vmem:[#allocation57_spill] sm:$0xff]  ;;  %v9687_v30 = vld [vmem:[#allocation51_spill] sm:$0xff] }
 0x4e9   : > { %v4567_v50 = vadd.f32 %v4566_v53, %v8195_v34  ;;  %v4577_v48 = vsel %vm4576_vm1, %v4575_v56, %v9675_v4  ;;  %v4588_v34 = vsel %vm4574_vm0, %v8343_v26, %v8345_v29  ;;  %v9681_v29 = vld [vmem:[#allocation53_spill] sm:$0xff]  ;;  %v4603_v35 = vsel %vm4576_vm1, %v4602_v46, %v9685_v41  ;;  %v9689_v52 = vld [vmem:[#allocation27_spill] sm:$0xff] }
 0x4ea   : > { %v4579_v9 = vsel %vm4578_vm2, %v4577_v48, %v9676_v12  ;;  %v4589_v39 = vsel %vm4576_vm1, %v4588_v34, %v9678_v28  ;;  %v4596_v10 = vsel %vm4576_vm1, %v4595_v44, %v9681_v29  ;;  %v9690_v4 = vld [vmem:[#allocation55_spill] sm:$0xff]  ;;  %v9693_v28 = vld [vmem:[#allocation29_spill] sm:$0xff]  ;;  %v9694_v44 = vld [vmem:[#allocation60_spill] sm:$0xff] }
 0x4eb   : > { %v4568_v60 = vrot.slane %v4567_v50, 4  ;;  %v4581_v11 = vsel %vm4580_vm3, %v4579_v9, %v9677_v55  ;;  %v4590_v26 = vsel %vm4578_vm2, %v4589_v39, %v9680_v24  ;;  %v4597_v57 = vsel %vm4578_vm2, %v4596_v10, %v9684_v43  ;;  %v9692_v55 = vld [vmem:[#allocation54_spill] sm:$0xff]  ;;  %v9697_v24 = vld [vmem:[#allocation61_spill] sm:$0xff]  ;;  %v9698_v10 = vld [vmem:[#allocation31_spill] sm:$0xff] }
 0x4ec   : > { %v4583_v2 = vsel %vm4582_vm4, %v4581_v11, %v9679_v31  ;;  %v4591_v7 = vsel %vm4580_vm3, %v4590_v26, %v9683_v45  ;;  %v4609_v9 = vsel %vm4574_vm0, %v8499_v38, %v8501_v59  ;;  %v9695_v31 = vld [vmem:[#allocation58_spill] sm:$0xff]  ;;  %v9696_v38 = vld [vmem:[#allocation59_spill] sm:$0xff] }
 0x4ed   : > { %v4569_v32 = vadd.f32 %v4568_v60, %v4567_v50  ;;  %v4585_v62 = vsel %vm4584_vm5, %v4583_v2, %v9682_v25  ;;  %v4592_v53 = vsel %vm4582_vm4, %v4591_v7, %v9687_v30  ;;  %v9688_v50 = vld [vmem:[#allocation56_spill] sm:$0xff]  ;;  %v9691_v60 = vld [vmem:[#allocation30_spill] sm:$0xff]  ;;  %v4610_v26 = vsel %vm4576_vm1, %v4609_v9, %v9697_v24 }
 0x4ee   : > { %v4587_v33 = vsel %vm4586_vm6, %v4585_v62, %v9686_v13  ;;  %v4598_v49 = vsel %vm4580_vm3, %v4597_v57, %v9688_v50  ;;  %v4593_v56 = vsel %vm4584_vm5, %v4592_v53, %v9689_v52  ;;  %v4604_v12 = vsel %vm4578_vm2, %v4603_v35, %v9691_v60  ;;  %v9699_v62 = vld [vmem:[#allocation32_spill] sm:$0xff]  ;;  %v9701_v57 = vld [vmem:[#allocation62_spill] sm:$0xff]  ;;  %v9702_v35 = vld [vmem:[#allocation63_spill] sm:$0xff] }
 0x4ef   : > { %v4570_v40 = vrot.slane %v4569_v32, 2  ;;  %v4599_v48 = vsel %vm4582_vm4, %v4598_v49, %v9690_v4  ;;  %4651 = vst [vmem:[%s8826_s8] sm:$0xff] %v4587_v33  ;;  %v4594_v11 = vsel %vm4586_vm6, %v4593_v56, %v9692_v55  ;;  %v4605_v46 = vsel %vm4580_vm3, %v4604_v12, %v9694_v44  ;;  %v9700_v7 = vld [vmem:[#allocation64_spill] sm:$0xff]  ;;  %v9703_v13 = vld [vmem:[#allocation35_spill] sm:$0xff]  ;;  %v9705_v53 = vld [vmem:[#allocation34_spill] sm:$0xff] }
 0x4f0   : > { %v4600_v39 = vsel %vm4584_vm5, %v4599_v48, %v9693_v28  ;;  %v4606_v59 = vsel %vm4582_vm4, %v4605_v46, %v9696_v38  ;;  %4652 = vst [vmem:[%s8826_s8 + $0x8] sm:$0xff] %v4594_v11  ;;  %v4611_v45 = vsel %vm4578_vm2, %v4610_v26, %v9699_v62  ;;  %v9706_v49 = vld [vmem:[#allocation65_spill] sm:$0xff]  ;;  %v9707_v56 = vld [vmem:[#allocation40_spill] sm:$0xff]  ;;  %v9709_v12 = vld [vmem:[#allocation38_spill] sm:$0xff] }
 0x4f1   : > { %v4571_v34 = vadd.f32 %v4570_v40, %v4569_v32  ;;  %v4601_v2 = vsel %vm4586_vm6, %v4600_v39, %v9695_v31  ;;  %v4616_v32 = vsel %vm4574_vm0, %v8551_v54, %v8553_v0  ;;  %v4607_v25 = vsel %vm4584_vm5, %v4606_v59, %v9698_v10  ;;  %v9704_v0 = vld [vmem:[#allocation39_spill] sm:$0xff]  ;;  %v9708_v48 = vld [vmem:[#allocation33_spill] sm:$0xff]  ;;  %v9712_v28 = vld [vmem:[#allocation36_spill] sm:$0xff] }
 0x4f2   : > { %v4617_v43 = vsel %vm4576_vm1, %v4616_v32, %v9700_v7  ;;  %4653 = vst [vmem:[%s8826_s8 + $0x10] sm:$0xff] %v4601_v2  ;;  %v4608_v41 = vsel %vm4586_vm6, %v4607_v25, %v9701_v57  ;;  %v4612_v40 = vsel %vm4580_vm3, %v4611_v45, %v9702_v35  ;;  %v4623_v33 = vsel %vm4574_vm0, %v9704_v0, %v8605_v19  ;;  %v9710_v55 = vld [vmem:[#allocation67_spill] sm:$0xff]  ;;  %v9713_v44 = vld [vmem:[#allocation37_spill] sm:$0xff]  ;;  %v9716_v24 = vld [vmem:[#allocation66_spill] sm:$0xff] }
 0x4f3   : > { %v4572_v29 = vrot.slane %v4571_v34, 1  ;;  %v4618_v54 = vsel %vm4578_vm2, %v4617_v43, %v9703_v13  ;;  %v4613_v50 = vsel %vm4582_vm4, %v4612_v40, %v9705_v53  ;;  %v4624_v4 = vsel %vm4576_vm1, %v4623_v33, %v9707_v56  ;;  %4654 = vst [vmem:[%s8826_s8 + $0x18] sm:$0xff] %v4608_v41  ;;  %v9714_v31 = vld [vmem:[#allocation41_spill] sm:$0xff]  ;;  %v9717_v32 = vld [vmem:[#allocation42_spill] sm:$0xff]  ;;  %v9719_v62 = vld [vmem:[#allocation68_spill] sm:$0xff] }
 0x4f4   : > { %v4619_v52 = vsel %vm4580_vm3, %v4618_v54, %v9706_v49  ;;  %v4614_v60 = vsel %vm4584_vm5, %v4613_v50, %v9708_v48  ;;  %v4625_v19 = vsel %vm4578_vm2, %v4624_v4, %v9710_v55  ;;  %v9715_v38 = vld [vmem:[#allocation69_spill] sm:$0xff]  ;;  %v4637_v25 = vsel %vm4574_vm0, %v8707_v8, %v8709_v42  ;;  %v9720_v7 = vld [vmem:[#allocation47_spill] sm:$0xff] }
 0x4f5   : > { %v4573_v30 = vadd.f32 %v4572_v29, %v4571_v34  ;;  %v4620_v9 = vsel %vm4582_vm4, %v4619_v52, %v9709_v12  ;;  %v9711_v34 = vld [vmem:[#allocation45_spill] sm:$0xff]  ;;  %v4615_v39 = vsel %vm4586_vm6, %v4614_v60, %v9712_v28  ;;  %v4626_v2 = vsel %vm4580_vm3, %v4625_v19, %v9714_v31  ;;  %v9721_v35 = vld [vmem:[#allocation43_spill] sm:$0xff] }
 0x4f6   : > { %v4630_v11 = vsel %vm4574_vm0, %v9711_v34, %v8657_v3  ;;  %v4621_v46 = vsel %vm4584_vm5, %v4620_v9, %v9713_v44  ;;  %v4627_v29 = vsel %vm4582_vm4, %v4626_v2, %v9717_v32  ;;  %v9718_v3 = vld [vmem:[#allocation46_spill] sm:$0xff]  ;;  %4655 = vst [vmem:[%s8826_s8 + $0x20] sm:$0xff] %v4615_v39  ;;  %v4638_v57 = vsel %vm4576_vm1, %v4637_v25, %v8711_v20 }
 0x4f7   : > { %v4631_v59 = vsel %vm4576_vm1, %v4630_v11, %v9715_v38  ;;  %4661 = vst [vmem:[%s8826_s8 + $0x50] sm:$0x1] %v4573_v30  ;;  %v4622_v26 = vsel %vm4586_vm6, %v4621_v46, %v9716_v24  ;;  %v4628_v45 = vsel %vm4584_vm5, %v4627_v29, %v9719_v62  ;;  %v4644_v41 = vsel %vm4574_vm0, %v8759_v37, %v8761_v6 }
 0x4f8   : > { %v4632_v10 = vsel %vm4578_vm2, %v4631_v59, %v9718_v3  ;;  %4656 = vst [vmem:[%s8826_s8 + $0x28] sm:$0xff] %v4622_v26  ;;  %v4629_v40 = vsel %vm4586_vm6, %v4628_v45, %v9721_v35  ;;  %v4639_v42 = vsel %vm4578_vm2, %v4638_v57, %v8713_v27  ;;  %v4645_v13 = vsel %vm4576_vm1, %v4644_v41, %v8763_v5 }
 0x4f9   : > { %v4633_v43 = vsel %vm4580_vm3, %v4632_v10, %v9720_v7  ;;  %v4546_v20 = vadd.f32 %v4545_v63, %v8744_v21  ;;  %v4640_v6 = vsel %vm4580_vm3, %v4639_v42, %v8718_v58  ;;  %4657 = vst [vmem:[%s8826_s8 + $0x30] sm:$0xff] %v4629_v40  ;;  %v4555_v27 = vadd.f32 %v4554_v17, %v8749_v15 }
 0x4fa   : > { %v4634_v8 = vsel %vm4582_vm4, %v4633_v43, %v8695_v18  ;;  %v4646_v18 = vsel %vm4578_vm2, %v4645_v13, %v8765_v16  ;;  %v4641_v21 = vsel %vm4582_vm4, %v4640_v6, %v8747_v61  ;;  %v4564_v58 = vadd.f32 %v4563_v36, %v8751_v51  ;;  %v4721_v51 = vld [vmem:[%s8826_s8] sm:$0xff] (%p5320_p3) }
 0x4fb   : > { %v4635_v37 = vsel %vm4584_vm5, %v4634_v8, %v8702_v23  ;;  %v4647_v23 = vsel %vm4580_vm3, %v4646_v18, %v8770_v22  ;;  %v4642_v16 = vsel %vm4584_vm5, %v4641_v21, %v8754_v1  ;;  %4668 = sbr.rel (!%p5320_p3) target bundleno = 1289 (0x509), region = 48  ;;  %v4723_v1 = vld [vmem:[%s8826_s8 + $0x8] sm:$0xff] (%p5320_p3)  ;;  %4722 = vst [vmem:[%s4672_s7] sm:$0xff] (%p5320_p3), %v4721_v51  ;;  %v4727_v22 = vld [vmem:[%s8826_s8 + $0x18] sm:$0xff] (%p5320_p3) }
 0x4fc   : > { %v4636_v5 = vsel %vm4586_vm6, %v4635_v37, %v8705_v14  ;;  %v4648_v63 = vsel %vm4582_vm4, %v4647_v23, %v4546_v20  ;;  %v4643_v15 = vsel %vm4586_vm6, %v4642_v16, %v8757_v47  ;;  %v4725_v47 = vld [vmem:[%s8826_s8 + $0x10] sm:$0xff] (%p5320_p3)  ;;  %4724 = vst [vmem:[%s4672_s7 + $0x10] sm:$0xff] (%p5320_p3), %v4723_v1 }
 0x4fd   : > { %4658 = vst [vmem:[%s8826_s8 + $0x38] sm:$0xff] %v4636_v5  ;;  %v4649_v14 = vsel %vm4584_vm5, %v4648_v63, %v4555_v27  ;;  %v4729_v17 = vld [vmem:[%s8826_s8 + $0x20] sm:$0xff] (%p5320_p3) }
 0x4fe   : > { %v4650_v61 = vsel %vm4586_vm6, %v4649_v14, %v4564_v58  ;;  %4659 = vst [vmem:[%s8826_s8 + $0x40] sm:$0xff] %v4643_v15  ;;  %v4741_v53 = vld [vmem:[%s8826_s8 + $0x50] sm:$0xff] (%p5320_p3) }
 0x4ff   : > { %4660 = vst [vmem:[%s8826_s8 + $0x48] sm:$0xff] %v4650_v61  ;;  %v4731_v36 = vld [vmem:[%s8826_s8 + $0x28] sm:$0xff] (%p5320_p3) }
 0x500   : > { %4726 = vst [vmem:[%s4672_s7 + $0x20] sm:$0xff] %v4725_v47  ;;  %v4733_v54 = vld [vmem:[%s8826_s8 + $0x30] sm:$0xff] }
 0x501   : > { %4728 = vst [vmem:[%s4672_s7 + $0x30] sm:$0xff] %v4727_v22 }
 0x502   : > { %4730 = vst [vmem:[%s4672_s7 + $0x40] sm:$0xff] %v4729_v17 }
 0x503   : > { %4732 = vst [vmem:[%s4672_s7 + $0x50] sm:$0xff] %v4731_v36 }
 0x504   : > { %v4735_v0 = vld [vmem:[%s8826_s8 + $0x38] sm:$0xff]  ;;  %4734 = vst [vmem:[%s4672_s7 + $0x60] sm:$0xff] %v4733_v54 }
 0x505   : > { %v4737_v33 = vld [vmem:[%s8826_s8 + $0x40] sm:$0xff]  ;;  %4736 = vst [vmem:[%s4672_s7 + $0x70] sm:$0xff] %v4735_v0 }
 0x506   : > { %v4739_v30 = vld [vmem:[%s8826_s8 + $0x48] sm:$0xff]  ;;  %4738 = vst [vmem:[%s4672_s7 + $0x80] sm:$0xff] %v4737_v33 }
 0x507   : > { %4740 = vst [vmem:[%s4672_s7 + $0x90] sm:$0xff] %v4739_v30 }
 0x508   : > { %4742 = vst [vmem:[%s4672_s7 + $0xa0] sm:$0xff] %v4741_v53 }
 0x509 PF: > { %s9723_s18 = sld [smem:[#allocation13_spill]]  ;;  %s9731_s12 = smov %s5150_s13 }
 0x50a   : > { %s9724_s19 = sld [smem:[#allocation10_spill]]  ;;  %s9733_s15 = smov %s5162_s16 }
 0x50b   : > { %s9725_s14 = sld [smem:[#allocation17_spill]] }
 0x50c   : > { %s9726_s5 = sld [smem:[#allocation11_spill]] }
 0x50d   : > { %s9727_s17 = sld [smem:[#allocation16_spill]] }
 0x50e   : > { %s9729_s20 = sld [smem:[#allocation14_spill]] }
 0x50f   : > { %s19_s22 = sadd.s32 1, %s9723_s18   ;;  %s9728_s18 = sld [smem:[#allocation12_spill]] }
 0x510   : > { %p16_p7 = scmp.ge.s32.totalorder %s19_s22, 6   ;;  %s9730_s28 = sld [smem:[#allocation15_spill]] }
 0x511   : > { %s9732_s13 = smov %s9724_s19  ;;  %s9735_s19 = smov %s5182_s21 }
 0x512   : > { %s9734_s16 = smov %s9726_s5  ;;  %18 = sbr.rel (!%p16_p7) target bundleno = 13 (0xd), region = 134 }
 0x516   : > { %s9736_s21 = smov %s9730_s28 }
 0x517   :  { %4758 = vsyncpa [#allocation3], 1 }
 0x518   :  { %4760 = vsyncpa [#allocation3 + $0x1], 1 }
 0x519   :  { %4761 = vsyncpa [#allocation5], 1 }
 0x51a   :  { %4763 = vsyncpa [#allocation5 + $0x1], 1 }

</bundles_post_ra>
